<compile_context>
chip_gen: v5e
topology: v5e:2x2
jax: 0.10.0
libtpu: 0.0.40
codegen_flags: <defaults>
</compile_context>

<pallas_src>
import functools

import jax
import jax.numpy as jnp
from jax.experimental import pallas as pl
from jax.experimental.pallas import tpu as pltpu


def _pack_params(params, R, U1, U2, A, L1, L2):
    """Lane-stack 22 small tensors into 7 weight matrices + 1 bias pack."""
    # lane order: [edge-type 0 | ... | edge-type R-1 | skip/self]
    w1 = jnp.concatenate([params["w1e"][r] for r in range(R)] + [params["w1s"]],
                         axis=1)                                      # (T, (R+1)*U1)
    w2n = jnp.concatenate([params["w2e_n"][r] for r in range(R)] + [params["w2s_n"]],
                          axis=1)                                     # (T, (R+1)*U2)
    w2h = jnp.concatenate([params["w2e_h"][r] for r in range(R)] + [params["w2s_h"]],
                          axis=1)                                     # (U1, (R+1)*U2)
    wan = jnp.concatenate([params["wi_n"], params["wj_n"]], axis=1)   # (T, 2A)
    wah = jnp.concatenate([params["wi_h"], params["wj_h"]], axis=1)   # (U2, 2A)
    wd1 = params["wd1"]                                               # (A, L1)
    wd2 = params["wd2"]                                               # (L1, L2)

    # biases, lane-stacked the same way, one row per layer, padded to max width
    b1 = jnp.concatenate([params["b1e"][r] for r in range(R)] + [params["b1s"]], axis=1)
    b2 = jnp.concatenate([params["b2e"][r] for r in range(R)] + [params["b2s"]], axis=1)
    ba = jnp.concatenate([params["bi"], params["bj"]], axis=1)
    bw = max(b1.shape[1], b2.shape[1], ba.shape[1], L1, L2)

    def row(v):
        return jnp.pad(v, ((0, 0), (0, bw - v.shape[1])))

    bpack = jnp.concatenate(
        [row(b1), row(b2), row(ba), row(params["bd1"]), row(params["bd2"])],
        axis=0)                                                       # (5, bw)
    return w1, w2n, w2h, wan, wah, wd1, wd2, bpack


def _auto_block_b(B):
    """Whole batch (grid=1) on single-TC v5e/v6e; an even grid on dual-TC v7x."""
    try:
        kind = jax.devices()[0].device_kind.lower()
    except Exception:
        kind = ""
    dual_tc = ("v7" in kind) or ("7x" in kind) or ("tpu7" in kind)
    if dual_tc and B >= 16 and (B // 2) % 8 == 0:
        return B // 2
    return B


def discriminator_forward(adj, node, params, *, block_b=None):
    """Returns (output (B,1), h (B, linear_dim[-1])) like Discriminator.forward
    with hidden=None and activation=None."""
    B, R, N, _ = adj.shape
    T = node.shape[-1]
    U1 = params["w1s"].shape[-1]
    U2 = params["w2s_n"].shape[-1]
    A = params["wi_n"].shape[-1]
    L1 = params["wd1"].shape[-1]
    L2 = params["wd2"].shape[-1]

    # --- per-generation batch block --------------------------------------------
    if block_b is None:
        block_b = _auto_block_b(B)
    BB = min(block_b, B)
    if BB < B:
        BB = max(8, (BB // 8) * 8)        # multi-block tiling needs sublane alignment
    n_blocks = -(-B // BB)
    B_pad = n_blocks * BB
    if B_pad != B:
        pad = B_pad - B
        adj = jnp.pad(adj, ((0, pad), (0, 0), (0, 0), (0, 0)))
        node = jnp.pad(node, ((0, pad), (0, 0), (0, 0)))

    NB = BB * N                            # matmul M dim per block
    W1P = (R + 1) * U1                     # lane-stacked projection widths
    W2P = (R + 1) * U2

    # --- batch-block-diagonal adjacency, column order (edge-type r, graph b, node j)
    # so the per-graph, per-edge-type message sum becomes ONE (NB, R*NB) @ (R*NB, U)
    # matmul per layer (cheap XLA-side plumbing: ~0.5-1 MiB per block).
    adj_blocks = adj.reshape(n_blocks, BB, R, N, N)
    eye = jnp.eye(BB, dtype=adj.dtype)
    adjd = jnp.einsum("gbrij,bc->gbircj", adj_blocks, eye)
    adjd = adjd.reshape(n_blocks * NB, R * NB)

    node2 = node.reshape(B_pad * N, T)     # all node rows, batch-major

    w1, w2n, w2h, wan, wah, wd1, wd2, bpack = _pack_params(params, R, U1, U2, A, L1, L2)

    def kernel(adjd_ref, node_ref, w1_ref, w2n_ref, w2h_ref, wan_ref, wah_ref,
               wd1_ref, wd2_ref, b_ref, h_ref, hs1, hs2):
        dot = functools.partial(jnp.dot, preferred_element_type=jnp.float32)

        x = node_ref[...]                                     # (NB, T)

        # -------- GraphConvolutionLayer 1 : annotations = node ---------------
        # single lane-stacked projection: [edge 0 | ... | edge R-1 | skip]
        p1 = dot(x, w1_ref[...]) + b_ref[0:1, :W1P]           # (NB, (R+1)*U1)
        for r in range(R):                                    # contiguous row-block stores
            hs1[r * NB:(r + 1) * NB, :] = p1[:, r * U1:(r + 1) * U1]
        msg1 = dot(adjd_ref[...], hs1[...])                   # (NB, U1) one matmul
        h1 = jnp.tanh(msg1 + p1[:, R * U1:W1P])               # + skip/self projection

        # -------- GraphConvolutionLayer 2 : annotations = [node, h1] ---------
        p2 = dot(x, w2n_ref[...]) + dot(h1, w2h_ref[...]) + b_ref[1:2, :W2P]
        for r in range(R):
            hs2[r * NB:(r + 1) * NB, :] = p2[:, r * U2:(r + 1) * U2]
        msg2 = dot(adjd_ref[...], hs2[...])                   # (NB, U2)
        h2 = jnp.tanh(msg2 + p2[:, R * U2:W2P])

        # -------- GraphAggregation : annotations = [h2, node] ----------------
        # lane-packed gates: pa = [i_pre | j_pre]
        pa = dot(h2, wah_ref[...]) + dot(x, wan_ref[...]) + b_ref[2:3, :2 * A]
        gated = jax.nn.sigmoid(pa[:, :A]) * jnp.tanh(pa[:, A:2 * A])   # (NB, A)
        g = jnp.tanh(jnp.sum(gated.reshape(BB, N, A), axis=1))         # (BB, A)

        # -------- MultiDenseLayer (tanh MLP) ---------------------------------
        d1 = jnp.tanh(dot(g, wd1_ref[...]) + b_ref[3:4, :L1])
        d2 = jnp.tanh(dot(d1, wd2_ref[...]) + b_ref[4:5, :L2])

        # (BB, L2) block store; L2=16 partial-lane store is negligible here.
        h_ref[...] = d2

    def full_spec(arr):
        return pl.BlockSpec(arr.shape, lambda i: (0, 0))      # weights resident (all 2D)

    weights = [w1, w2n, w2h, wan, wah, wd1, wd2, bpack]
    in_specs = [
        pl.BlockSpec((NB, R * NB), lambda i: (i, 0)),         # block-diag adj, batch-tiled
        pl.BlockSpec((NB, T), lambda i: (i, 0)),              # node rows, batch-tiled
    ] + [full_spec(w) for w in weights]

    h_full = pl.pallas_call(
        kernel,
        out_shape=jax.ShapeDtypeStruct((B_pad, L2), jnp.float32),
        grid_spec=pltpu.PrefetchScalarGridSpec(
            num_scalar_prefetch=0,
            grid=(n_blocks,),
            in_specs=in_specs,
            out_specs=pl.BlockSpec((BB, L2), lambda i: (i, 0)),
            scratch_shapes=[pltpu.VMEM((R * NB, U1), jnp.float32),
                            pltpu.VMEM((R * NB, U2), jnp.float32)],
        ),
        compiler_params=pltpu.CompilerParams(
            dimension_semantics=("parallel",)),
    )(adjd, node2, *weights)

    h = h_full[:B]
    # trivial (B, L2) @ (L2, 1) head done in XLA; keeps the kernel output lane-friendly
    out = h @ params["wo"] + params["bo"]
    return out, h


def init_params(key, R, T, U1, U2, A, L1, L2):
    """Deterministic PyTorch-Linear-style uniform(-1/sqrt(fan_in), +) init."""
    def linear(k, fan_in, shape):
        bound = 1.0 / float(fan_in) ** 0.5
        return jax.random.uniform(k, shape, jnp.float32, -bound, bound)

    ks = iter(jax.random.split(key, 22))
    p = {}
    # GCN layer 1 (in = T)
    p["w1e"] = linear(next(ks), T, (R, T, U1))
    p["b1e"] = linear(next(ks), T, (R, 1, U1))
    p["w1s"] = linear(next(ks), T, (T, U1))
    p["b1s"] = linear(next(ks), T, (1, U1))
    # GCN layer 2 (in = T + U1, weights split into node-part / hidden-part)
    f2 = T + U1
    p["w2e_n"] = linear(next(ks), f2, (R, T, U2))
    p["w2e_h"] = linear(next(ks), f2, (R, U1, U2))
    p["b2e"] = linear(next(ks), f2, (R, 1, U2))
    p["w2s_n"] = linear(next(ks), f2, (T, U2))
    p["w2s_h"] = linear(next(ks), f2, (U1, U2))
    p["b2s"] = linear(next(ks), f2, (1, U2))
    # GraphAggregation (in = U2 + T)
    fa = U2 + T
    p["wi_h"] = linear(next(ks), fa, (U2, A))
    p["wi_n"] = linear(next(ks), fa, (T, A))
    p["bi"] = linear(next(ks), fa, (1, A))
    p["wj_h"] = linear(next(ks), fa, (U2, A))
    p["wj_n"] = linear(next(ks), fa, (T, A))
    p["bj"] = linear(next(ks), fa, (1, A))
    # MultiDenseLayer + output head
    p["wd1"] = linear(next(ks), A, (A, L1))
    p["bd1"] = linear(next(ks), A, (1, L1))
    p["wd2"] = linear(next(ks), L1, (L1, L2))
    p["bd2"] = linear(next(ks), L1, (1, L2))
    p["wo"] = linear(next(ks), L2, (L2, 1))
    p["bo"] = linear(next(ks), L2, (1, 1))
    return p


def reference_forward(adj, node, p):
    """Pure-JAX reference written torch-style (stack / matmul / sum / concat)."""
    w2e = jnp.concatenate([p["w2e_n"], p["w2e_h"]], axis=1)   # (R, T+U1, U2)
    w2s = jnp.concatenate([p["w2s_n"], p["w2s_h"]], axis=0)   # (T+U1, U2)
    wi = jnp.concatenate([p["wi_h"], p["wi_n"]], axis=0)      # (U2+T, A)
    wj = jnp.concatenate([p["wj_h"], p["wj_n"]], axis=0)

    def gcn_layer(ann, we, be, ws, bs):
        hid = jnp.einsum("bnf,rfu->brnu", ann, we) + be[None]      # stacked Linears
        msg = jnp.einsum("brij,brju->briu", adj, hid)              # adj matmul
        out = jnp.sum(msg, axis=1) + (ann @ ws + bs)               # sum edge types + skip
        return jnp.tanh(out)

    h1 = gcn_layer(node, p["w1e"], p["b1e"], p["w1s"], p["b1s"])
    ann2 = jnp.concatenate([node, h1], axis=-1)
    h2 = gcn_layer(ann2, w2e, p["b2e"], w2s, p["b2s"])

    ann3 = jnp.concatenate([h2, node], axis=-1)
    i = jax.nn.sigmoid(ann3 @ wi + p["bi"])
    j = jnp.tanh(ann3 @ wj + p["bj"])
    g = jnp.tanh(jnp.sum(i * j, axis=1))                           # (B, A)

    d1 = jnp.tanh(g @ p["wd1"] + p["bd1"])
    d2 = jnp.tanh(d1 @ p["wd2"] + p["bd2"])
    out = d2 @ p["wo"] + p["bo"]
    return out, d2


if __name__ == "__main__":
    # Hyperparameters consistent with the module:
    #   b_n_type=R=4, a_n_node=N=8, a_n_type=T=8,
    #   conv_dim = [[32, 16], 32, [32, 16]], with_features=False, activation='tanh'
    # Batch 32; block size is auto-chosen per TPU generation: whole batch
    # (grid=(1,), M=256) on single-TC v5e/v6e, two parallel blocks on dual-TC v7x.
    B, R, N, T = 32, 4, 8, 8
    U1, U2, A, L1, L2 = 32, 16, 32, 32, 16

    key = jax.random.PRNGKey(0)
    k_adj, k_node, k_param = jax.random.split(key, 3)

    adj = jax.random.uniform(k_adj, (B, R, N, N), jnp.float32)
    adj = 0.5 * (adj + jnp.swapaxes(adj, -1, -2))          # symmetric edge weights
    node = jax.random.uniform(k_node, (B, N, T), jnp.float32)

    params = init_params(k_param, R, T, U1, U2, A, L1, L2)

    out, h = discriminator_forward(adj, node, params)
    jax.block_until_ready((out, h))

    ref_out, ref_h = reference_forward(adj, node, params)
    assert out.shape == (B, 1) and h.shape == (B, L2)
    assert jnp.allclose(out, ref_out, atol=1e-4, rtol=1e-4)
    assert jnp.allclose(h, ref_h, atol=1e-4, rtol=1e-4)

    print("KERNEL_OK")
</pallas_src>

<mosaic_0001>
module attributes {stable_mosaic.version = 11 : i64} {
  func.func @kernel(%arg0: i32, %arg1: memref<256x1024xf32, #tpu.memory_space<vmem>>, %arg2: memref<256x8xf32, #tpu.memory_space<vmem>>, %arg3: memref<8x160xf32, #tpu.memory_space<vmem>>, %arg4: memref<8x80xf32, #tpu.memory_space<vmem>>, %arg5: memref<32x80xf32, #tpu.memory_space<vmem>>, %arg6: memref<8x64xf32, #tpu.memory_space<vmem>>, %arg7: memref<16x64xf32, #tpu.memory_space<vmem>>, %arg8: memref<32x32xf32, #tpu.memory_space<vmem>>, %arg9: memref<32x16xf32, #tpu.memory_space<vmem>>, %arg10: memref<5x160xf32, #tpu.memory_space<vmem>>, %arg11: memref<32x16xf32, #tpu.memory_space<vmem>>, %arg12: memref<1024x32xf32, #tpu.memory_space<vmem>>, %arg13: memref<1024x16xf32, #tpu.memory_space<vmem>>) attributes {dimension_semantics = [#tpu.dimension_semantics<parallel>], iteration_bounds = array<i64: 1>, scalar_prefetch = 0 : i64, scratch_operands = 2 : i64, tpu.core_type = #tpu.core_type<tc>, window_params = [{transform_indices = @transform_0, window_bounds = array<i64: 256, 1024>}, {transform_indices = @transform_1, window_bounds = array<i64: 256, 8>}, {pipeline_mode = #tpu.pipeline_mode<synchronous>, transform_indices = @transform_2, window_bounds = array<i64: 8, 160>}, {pipeline_mode = #tpu.pipeline_mode<synchronous>, transform_indices = @transform_3, window_bounds = array<i64: 8, 80>}, {pipeline_mode = #tpu.pipeline_mode<synchronous>, transform_indices = @transform_4, window_bounds = array<i64: 32, 80>}, {pipeline_mode = #tpu.pipeline_mode<synchronous>, transform_indices = @transform_5, window_bounds = array<i64: 8, 64>}, {pipeline_mode = #tpu.pipeline_mode<synchronous>, transform_indices = @transform_6, window_bounds = array<i64: 16, 64>}, {pipeline_mode = #tpu.pipeline_mode<synchronous>, transform_indices = @transform_7, window_bounds = array<i64: 32, 32>}, {pipeline_mode = #tpu.pipeline_mode<synchronous>, transform_indices = @transform_8, window_bounds = array<i64: 32, 16>}, {pipeline_mode = #tpu.pipeline_mode<synchronous>, transform_indices = @transform_9, window_bounds = array<i64: 5, 160>}, {transform_indices = @transform_10, window_bounds = array<i64: 32, 16>}]} {
    %c0 = arith.constant 0 : index
    %c0_0 = arith.constant 0 : index
    %0 = vector.load %arg2[%c0, %c0_0] : memref<256x8xf32, #tpu.memory_space<vmem>>, vector<256x8xf32>
    %c0_1 = arith.constant 0 : index
    %c0_2 = arith.constant 0 : index
    %1 = vector.load %arg3[%c0_1, %c0_2] : memref<8x160xf32, #tpu.memory_space<vmem>>, vector<8x160xf32>
    %cst = arith.constant dense<0.000000e+00> : vector<256x160xf32>
    %2 = tpu.matmul %0, %1, %cst {dimension_numbers = #tpu.dot_dimension_numbers<[1], [0], [0], [1], [0, 0, 1, 1], [], []>} : vector<256x8xf32>, vector<8x160xf32>, vector<256x160xf32> -> vector<256x160xf32>
    %c0_3 = arith.constant 0 : index
    %c0_4 = arith.constant 0 : index
    %3 = vector.load %arg10[%c0_3, %c0_4] : memref<5x160xf32, #tpu.memory_space<vmem>>, vector<1x160xf32>
    %4 = vector.broadcast %3 : vector<1x160xf32> to vector<256x160xf32>
    %5 = arith.addf %2, %4 : vector<256x160xf32>
    %6 = vector.extract_strided_slice %5 {offsets = [0, 0], sizes = [256, 32], strides = [1, 1]} : vector<256x160xf32> to vector<256x32xf32>
    %c0_5 = arith.constant 0 : index
    %c0_6 = arith.constant 0 : index
    %7 = vector.load %arg12[%c0_5, %c0_6] : memref<1024x32xf32, #tpu.memory_space<vmem>>, vector<256x32xf32>
    tpu.vector_store %arg12[%c0_5, %c0_6], %6 {strides = array<i32>} : memref<1024x32xf32, #tpu.memory_space<vmem>>, vector<256x32xf32>,
    %8 = vector.extract_strided_slice %5 {offsets = [0, 32], sizes = [256, 32], strides = [1, 1]} : vector<256x160xf32> to vector<256x32xf32>
    %c256 = arith.constant 256 : index
    %c0_7 = arith.constant 0 : index
    %9 = vector.load %arg12[%c256, %c0_7] : memref<1024x32xf32, #tpu.memory_space<vmem>>, vector<256x32xf32>
    tpu.vector_store %arg12[%c256, %c0_7], %8 {strides = array<i32>} : memref<1024x32xf32, #tpu.memory_space<vmem>>, vector<256x32xf32>,
    %10 = vector.extract_strided_slice %5 {offsets = [0, 64], sizes = [256, 32], strides = [1, 1]} : vector<256x160xf32> to vector<256x32xf32>
    %c512 = arith.constant 512 : index
    %c0_8 = arith.constant 0 : index
    %11 = vector.load %arg12[%c512, %c0_8] : memref<1024x32xf32, #tpu.memory_space<vmem>>, vector<256x32xf32>
    tpu.vector_store %arg12[%c512, %c0_8], %10 {strides = array<i32>} : memref<1024x32xf32, #tpu.memory_space<vmem>>, vector<256x32xf32>,
    %12 = vector.extract_strided_slice %5 {offsets = [0, 96], sizes = [256, 32], strides = [1, 1]} : vector<256x160xf32> to vector<256x32xf32>
    %c768 = arith.constant 768 : index
    %c0_9 = arith.constant 0 : index
    %13 = vector.load %arg12[%c768, %c0_9] : memref<1024x32xf32, #tpu.memory_space<vmem>>, vector<256x32xf32>
    tpu.vector_store %arg12[%c768, %c0_9], %12 {strides = array<i32>} : memref<1024x32xf32, #tpu.memory_space<vmem>>, vector<256x32xf32>,
    %c0_10 = arith.constant 0 : index
    %c0_11 = arith.constant 0 : index
    %14 = vector.load %arg1[%c0_10, %c0_11] : memref<256x1024xf32, #tpu.memory_space<vmem>>, vector<256x1024xf32>
    %c0_12 = arith.constant 0 : index
    %c0_13 = arith.constant 0 : index
    %15 = vector.load %arg12[%c0_12, %c0_13] : memref<1024x32xf32, #tpu.memory_space<vmem>>, vector<1024x32xf32>
    %cst_14 = arith.constant dense<0.000000e+00> : vector<256x32xf32>
    %16 = tpu.matmul %14, %15, %cst_14 {dimension_numbers = #tpu.dot_dimension_numbers<[1], [0], [0], [1], [0, 0, 1, 1], [], []>} : vector<256x1024xf32>, vector<1024x32xf32>, vector<256x32xf32> -> vector<256x32xf32>
    %17 = vector.extract_strided_slice %5 {offsets = [0, 128], sizes = [256, 32], strides = [1, 1]} : vector<256x160xf32> to vector<256x32xf32>
    %18 = arith.addf %16, %17 : vector<256x32xf32>
    %19 = math.tanh %18 : vector<256x32xf32>
    %c0_15 = arith.constant 0 : index
    %c0_16 = arith.constant 0 : index
    %20 = vector.load %arg4[%c0_15, %c0_16] : memref<8x80xf32, #tpu.memory_space<vmem>>, vector<8x80xf32>
    %cst_17 = arith.constant dense<0.000000e+00> : vector<256x80xf32>
    %21 = tpu.matmul %0, %20, %cst_17 {dimension_numbers = #tpu.dot_dimension_numbers<[1], [0], [0], [1], [0, 0, 1, 1], [], []>} : vector<256x8xf32>, vector<8x80xf32>, vector<256x80xf32> -> vector<256x80xf32>
    %c0_18 = arith.constant 0 : index
    %c0_19 = arith.constant 0 : index
    %22 = vector.load %arg5[%c0_18, %c0_19] : memref<32x80xf32, #tpu.memory_space<vmem>>, vector<32x80xf32>
    %cst_20 = arith.constant dense<0.000000e+00> : vector<256x80xf32>
    %23 = tpu.matmul %19, %22, %cst_20 {dimension_numbers = #tpu.dot_dimension_numbers<[1], [0], [0], [1], [0, 0, 1, 1], [], []>} : vector<256x32xf32>, vector<32x80xf32>, vector<256x80xf32> -> vector<256x80xf32>
    %24 = arith.addf %21, %23 : vector<256x80xf32>
    %c1 = arith.constant 1 : index
    %c0_21 = arith.constant 0 : index
    %25 = vector.load %arg10[%c1, %c0_21] : memref<5x160xf32, #tpu.memory_space<vmem>>, vector<1x80xf32>
    %26 = vector.broadcast %25 : vector<1x80xf32> to vector<256x80xf32>
    %27 = arith.addf %24, %26 : vector<256x80xf32>
    %28 = vector.extract_strided_slice %27 {offsets = [0, 0], sizes = [256, 16], strides = [1, 1]} : vector<256x80xf32> to vector<256x16xf32>
    %c0_22 = arith.constant 0 : index
    %c0_23 = arith.constant 0 : index
    %29 = vector.load %arg13[%c0_22, %c0_23] : memref<1024x16xf32, #tpu.memory_space<vmem>>, vector<256x16xf32>
    tpu.vector_store %arg13[%c0_22, %c0_23], %28 {strides = array<i32>} : memref<1024x16xf32, #tpu.memory_space<vmem>>, vector<256x16xf32>,
    %30 = vector.extract_strided_slice %27 {offsets = [0, 16], sizes = [256, 16], strides = [1, 1]} : vector<256x80xf32> to vector<256x16xf32>
    %c256_24 = arith.constant 256 : index
    %c0_25 = arith.constant 0 : index
    %31 = vector.load %arg13[%c256_24, %c0_25] : memref<1024x16xf32, #tpu.memory_space<vmem>>, vector<256x16xf32>
    tpu.vector_store %arg13[%c256_24, %c0_25], %30 {strides = array<i32>} : memref<1024x16xf32, #tpu.memory_space<vmem>>, vector<256x16xf32>,
    %32 = vector.extract_strided_slice %27 {offsets = [0, 32], sizes = [256, 16], strides = [1, 1]} : vector<256x80xf32> to vector<256x16xf32>
    %c512_26 = arith.constant 512 : index
    %c0_27 = arith.constant 0 : index
    %33 = vector.load %arg13[%c512_26, %c0_27] : memref<1024x16xf32, #tpu.memory_space<vmem>>, vector<256x16xf32>
    tpu.vector_store %arg13[%c512_26, %c0_27], %32 {strides = array<i32>} : memref<1024x16xf32, #tpu.memory_space<vmem>>, vector<256x16xf32>,
    %34 = vector.extract_strided_slice %27 {offsets = [0, 48], sizes = [256, 16], strides = [1, 1]} : vector<256x80xf32> to vector<256x16xf32>
    %c768_28 = arith.constant 768 : index
    %c0_29 = arith.constant 0 : index
    %35 = vector.load %arg13[%c768_28, %c0_29] : memref<1024x16xf32, #tpu.memory_space<vmem>>, vector<256x16xf32>
    tpu.vector_store %arg13[%c768_28, %c0_29], %34 {strides = array<i32>} : memref<1024x16xf32, #tpu.memory_space<vmem>>, vector<256x16xf32>,
    %c0_30 = arith.constant 0 : index
    %c0_31 = arith.constant 0 : index
    %36 = vector.load %arg1[%c0_30, %c0_31] : memref<256x1024xf32, #tpu.memory_space<vmem>>, vector<256x1024xf32>
    %c0_32 = arith.constant 0 : index
    %c0_33 = arith.constant 0 : index
    %37 = vector.load %arg13[%c0_32, %c0_33] : memref<1024x16xf32, #tpu.memory_space<vmem>>, vector<1024x16xf32>
    %cst_34 = arith.constant dense<0.000000e+00> : vector<256x16xf32>
    %38 = tpu.matmul %36, %37, %cst_34 {dimension_numbers = #tpu.dot_dimension_numbers<[1], [0], [0], [1], [0, 0, 1, 1], [], []>} : vector<256x1024xf32>, vector<1024x16xf32>, vector<256x16xf32> -> vector<256x16xf32>
    %39 = vector.extract_strided_slice %27 {offsets = [0, 64], sizes = [256, 16], strides = [1, 1]} : vector<256x80xf32> to vector<256x16xf32>
    %40 = arith.addf %38, %39 : vector<256x16xf32>
    %41 = math.tanh %40 : vector<256x16xf32>
    %c0_35 = arith.constant 0 : index
    %c0_36 = arith.constant 0 : index
    %42 = vector.load %arg7[%c0_35, %c0_36] : memref<16x64xf32, #tpu.memory_space<vmem>>, vector<16x64xf32>
    %cst_37 = arith.constant dense<0.000000e+00> : vector<256x64xf32>
    %43 = tpu.matmul %41, %42, %cst_37 {dimension_numbers = #tpu.dot_dimension_numbers<[1], [0], [0], [1], [0, 0, 1, 1], [], []>} : vector<256x16xf32>, vector<16x64xf32>, vector<256x64xf32> -> vector<256x64xf32>
    %c0_38 = arith.constant 0 : index
    %c0_39 = arith.constant 0 : index
    %44 = vector.load %arg6[%c0_38, %c0_39] : memref<8x64xf32, #tpu.memory_space<vmem>>, vector<8x64xf32>
    %cst_40 = arith.constant dense<0.000000e+00> : vector<256x64xf32>
    %45 = tpu.matmul %0, %44, %cst_40 {dimension_numbers = #tpu.dot_dimension_numbers<[1], [0], [0], [1], [0, 0, 1, 1], [], []>} : vector<256x8xf32>, vector<8x64xf32>, vector<256x64xf32> -> vector<256x64xf32>
    %46 = arith.addf %43, %45 : vector<256x64xf32>
    %c2 = arith.constant 2 : index
    %c0_41 = arith.constant 0 : index
    %47 = vector.load %arg10[%c2, %c0_41] : memref<5x160xf32, #tpu.memory_space<vmem>>, vector<1x64xf32>
    %48 = vector.broadcast %47 : vector<1x64xf32> to vector<256x64xf32>
    %49 = arith.addf %46, %48 : vector<256x64xf32>
    %50 = vector.extract_strided_slice %49 {offsets = [0, 0], sizes = [256, 32], strides = [1, 1]} : vector<256x64xf32> to vector<256x32xf32>
    %51 = arith.negf %50 : vector<256x32xf32>
    %52 = math.exp %51 : vector<256x32xf32>
    %cst_42 = arith.constant 1.000000e+00 : f32
    %53 = vector.broadcast %cst_42 : f32 to vector<256x32xf32>
    %54 = arith.addf %53, %52 : vector<256x32xf32>
    %55 = arith.divf %53, %54 : vector<256x32xf32>
    %56 = vector.extract_strided_slice %49 {offsets = [0, 32], sizes = [256, 32], strides = [1, 1]} : vector<256x64xf32> to vector<256x32xf32>
    %57 = math.tanh %56 : vector<256x32xf32>
    %58 = arith.mulf %55, %57 : vector<256x32xf32>
    %59 = vector.shape_cast %58 : vector<256x32xf32> to vector<32x8x32xf32>
    %cst_43 = arith.constant dense<0.000000e+00> : vector<32x32xf32>
    %60 = vector.multi_reduction <add>, %59, %cst_43 [1] : vector<32x8x32xf32> to vector<32x32xf32>
    %61 = math.tanh %60 : vector<32x32xf32>
    %c0_44 = arith.constant 0 : index
    %c0_45 = arith.constant 0 : index
    %62 = vector.load %arg8[%c0_44, %c0_45] : memref<32x32xf32, #tpu.memory_space<vmem>>, vector<32x32xf32>
    %cst_46 = arith.constant dense<0.000000e+00> : vector<32x32xf32>
    %63 = tpu.matmul %61, %62, %cst_46 {dimension_numbers = #tpu.dot_dimension_numbers<[1], [0], [0], [1], [0, 0, 1, 1], [], []>} : vector<32x32xf32>, vector<32x32xf32>, vector<32x32xf32> -> vector<32x32xf32>
    %c3 = arith.constant 3 : index
    %c0_47 = arith.constant 0 : index
    %64 = vector.load %arg10[%c3, %c0_47] : memref<5x160xf32, #tpu.memory_space<vmem>>, vector<1x32xf32>
    %65 = vector.broadcast %64 : vector<1x32xf32> to vector<32x32xf32>
    %66 = arith.addf %63, %65 : vector<32x32xf32>
    %67 = math.tanh %66 : vector<32x32xf32>
    %c0_48 = arith.constant 0 : index
    %c0_49 = arith.constant 0 : index
    %68 = vector.load %arg9[%c0_48, %c0_49] : memref<32x16xf32, #tpu.memory_space<vmem>>, vector<32x16xf32>
    %cst_50 = arith.constant dense<0.000000e+00> : vector<32x16xf32>
    %69 = tpu.matmul %67, %68, %cst_50 {dimension_numbers = #tpu.dot_dimension_numbers<[1], [0], [0], [1], [0, 0, 1, 1], [], []>} : vector<32x32xf32>, vector<32x16xf32>, vector<32x16xf32> -> vector<32x16xf32>
    %c4 = arith.constant 4 : index
    %c0_51 = arith.constant 0 : index
    %70 = vector.load %arg10[%c4, %c0_51] : memref<5x160xf32, #tpu.memory_space<vmem>>, vector<1x16xf32>
    %71 = vector.broadcast %70 : vector<1x16xf32> to vector<32x16xf32>
    %72 = arith.addf %69, %71 : vector<32x16xf32>
    %73 = math.tanh %72 : vector<32x16xf32>
    %c0_52 = arith.constant 0 : index
    %c0_53 = arith.constant 0 : index
    %74 = vector.load %arg11[%c0_52, %c0_53] : memref<32x16xf32, #tpu.memory_space<vmem>>, vector<32x16xf32>
    tpu.vector_store %arg11[%c0_52, %c0_53], %73 {strides = array<i32>} : memref<32x16xf32, #tpu.memory_space<vmem>>, vector<32x16xf32>,
    return
  }
  func.func @transform_0(%arg0: i32) -> (i32, i32) {
    %c0_i32 = arith.constant 0 : i32
    %c0_i32_0 = arith.constant 0 : i32
    return %arg0, %c0_i32 : i32, i32
  }
  func.func @transform_1(%arg0: i32) -> (i32, i32) {
    %c0_i32 = arith.constant 0 : i32
    %c0_i32_0 = arith.constant 0 : i32
    return %arg0, %c0_i32 : i32, i32
  }
  func.func @transform_2(%arg0: i32) -> (i32, i32) {
    %c0_i32 = arith.constant 0 : i32
    %c0_i32_0 = arith.constant 0 : i32
    %c0_i32_1 = arith.constant 0 : i32
    return %c0_i32, %c0_i32_0 : i32, i32
  }
  func.func @transform_3(%arg0: i32) -> (i32, i32) {
    %c0_i32 = arith.constant 0 : i32
    %c0_i32_0 = arith.constant 0 : i32
    %c0_i32_1 = arith.constant 0 : i32
    return %c0_i32, %c0_i32_0 : i32, i32
  }
  func.func @transform_4(%arg0: i32) -> (i32, i32) {
    %c0_i32 = arith.constant 0 : i32
    %c0_i32_0 = arith.constant 0 : i32
    %c0_i32_1 = arith.constant 0 : i32
    return %c0_i32, %c0_i32_0 : i32, i32
  }
  func.func @transform_5(%arg0: i32) -> (i32, i32) {
    %c0_i32 = arith.constant 0 : i32
    %c0_i32_0 = arith.constant 0 : i32
    %c0_i32_1 = arith.constant 0 : i32
    return %c0_i32, %c0_i32_0 : i32, i32
  }
  func.func @transform_6(%arg0: i32) -> (i32, i32) {
    %c0_i32 = arith.constant 0 : i32
    %c0_i32_0 = arith.constant 0 : i32
    %c0_i32_1 = arith.constant 0 : i32
    return %c0_i32, %c0_i32_0 : i32, i32
  }
  func.func @transform_7(%arg0: i32) -> (i32, i32) {
    %c0_i32 = arith.constant 0 : i32
    %c0_i32_0 = arith.constant 0 : i32
    %c0_i32_1 = arith.constant 0 : i32
    return %c0_i32, %c0_i32_0 : i32, i32
  }
  func.func @transform_8(%arg0: i32) -> (i32, i32) {
    %c0_i32 = arith.constant 0 : i32
    %c0_i32_0 = arith.constant 0 : i32
    %c0_i32_1 = arith.constant 0 : i32
    return %c0_i32, %c0_i32_0 : i32, i32
  }
  func.func @transform_9(%arg0: i32) -> (i32, i32) {
    %c0_i32 = arith.constant 0 : i32
    %c0_i32_0 = arith.constant 0 : i32
    %c0_i32_1 = arith.constant 0 : i32
    return %c0_i32, %c0_i32_0 : i32, i32
  }
  func.func @transform_10(%arg0: i32) -> (i32, i32) {
    %c0_i32 = arith.constant 0 : i32
    %c0_i32_0 = arith.constant 0 : i32
    return %arg0, %c0_i32 : i32, i32
  }
}

</mosaic_0001>

<bundles_post_ra>
// kernel: tpu_custom_call.1
= control target key start
LH: loop header
LB: loop body
LE: loop exit
PB: predicated region body
PF: predicated region fallthrough
CT: control target
= control target key end

     0   :  { %15 = vsyncpa [#allocation5], 0  ;;  %s6743_s16 = smov [#allocation4]   ;;  %s6744_s18 = smov 1024   ;;  %s10466_s0 = inlined_call_operand.hbm [shape: f32[256,1024], index: 0, kind: input, shape index: {}]   ;;  %s10467_s1 = inlined_call_operand.vmem [shape: f32[256,8], index: 1, kind: input, shape index: {}]   ;;  %s10468_s2 = inlined_call_operand.vmem [shape: f32[8,160], index: 2, kind: input, shape index: {}]   ;;  %s10469_s3 = inlined_call_operand.vmem [shape: f32[8,80], index: 3, kind: input, shape index: {}]   ;;  %s10470_s4 = inlined_call_operand.vmem [shape: f32[32,80], index: 4, kind: input, shape index: {}]   ;;  %s10471_s5 = inlined_call_operand.vmem [shape: f32[8,64], index: 5, kind: input, shape index: {}]   ;;  %s10472_s6 = inlined_call_operand.vmem [shape: f32[16,64], index: 6, kind: input, shape index: {}]   ;;  %s10473_s7 = inlined_call_operand.vmem [shape: f32[32,32], index: 7, kind: input, shape index: {}]   ;;  %s10474_s8 = inlined_call_operand.vmem [shape: f32[32,16], index: 8, kind: input, shape index: {}]   ;;  %s10475_s9 = inlined_call_operand.vmem [shape: f32[5,160], index: 9, kind: input, shape index: {}]   ;;  %s10476_s10 = inlined_call_operand.vmem [shape: f32[32,16], index: 10, kind: output, shape index: {}]  }
   0x1   :  { %s20_s15 = sshll.u32 %s10466_s0, 4  ;;  %s22_s17 = sshll.u32 %s6743_s16, 4  ;;  %s21_s15 = int_to_ptr.hbm [resolvable:$true] %s20_s15  ;;  %s23_s17 = int_to_ptr.vmem [resolvable:$true] %s22_s17 }
   0x2   :  { %s6745_s19 = smov 64  }
   0x3   :  { %28 = dma.hbm_to_vmem [thread:$0]  %s21_s15, 32768, %s23_s17, [#allocation5], %s6744_s18, %s6744_s18, %s6745_s19  }
   0x4   :  { %6741 = dma.done.wait [#allocation5], 32768  }
   0x5   :  { %6742 = vsyncadd [#allocation5], 4294934528  ;;  %vm91_vm0 = vcmask 64512   ;;  %v83_v0 = vld [vmem:[%s10468_s2] sm:$0xff]  ;;  %v6820_v2 = vld [vmem:[%s10467_s1 + $0x98] sm:$0xff]  ;;  %vm414_vm1 = vcmask 261120  }
   0x6   :  { %v6815_v1 = vld [vmem:[%s10467_s1] sm:$0xff]  ;;  %203 = vmatpush.msra.mxu0 %v83_v0  ;;  %6226 = vmatpush.msra.mxu2 %v83_v0  ;;  %v6829_v3 = vld [vmem:[%s10467_s1 + $0x8] sm:$0xff]  ;;  %v6843_v5 = vld [vmem:[%s10467_s1 + $0x10] sm:$0xff]  ;;  %s6747_s29 = smov 32   ;;  %vm2543_vm2 = vcmask 130048   ;;  %s6748_s24 = smov 112  }
   0x7   :  { %5994 = vmatmul.msk.f32.vlgmr.msra.gmra.mxu0 %vm91_vm0, %v6815_v1  ;;  %6013 = vmatmul.msk.f32.vlgmr.msra.gmra.mxu2 %vm91_vm0, %v6820_v2  ;;  %v6834_v4 = vld [vmem:[%s10467_s1 + $0xa0] sm:$0xff]  ;;  %v6848_v6 = vld [vmem:[%s10467_s1 + $0xa8] sm:$0xff]  ;;  %v6857_v7 = vld [vmem:[%s10467_s1 + $0x18] sm:$0xff]  ;;  %s6749_s22 = smov 80  }
   0x8   :  { %v6862_v8 = vld [vmem:[%s10467_s1 + $0xb0] sm:$0xff]  ;;  %v6871_v9 = vld [vmem:[%s10467_s1 + $0x20] sm:$0xff]  ;;  %v6876_v10 = vld [vmem:[%s10467_s1 + $0xb8] sm:$0xff] }
   0x9   :  { %v6885_v11 = vld [vmem:[%s10467_s1 + $0x28] sm:$0xff]  ;;  %v6890_v12 = vld [vmem:[%s10467_s1 + $0xc0] sm:$0xff]  ;;  %v6899_v13 = vld [vmem:[%s10467_s1 + $0x30] sm:$0xff] }
   0xa   :  { %v6904_v14 = vld [vmem:[%s10467_s1 + $0xc8] sm:$0xff]  ;;  %v6913_v15 = vld [vmem:[%s10467_s1 + $0x38] sm:$0xff]  ;;  %v6918_v16 = vld [vmem:[%s10467_s1 + $0xd0] sm:$0xff] }
   0xb   :  { %v6927_v17 = vld [vmem:[%s10467_s1 + $0x40] sm:$0xff]  ;;  %v6932_v18 = vld [vmem:[%s10467_s1 + $0xd8] sm:$0xff]  ;;  %v6941_v19 = vld [vmem:[%s10467_s1 + $0x48] sm:$0xff] }
   0xc   :  { %v6946_v20 = vld [vmem:[%s10467_s1 + $0xe0] sm:$0xff]  ;;  %v6955_v21 = vld [vmem:[%s10467_s1 + $0x50] sm:$0xff]  ;;  %v6960_v22 = vld [vmem:[%s10467_s1 + $0xe8] sm:$0xff] }
   0xd   :  { %v6969_v23 = vld [vmem:[%s10467_s1 + $0x58] sm:$0xff]  ;;  %v6974_v24 = vld [vmem:[%s10467_s1 + $0xf0] sm:$0xff]  ;;  %v6983_v25 = vld [vmem:[%s10467_s1 + $0x60] sm:$0xff] }
   0xe   :  { %v6988_v26 = vld [vmem:[%s10467_s1 + $0xf8] sm:$0xff]  ;;  %v6997_v27 = vld [vmem:[%s10467_s1 + $0x68] sm:$0xff]  ;;  %v7004_v28 = vld [vmem:[%s10467_s1 + $0x70] sm:$0xff] }
   0xf   :  { %5995 = vmatmul.msk.f32.gmra.mxu0 %vm91_vm0, %v6829_v3  ;;  %6014 = vmatmul.msk.f32.gmra.mxu2 %vm91_vm0, %v6834_v4  ;;  %v7011_v29 = vld [vmem:[%s10467_s1 + $0x78] sm:$0xff]  ;;  %v85_v30 = vld [vmem:[%s10475_s9] ss:$8 sm:$0x3]  ;;  %v69_v43 = vld [vmem:[%s10467_s1 + $0x90] sm:$0xff] }
  0x10   :  { %v7018_v31 = vperm.slane %v85_v30, 0  ;;  %v7023_v33 = vld [vmem:[%s10467_s1 + $0x80] sm:$0xff]  ;;  %v7038_v38 = vld [vmem:[%s10467_s1 + $0x88] sm:$0xff] }
  0x11   :  { %v84_v45 = vld [vmem:[%s10468_s2 + $0x8] sm:$0xff]  ;;  %s6746_s2 = smov 96  }
  0x12   :  { %6227 = vmatpush.msra.mxu3 %v84_v45  ;;  %316 = vmatpush.msra.mxu1 %v84_v45 }
  0x13   :  { %6044 = vmatmul.msk.f32.vlgmr.msra.gmra.mxu3 %vm91_vm0, %v69_v43  ;;  %6026 = vmatmul.msk.f32.vlgmr.msra.gmra.mxu1 %vm91_vm0, %v6815_v1 }
  0x17   :  { %5996 = vmatmul.msk.f32.gmra.mxu0 %vm91_vm0, %v6843_v5  ;;  %6015 = vmatmul.msk.f32.gmra.mxu2 %vm91_vm0, %v6848_v6 }
  0x1b   :  { %6045 = vmatmul.msk.f32.gmra.mxu3 %vm91_vm0, %v6820_v2  ;;  %6027 = vmatmul.msk.f32.gmra.mxu1 %vm91_vm0, %v6829_v3 }
  0x1f   :  { %5997 = vmatmul.msk.f32.gmra.mxu0 %vm91_vm0, %v6857_v7  ;;  %6016 = vmatmul.msk.f32.gmra.mxu2 %vm91_vm0, %v6862_v8 }
  0x23   :  { %6046 = vmatmul.msk.f32.gmra.mxu3 %vm91_vm0, %v6834_v4  ;;  %6028 = vmatmul.msk.f32.gmra.mxu1 %vm91_vm0, %v6843_v5 }
  0x27   :  { %5998 = vmatmul.msk.f32.gmra.mxu0 %vm91_vm0, %v6871_v9  ;;  %6017 = vmatmul.msk.f32.gmra.mxu2 %vm91_vm0, %v6876_v10 }
  0x2b   :  { %6047 = vmatmul.msk.f32.gmra.mxu3 %vm91_vm0, %v6848_v6  ;;  %6029 = vmatmul.msk.f32.gmra.mxu1 %vm91_vm0, %v6857_v7 }
  0x2f   :  { %5999 = vmatmul.msk.f32.gmra.mxu0 %vm91_vm0, %v6885_v11  ;;  %6018 = vmatmul.msk.f32.gmra.mxu2 %vm91_vm0, %v6890_v12 }
  0x33   :  { %6048 = vmatmul.msk.f32.gmra.mxu3 %vm91_vm0, %v6862_v8  ;;  %6030 = vmatmul.msk.f32.gmra.mxu1 %vm91_vm0, %v6871_v9 }
  0x37   :  { %6000 = vmatmul.msk.f32.gmra.mxu0 %vm91_vm0, %v6899_v13  ;;  %6019 = vmatmul.msk.f32.gmra.mxu2 %vm91_vm0, %v6904_v14 }
  0x3b   :  { %6049 = vmatmul.msk.f32.gmra.mxu3 %vm91_vm0, %v6876_v10  ;;  %6031 = vmatmul.msk.f32.gmra.mxu1 %vm91_vm0, %v6885_v11 }
  0x3f   :  { %6001 = vmatmul.msk.f32.gmra.mxu0 %vm91_vm0, %v6913_v15  ;;  %6020 = vmatmul.msk.f32.gmra.mxu2 %vm91_vm0, %v6918_v16 }
  0x43   :  { %6050 = vmatmul.msk.f32.gmra.mxu3 %vm91_vm0, %v6890_v12  ;;  %6032 = vmatmul.msk.f32.gmra.mxu1 %vm91_vm0, %v6899_v13 }
  0x47   :  { %6002 = vmatmul.msk.f32.gmra.mxu0 %vm91_vm0, %v6927_v17  ;;  %6021 = vmatmul.msk.f32.gmra.mxu2 %vm91_vm0, %v6932_v18 }
  0x4b   :  { %6051 = vmatmul.msk.f32.gmra.mxu3 %vm91_vm0, %v6904_v14  ;;  %6033 = vmatmul.msk.f32.gmra.mxu1 %vm91_vm0, %v6913_v15 }
  0x4f   :  { %6003 = vmatmul.msk.f32.gmra.mxu0 %vm91_vm0, %v6941_v19  ;;  %6022 = vmatmul.msk.f32.gmra.mxu2 %vm91_vm0, %v6946_v20 }
  0x53   :  { %6052 = vmatmul.msk.f32.gmra.mxu3 %vm91_vm0, %v6918_v16  ;;  %6034 = vmatmul.msk.f32.gmra.mxu1 %vm91_vm0, %v6927_v17 }
  0x57   :  { %6004 = vmatmul.msk.f32.gmra.mxu0 %vm91_vm0, %v6955_v21  ;;  %6023 = vmatmul.msk.f32.gmra.mxu2 %vm91_vm0, %v6960_v22 }
  0x5b   :  { %6053 = vmatmul.msk.f32.gmra.mxu3 %vm91_vm0, %v6932_v18  ;;  %6035 = vmatmul.msk.f32.gmra.mxu1 %vm91_vm0, %v6941_v19 }
  0x5f   :  { %6005 = vmatmul.msk.f32.gmra.mxu0 %vm91_vm0, %v6969_v23  ;;  %6024 = vmatmul.msk.f32.gmra.mxu2 %vm91_vm0, %v6974_v24 }
  0x63   :  { %6054 = vmatmul.msk.f32.gmra.mxu3 %vm91_vm0, %v6946_v20  ;;  %6036 = vmatmul.msk.f32.gmra.mxu1 %vm91_vm0, %v6955_v21 }
  0x67   :  { %6006 = vmatmul.msk.f32.gmra.mxu0 %vm91_vm0, %v6983_v25  ;;  %6025 = vmatmul.msk.f32.gmra.mxu2 %vm91_vm0, %v6988_v26 }
  0x6b   :  { %6055 = vmatmul.msk.f32.gmra.mxu3 %vm91_vm0, %v6960_v22  ;;  %6037 = vmatmul.msk.f32.gmra.mxu1 %vm91_vm0, %v6969_v23 }
  0x6f   :  { %6007 = vmatmul.msk.f32.gmra.mxu0 %vm91_vm0, %v6997_v27 }
  0x73   :  { %6056 = vmatmul.msk.f32.gmra.mxu3 %vm91_vm0, %v6974_v24  ;;  %6038 = vmatmul.msk.f32.gmra.mxu1 %vm91_vm0, %v6983_v25 }
  0x77   :  { %6008 = vmatmul.msk.f32.gmra.mxu0 %vm91_vm0, %v7004_v28 }
  0x7b   :  { %6057 = vmatmul.msk.f32.gmra.mxu3 %vm91_vm0, %v6988_v26  ;;  %6039 = vmatmul.msk.f32.gmra.mxu1 %vm91_vm0, %v6997_v27 }
  0x7f   :  { %6009 = vmatmul.msk.f32.gmra.mxu0 %vm91_vm0, %v7011_v29 }
  0x83   :  { %6040 = vmatmul.msk.f32.gmra.mxu1 %vm91_vm0, %v7004_v28 }
  0x84   :  { %v205_v32 = vpop.f32.mrf.mxu0 }
  0x85   :  { %v7026_v34 = vadd.f32 %v205_v32, %v7018_v31 }
  0x87   :  { %415 = vst.msk [vmem:[#allocation2] sm:$0xff] %vm414_vm1, %v7026_v34  ;;  %6010 = vmatmul.msk.f32.gmra.mxu0 %vm91_vm0, %v7023_v33 }
  0x8a   :  { %v262_v35 = vpop.f32.mrf.mxu2 }
  0x8b   :  { %v7033_v36 = vadd.f32 %v262_v35, %v7018_v31  ;;  %6041 = vmatmul.msk.f32.gmra.mxu1 %vm91_vm0, %v7011_v29 }
  0x8c   :  { %v208_v37 = vpop.f32.mrf.mxu0 }
  0x8d   :  { %434 = vst.msk [vmem:[#allocation2 + $0x98] sm:$0xff] %vm414_vm1, %v7033_v36  ;;  %v7043_v39 = vadd.f32 %v208_v37, %v7018_v31 }
  0x8f   :  { %416 = vst.msk [vmem:[#allocation2 + $0x8] sm:$0xff] %vm414_vm1, %v7043_v39  ;;  %6011 = vmatmul.msk.f32.gmra.mxu0 %vm91_vm0, %v7038_v38 }
  0x92   :  { %v265_v40 = vpop.f32.mrf.mxu2 }
  0x93   :  { %v7050_v41 = vadd.f32 %v265_v40, %v7018_v31  ;;  %6042 = vmatmul.msk.f32.gmra.mxu1 %vm91_vm0, %v7023_v33 }
  0x94   :  { %v211_v42 = vpop.f32.mrf.mxu0 }
  0x95   :  { %435 = vst.msk [vmem:[#allocation2 + $0xa0] sm:$0xff] %vm414_vm1, %v7050_v41  ;;  %v7058_v44 = vadd.f32 %v211_v42, %v7018_v31 }
  0x97   :  { %417 = vst.msk [vmem:[#allocation2 + $0x10] sm:$0xff] %vm414_vm1, %v7058_v44  ;;  %6012 = vmatmul.msk.f32.gmra.mxu0 %vm91_vm0, %v69_v43 }
  0x9a   :  { %v268_v46 = vpop.f32.mrf.mxu2 }
  0x9b   :  { %v7070_v47 = vadd.f32 %v268_v46, %v7018_v31  ;;  %6043 = vmatmul.msk.f32.gmra.mxu1 %vm91_vm0, %v7038_v38  ;;  %v872_v38 = vld [vmem:[#allocation4 + $0x48] sm:$0xff] }
  0x9c   :  { %v214_v48 = vpop.f32.mrf.mxu0 }
  0x9d   :  { %436 = vst.msk [vmem:[#allocation2 + $0xa8] sm:$0xff] %vm414_vm1, %v7070_v47  ;;  %v7075_v49 = vadd.f32 %v214_v48, %v7018_v31 }
  0x9e   :  { %v1121_v33 = vld [vmem:[#allocation2 + $0x10] sm:$0xff] }
  0x9f   :  { %418 = vst.msk [vmem:[#allocation2 + $0x18] sm:$0xff] %vm414_vm1, %v7075_v49 }
  0xa2   :  { %v271_v50 = vpop.f32.mrf.mxu2 }
  0xa3   :  { %v7084_v51 = vadd.f32 %v271_v50, %v7018_v31 }
  0xa4   :  { %v217_v52 = vpop.f32.mrf.mxu0 }
  0xa5   :  { %437 = vst.msk [vmem:[#allocation2 + $0xb0] sm:$0xff] %vm414_vm1, %v7084_v51  ;;  %v7089_v53 = vadd.f32 %v217_v52, %v7018_v31  ;;  %523 = vrot.lane.b32.xlu2 %v7084_v51, %s6746_s2 }
  0xa7   :  { %419 = vst.msk [vmem:[#allocation2 + $0x20] sm:$0xff] %vm414_vm1, %v7089_v53 }
  0xaa   :  { %v274_v54 = vpop.f32.mrf.mxu2 }
  0xab   :  { %v7100_v55 = vadd.f32 %v274_v54, %v7018_v31 }
  0xac   :  { %v220_v56 = vpop.f32.mrf.mxu0  ;;  %v1141_v26 = vld [vmem:[#allocation2 + $0xb0] sm:$0xff] }
  0xad   :  { %438 = vst.msk [vmem:[#allocation2 + $0xb8] sm:$0xff] %vm414_vm1, %v7100_v55  ;;  %v7105_v57 = vadd.f32 %v220_v56, %v7018_v31  ;;  %525 = vrot.lane.b32.xlu0 %v7100_v55, %s6746_s2 }
  0xaf   :  { %420 = vst.msk [vmem:[#allocation2 + $0x28] sm:$0xff] %vm414_vm1, %v7105_v57  ;;  %489 = vrot.lane.b32.xlu1 %v7105_v57, %s6746_s2 }
  0xb2   :  { %v277_v58 = vpop.f32.mrf.mxu2 }
  0xb3   :  { %v7118_v59 = vadd.f32 %v277_v58, %v7018_v31 }
  0xb4   :  { %v223_v60 = vpop.f32.mrf.mxu0  ;;  %v1142_v58 = vld [vmem:[#allocation2 + $0xb8] sm:$0xff] }
  0xb5   :  { %439 = vst.msk [vmem:[#allocation2 + $0xc0] sm:$0xff] %vm414_vm1, %v7118_v59  ;;  %v7123_v61 = vadd.f32 %v223_v60, %v7018_v31 }
  0xb7   :  { %421 = vst.msk [vmem:[#allocation2 + $0x30] sm:$0xff] %vm414_vm1, %v7123_v61  ;;  %491 = vrot.lane.b32.xlu2 %v7123_v61, %s6746_s2  ;;  %527 = vrot.lane.b32.xlu1 %v7118_v59, %s6746_s2 }
  0xba   :  { %v280_v62 = vpop.f32.mrf.mxu2 }
  0xbb   :  { %v7136_v63 = vadd.f32 %v280_v62, %v7018_v31 }
  0xbc   :  { %v226_v0 = vpop.f32.mrf.mxu0  ;;  %v1143_v54 = vld [vmem:[#allocation2 + $0xc0] sm:$0xff] }
  0xbd   :  { %440 = vst.msk [vmem:[#allocation2 + $0xc8] sm:$0xff] %vm414_vm1, %v7136_v63  ;;  %v7141_v1 = vadd.f32 %v226_v0, %v7018_v31  ;;  %v1140_v0 = vld [vmem:[#allocation2 + $0xa8] sm:$0xff] }
  0xbe   :  { %v1125_v29 = vld [vmem:[#allocation2 + $0x30] sm:$0xff] }
  0xbf   :  { %422 = vst.msk [vmem:[#allocation2 + $0x38] sm:$0xff] %vm414_vm1, %v7141_v1  ;;  %493 = vrot.lane.b32.xlu0 %v7141_v1, %s6746_s2  ;;  %529 = vrot.lane.b32.xlu2 %v7136_v63, %s6746_s2 }
  0xc2   :  { %v283_v2 = vpop.f32.mrf.mxu2 }
  0xc3   :  { %v7154_v3 = vadd.f32 %v283_v2, %v7018_v31 }
  0xc4   :  { %v229_v4 = vpop.f32.mrf.mxu0  ;;  %v1144_v25 = vld [vmem:[#allocation2 + $0xc8] sm:$0xff] }
  0xc5   :  { %441 = vst.msk [vmem:[#allocation2 + $0xd0] sm:$0xff] %vm414_vm1, %v7154_v3  ;;  %v7159_v5 = vadd.f32 %v229_v4, %v7018_v31  ;;  %v1139_v4 = vld [vmem:[#allocation2 + $0xa0] sm:$0xff] }
  0xc7   :  { %423 = vst.msk [vmem:[#allocation2 + $0x40] sm:$0xff] %vm414_vm1, %v7159_v5  ;;  %495 = vrot.lane.b32.xlu1 %v7159_v5, %s6746_s2  ;;  %531 = vrot.lane.b32.xlu0 %v7154_v3, %s6746_s2 }
  0xca   :  { %v286_v6 = vpop.f32.mrf.mxu2 }
  0xcb   :  { %v7172_v7 = vadd.f32 %v286_v6, %v7018_v31 }
  0xcc   :  { %v232_v8 = vpop.f32.mrf.mxu0  ;;  %v1145_v52 = vld [vmem:[#allocation2 + $0xd0] sm:$0xff] }
  0xcd   :  { %442 = vst.msk [vmem:[#allocation2 + $0xd8] sm:$0xff] %vm414_vm1, %v7172_v7  ;;  %v7177_v9 = vadd.f32 %v232_v8, %v7018_v31 }
  0xcf   :  { %424 = vst.msk [vmem:[#allocation2 + $0x48] sm:$0xff] %vm414_vm1, %v7177_v9  ;;  %497 = vrot.lane.b32.xlu2 %v7177_v9, %s6746_s2  ;;  %533 = vrot.lane.b32.xlu1 %v7172_v7, %s6746_s2 }
  0xd2   :  { %v289_v10 = vpop.f32.mrf.mxu2 }
  0xd3   :  { %v7190_v11 = vadd.f32 %v289_v10, %v7018_v31  ;;  %v1138_v10 = vld [vmem:[#allocation2 + $0x98] sm:$0xff] }
  0xd4   :  { %v235_v12 = vpop.f32.mrf.mxu0  ;;  %v1146_v48 = vld [vmem:[#allocation2 + $0xd8] sm:$0xff] }
  0xd5   :  { %443 = vst.msk [vmem:[#allocation2 + $0xe0] sm:$0xff] %vm414_vm1, %v7190_v11  ;;  %v7195_v13 = vadd.f32 %v235_v12, %v7018_v31 }
  0xd7   :  { %425 = vst.msk [vmem:[#allocation2 + $0x50] sm:$0xff] %vm414_vm1, %v7195_v13  ;;  %499 = vrot.lane.b32.xlu0 %v7195_v13, %s6746_s2  ;;  %535 = vrot.lane.b32.xlu2 %v7190_v11, %s6746_s2 }
  0xda   :  { %v292_v14 = vpop.f32.mrf.mxu2 }
  0xdb   :  { %v7208_v15 = vadd.f32 %v292_v14, %v7018_v31 }
  0xdc   :  { %v238_v30 = vpop.f32.mrf.mxu0  ;;  %v1147_v22 = vld [vmem:[#allocation2 + $0xe0] sm:$0xff] }
  0xdd   :  { %444 = vst.msk [vmem:[#allocation2 + $0xe8] sm:$0xff] %vm414_vm1, %v7208_v15  ;;  %v7213_v32 = vadd.f32 %v238_v30, %v7018_v31 }
  0xde   :  { %v1129_v28 = vld [vmem:[#allocation2 + $0x50] sm:$0xff] }
  0xdf   :  { %426 = vst.msk [vmem:[#allocation2 + $0x58] sm:$0xff] %vm414_vm1, %v7213_v32  ;;  %501 = vrot.lane.b32.xlu1 %v7213_v32, %s6746_s2  ;;  %537 = vrot.lane.b32.xlu0 %v7208_v15, %s6746_s2 }
  0xe2   :  { %v295_v16 = vpop.f32.mrf.mxu2 }
  0xe3   :  { %v7226_v17 = vadd.f32 %v295_v16, %v7018_v31  ;;  %v1128_v16 = vld [vmem:[#allocation2 + $0x48] sm:$0xff] }
  0xe4   :  { %v241_v35 = vpop.f32.mrf.mxu0  ;;  %v1148_v46 = vld [vmem:[#allocation2 + $0xe8] sm:$0xff] }
  0xe5   :  { %445 = vst.msk [vmem:[#allocation2 + $0xf0] sm:$0xff] %vm414_vm1, %v7226_v17  ;;  %v7231_v37 = vadd.f32 %v241_v35, %v7018_v31  ;;  %539 = vrot.lane.b32.xlu2 %v7226_v17, %s6746_s2 }
  0xe6   :  { %v1130_v14 = vld [vmem:[#allocation2 + $0x58] sm:$0xff] }
  0xe7   :  { %427 = vst.msk [vmem:[#allocation2 + $0x60] sm:$0xff] %vm414_vm1, %v7231_v37 }
  0xea   :  { %v298_v18 = vpop.f32.mrf.mxu2 }
  0xeb   :  { %v7242_v19 = vadd.f32 %v298_v18, %v7018_v31  ;;  %v1127_v18 = vld [vmem:[#allocation2 + $0x40] sm:$0xff] }
  0xec   :  { %v244_v40 = vpop.f32.mrf.mxu0  ;;  %v1149_v43 = vld [vmem:[#allocation2 + $0xf0] sm:$0xff] }
  0xed   :  { %446 = vst.msk [vmem:[#allocation2 + $0xf8] sm:$0xff] %vm414_vm1, %v7242_v19  ;;  %v7247_v42 = vadd.f32 %v244_v40, %v7018_v31  ;;  %503 = vrot.lane.b32.xlu2 %v7231_v37, %s6746_s2  ;;  %541 = vrot.lane.b32.xlu1 %v7242_v19, %s6746_s2 }
  0xee   :  { %v1131_v8 = vld [vmem:[#allocation2 + $0x60] sm:$0xff] }
  0xef   :  { %428 = vst.msk [vmem:[#allocation2 + $0x68] sm:$0xff] %vm414_vm1, %v7247_v42 }
  0xf4   :  { %v247_v20 = vpop.f32.mrf.mxu0  ;;  %v1150_v21 = vld [vmem:[#allocation2 + $0xf8] sm:$0xff] }
  0xf5   :  { %v7260_v45 = vadd.f32 %v247_v20, %v7018_v31  ;;  %1360 = vmatpush.msrb.mxu3 %v1150_v21  ;;  %505 = vrot.lane.b32.xlu1 %v7247_v42, %s6746_s2  ;;  %v1126_v20 = vld [vmem:[#allocation2 + $0x38] sm:$0xff] }
  0xf6   :  { %485 = vrot.lane.b32.xlu2 %v7075_v49, %s6746_s2  ;;  %v1132_v2 = vld [vmem:[#allocation2 + $0x68] sm:$0xff] }
  0xf7   :  { %429 = vst.msk [vmem:[#allocation2 + $0x70] sm:$0xff] %vm414_vm1, %v7260_v45  ;;  %1361 = vmatpush.msrb.mxu3 %v1149_v43  ;;  %507 = vrot.lane.b32.xlu0 %v7260_v45, %s6746_s2  ;;  %v7329_v43 = vpop.f32.mrf.mxu3 }
  0xf9   :  { %1362 = vmatpush.msrb.mxu3 %v1148_v46  ;;  %v1123_v46 = vld [vmem:[#allocation2 + $0x20] sm:$0xff] }
  0xfb   :  { %1363 = vmatpush.msrb.mxu3 %v1147_v22  ;;  %v1122_v22 = vld [vmem:[#allocation2 + $0x18] sm:$0xff] }
  0xfc   :  { %v250_v23 = vpop.f32.mrf.mxu0 }
  0xfd   :  { %v7275_v50 = vadd.f32 %v250_v23, %v7018_v31  ;;  %1364 = vmatpush.msrb.mxu3 %v1146_v48  ;;  %521 = vrot.lane.b32.xlu1 %v7070_v47, %s6746_s2 }
  0xfe   :  { %517 = vrot.lane.b32.xlu2 %v7033_v36, %s6746_s2  ;;  %v1133_v27 = vld [vmem:[#allocation2 + $0x70] sm:$0xff] }
  0xff   :  { %430 = vst.msk [vmem:[#allocation2 + $0x78] sm:$0xff] %vm414_vm1, %v7275_v50  ;;  %1365 = vmatpush.msrb.mxu3 %v1145_v52  ;;  %509 = vrot.lane.b32.xlu0 %v7275_v50, %s6746_s2  ;;  %v524_v24 = vpop.permute.xlu2 %523 }
 0x100   :  { %597 = vst.msk [vmem:[#allocation2 + $0x1b0] sm:$0xff] %vm414_vm1, %v524_v24 }
 0x101   :  { %1366 = vmatpush.msrb.mxu3 %v1144_v25  ;;  %v864_v25 = vld [vmem:[#allocation4 + $0x8] sm:$0xff] }
 0x103   :  { %1367 = vmatpush.msrb.mxu3 %v1143_v54  ;;  %v1120_v54 = vld [vmem:[#allocation2 + $0x8] sm:$0xff] }
 0x104   :  { %v253_v56 = vpop.f32.mrf.mxu0 }
 0x105   :  { %v7291_v60 = vadd.f32 %v253_v56, %v7018_v31  ;;  %1368 = vmatpush.msrb.mxu3 %v1142_v58  ;;  %483 = vrot.lane.b32.xlu1 %v7058_v44, %s6746_s2  ;;  %v863_v58 = vld [vmem:[#allocation4] sm:$0xff] }
 0x106   :  { %479 = vrot.lane.b32.xlu2 %v7026_v34, %s6746_s2  ;;  %v1134_v62 = vld [vmem:[#allocation2 + $0x78] sm:$0xff] }
 0x107   :  { %431 = vst.msk [vmem:[#allocation2 + $0x80] sm:$0xff] %vm414_vm1, %v7291_v60  ;;  %1247 = vmatpush.msrb.mxu2 %v1134_v62  ;;  %1369 = vmatpush.msrb.mxu3 %v1141_v26  ;;  %v1119_v62 = vld [vmem:[#allocation2] sm:$0xff]  ;;  %v7341_v26 = vpop.f32.mrf.mxu3 }
 0x108   :  { %487 = vrot.lane.b32.xlu0 %v7089_v53, %s6746_s2 }
 0x109   :  { %1248 = vmatpush.msrb.mxu2 %v1133_v27  ;;  %1370 = vmatpush.msrb.mxu3 %v1140_v0 }
 0x10b   :  { %1249 = vmatpush.msrb.mxu2 %v1132_v2  ;;  %1371 = vmatpush.msrb.mxu3 %v1139_v4  ;;  %v871_v2 = vld [vmem:[#allocation4 + $0x40] sm:$0xff] }
 0x10c   :  { %v256_v6 = vpop.f32.mrf.mxu0 }
 0x10d   :  { %v7304_v12 = vadd.f32 %v256_v6, %v7018_v31  ;;  %1250 = vmatpush.msrb.mxu2 %v1131_v8  ;;  %1372 = vmatpush.msrb.mxu3 %v1138_v10  ;;  %v880_v8 = vld [vmem:[#allocation4 + $0x88] sm:$0xff] }
 0x10e   :  { %637 = vrot.lane.b32.xlu2 %v7275_v50, %s6745_s19  ;;  %v1135_v56 = vld [vmem:[#allocation2 + $0x80] sm:$0xff] }
 0x10f   :  { %432 = vst.msk [vmem:[#allocation2 + $0x88] sm:$0xff] %vm414_vm1, %v7304_v12  ;;  %1251 = vmatpush.msrb.mxu2 %v1130_v14  ;;  %v7353_v4 = vpop.f32.mrf.mxu3  ;;  %v879_v14 = vld [vmem:[#allocation4 + $0x80] sm:$0xff] }
 0x110   :  { %519 = vrot.lane.b32.xlu0 %v7050_v41, %s6746_s2 }
 0x111   :  { %1252 = vmatpush.msrb.mxu2 %v1129_v28  ;;  %v492_v30 = vpop.permute.xlu2 %491 }
 0x112   :  { %581 = vst.msk [vmem:[#allocation2 + $0x130] sm:$0xff] %vm414_vm1, %v492_v30  ;;  %v888_v30 = vld [vmem:[#allocation4 + $0xc8] sm:$0xff] }
 0x113   :  { %1253 = vmatpush.msrb.mxu2 %v1128_v16 }
 0x114   :  { %v259_v35 = vpop.f32.mrf.mxu0 }
 0x115   :  { %v7316_v40 = vadd.f32 %v259_v35, %v7018_v31  ;;  %1254 = vmatpush.msrb.mxu2 %v1127_v18  ;;  %v1124_v31 = vld [vmem:[#allocation2 + $0x28] sm:$0xff]  ;;  %v887_v18 = vld [vmem:[#allocation4 + $0xc0] sm:$0xff] }
 0x116   :  { %631 = vrot.lane.b32.xlu2 %v7231_v37, %s6745_s19  ;;  %v1136_v48 = vld [vmem:[#allocation2 + $0x88] sm:$0xff] }
 0x117   :  { %433 = vst.msk [vmem:[#allocation2 + $0x90] sm:$0xff] %vm414_vm1, %v7316_v40  ;;  %1255 = vmatpush.msrb.mxu2 %v1126_v20  ;;  %515 = vrot.lane.b32.xlu1 %v7316_v40, %s6746_s2  ;;  %v7367_v16 = vpop.f32.mrf.mxu3 }
 0x118   :  { %481 = vrot.lane.b32.xlu0 %v7043_v39, %s6746_s2 }
 0x119   :  { %1256 = vmatpush.msrb.mxu2 %v1125_v29  ;;  %v530_v21 = vpop.permute.xlu2 %529  ;;  %v896_v29 = vld [vmem:[#allocation4 + $0x108] sm:$0xff] }
 0x11a   :  { %600 = vst.msk [vmem:[#allocation2 + $0x1c8] sm:$0xff] %vm414_vm1, %v530_v21 }
 0x11b   :  { %1257 = vmatpush.msrb.mxu2 %v1124_v31  ;;  %v895_v31 = vld [vmem:[#allocation4 + $0x100] sm:$0xff] }
 0x11d   :  { %1258 = vmatpush.msrb.mxu2 %v1123_v46 }
 0x11e   :  { %627 = vrot.lane.b32.xlu2 %v7195_v13, %s6745_s19  ;;  %v1137_v23 = vld [vmem:[#allocation2 + $0x90] sm:$0xff] }
 0x11f   :  { %1259 = vmatpush.msrb.mxu2 %v1122_v22  ;;  %1373 = vmatpush.msrb.mxu3 %v1137_v23  ;;  %v526_v52 = vpop.permute.xlu0 %525  ;;  %v7379_v46 = vpop.f32.mrf.mxu3 }
 0x120   :  { %511 = vrot.lane.b32.xlu1 %v7291_v60, %s6746_s2  ;;  %513 = vrot.lane.b32.xlu0 %v7304_v12, %s6746_s2  ;;  %598 = vst.msk [vmem:[#allocation2 + $0x1b8] sm:$0xff] %vm414_vm1, %v526_v52  ;;  %v903_v52 = vld [vmem:[#allocation4 + $0x140] sm:$0xff] }
 0x121   :  { %1374 = vmatpush.msrb.mxu3 %v1136_v48  ;;  %v490_v24 = vpop.permute.xlu1 %489  ;;  %1260 = vmatpush.msrb.mxu2 %v1121_v33  ;;  %v904_v48 = vld [vmem:[#allocation4 + $0x148] sm:$0xff] }
 0x122   :  { %580 = vst.msk [vmem:[#allocation2 + $0x128] sm:$0xff] %vm414_vm1, %v490_v24 }
 0x123   :  { %1261 = vmatpush.msrb.mxu2 %v1120_v54  ;;  %1375 = vmatpush.msrb.mxu3 %v1135_v56  ;;  %v912_v54 = vld [vmem:[#allocation4 + $0x188] sm:$0xff] }
 0x124   :  { %1376 = vmatmul.f32.vlgmr.msrb.gmra.mxu3 %v864_v25 }
 0x125   :  { %1262 = vmatpush.msrb.mxu2 %v1119_v62 }
 0x126   :  { %665 = vrot.lane.b32.xlu2 %v7208_v15, %s6745_s19  ;;  %1263 = vmatmul.f32.vlgmr.msrb.gmra.mxu2 %v863_v58  ;;  %v911_v58 = vld [vmem:[#allocation4 + $0x180] sm:$0xff] }
 0x127   :  { %v7389_v33 = vpop.f32.mrf.mxu3 }
 0x128   :  { %633 = vrot.lane.b32.xlu1 %v7247_v42, %s6745_s19  ;;  %635 = vrot.lane.b32.xlu0 %v7260_v45, %s6745_s19 }
 0x129   :  { %v498_v27 = vpop.permute.xlu2 %497  ;;  %v528_v0 = vpop.permute.xlu1 %527 }
 0x12a   :  { %584 = vst.msk [vmem:[#allocation2 + $0x148] sm:$0xff] %vm414_vm1, %v498_v27 }
 0x12b   :  { %599 = vst.msk [vmem:[#allocation2 + $0x1c0] sm:$0xff] %vm414_vm1, %v528_v0  ;;  %v919_v0 = vld [vmem:[#allocation4 + $0x1c0] sm:$0xff] }
 0x12c   :  { %1379 = vmatmul.f32.gmra.mxu3 %v872_v38  ;;  %v920_v38 = vld [vmem:[#allocation4 + $0x1c8] sm:$0xff] }
 0x12e   :  { %621 = vrot.lane.b32.xlu2 %v7141_v1, %s6745_s19  ;;  %1266 = vmatmul.f32.gmra.mxu2 %v871_v2 }
 0x12f   :  { %v7402_v62 = vpop.f32.mrf.mxu3 }
 0x130   :  { %669 = vrot.lane.b32.xlu1 %v7242_v19, %s6745_s19  ;;  %629 = vrot.lane.b32.xlu0 %v7213_v32, %s6745_s19 }
 0x131   :  { %v494_v6 = vpop.permute.xlu0 %493  ;;  %v536_v10 = vpop.permute.xlu2 %535 }
 0x132   :  { %582 = vst.msk [vmem:[#allocation2 + $0x138] sm:$0xff] %vm414_vm1, %v494_v6 }
 0x133   :  { %603 = vst.msk [vmem:[#allocation2 + $0x1e0] sm:$0xff] %vm414_vm1, %v536_v10 }
 0x134   :  { %1382 = vmatmul.f32.gmra.mxu3 %v880_v8  ;;  %v928_v8 = vld [vmem:[#allocation4 + $0x208] sm:$0xff] }
 0x136   :  { %659 = vrot.lane.b32.xlu2 %v7154_v3, %s6745_s19  ;;  %1269 = vmatmul.f32.gmra.mxu2 %v879_v14  ;;  %v927_v14 = vld [vmem:[#allocation4 + $0x200] sm:$0xff] }
 0x137   :  { %v7417_v10 = vpop.f32.mrf.mxu3 }
 0x138   :  { %625 = vrot.lane.b32.xlu1 %v7177_v9, %s6745_s19  ;;  %667 = vrot.lane.b32.xlu0 %v7226_v17, %s6745_s19 }
 0x139   :  { %v496_v28 = vpop.permute.xlu1 %495  ;;  %v532_v35 = vpop.permute.xlu0 %531 }
 0x13a   :  { %583 = vst.msk [vmem:[#allocation2 + $0x140] sm:$0xff] %vm414_vm1, %v496_v28 }
 0x13b   :  { %601 = vst.msk [vmem:[#allocation2 + $0x1d0] sm:$0xff] %vm414_vm1, %v532_v35 }
 0x13c   :  { %1385 = vmatmul.f32.gmra.mxu3 %v888_v30 }
 0x13e   :  { %615 = vrot.lane.b32.xlu2 %v7089_v53, %s6745_s19  ;;  %1272 = vmatmul.f32.gmra.mxu2 %v887_v18 }
 0x13f   :  { %v540_v20 = vpop.permute.xlu2 %539 }
 0x140   :  { %605 = vst.msk [vmem:[#allocation2 + $0x1f0] sm:$0xff] %vm414_vm1, %v540_v20  ;;  %663 = vrot.lane.b32.xlu1 %v7190_v11, %s6745_s19  ;;  %623 = vrot.lane.b32.xlu0 %v7159_v5, %s6745_s19  ;;  %v936_v20 = vld [vmem:[#allocation4 + $0x248] sm:$0xff] }
 0x141   :  { %v534_v21 = vpop.permute.xlu1 %533 }
 0x142   :  { %602 = vst.msk [vmem:[#allocation2 + $0x1d8] sm:$0xff] %vm414_vm1, %v534_v21  ;;  %v935_v21 = vld [vmem:[#allocation4 + $0x240] sm:$0xff] }
 0x144   :  { %1388 = vmatmul.f32.gmra.mxu3 %v896_v29 }
 0x146   :  { %653 = vrot.lane.b32.xlu2 %v7100_v55, %s6745_s19  ;;  %1275 = vmatmul.f32.gmra.mxu2 %v895_v31  ;;  %v7428_v31 = vpop.f32.mrf.mxu3 }
 0x147   :  { %v504_v22 = vpop.permute.xlu2 %503 }
 0x148   :  { %587 = vst.msk [vmem:[#allocation2 + $0x160] sm:$0xff] %vm414_vm1, %v504_v22  ;;  %619 = vrot.lane.b32.xlu1 %v7123_v61, %s6745_s19  ;;  %661 = vrot.lane.b32.xlu0 %v7172_v7, %s6745_s19  ;;  %v7430_v22 = vpop.f32.mrf.mxu1 }
 0x149   :  { %v500_v23 = vpop.permute.xlu0 %499 }
 0x14a   :  { %585 = vst.msk [vmem:[#allocation2 + $0x150] sm:$0xff] %vm414_vm1, %v500_v23  ;;  %v1179_v23 = vld [vmem:[#allocation2 + $0x1e0] sm:$0xff] }
 0x14c   :  { %1391 = vmatmul.f32.gmra.mxu3 %v904_v48 }
 0x14e   :  { %609 = vrot.lane.b32.xlu2 %v7043_v39, %s6745_s19  ;;  %1278 = vmatmul.f32.gmra.mxu2 %v903_v52 }
 0x150   :  { %v486_v24 = vpop.permute.xlu2 %485  ;;  %657 = vrot.lane.b32.xlu1 %v7136_v63, %s6745_s19  ;;  %617 = vrot.lane.b32.xlu0 %v7105_v57, %s6745_s19 }
 0x151   :  { %578 = vst.msk [vmem:[#allocation2 + $0x118] sm:$0xff] %vm414_vm1, %v486_v24  ;;  %v502_v25 = vpop.permute.xlu1 %501  ;;  %v538_v56 = vpop.permute.xlu0 %537  ;;  %v1178_v24 = vld [vmem:[#allocation2 + $0x1d8] sm:$0xff] }
 0x152   :  { %586 = vst.msk [vmem:[#allocation2 + $0x158] sm:$0xff] %vm414_vm1, %v502_v25 }
 0x153   :  { %604 = vst.msk [vmem:[#allocation2 + $0x1e8] sm:$0xff] %vm414_vm1, %v538_v56  ;;  %v1177_v56 = vld [vmem:[#allocation2 + $0x1d0] sm:$0xff] }
 0x154   :  { %1394 = vmatmul.f32.gmra.mxu3 %v912_v54  ;;  %v944_v54 = vld [vmem:[#allocation4 + $0x288] sm:$0xff] }
 0x156   :  { %647 = vrot.lane.b32.xlu2 %v7050_v41, %s6745_s19  ;;  %1281 = vmatmul.f32.gmra.mxu2 %v911_v58  ;;  %v943_v58 = vld [vmem:[#allocation4 + $0x280] sm:$0xff] }
 0x158   :  { %v518_v27 = vpop.permute.xlu2 %517  ;;  %613 = vrot.lane.b32.xlu1 %v7075_v49, %s6745_s19  ;;  %655 = vrot.lane.b32.xlu0 %v7118_v59, %s6745_s19 }
 0x159   :  { %594 = vst.msk [vmem:[#allocation2 + $0x198] sm:$0xff] %vm414_vm1, %v518_v27  ;;  %v1176_v27 = vld [vmem:[#allocation2 + $0x1c8] sm:$0xff] }
 0x15a   :  { %v1180_v29 = vld [vmem:[#allocation2 + $0x1e8] sm:$0xff] }
 0x15c   :  { %1397 = vmatmul.f32.gmra.mxu3 %v920_v38  ;;  %v7441_v38 = vpop.f32.mrf.mxu1 }
 0x15e   :  { %641 = vrot.lane.b32.xlu2 %v7304_v12, %s6745_s19  ;;  %1284 = vmatmul.f32.gmra.mxu2 %v919_v0  ;;  %v7443_v0 = vpop.f32.mrf.mxu3 }
 0x15f   :  { %v542_v2 = vpop.permute.xlu1 %541 }
 0x160   :  { %606 = vst.msk [vmem:[#allocation2 + $0x1f8] sm:$0xff] %vm414_vm1, %v542_v2  ;;  %651 = vrot.lane.b32.xlu1 %v7084_v51, %s6745_s19  ;;  %611 = vrot.lane.b32.xlu0 %v7058_v44, %s6745_s19  ;;  %v480_v6 = vpop.permute.xlu2 %479  ;;  %v1175_v2 = vld [vmem:[#allocation2 + $0x1c0] sm:$0xff] }
 0x161   :  { %575 = vst.msk [vmem:[#allocation2 + $0x100] sm:$0xff] %vm414_vm1, %v480_v6 }
 0x164   :  { %1400 = vmatmul.f32.gmra.mxu3 %v928_v8 }
 0x166   :  { %763 = vrot.lane.b32.xlu2 %v7260_v45, %s6747_s29  ;;  %1287 = vmatmul.f32.gmra.mxu2 %v927_v14  ;;  %v1181_v45 = vld [vmem:[#allocation2 + $0x1f0] sm:$0xff]  ;;  %v1174_v14 = vld [vmem:[#allocation2 + $0x1b8] sm:$0xff] }
 0x167   :  { %v506_v28 = vpop.permute.xlu1 %505  ;;  %v1182_v30 = vld [vmem:[#allocation2 + $0x1f8] sm:$0xff] }
 0x168   :  { %588 = vst.msk [vmem:[#allocation2 + $0x168] sm:$0xff] %vm414_vm1, %v506_v28  ;;  %649 = vrot.lane.b32.xlu0 %v7070_v47, %s6745_s19  ;;  %607 = vrot.lane.b32.xlu1 %v7026_v34, %s6745_s19  ;;  %v638_v35 = vpop.permute.xlu2 %637 }
 0x169   :  { %718 = vst.msk [vmem:[#allocation2 + $0x278] sm:$0xff] %vm414_vm1, %v638_v35  ;;  %1586 = vmatpush.msrb.mxu1 %v1182_v30  ;;  %v508_v18 = vpop.permute.xlu0 %507  ;;  %v952_v30 = vld [vmem:[#allocation4 + $0x2c8] sm:$0xff]  ;;  %v1173_v35 = vld [vmem:[#allocation2 + $0x1b0] sm:$0xff] }
 0x16a   :  { %589 = vst.msk [vmem:[#allocation2 + $0x170] sm:$0xff] %vm414_vm1, %v508_v18 }
 0x16b   :  { %1587 = vmatpush.msrb.mxu1 %v1181_v45 }
 0x16c   :  { %1403 = vmatmul.f32.gmra.mxu3 %v936_v20  ;;  %v951_v20 = vld [vmem:[#allocation4 + $0x2c0] sm:$0xff] }
 0x16d   :  { %1588 = vmatpush.msrb.mxu1 %v1180_v29  ;;  %v7454_v29 = vpop.f32.mrf.mxu1 }
 0x16e   :  { %795 = vrot.lane.b32.xlu2 %v7226_v17, %s6747_s29  ;;  %1290 = vmatmul.f32.gmra.mxu2 %v935_v21  ;;  %v7458_v21 = vpop.f32.mrf.mxu3 }
 0x16f   :  { %1589 = vmatpush.msrb.mxu1 %v1179_v23  ;;  %v522_v48 = vpop.permute.xlu1 %521 }
 0x170   :  { %596 = vst.msk [vmem:[#allocation2 + $0x1a8] sm:$0xff] %vm414_vm1, %v522_v48  ;;  %645 = vrot.lane.b32.xlu0 %v7033_v36, %s6745_s19  ;;  %643 = vrot.lane.b32.xlu1 %v7316_v40, %s6745_s19  ;;  %v632_v52 = vpop.permute.xlu2 %631  ;;  %v1198_v25 = vld [vmem:[#allocation2 + $0x278] sm:$0xff]  ;;  %v1163_v48 = vld [vmem:[#allocation2 + $0x160] sm:$0xff] }
 0x171   :  { %715 = vst.msk [vmem:[#allocation2 + $0x260] sm:$0xff] %vm414_vm1, %v632_v52  ;;  %1590 = vmatpush.msrb.mxu1 %v1178_v24  ;;  %1699 = vmatpush.msra.mxu2 %v1198_v25  ;;  %v510_v17 = vpop.permute.xlu0 %509  ;;  %v1165_v18 = vld [vmem:[#allocation2 + $0x170] sm:$0xff]  ;;  %v960_v52 = vld [vmem:[#allocation4 + $0x308] sm:$0xff]  ;;  %v1162_v25 = vld [vmem:[#allocation2 + $0x158] sm:$0xff] }
 0x172   :  { %590 = vst.msk [vmem:[#allocation2 + $0x178] sm:$0xff] %vm414_vm1, %v510_v17  ;;  %v1161_v17 = vld [vmem:[#allocation2 + $0x150] sm:$0xff] }
 0x173   :  { %1591 = vmatpush.msrb.mxu1 %v1177_v56  ;;  %v1159_v56 = vld [vmem:[#allocation2 + $0x140] sm:$0xff] }
 0x174   :  { %1406 = vmatmul.f32.gmra.mxu3 %v944_v54 }
 0x175   :  { %1592 = vmatpush.msrb.mxu1 %v1176_v27  ;;  %v7466_v54 = vpop.f32.mrf.mxu1  ;;  %v968_v27 = vld [vmem:[#allocation4 + $0x348] sm:$0xff] }
 0x176   :  { %757 = vrot.lane.b32.xlu2 %v7213_v32, %s6747_s29  ;;  %1293 = vmatmul.f32.gmra.mxu2 %v943_v58 }
 0x177   :  { %1593 = vmatpush.msrb.mxu1 %v1175_v2  ;;  %v484_v6 = vpop.permute.xlu1 %483  ;;  %v1172_v45 = vld [vmem:[#allocation2 + $0x1a8] sm:$0xff]  ;;  %v7475_v2 = vpop.f32.mrf.mxu3 }
 0x178   :  { %577 = vst.msk [vmem:[#allocation2 + $0x110] sm:$0xff] %vm414_vm1, %v484_v6  ;;  %639 = vrot.lane.b32.xlu0 %v7291_v60, %s6745_s19  ;;  %765 = vrot.lane.b32.xlu1 %v7275_v50, %s6747_s29  ;;  %v628_v8 = vpop.permute.xlu2 %627  ;;  %v1164_v50 = vld [vmem:[#allocation2 + $0x168] sm:$0xff]  ;;  %v1158_v6 = vld [vmem:[#allocation2 + $0x138] sm:$0xff] }
 0x179   :  { %713 = vst.msk [vmem:[#allocation2 + $0x250] sm:$0xff] %vm414_vm1, %v628_v8  ;;  %1594 = vmatpush.msrb.mxu1 %v1174_v14  ;;  %v1166_v28 = vld [vmem:[#allocation2 + $0x178] sm:$0xff] }
 0x17a   :  { %v488_v32 = vpop.permute.xlu0 %487  ;;  %1473 = vmatpush.msrb.mxu0 %v1166_v28  ;;  %v1170_v14 = vld [vmem:[#allocation2 + $0x198] sm:$0xff]  ;;  %v1156_v28 = vld [vmem:[#allocation2 + $0x128] sm:$0xff] }
 0x17b   :  { %579 = vst.msk [vmem:[#allocation2 + $0x120] sm:$0xff] %vm414_vm1, %v488_v32  ;;  %1595 = vmatpush.msrb.mxu1 %v1173_v35 }
 0x17c   :  { %1474 = vmatpush.msrb.mxu0 %v1165_v18  ;;  %1409 = vmatmul.f32.gmra.mxu3 %v952_v30  ;;  %v976_v18 = vld [vmem:[#allocation4 + $0x388] sm:$0xff] }
 0x17d   :  { %1596 = vmatpush.msrb.mxu1 %v1172_v45  ;;  %v7481_v30 = vpop.f32.mrf.mxu1 }
 0x17e   :  { %789 = vrot.lane.b32.xlu2 %v7172_v7, %s6747_s29  ;;  %1296 = vmatmul.f32.gmra.mxu2 %v951_v20  ;;  %v959_v7 = vld [vmem:[#allocation4 + $0x300] sm:$0xff] }
 0x17f   :  { %1475 = vmatpush.msrb.mxu0 %v1164_v50  ;;  %v1154_v50 = vld [vmem:[#allocation2 + $0x118] sm:$0xff] }
 0x180   :  { %797 = vrot.lane.b32.xlu0 %v7242_v19, %s6747_s29  ;;  %761 = vrot.lane.b32.xlu1 %v7247_v42, %s6747_s29  ;;  %v666_v23 = vpop.permute.xlu2 %665  ;;  %v1160_v19 = vld [vmem:[#allocation2 + $0x148] sm:$0xff] }
 0x181   :  { %732 = vst.msk [vmem:[#allocation2 + $0x2e8] sm:$0xff] %vm414_vm1, %v666_v23  ;;  %1476 = vmatpush.msrb.mxu0 %v1163_v48  ;;  %v975_v23 = vld [vmem:[#allocation4 + $0x380] sm:$0xff]  ;;  %v7489_v48 = vpop.f32.mrf.mxu3 }
 0x182   :  { %v520_v24 = vpop.permute.xlu0 %519  ;;  %v1155_v35 = vld [vmem:[#allocation2 + $0x120] sm:$0xff] }
 0x183   :  { %595 = vst.msk [vmem:[#allocation2 + $0x1a0] sm:$0xff] %vm414_vm1, %v520_v24  ;;  %1477 = vmatpush.msrb.mxu0 %v1162_v25  ;;  %v1151_v25 = vld [vmem:[#allocation2 + $0x100] sm:$0xff] }
 0x184   :  { %1412 = vmatmul.f32.gmra.mxu3 %v960_v52  ;;  %v865_v52 = vld [vmem:[#allocation4 + $0x10] sm:$0xff] }
 0x185   :  { %1478 = vmatpush.msrb.mxu0 %v1161_v17  ;;  %v7499_v17 = vpop.f32.mrf.mxu1 }
 0x186   :  { %751 = vrot.lane.b32.xlu2 %v7159_v5, %s6747_s29  ;;  %1299 = vmatmul.f32.gmra.mxu2 %v959_v7  ;;  %v984_v7 = vld [vmem:[#allocation4 + $0x3c8] sm:$0xff] }
 0x187   :  { %1479 = vmatpush.msrb.mxu0 %v1160_v19 }
 0x188   :  { %759 = vrot.lane.b32.xlu0 %v7231_v37, %s6747_s29  ;;  %793 = vrot.lane.b32.xlu1 %v7208_v15, %s6747_s29  ;;  %v622_v42 = vpop.permute.xlu2 %621  ;;  %v967_v37 = vld [vmem:[#allocation4 + $0x340] sm:$0xff]  ;;  %v1157_v15 = vld [vmem:[#allocation2 + $0x130] sm:$0xff] }
 0x189   :  { %710 = vst.msk [vmem:[#allocation2 + $0x238] sm:$0xff] %vm414_vm1, %v622_v42  ;;  %1480 = vmatpush.msrb.mxu0 %v1159_v56  ;;  %v516_v58 = vpop.permute.xlu1 %515  ;;  %v983_v56 = vld [vmem:[#allocation4 + $0x3c0] sm:$0xff] }
 0x18a   :  { %593 = vst.msk [vmem:[#allocation2 + $0x190] sm:$0xff] %vm414_vm1, %v516_v58  ;;  %v482_v5 = vpop.permute.xlu0 %481  ;;  %v1171_v8 = vld [vmem:[#allocation2 + $0x1a0] sm:$0xff]  ;;  %v7503_v58 = vpop.f32.mrf.mxu3 }
 0x18b   :  { %576 = vst.msk [vmem:[#allocation2 + $0x108] sm:$0xff] %vm414_vm1, %v482_v5  ;;  %1481 = vmatpush.msrb.mxu0 %v1158_v6  ;;  %1597 = vmatpush.msrb.mxu1 %v1171_v8  ;;  %v992_v6 = vld [vmem:[#allocation4 + $0x408] sm:$0xff] }
 0x18c   :  { %1415 = vmatmul.f32.gmra.mxu3 %v968_v27  ;;  %v873_v27 = vld [vmem:[#allocation4 + $0x50] sm:$0xff] }
 0x18d   :  { %1482 = vmatpush.msrb.mxu0 %v1157_v15  ;;  %1598 = vmatpush.msrb.mxu1 %v1170_v14  ;;  %v874_v14 = vld [vmem:[#allocation4 + $0x58] sm:$0xff] }
 0x18e   :  { %783 = vrot.lane.b32.xlu2 %v7118_v59, %s6747_s29  ;;  %1302 = vmatmul.f32.gmra.mxu2 %v967_v37 }
 0x18f   :  { %1483 = vmatpush.msrb.mxu0 %v1156_v28 }
 0x190   :  { %791 = vrot.lane.b32.xlu0 %v7190_v11, %s6747_s29  ;;  %755 = vrot.lane.b32.xlu1 %v7195_v13, %s6747_s29  ;;  %v660_v32 = vpop.permute.xlu2 %659  ;;  %v1153_v11 = vld [vmem:[#allocation2 + $0x110] sm:$0xff] }
 0x191   :  { %729 = vst.msk [vmem:[#allocation2 + $0x2d0] sm:$0xff] %vm414_vm1, %v660_v32  ;;  %1484 = vmatpush.msrb.mxu0 %v1155_v35  ;;  %v1169_v20 = vld [vmem:[#allocation2 + $0x190] sm:$0xff]  ;;  %v1195_v35 = vld [vmem:[#allocation2 + $0x260] sm:$0xff] }
 0x192   :  { %v512_v45 = vpop.permute.xlu1 %511  ;;  %v514_v59 = vpop.permute.xlu0 %513  ;;  %1599 = vmatpush.msrb.mxu1 %v1169_v20  ;;  %v1152_v13 = vld [vmem:[#allocation2 + $0x108] sm:$0xff] }
 0x193   :  { %591 = vst.msk [vmem:[#allocation2 + $0x180] sm:$0xff] %vm414_vm1, %v512_v45  ;;  %1485 = vmatpush.msrb.mxu0 %v1154_v50 }
 0x194   :  { %592 = vst.msk [vmem:[#allocation2 + $0x188] sm:$0xff] %vm414_vm1, %v514_v59  ;;  %1418 = vmatmul.f32.gmra.mxu3 %v976_v18  ;;  %v881_v18 = vld [vmem:[#allocation4 + $0x90] sm:$0xff] }
 0x195   :  { %1486 = vmatpush.msrb.mxu0 %v1153_v11 }
 0x196   :  { %745 = vrot.lane.b32.xlu2 %v7105_v57, %s6747_s29  ;;  %1305 = vmatmul.f32.gmra.mxu2 %v975_v23 }
 0x197   :  { %1487 = vmatpush.msrb.mxu0 %v1152_v13 }
 0x198   :  { %753 = vrot.lane.b32.xlu0 %v7177_v9, %s6747_s29  ;;  %787 = vrot.lane.b32.xlu1 %v7154_v3, %s6747_s29  ;;  %v616_v24 = vpop.permute.xlu2 %615  ;;  %v866_v9 = vld [vmem:[#allocation4 + $0x18] sm:$0xff] }
 0x199   :  { %707 = vst.msk [vmem:[#allocation2 + $0x220] sm:$0xff] %vm414_vm1, %v616_v24  ;;  %1488 = vmatpush.msrb.mxu0 %v1151_v25  ;;  %v882_v24 = vld [vmem:[#allocation4 + $0x98] sm:$0xff]  ;;  %v1193_v25 = vld [vmem:[#allocation2 + $0x250] sm:$0xff] }
 0x19a   :  { %v634_v19 = vpop.permute.xlu1 %633  ;;  %v636_v57 = vpop.permute.xlu0 %635  ;;  %1489 = vmatmul.f32.vlgmr.msrb.gmra.mxu0 %v865_v52  ;;  %v1167_v3 = vld [vmem:[#allocation2 + $0x180] sm:$0xff] }
 0x19b   :  { %716 = vst.msk [vmem:[#allocation2 + $0x268] sm:$0xff] %vm414_vm1, %v634_v19  ;;  %v1168_v42 = vld [vmem:[#allocation2 + $0x188] sm:$0xff]  ;;  %v889_v19 = vld [vmem:[#allocation4 + $0xd0] sm:$0xff] }
 0x19c   :  { %717 = vst.msk [vmem:[#allocation2 + $0x270] sm:$0xff] %vm414_vm1, %v636_v57  ;;  %1600 = vmatpush.msrb.mxu1 %v1168_v42  ;;  %1421 = vmatmul.f32.gmra.mxu3 %v984_v7 }
 0x19e   :  { %1601 = vmatpush.msrb.mxu1 %v1167_v3  ;;  %777 = vrot.lane.b32.xlu2 %v7070_v47, %s6747_s29  ;;  %v7513_v47 = vpop.f32.mrf.mxu1 }
 0x19f   :  { %1602 = vmatmul.f32.vlgmr.msrb.gmra.mxu1 %v866_v9  ;;  %1308 = vmatmul.f32.gmra.mxu2 %v983_v56 }
 0x1a0   :  { %785 = vrot.lane.b32.xlu0 %v7136_v63, %s6747_s29  ;;  %749 = vrot.lane.b32.xlu1 %v7141_v1, %s6747_s29  ;;  %v654_v5 = vpop.permute.xlu2 %653  ;;  %v991_v63 = vld [vmem:[#allocation4 + $0x400] sm:$0xff] }
 0x1a1   :  { %726 = vst.msk [vmem:[#allocation2 + $0x2b8] sm:$0xff] %vm414_vm1, %v654_v5  ;;  %v6651_v1 = vld [vmem:[%s10475_s9] ss:$8 sm:$0x3] }
 0x1a2   :  { %v670_v8 = vpop.permute.xlu1 %669  ;;  %v630_v37 = vpop.permute.xlu0 %629  ;;  %1492 = vmatmul.f32.gmra.mxu0 %v873_v27  ;;  %v1196_v28 = vld [vmem:[#allocation2 + $0x268] sm:$0xff]  ;;  %v7519_v32 = vperm.slane %v6651_v1, 1 }
 0x1a3   :  { %734 = vst.msk [vmem:[#allocation2 + $0x2f8] sm:$0xff] %vm414_vm1, %v670_v8  ;;  %v1197_v15 = vld [vmem:[#allocation2 + $0x270] sm:$0xff]  ;;  %v890_v8 = vld [vmem:[#allocation4 + $0xd8] sm:$0xff] }
 0x1a4   :  { %714 = vst.msk [vmem:[#allocation2 + $0x258] sm:$0xff] %vm414_vm1, %v630_v37  ;;  %1700 = vmatpush.msra.mxu2 %v1197_v15  ;;  %1424 = vmatmul.f32.gmra.mxu3 %v992_v6  ;;  %v319_v45 = vadd.f32 %v7430_v22, %v7519_v32  ;;  %v322_v42 = vadd.f32 %v7441_v38, %v7519_v32  ;;  %v1008_v6 = vld [vmem:[#allocation4 + $0x488] sm:$0xff]  ;;  %v897_v15 = vld [vmem:[#allocation4 + $0x110] sm:$0xff] }
 0x1a5   :  { %v1212_v37 = vld [vmem:[#allocation2 + $0x2e8] sm:$0xff] }
 0x1a6   :  { %1701 = vmatpush.msra.mxu2 %v1196_v28  ;;  %739 = vrot.lane.b32.xlu2 %v7058_v44, %s6747_s29  ;;  %v1000_v44 = vld [vmem:[#allocation4 + $0x448] sm:$0xff]  ;;  %v7534_v7 = vpop.f32.mrf.mxu1  ;;  %v325_v28 = vadd.f32 %v7454_v29, %v7519_v32  ;;  %v898_v29 = vld [vmem:[#allocation4 + $0x118] sm:$0xff] }
 0x1a7   :  { %1605 = vmatmul.f32.gmra.mxu1 %v874_v14  ;;  %1311 = vmatmul.f32.gmra.mxu2 %v991_v63  ;;  %v1377_v20 = vpop.f32.mrf.mxu3 }
 0x1a8   :  { %1702 = vmatpush.msra.mxu2 %v1195_v35  ;;  %747 = vrot.lane.b32.xlu0 %v7123_v61, %s6747_s29  ;;  %v610_v59 = vpop.permute.xlu2 %609 }
 0x1a9   :  { %781 = vrot.lane.b32.xlu1 %v7100_v55, %s6747_s29  ;;  %704 = vst.msk [vmem:[#allocation2 + $0x208] sm:$0xff] %vm414_vm1, %v610_v59  ;;  %v1264_v50 = vpop.f32.mrf.mxu2  ;;  %v999_v55 = vld [vmem:[#allocation4 + $0x440] sm:$0xff]  ;;  %v1016_v59 = vld [vmem:[#allocation4 + $0x4c8] sm:$0xff] }
 0x1aa   :  { %v626_v23 = vpop.permute.xlu1 %625  ;;  %v668_v11 = vpop.permute.xlu0 %667  ;;  %v1265_v13 = vadd.f32 %v1264_v50, %v319_v45  ;;  %1495 = vmatmul.f32.gmra.mxu0 %v881_v18  ;;  %v1214_v52 = vld [vmem:[#allocation2 + $0x2f8] sm:$0xff] }
 0x1ab   :  { %712 = vst.msk [vmem:[#allocation2 + $0x248] sm:$0xff] %vm414_vm1, %v626_v23  ;;  %v1194_v22 = vld [vmem:[#allocation2 + $0x258] sm:$0xff]  ;;  %1812 = vmatpush.msra.mxu3 %v1214_v52  ;;  %v905_v23 = vld [vmem:[#allocation4 + $0x150] sm:$0xff] }
 0x1ac   :  { %733 = vst.msk [vmem:[#allocation2 + $0x2f0] sm:$0xff] %vm414_vm1, %v668_v11  ;;  %1703 = vmatpush.msra.mxu2 %v1194_v22  ;;  %v7532_v61 = vadd.f32 %v1377_v20, %v1265_v13  ;;  %1427 = vmatmul.f32.gmra.mxu3 %v1000_v44  ;;  %v1190_v44 = vld [vmem:[#allocation2 + $0x238] sm:$0xff]  ;;  %v328_v13 = vadd.f32 %v7466_v54, %v7519_v32 }
 0x1ae   :  { %1704 = vmatpush.msra.mxu2 %v1193_v25  ;;  %771 = vrot.lane.b32.xlu2 %v7316_v40, %s6747_s29  ;;  %v7551_v63 = vpop.f32.mrf.mxu1 }
 0x1af   :  { %1608 = vmatmul.f32.gmra.mxu1 %v882_v24  ;;  %1314 = vmatmul.f32.gmra.mxu2 %v999_v55  ;;  %v1380_v57 = vpop.f32.mrf.mxu3 }
 0x1b0   :  { %779 = vrot.lane.b32.xlu0 %v7084_v51, %s6747_s29  ;;  %v648_v9 = vpop.permute.xlu2 %647 }
 0x1b1   :  { %743 = vrot.lane.b32.xlu1 %v7089_v53, %s6747_s29  ;;  %723 = vst.msk [vmem:[#allocation2 + $0x2a0] sm:$0xff] %vm414_vm1, %v648_v9  ;;  %v1267_v56 = vpop.f32.mrf.mxu2  ;;  %v1007_v53 = vld [vmem:[#allocation4 + $0x480] sm:$0xff] }
 0x1b2   :  { %v664_v3 = vpop.permute.xlu1 %663  ;;  %v624_v27 = vpop.permute.xlu0 %623  ;;  %v1268_v40 = vadd.f32 %v1267_v56, %v322_v42  ;;  %1498 = vmatmul.f32.gmra.mxu0 %v889_v19  ;;  %v1192_v5 = vld [vmem:[#allocation2 + $0x248] sm:$0xff]  ;;  %v1023_v9 = vld [vmem:[#allocation4 + $0x500] sm:$0xff]  ;;  %v1209_v56 = vld [vmem:[#allocation2 + $0x2d0] sm:$0xff] }
 0x1b3   :  { %731 = vst.msk [vmem:[#allocation2 + $0x2e0] sm:$0xff] %vm414_vm1, %v664_v3  ;;  %1705 = vmatpush.msra.mxu2 %v1192_v5  ;;  %v1213_v38 = vld [vmem:[#allocation2 + $0x2f0] sm:$0xff]  ;;  %v1024_v42 = vld [vmem:[#allocation4 + $0x508] sm:$0xff] }
 0x1b4   :  { %711 = vst.msk [vmem:[#allocation2 + $0x240] sm:$0xff] %vm414_vm1, %v624_v27  ;;  %1813 = vmatpush.msra.mxu3 %v1213_v38  ;;  %v7547_v51 = vadd.f32 %v1380_v57, %v1268_v40  ;;  %v913_v3 = vld [vmem:[#allocation4 + $0x190] sm:$0xff]  ;;  %v331_v40 = vadd.f32 %v7481_v30, %v7519_v32 }
 0x1b5   :  { %1430 = vmatmul.f32.gmra.mxu3 %v1008_v6 }
 0x1b6   :  { %1814 = vmatpush.msra.mxu3 %v1212_v37  ;;  %767 = vrot.lane.b32.xlu2 %v7291_v60, %s6747_s29  ;;  %v7571_v24 = vpop.f32.mrf.mxu1 }
 0x1b7   :  { %1611 = vmatmul.f32.gmra.mxu1 %v890_v8  ;;  %1317 = vmatmul.f32.gmra.mxu2 %v1007_v53  ;;  %v1383_v14 = vpop.f32.mrf.mxu3 }
 0x1b8   :  { %741 = vrot.lane.b32.xlu0 %v7075_v49, %s6747_s29  ;;  %v642_v1 = vpop.permute.xlu2 %641 }
 0x1b9   :  { %775 = vrot.lane.b32.xlu1 %v7050_v41, %s6747_s29  ;;  %720 = vst.msk [vmem:[#allocation2 + $0x288] sm:$0xff] %vm414_vm1, %v642_v1  ;;  %v1270_v35 = vpop.f32.mrf.mxu2  ;;  %v1015_v41 = vld [vmem:[#allocation4 + $0x4c0] sm:$0xff] }
 0x1ba   :  { %v620_v60 = vpop.permute.xlu1 %619  ;;  %v662_v18 = vpop.permute.xlu0 %661  ;;  %v1271_v20 = vadd.f32 %v1270_v35, %v325_v28  ;;  %1501 = vmatmul.f32.gmra.mxu0 %v897_v15  ;;  %v1211_v45 = vld [vmem:[#allocation2 + $0x2e0] sm:$0xff]  ;;  %v1032_v15 = vld [vmem:[#allocation4 + $0x548] sm:$0xff]  ;;  %v921_v35 = vld [vmem:[#allocation4 + $0x1d0] sm:$0xff] }
 0x1bb   :  { %709 = vst.msk [vmem:[#allocation2 + $0x230] sm:$0xff] %vm414_vm1, %v620_v60  ;;  %v1191_v50 = vld [vmem:[#allocation2 + $0x240] sm:$0xff]  ;;  %1815 = vmatpush.msra.mxu3 %v1211_v45 }
 0x1bc   :  { %730 = vst.msk [vmem:[#allocation2 + $0x2d8] sm:$0xff] %vm414_vm1, %v662_v18  ;;  %1706 = vmatpush.msra.mxu2 %v1191_v50  ;;  %v7562_v49 = vadd.f32 %v1383_v14, %v1271_v20  ;;  %v1031_v28 = vld [vmem:[#allocation4 + $0x540] sm:$0xff]  ;;  %v334_v18 = vadd.f32 %v7499_v17, %v7519_v32  ;;  %v922_v17 = vld [vmem:[#allocation4 + $0x1d8] sm:$0xff] }
 0x1bd   :  { %1433 = vmatmul.f32.gmra.mxu3 %v1016_v59  ;;  %v1187_v1 = vld [vmem:[#allocation2 + $0x220] sm:$0xff] }
 0x1be   :  { %1707 = vmatpush.msra.mxu2 %v1190_v44  ;;  %v7585_v30 = vpop.f32.mrf.mxu1  ;;  %v1040_v44 = vld [vmem:[#allocation4 + $0x588] sm:$0xff] }
 0x1bf   :  { %1614 = vmatmul.f32.gmra.mxu1 %v898_v29  ;;  %1320 = vmatmul.f32.gmra.mxu2 %v1015_v41  ;;  %v1386_v11 = vpop.f32.mrf.mxu3 }
 0x1c0   :  { %773 = vrot.lane.b32.xlu0 %v7033_v36, %s6747_s29  ;;  %v764_v52 = vpop.permute.xlu2 %763 }
 0x1c1   :  { %737 = vrot.lane.b32.xlu1 %v7043_v39, %s6747_s29  ;;  %845 = vst.msk [vmem:[#allocation2 + $0x370] sm:$0xff] %vm414_vm1, %v764_v52  ;;  %v1273_v22 = vpop.f32.mrf.mxu2  ;;  %v906_v39 = vld [vmem:[#allocation4 + $0x158] sm:$0xff] }
 0x1c2   :  { %v658_v55 = vpop.permute.xlu1 %657  ;;  %v618_v25 = vpop.permute.xlu0 %617  ;;  %v1274_v19 = vadd.f32 %v1273_v22, %v328_v13  ;;  %1504 = vmatmul.f32.gmra.mxu0 %v905_v23  ;;  %v1189_v57 = vld [vmem:[#allocation2 + $0x230] sm:$0xff]  ;;  %v1039_v13 = vld [vmem:[#allocation4 + $0x580] sm:$0xff]  ;;  %v1206_v52 = vld [vmem:[#allocation2 + $0x2b8] sm:$0xff] }
 0x1c3   :  { %728 = vst.msk [vmem:[#allocation2 + $0x2c8] sm:$0xff] %vm414_vm1, %v658_v55  ;;  %1708 = vmatpush.msra.mxu2 %v1189_v57  ;;  %v1210_v54 = vld [vmem:[#allocation2 + $0x2d8] sm:$0xff]  ;;  %v929_v55 = vld [vmem:[#allocation4 + $0x210] sm:$0xff] }
 0x1c4   :  { %708 = vst.msk [vmem:[#allocation2 + $0x228] sm:$0xff] %vm414_vm1, %v618_v25  ;;  %1816 = vmatpush.msra.mxu3 %v1210_v54  ;;  %v7575_v36 = vadd.f32 %v1386_v11, %v1274_v19  ;;  %v337_v19 = vadd.f32 %v7513_v47, %v7519_v32  ;;  %v930_v47 = vld [vmem:[#allocation4 + $0x218] sm:$0xff] }
 0x1c5   :  { %1436 = vmatmul.f32.gmra.mxu3 %v1024_v42 }
 0x1c6   :  { %1817 = vmatpush.msra.mxu3 %v1209_v56  ;;  %v7597_v22 = vpop.f32.mrf.mxu1 }
 0x1c7   :  { %1617 = vmatmul.f32.gmra.mxu1 %v906_v39  ;;  %1323 = vmatmul.f32.gmra.mxu2 %v1023_v9  ;;  %v1389_v27 = vpop.f32.mrf.mxu3 }
 0x1c8   :  { %735 = vrot.lane.b32.xlu0 %v7026_v34, %s6747_s29  ;;  %v796_v5 = vpop.permute.xlu2 %795 }
 0x1c9   :  { %769 = vrot.lane.b32.xlu1 %v7304_v12, %s6747_s29  ;;  %861 = vst.msk [vmem:[#allocation2 + $0x3f0] sm:$0xff] %vm414_vm1, %v796_v5  ;;  %v1276_v6 = vpop.f32.mrf.mxu2  ;;  %v914_v12 = vld [vmem:[#allocation4 + $0x198] sm:$0xff]  ;;  %v1047_v5 = vld [vmem:[#allocation4 + $0x5c0] sm:$0xff] }
 0x1ca   :  { %v614_v38 = vpop.permute.xlu1 %613  ;;  %v656_v8 = vpop.permute.xlu0 %655  ;;  %v1277_v53 = vadd.f32 %v1276_v6, %v331_v40  ;;  %1507 = vmatmul.f32.gmra.mxu0 %v913_v3  ;;  %v1208_v37 = vld [vmem:[#allocation2 + $0x2c8] sm:$0xff] }
 0x1cb   :  { %706 = vst.msk [vmem:[#allocation2 + $0x218] sm:$0xff] %vm414_vm1, %v614_v38  ;;  %v1188_v14 = vld [vmem:[#allocation2 + $0x228] sm:$0xff]  ;;  %1818 = vmatpush.msra.mxu3 %v1208_v37  ;;  %v937_v38 = vld [vmem:[#allocation4 + $0x250] sm:$0xff]  ;;  %v340_v37 = vadd.f32 %v7534_v7, %v7519_v32  ;;  %v1203_v7 = vld [vmem:[#allocation2 + $0x2a0] sm:$0xff] }
 0x1cc   :  { %727 = vst.msk [vmem:[#allocation2 + $0x2c0] sm:$0xff] %vm414_vm1, %v656_v8  ;;  %1709 = vmatpush.msra.mxu2 %v1188_v14  ;;  %v7588_v34 = vadd.f32 %v1389_v27, %v1277_v53  ;;  %v1048_v3 = vld [vmem:[#allocation4 + $0x5c8] sm:$0xff] }
 0x1cd   :  { %1439 = vmatmul.f32.gmra.mxu3 %v1032_v15  ;;  %v1184_v6 = vld [vmem:[#allocation2 + $0x208] sm:$0xff] }
 0x1ce   :  { %1710 = vmatpush.msra.mxu2 %v1187_v1  ;;  %v7606_v53 = vpop.f32.mrf.mxu1 }
 0x1cf   :  { %1620 = vmatmul.f32.gmra.mxu1 %v914_v12  ;;  %1326 = vmatmul.f32.gmra.mxu2 %v1031_v28  ;;  %v1392_v60 = vpop.f32.mrf.mxu3 }
 0x1d0   :  { %v758_v20 = vpop.permute.xlu2 %757 }
 0x1d1   :  { %842 = vst.msk [vmem:[#allocation2 + $0x358] sm:$0xff] %vm414_vm1, %v758_v20  ;;  %v1279_v45 = vpop.f32.mrf.mxu2 }
 0x1d2   :  { %v652_v59 = vpop.permute.xlu1 %651  ;;  %v612_v50 = vpop.permute.xlu0 %611  ;;  %v1280_v29 = vadd.f32 %v1279_v45, %v334_v18  ;;  %1510 = vmatmul.f32.gmra.mxu0 %v921_v35  ;;  %v1186_v41 = vld [vmem:[#allocation2 + $0x218] sm:$0xff]  ;;  %v1056_v18 = vld [vmem:[#allocation4 + $0x608] sm:$0xff] }
 0x1d3   :  { %725 = vst.msk [vmem:[#allocation2 + $0x2b0] sm:$0xff] %vm414_vm1, %v652_v59  ;;  %1711 = vmatpush.msra.mxu2 %v1186_v41  ;;  %v1207_v23 = vld [vmem:[#allocation2 + $0x2c0] sm:$0xff]  ;;  %v938_v45 = vld [vmem:[#allocation4 + $0x258] sm:$0xff]  ;;  %v343_v41 = vadd.f32 %v7551_v63, %v7519_v32 }
 0x1d4   :  { %705 = vst.msk [vmem:[#allocation2 + $0x210] sm:$0xff] %vm414_vm1, %v612_v50  ;;  %1819 = vmatpush.msra.mxu3 %v1207_v23  ;;  %v7595_v11 = vadd.f32 %v1392_v60, %v1280_v29  ;;  %v1055_v59 = vld [vmem:[#allocation4 + $0x600] sm:$0xff]  ;;  %v945_v50 = vld [vmem:[#allocation4 + $0x290] sm:$0xff] }
 0x1d5   :  { %1442 = vmatmul.f32.gmra.mxu3 %v1040_v44 }
 0x1d6   :  { %1820 = vmatpush.msra.mxu3 %v1206_v52 }
 0x1d7   :  { %1623 = vmatmul.f32.gmra.mxu1 %v922_v17  ;;  %1329 = vmatmul.f32.gmra.mxu2 %v1039_v13  ;;  %v1395_v25 = vpop.f32.mrf.mxu3  ;;  %v7618_v17 = vpop.f32.mrf.mxu1 }
 0x1d8   :  { %v790_v57 = vpop.permute.xlu2 %789 }
 0x1d9   :  { %858 = vst.msk [vmem:[#allocation2 + $0x3d8] sm:$0xff] %vm414_vm1, %v790_v57  ;;  %v1282_v42 = vpop.f32.mrf.mxu2 }
 0x1da   :  { %v650_v54 = vpop.permute.xlu0 %649  ;;  %v608_v39 = vpop.permute.xlu1 %607  ;;  %v1283_v9 = vadd.f32 %v1282_v42, %v337_v19  ;;  %1513 = vmatmul.f32.gmra.mxu0 %v929_v55  ;;  %v1205_v56 = vld [vmem:[#allocation2 + $0x2b0] sm:$0xff]  ;;  %v1064_v19 = vld [vmem:[#allocation4 + $0x648] sm:$0xff]  ;;  %v946_v42 = vld [vmem:[#allocation4 + $0x298] sm:$0xff] }
 0x1db   :  { %724 = vst.msk [vmem:[#allocation2 + $0x2a8] sm:$0xff] %vm414_vm1, %v650_v54  ;;  %v1185_v27 = vld [vmem:[#allocation2 + $0x210] sm:$0xff]  ;;  %1821 = vmatpush.msra.mxu3 %v1205_v56  ;;  %v1063_v54 = vld [vmem:[#allocation4 + $0x640] sm:$0xff] }
 0x1dc   :  { %703 = vst.msk [vmem:[#allocation2 + $0x200] sm:$0xff] %vm414_vm1, %v608_v39  ;;  %1712 = vmatpush.msra.mxu2 %v1185_v27  ;;  %v7604_v40 = vadd.f32 %v1395_v25, %v1283_v9  ;;  %v1200_v39 = vld [vmem:[#allocation2 + $0x288] sm:$0xff]  ;;  %v953_v9 = vld [vmem:[#allocation4 + $0x2d0] sm:$0xff] }
 0x1dd   :  { %1445 = vmatmul.f32.gmra.mxu3 %v1048_v3  ;;  %v346_v3 = vadd.f32 %v7571_v24, %v7519_v32 }
 0x1de   :  { %1713 = vmatpush.msra.mxu2 %v1184_v6 }
 0x1df   :  { %1626 = vmatmul.f32.gmra.mxu1 %v930_v47  ;;  %1332 = vmatmul.f32.gmra.mxu2 %v1047_v5  ;;  %v1398_v8 = vpop.f32.mrf.mxu3 }
 0x1e0   :  { %v752_v15 = vpop.permute.xlu2 %751 }
 0x1e1   :  { %839 = vst.msk [vmem:[#allocation2 + $0x340] sm:$0xff] %vm414_vm1, %v752_v15  ;;  %v1285_v14 = vpop.f32.mrf.mxu2  ;;  %v7628_v15 = vpop.f32.mrf.mxu1 }
 0x1e2   :  { %v646_v12 = vpop.permute.xlu0 %645  ;;  %v644_v28 = vpop.permute.xlu1 %643  ;;  %v1286_v1 = vadd.f32 %v1285_v14, %v340_v37  ;;  %1516 = vmatmul.f32.gmra.mxu0 %v937_v38  ;;  %v1204_v35 = vld [vmem:[#allocation2 + $0x2a8] sm:$0xff]  ;;  %v954_v14 = vld [vmem:[#allocation4 + $0x2d8] sm:$0xff] }
 0x1e3   :  { %722 = vst.msk [vmem:[#allocation2 + $0x298] sm:$0xff] %vm414_vm1, %v646_v12  ;;  %v1183_v60 = vld [vmem:[#allocation2 + $0x200] sm:$0xff]  ;;  %1822 = vmatpush.msra.mxu3 %v1204_v35  ;;  %v961_v35 = vld [vmem:[#allocation4 + $0x310] sm:$0xff] }
 0x1e4   :  { %721 = vst.msk [vmem:[#allocation2 + $0x290] sm:$0xff] %vm414_vm1, %v644_v28  ;;  %1714 = vmatpush.msra.mxu2 %v1183_v60  ;;  %v7613_v20 = vadd.f32 %v1398_v8, %v1286_v1  ;;  %v1071_v12 = vld [vmem:[#allocation4 + $0x680] sm:$0xff]  ;;  %v1229_v28 = vld [vmem:[#allocation2 + $0x370] sm:$0xff]  ;;  %v1072_v1 = vld [vmem:[#allocation4 + $0x688] sm:$0xff] }
 0x1e5   :  { %1823 = vmatpush.msra.mxu3 %v1203_v7 }
 0x1e6   :  { %1448 = vmatmul.f32.gmra.mxu3 %v1056_v18  ;;  %v349_v18 = vadd.f32 %v7585_v30, %v7519_v32  ;;  %v1245_v30 = vld [vmem:[#allocation2 + $0x3f0] sm:$0xff] }
 0x1e7   :  { %1629 = vmatmul.f32.gmra.mxu1 %v938_v45  ;;  %1335 = vmatmul.f32.gmra.mxu2 %v1055_v59  ;;  %v1401_v29 = vpop.f32.mrf.mxu3 }
 0x1e8   :  { %v784_v44 = vpop.permute.xlu2 %783 }
 0x1e9   :  { %855 = vst.msk [vmem:[#allocation2 + $0x3c0] sm:$0xff] %vm414_vm1, %v784_v44  ;;  %v1288_v23 = vpop.f32.mrf.mxu2 }
 0x1ea   :  { %v640_v13 = vpop.permute.xlu0 %639  ;;  %v766_v52 = vpop.permute.xlu1 %765  ;;  %v1289_v55 = vadd.f32 %v1288_v23, %v343_v41  ;;  %1519 = vmatmul.f32.gmra.mxu0 %v945_v50  ;;  %v1202_v25 = vld [vmem:[#allocation2 + $0x298] sm:$0xff] }
 0x1eb   :  { %719 = vst.msk [vmem:[#allocation2 + $0x280] sm:$0xff] %vm414_vm1, %v640_v13  ;;  %1824 = vmatpush.msra.mxu3 %v1202_v25  ;;  %v1201_v63 = vld [vmem:[#allocation2 + $0x290] sm:$0xff]  ;;  %v962_v13 = vld [vmem:[#allocation4 + $0x318] sm:$0xff]  ;;  %v7640_v25 = vpop.f32.mrf.mxu1 }
 0x1ec   :  { %846 = vst.msk [vmem:[#allocation2 + $0x378] sm:$0xff] %vm414_vm1, %v766_v52  ;;  %v7622_v57 = vadd.f32 %v1401_v29, %v1289_v55  ;;  %v1079_v52 = vld [vmem:[#allocation4 + $0x6c0] sm:$0xff]  ;;  %v1080_v55 = vld [vmem:[#allocation4 + $0x6c8] sm:$0xff] }
 0x1ed   :  { %1825 = vmatpush.msra.mxu3 %v1201_v63 }
 0x1ee   :  { %1451 = vmatmul.f32.gmra.mxu3 %v1064_v19  ;;  %v969_v19 = vld [vmem:[#allocation4 + $0x350] sm:$0xff] }
 0x1ef   :  { %1632 = vmatmul.f32.gmra.mxu1 %v946_v42  ;;  %1338 = vmatmul.f32.gmra.mxu2 %v1063_v54  ;;  %v1404_v56 = vpop.f32.mrf.mxu3  ;;  %v352_v42 = vadd.f32 %v7597_v22, %v7519_v32  ;;  %v1226_v22 = vld [vmem:[#allocation2 + $0x358] sm:$0xff] }
 0x1f0   :  { %1826 = vmatpush.msra.mxu3 %v1200_v39  ;;  %v746_v27 = vpop.permute.xlu2 %745 }
 0x1f1   :  { %836 = vst.msk [vmem:[#allocation2 + $0x328] sm:$0xff] %vm414_vm1, %v746_v27  ;;  %v1291_v47 = vpop.f32.mrf.mxu2 }
 0x1f2   :  { %v798_v5 = vpop.permute.xlu0 %797  ;;  %v762_v6 = vpop.permute.xlu1 %761  ;;  %v1292_v38 = vadd.f32 %v1291_v47, %v346_v3  ;;  %1522 = vmatmul.f32.gmra.mxu0 %v953_v9  ;;  %v1199_v8 = vld [vmem:[#allocation2 + $0x280] sm:$0xff] }
 0x1f3   :  { %862 = vst.msk [vmem:[#allocation2 + $0x3f8] sm:$0xff] %vm414_vm1, %v798_v5  ;;  %1827 = vmatpush.msra.mxu3 %v1199_v8  ;;  %v1230_v37 = vld [vmem:[#allocation2 + $0x378] sm:$0xff]  ;;  %v1088_v8 = vld [vmem:[#allocation4 + $0x708] sm:$0xff] }
 0x1f4   :  { %844 = vst.msk [vmem:[#allocation2 + $0x368] sm:$0xff] %vm414_vm1, %v762_v6  ;;  %1925 = vmatpush.msra.mxu0 %v1230_v37  ;;  %6228 = vmatpush.msrb.mxu2 %v1230_v37  ;;  %v7631_v24 = vadd.f32 %v1404_v56, %v1292_v38  ;;  %v970_v6 = vld [vmem:[#allocation4 + $0x358] sm:$0xff]  ;;  %v1087_v38 = vld [vmem:[#allocation4 + $0x700] sm:$0xff]  ;;  %v977_v37 = vld [vmem:[#allocation4 + $0x390] sm:$0xff] }
 0x1f6   :  { %1926 = vmatpush.msra.mxu0 %v1229_v28  ;;  %6229 = vmatpush.msrb.mxu2 %v1229_v28  ;;  %v355_v28 = vadd.f32 %v7606_v53, %v7519_v32  ;;  %v1242_v53 = vld [vmem:[#allocation2 + $0x3d8] sm:$0xff] }
 0x1f7   :  { %1635 = vmatmul.f32.gmra.mxu1 %v954_v14  ;;  %1341 = vmatmul.f32.gmra.mxu2 %v1071_v12  ;;  %v1407_v60 = vpop.f32.mrf.mxu3  ;;  %v7649_v14 = vpop.f32.mrf.mxu1 }
 0x1f8   :  { %v778_v7 = vpop.permute.xlu2 %777  ;;  %1454 = vmatmul.f32.gmra.mxu3 %v1072_v1 }
 0x1f9   :  { %852 = vst.msk [vmem:[#allocation2 + $0x3a8] sm:$0xff] %vm414_vm1, %v778_v7  ;;  %v1294_v45 = vpop.f32.mrf.mxu2 }
 0x1fa   :  { %v760_v59 = vpop.permute.xlu0 %759  ;;  %v794_v50 = vpop.permute.xlu1 %793  ;;  %v1295_v29 = vadd.f32 %v1294_v45, %v349_v18  ;;  %1525 = vmatmul.f32.gmra.mxu0 %v961_v35  ;;  %v1246_v41 = vld [vmem:[#allocation2 + $0x3f8] sm:$0xff] }
 0x1fb   :  { %843 = vst.msk [vmem:[#allocation2 + $0x360] sm:$0xff] %vm414_vm1, %v760_v59  ;;  %v1228_v44 = vld [vmem:[#allocation2 + $0x368] sm:$0xff]  ;;  %2038 = vmatpush.msra.mxu1 %v1246_v41  ;;  %v1095_v41 = vld [vmem:[#allocation4 + $0x740] sm:$0xff] }
 0x1fc   :  { %860 = vst.msk [vmem:[#allocation2 + $0x3e8] sm:$0xff] %vm414_vm1, %v794_v50  ;;  %1927 = vmatpush.msra.mxu0 %v1228_v44  ;;  %6230 = vmatpush.msrb.mxu2 %v1228_v44  ;;  %v7638_v23 = vadd.f32 %v1407_v60, %v1295_v29  ;;  %v978_v29 = vld [vmem:[#allocation4 + $0x398] sm:$0xff]  ;;  %v1096_v44 = vld [vmem:[#allocation4 + $0x748] sm:$0xff] }
 0x1fd   :  { %2039 = vmatpush.msra.mxu1 %v1245_v30  ;;  %v985_v30 = vld [vmem:[#allocation4 + $0x3d0] sm:$0xff] }
 0x1ff   :  { %1638 = vmatmul.f32.gmra.mxu1 %v962_v13  ;;  %1344 = vmatmul.f32.gmra.mxu2 %v1079_v52  ;;  %v1410_v63 = vpop.f32.mrf.mxu3  ;;  %v358_v52 = vadd.f32 %v7618_v17, %v7519_v32 }
 0x200   :  { %v740_v54 = vpop.permute.xlu2 %739  ;;  %1457 = vmatmul.f32.gmra.mxu3 %v1080_v55 }
 0x201   :  { %833 = vst.msk [vmem:[#allocation2 + $0x310] sm:$0xff] %vm414_vm1, %v740_v54  ;;  %v1297_v39 = vpop.f32.mrf.mxu2 }
 0x202   :  { %v792_v9 = vpop.permute.xlu0 %791  ;;  %v756_v56 = vpop.permute.xlu1 %755  ;;  %v1298_v3 = vadd.f32 %v1297_v39, %v352_v42  ;;  %1528 = vmatmul.f32.gmra.mxu0 %v969_v19  ;;  %v1227_v27 = vld [vmem:[#allocation2 + $0x360] sm:$0xff] }
 0x203   :  { %859 = vst.msk [vmem:[#allocation2 + $0x3e0] sm:$0xff] %vm414_vm1, %v792_v9  ;;  %1928 = vmatpush.msra.mxu0 %v1227_v27  ;;  %6231 = vmatpush.msrb.mxu2 %v1227_v27  ;;  %v1244_v47 = vld [vmem:[#allocation2 + $0x3e8] sm:$0xff]  ;;  %v986_v27 = vld [vmem:[#allocation4 + $0x3d8] sm:$0xff] }
 0x204   :  { %841 = vst.msk [vmem:[#allocation2 + $0x350] sm:$0xff] %vm414_vm1, %v756_v56  ;;  %2040 = vmatpush.msra.mxu1 %v1244_v47  ;;  %v7647_v5 = vadd.f32 %v1410_v63, %v1298_v3  ;;  %v7661_v63 = vpop.f32.mrf.mxu1  ;;  %v1223_v3 = vld [vmem:[#allocation2 + $0x340] sm:$0xff] }
 0x205   :  { %1929 = vmatpush.msra.mxu0 %v1226_v22  ;;  %6232 = vmatpush.msrb.mxu2 %v1226_v22  ;;  %v1103_v47 = vld [vmem:[#allocation4 + $0x780] sm:$0xff]  ;;  %v1104_v22 = vld [vmem:[#allocation4 + $0x788] sm:$0xff] }
 0x207   :  { %1641 = vmatmul.f32.gmra.mxu1 %v970_v6  ;;  %1347 = vmatmul.f32.gmra.mxu2 %v1087_v38  ;;  %v1413_v12 = vpop.f32.mrf.mxu3  ;;  %v993_v38 = vld [vmem:[#allocation4 + $0x410] sm:$0xff] }
 0x208   :  { %v772_v1 = vpop.permute.xlu2 %771  ;;  %1460 = vmatmul.f32.gmra.mxu3 %v1088_v8 }
 0x209   :  { %849 = vst.msk [vmem:[#allocation2 + $0x390] sm:$0xff] %vm414_vm1, %v772_v1  ;;  %v1300_v35 = vpop.f32.mrf.mxu2 }
 0x20a   :  { %v754_v60 = vpop.permute.xlu0 %753  ;;  %v788_v18 = vpop.permute.xlu1 %787  ;;  %v1301_v7 = vadd.f32 %v1300_v35, %v355_v28  ;;  %1531 = vmatmul.f32.gmra.mxu0 %v977_v37  ;;  %v1243_v45 = vld [vmem:[#allocation2 + $0x3e0] sm:$0xff]  ;;  %v361_v37 = vadd.f32 %v7628_v15, %v7519_v32 }
 0x20b   :  { %840 = vst.msk [vmem:[#allocation2 + $0x348] sm:$0xff] %vm414_vm1, %v754_v60  ;;  %v1225_v59 = vld [vmem:[#allocation2 + $0x350] sm:$0xff]  ;;  %2041 = vmatpush.msra.mxu1 %v1243_v45  ;;  %v1239_v15 = vld [vmem:[#allocation2 + $0x3c0] sm:$0xff] }
 0x20c   :  { %857 = vst.msk [vmem:[#allocation2 + $0x3d0] sm:$0xff] %vm414_vm1, %v788_v18  ;;  %1930 = vmatpush.msra.mxu0 %v1225_v59  ;;  %6233 = vmatpush.msrb.mxu2 %v1225_v59  ;;  %v7656_v50 = vadd.f32 %v1413_v12, %v1301_v7  ;;  %v994_v59 = vld [vmem:[#allocation4 + $0x418] sm:$0xff] }
 0x20d   :  { %2042 = vmatpush.msra.mxu1 %v1242_v53  ;;  %v1111_v53 = vld [vmem:[#allocation4 + $0x7c0] sm:$0xff] }
 0x20f   :  { %1644 = vmatmul.f32.gmra.mxu1 %v978_v29  ;;  %1350 = vmatmul.f32.gmra.mxu2 %v1095_v41  ;;  %v1416_v13 = vpop.f32.mrf.mxu3  ;;  %v1112_v29 = vld [vmem:[#allocation4 + $0x7c8] sm:$0xff] }
 0x210   :  { %v768_v55 = vpop.permute.xlu2 %767  ;;  %1463 = vmatmul.f32.gmra.mxu3 %v1096_v44  ;;  %v1001_v44 = vld [vmem:[#allocation4 + $0x450] sm:$0xff] }
 0x211   :  { %847 = vst.msk [vmem:[#allocation2 + $0x380] sm:$0xff] %vm414_vm1, %v768_v55  ;;  %v1303_v19 = vpop.f32.mrf.mxu2 }
 0x212   :  { %v786_v42 = vpop.permute.xlu0 %785  ;;  %v750_v54 = vpop.permute.xlu1 %749  ;;  %v1304_v39 = vadd.f32 %v1303_v19, %v358_v52  ;;  %1534 = vmatmul.f32.gmra.mxu0 %v985_v30  ;;  %v1224_v9 = vld [vmem:[#allocation2 + $0x348] sm:$0xff] }
 0x213   :  { %856 = vst.msk [vmem:[#allocation2 + $0x3c8] sm:$0xff] %vm414_vm1, %v786_v42  ;;  %1931 = vmatpush.msra.mxu0 %v1224_v9  ;;  %6234 = vmatpush.msrb.mxu2 %v1224_v9  ;;  %v1241_v56 = vld [vmem:[#allocation2 + $0x3d0] sm:$0xff] }
 0x214   :  { %838 = vst.msk [vmem:[#allocation2 + $0x338] sm:$0xff] %vm414_vm1, %v750_v54  ;;  %2043 = vmatpush.msra.mxu1 %v1241_v56  ;;  %v7665_v17 = vadd.f32 %v1416_v13, %v1304_v39  ;;  %v364_v13 = vadd.f32 %v7640_v25, %v7519_v32  ;;  %v1220_v56 = vld [vmem:[#allocation2 + $0x328] sm:$0xff] }
 0x215   :  { %1932 = vmatpush.msra.mxu0 %v1223_v3  ;;  %6235 = vmatpush.msrb.mxu2 %v1223_v3  ;;  %v1002_v3 = vld [vmem:[#allocation4 + $0x458] sm:$0xff] }
 0x217   :  { %1647 = vmatmul.f32.gmra.mxu1 %v986_v27  ;;  %1353 = vmatmul.f32.gmra.mxu2 %v1103_v47  ;;  %v7667_v6 = vpop.f32.mrf.mxu0  ;;  %v1419_v8 = vpop.f32.mrf.mxu3  ;;  %v867_v27 = vld [vmem:[#allocation4 + $0x20] sm:$0xff]  ;;  %v868_v47 = vld [vmem:[#allocation4 + $0x28] sm:$0xff] }
 0x218   :  { %1466 = vmatmul.f32.gmra.mxu3 %v1104_v22 }
 0x219   :  { %v1306_v12 = vpop.f32.mrf.mxu2 }
 0x21a   :  { %v748_v28 = vpop.permute.xlu0 %747  ;;  %v1307_v1 = vadd.f32 %v1306_v12, %v361_v37  ;;  %1537 = vmatmul.f32.gmra.mxu0 %v993_v38  ;;  %v1240_v35 = vld [vmem:[#allocation2 + $0x3c8] sm:$0xff]  ;;  %v1009_v38 = vld [vmem:[#allocation4 + $0x490] sm:$0xff]  ;;  %v367_v37 = vadd.f32 %v7649_v14, %v7519_v32 }
 0x21b   :  { %837 = vst.msk [vmem:[#allocation2 + $0x330] sm:$0xff] %vm414_vm1, %v748_v28  ;;  %v782_v60 = vpop.permute.xlu1 %781  ;;  %v1222_v18 = vld [vmem:[#allocation2 + $0x338] sm:$0xff]  ;;  %2044 = vmatpush.msra.mxu1 %v1240_v35 }
 0x21c   :  { %854 = vst.msk [vmem:[#allocation2 + $0x3b8] sm:$0xff] %vm414_vm1, %v782_v60  ;;  %v7673_v7 = vpop.f32.mrf.mxu1  ;;  %1933 = vmatpush.msra.mxu0 %v1222_v18  ;;  %6236 = vmatpush.msrb.mxu2 %v1222_v18  ;;  %v7675_v45 = vadd.f32 %v1419_v8, %v1307_v1 }
 0x21d   :  { %2045 = vmatpush.msra.mxu1 %v1239_v15 }
 0x21f   :  { %1650 = vmatmul.f32.gmra.mxu1 %v994_v59  ;;  %1356 = vmatmul.f32.gmra.mxu2 %v1111_v53  ;;  %v7677_v41 = vpop.f32.mrf.mxu0  ;;  %v1422_v30 = vpop.f32.mrf.mxu3  ;;  %v1236_v59 = vld [vmem:[#allocation2 + $0x3a8] sm:$0xff]  ;;  %v1010_v53 = vld [vmem:[#allocation4 + $0x498] sm:$0xff] }
 0x220   :  { %1469 = vmatmul.f32.gmra.mxu3 %v1112_v29  ;;  %v875_v29 = vld [vmem:[#allocation4 + $0x60] sm:$0xff] }
 0x222   :  { %v780_v52 = vpop.permute.xlu0 %779  ;;  %v1309_v55 = vpop.f32.mrf.mxu2  ;;  %1540 = vmatmul.f32.gmra.mxu0 %v1001_v44  ;;  %v1221_v19 = vld [vmem:[#allocation2 + $0x330] sm:$0xff]  ;;  %v876_v44 = vld [vmem:[#allocation4 + $0x68] sm:$0xff] }
 0x223   :  { %853 = vst.msk [vmem:[#allocation2 + $0x3b0] sm:$0xff] %vm414_vm1, %v780_v52  ;;  %v744_v42 = vpop.permute.xlu1 %743  ;;  %v1310_v54 = vadd.f32 %v1309_v55, %v364_v13  ;;  %1934 = vmatpush.msra.mxu0 %v1221_v19  ;;  %6237 = vmatpush.msrb.mxu2 %v1221_v19  ;;  %v1238_v39 = vld [vmem:[#allocation2 + $0x3b8] sm:$0xff]  ;;  %v1017_v13 = vld [vmem:[#allocation4 + $0x4d0] sm:$0xff]  ;;  %v370_v55 = vadd.f32 %v7661_v63, %v7519_v32 }
 0x224   :  { %835 = vst.msk [vmem:[#allocation2 + $0x320] sm:$0xff] %vm414_vm1, %v744_v42  ;;  %v7683_v9 = vpop.f32.mrf.mxu1  ;;  %2046 = vmatpush.msra.mxu1 %v1238_v39 }
 0x225   :  { %v7685_v25 = vadd.f32 %v1422_v30, %v1310_v54  ;;  %1935 = vmatpush.msra.mxu0 %v1220_v56  ;;  %6238 = vmatpush.msrb.mxu2 %v1220_v56 }
 0x227   :  { %10477 = vst [vmem:[#allocation7_spill] sm:$0xff] %v7685_v25  ;;  %1653 = vmatmul.f32.gmra.mxu1 %v1002_v3  ;;  %v7687_v22 = vpop.f32.mrf.mxu0  ;;  %1715 = vmatmul.f32.vlgmr.msra.gmra.mxu2 %v867_v27  ;;  %v1425_v8 = vpop.f32.mrf.mxu3  ;;  %v979_v25 = vld [vmem:[#allocation4 + $0x3a0] sm:$0xff] }
 0x228   :  { %1828 = vmatmul.f32.vlgmr.msra.gmra.mxu3 %v868_v47  ;;  %v1217_v47 = vld [vmem:[#allocation2 + $0x310] sm:$0xff] }
 0x22a   :  { %v742_v12 = vpop.permute.xlu0 %741  ;;  %v1312_v28 = vpop.f32.mrf.mxu2  ;;  %1543 = vmatmul.f32.gmra.mxu0 %v1009_v38  ;;  %v1237_v1 = vld [vmem:[#allocation2 + $0x3b0] sm:$0xff]  ;;  %v1018_v38 = vld [vmem:[#allocation4 + $0x4d8] sm:$0xff] }
 0x22b   :  { %834 = vst.msk [vmem:[#allocation2 + $0x318] sm:$0xff] %vm414_vm1, %v742_v12  ;;  %v776_v35 = vpop.permute.xlu1 %775  ;;  %v1313_v60 = vadd.f32 %v1312_v28, %v367_v37  ;;  %v1219_v18 = vld [vmem:[#allocation2 + $0x320] sm:$0xff]  ;;  %2047 = vmatpush.msra.mxu1 %v1237_v1  ;;  %v884_v37 = vld [vmem:[#allocation4 + $0xa8] sm:$0xff]  ;;  %v1025_v28 = vld [vmem:[#allocation4 + $0x510] sm:$0xff] }
 0x22c   :  { %851 = vst.msk [vmem:[#allocation2 + $0x3a0] sm:$0xff] %vm414_vm1, %v776_v35  ;;  %v7693_v15 = vpop.f32.mrf.mxu1  ;;  %1936 = vmatpush.msra.mxu0 %v1219_v18  ;;  %6239 = vmatpush.msrb.mxu2 %v1219_v18  ;;  %v373_v35 = vadd.f32 %v7329_v43, %v7519_v32 }
 0x22d   :  { %v7695_v14 = vadd.f32 %v1425_v8, %v1313_v60  ;;  %2048 = vmatpush.msra.mxu1 %v1236_v59  ;;  %v883_v8 = vld [vmem:[#allocation4 + $0xa0] sm:$0xff] }
 0x22f   :  { %10478 = vst [vmem:[#allocation8_spill] sm:$0xff] %v7695_v14  ;;  %1656 = vmatmul.f32.gmra.mxu1 %v1010_v53  ;;  %v7697_v30 = vpop.f32.mrf.mxu0  ;;  %1718 = vmatmul.f32.gmra.mxu2 %v875_v29  ;;  %v1428_v52 = vpop.f32.mrf.mxu3  ;;  %v971_v14 = vld [vmem:[#allocation4 + $0x360] sm:$0xff] }
 0x230   :  { %1831 = vmatmul.f32.gmra.mxu3 %v876_v44 }
 0x232   :  { %v774_v19 = vpop.permute.xlu0 %773  ;;  %v1315_v42 = vpop.f32.mrf.mxu2  ;;  %1546 = vmatmul.f32.gmra.mxu0 %v1017_v13  ;;  %v1218_v54 = vld [vmem:[#allocation2 + $0x318] sm:$0xff] }
 0x233   :  { %850 = vst.msk [vmem:[#allocation2 + $0x398] sm:$0xff] %vm414_vm1, %v774_v19  ;;  %v738_v39 = vpop.permute.xlu1 %737  ;;  %v1316_v56 = vadd.f32 %v1315_v42, %v370_v55  ;;  %1937 = vmatpush.msra.mxu0 %v1218_v54  ;;  %6240 = vmatpush.msrb.mxu2 %v1218_v54  ;;  %v1235_v3 = vld [vmem:[#allocation2 + $0x3a0] sm:$0xff]  ;;  %v1026_v55 = vld [vmem:[#allocation4 + $0x518] sm:$0xff]  ;;  %v892_v42 = vld [vmem:[#allocation4 + $0xe8] sm:$0xff] }
 0x234   :  { %832 = vst.msk [vmem:[#allocation2 + $0x308] sm:$0xff] %vm414_vm1, %v738_v39  ;;  %v7703_v27 = vpop.f32.mrf.mxu1  ;;  %2049 = vmatpush.msra.mxu1 %v1235_v3  ;;  %v891_v19 = vld [vmem:[#allocation4 + $0xe0] sm:$0xff]  ;;  %v1033_v39 = vld [vmem:[#allocation4 + $0x550] sm:$0xff]  ;;  %v376_v3 = vadd.f32 %v7341_v26, %v7519_v32 }
 0x235   :  { %v7705_v63 = vadd.f32 %v1428_v52, %v1316_v56  ;;  %1938 = vmatpush.msra.mxu0 %v1217_v47  ;;  %6241 = vmatpush.msrb.mxu2 %v1217_v47  ;;  %v1233_v52 = vld [vmem:[#allocation2 + $0x390] sm:$0xff] }
 0x236   :  { %v1041_v26 = vld [vmem:[#allocation4 + $0x590] sm:$0xff] }
 0x237   :  { %10479 = vst [vmem:[#allocation9_spill] sm:$0xff] %v7705_v63  ;;  %1659 = vmatmul.f32.gmra.mxu1 %v1018_v38  ;;  %v7707_v12 = vpop.f32.mrf.mxu0  ;;  %1721 = vmatmul.f32.gmra.mxu2 %v883_v8  ;;  %v963_v63 = vld [vmem:[#allocation4 + $0x320] sm:$0xff] }
 0x238   :  { %1834 = vmatmul.f32.gmra.mxu3 %v884_v37  ;;  %v1431_v1 = vpop.f32.mrf.mxu3 }
 0x23a   :  { %v736_v60 = vpop.permute.xlu0 %735  ;;  %v1318_v18 = vpop.f32.mrf.mxu2  ;;  %1549 = vmatmul.f32.gmra.mxu0 %v1025_v28  ;;  %v1234_v59 = vld [vmem:[#allocation2 + $0x398] sm:$0xff] }
 0x23b   :  { %831 = vst.msk [vmem:[#allocation2 + $0x300] sm:$0xff] %vm414_vm1, %v736_v60  ;;  %v770_v53 = vpop.permute.xlu1 %769  ;;  %v1319_v29 = vadd.f32 %v1318_v18, %v373_v35  ;;  %v1216_v44 = vld [vmem:[#allocation2 + $0x308] sm:$0xff]  ;;  %2050 = vmatpush.msra.mxu1 %v1234_v59  ;;  %v899_v35 = vld [vmem:[#allocation4 + $0x120] sm:$0xff] }
 0x23c   :  { %848 = vst.msk [vmem:[#allocation2 + $0x388] sm:$0xff] %vm414_vm1, %v770_v53  ;;  %v7713_v13 = vpop.f32.mrf.mxu1  ;;  %1939 = vmatpush.msra.mxu0 %v1216_v44  ;;  %6242 = vmatpush.msrb.mxu2 %v1216_v44  ;;  %v1231_v18 = vld [vmem:[#allocation2 + $0x380] sm:$0xff]  ;;  %v900_v59 = vld [vmem:[#allocation4 + $0x128] sm:$0xff]  ;;  %v379_v44 = vadd.f32 %v7353_v4, %v7519_v32  ;;  %v382_v4 = vadd.f32 %v7367_v16, %v7519_v32 }
 0x23d   :  { %v7715_v43 = vadd.f32 %v1431_v1, %v1319_v29  ;;  %2051 = vmatpush.msra.mxu1 %v1233_v52  ;;  %v1034_v1 = vld [vmem:[#allocation4 + $0x558] sm:$0xff]  ;;  %v385_v16 = vadd.f32 %v7379_v46, %v7519_v32  ;;  %v388_v46 = vadd.f32 %v7389_v33, %v7519_v32 }
 0x23f   :  { %10480 = vst [vmem:[#allocation10_spill] sm:$0xff] %v7715_v43  ;;  %1662 = vmatmul.f32.gmra.mxu1 %v1026_v55  ;;  %v7717_v54 = vpop.f32.mrf.mxu0  ;;  %1724 = vmatmul.f32.gmra.mxu2 %v891_v19  ;;  %v955_v43 = vld [vmem:[#allocation4 + $0x2e0] sm:$0xff] }
 0x240   :  { %1837 = vmatmul.f32.gmra.mxu3 %v892_v42  ;;  %v1434_v56 = vpop.f32.mrf.mxu3  ;;  %v1042_v42 = vld [vmem:[#allocation4 + $0x598] sm:$0xff] }
 0x242   :  { %v1321_v47 = vpop.f32.mrf.mxu2  ;;  %1552 = vmatmul.f32.gmra.mxu0 %v1033_v39  ;;  %v1215_v38 = vld [vmem:[#allocation2 + $0x300] sm:$0xff] }
 0x243   :  { %v1322_v8 = vadd.f32 %v1321_v47, %v376_v3  ;;  %1940 = vmatpush.msra.mxu0 %v1215_v38  ;;  %6243 = vmatpush.msrb.mxu2 %v1215_v38  ;;  %v1232_v37 = vld [vmem:[#allocation2 + $0x388] sm:$0xff]  ;;  %v907_v39 = vld [vmem:[#allocation4 + $0x160] sm:$0xff]  ;;  %v1049_v38 = vld [vmem:[#allocation4 + $0x5d0] sm:$0xff] }
 0x244   :  { %v7721_v28 = vpop.f32.mrf.mxu1  ;;  %2052 = vmatpush.msra.mxu1 %v1232_v37  ;;  %v908_v3 = vld [vmem:[#allocation4 + $0x168] sm:$0xff] }
 0x245   :  { %v7723_v60 = vadd.f32 %v1434_v56, %v1322_v8 }
 0x246   :  { %2053 = vmatpush.msra.mxu1 %v1231_v18  ;;  %v1050_v18 = vld [vmem:[#allocation4 + $0x5d8] sm:$0xff] }
 0x247   :  { %10481 = vst [vmem:[#allocation11_spill] sm:$0xff] %v7723_v60  ;;  %1665 = vmatmul.f32.gmra.mxu1 %v1034_v1  ;;  %v7725_v53 = vpop.f32.mrf.mxu0  ;;  %1727 = vmatmul.f32.gmra.mxu2 %v899_v35  ;;  %v947_v60 = vld [vmem:[#allocation4 + $0x2a0] sm:$0xff] }
 0x248   :  { %1840 = vmatmul.f32.gmra.mxu3 %v900_v59  ;;  %v1437_v29 = vpop.f32.mrf.mxu3  ;;  %v915_v59 = vld [vmem:[#allocation4 + $0x1a0] sm:$0xff] }
 0x24a   :  { %v1324_v52 = vpop.f32.mrf.mxu2  ;;  %1555 = vmatmul.f32.gmra.mxu0 %v1041_v26 }
 0x24b   :  { %v1325_v55 = vadd.f32 %v1324_v52, %v379_v44  ;;  %v1057_v52 = vld [vmem:[#allocation4 + $0x610] sm:$0xff] }
 0x24c   :  { %v7729_v19 = vpop.f32.mrf.mxu1 }
 0x24d   :  { %v7731_v56 = vadd.f32 %v1437_v29, %v1325_v55  ;;  %v916_v29 = vld [vmem:[#allocation4 + $0x1a8] sm:$0xff] }
 0x24f   :  { %10482 = vst [vmem:[#allocation12_spill] sm:$0xff] %v7731_v56  ;;  %1668 = vmatmul.f32.gmra.mxu1 %v1042_v42  ;;  %v7733_v47 = vpop.f32.mrf.mxu0  ;;  %1730 = vmatmul.f32.gmra.mxu2 %v907_v39  ;;  %v939_v56 = vld [vmem:[#allocation4 + $0x260] sm:$0xff] }
 0x250   :  { %1843 = vmatmul.f32.gmra.mxu3 %v908_v3  ;;  %v1440_v8 = vpop.f32.mrf.mxu3 }
 0x252   :  { %v1327_v37 = vpop.f32.mrf.mxu2  ;;  %1558 = vmatmul.f32.gmra.mxu0 %v1049_v38  ;;  %v1058_v38 = vld [vmem:[#allocation4 + $0x618] sm:$0xff] }
 0x253   :  { %v1328_v1 = vadd.f32 %v1327_v37, %v382_v4  ;;  %v923_v4 = vld [vmem:[#allocation4 + $0x1e0] sm:$0xff]  ;;  %v924_v37 = vld [vmem:[#allocation4 + $0x1e8] sm:$0xff] }
 0x254   :  { %v7737_v35 = vpop.f32.mrf.mxu1 }
 0x255   :  { %v7739_v26 = vadd.f32 %v1440_v8, %v1328_v1 }
 0x257   :  { %10483 = vst [vmem:[#allocation13_spill] sm:$0xff] %v7739_v26  ;;  %1671 = vmatmul.f32.gmra.mxu1 %v1050_v18  ;;  %v7741_v44 = vpop.f32.mrf.mxu0  ;;  %1733 = vmatmul.f32.gmra.mxu2 %v915_v59  ;;  %v1065_v18 = vld [vmem:[#allocation4 + $0x650] sm:$0xff]  ;;  %v931_v26 = vld [vmem:[#allocation4 + $0x220] sm:$0xff] }
 0x258   :  { %1846 = vmatmul.f32.gmra.mxu3 %v916_v29  ;;  %v1443_v55 = vpop.f32.mrf.mxu3 }
 0x25a   :  { %v1330_v42 = vpop.f32.mrf.mxu2  ;;  %1561 = vmatmul.f32.gmra.mxu0 %v1057_v52 }
 0x25b   :  { %v1331_v39 = vadd.f32 %v1330_v42, %v385_v16  ;;  %v1066_v42 = vld [vmem:[#allocation4 + $0x658] sm:$0xff] }
 0x25c   :  { %v7745_v3 = vpop.f32.mrf.mxu1 }
 0x25d   :  { %v7747_v8 = vadd.f32 %v1443_v55, %v1331_v39  ;;  %v932_v39 = vld [vmem:[#allocation4 + $0x228] sm:$0xff] }
 0x25f   :  { %10484 = vst [vmem:[#allocation14_spill] sm:$0xff] %v7747_v8  ;;  %1674 = vmatmul.f32.gmra.mxu1 %v1058_v38  ;;  %v7749_v1 = vpop.f32.mrf.mxu0  ;;  %1736 = vmatmul.f32.gmra.mxu2 %v923_v4  ;;  %v1073_v4 = vld [vmem:[#allocation4 + $0x690] sm:$0xff] }
 0x260   :  { %1849 = vmatmul.f32.gmra.mxu3 %v924_v37  ;;  %v1446_v59 = vpop.f32.mrf.mxu3  ;;  %v391_v37 = vadd.f32 %v7402_v62, %v7519_v32  ;;  %v394_v62 = vadd.f32 %v7417_v10, %v7519_v32  ;;  %v397_v10 = vadd.f32 %v7428_v31, %v7519_v32  ;;  %v400_v31 = vadd.f32 %v7443_v0, %v7519_v32 }
 0x261   :  { %v403_v0 = vadd.f32 %v7458_v21, %v7519_v32  ;;  %v406_v21 = vadd.f32 %v7475_v2, %v7519_v32  ;;  %v409_v2 = vadd.f32 %v7489_v48, %v7519_v32  ;;  %v412_v48 = vadd.f32 %v7503_v58, %v7519_v32 }
 0x262   :  { %v1333_v29 = vpop.f32.mrf.mxu2  ;;  %1564 = vmatmul.f32.gmra.mxu0 %v1065_v18 }
 0x263   :  { %v1334_v52 = vadd.f32 %v1333_v29, %v388_v46  ;;  %v1074_v29 = vld [vmem:[#allocation4 + $0x698] sm:$0xff] }
 0x264   :  { %v7753_v16 = vpop.f32.mrf.mxu1 }
 0x265   :  { %v7755_v55 = vadd.f32 %v1446_v59, %v1334_v52  ;;  %v940_v52 = vld [vmem:[#allocation4 + $0x268] sm:$0xff] }
 0x267   :  { %10485 = vst [vmem:[#allocation15_spill] sm:$0xff] %v7755_v55  ;;  %1677 = vmatmul.f32.gmra.mxu1 %v1066_v42  ;;  %v7757_v38 = vpop.f32.mrf.mxu0  ;;  %1739 = vmatmul.f32.gmra.mxu2 %v931_v26  ;;  %v1081_v26 = vld [vmem:[#allocation4 + $0x6d0] sm:$0xff] }
 0x268   :  { %1852 = vmatmul.f32.gmra.mxu3 %v932_v39 }
 0x269   :  { %v1449_v33 = vpop.f32.mrf.mxu3 }
 0x26a   :  { %v1336_v8 = vpop.f32.mrf.mxu2  ;;  %1567 = vmatmul.f32.gmra.mxu0 %v1073_v4 }
 0x26b   :  { %v1337_v18 = vadd.f32 %v1336_v8, %v391_v37  ;;  %v1082_v37 = vld [vmem:[#allocation4 + $0x6d8] sm:$0xff] }
 0x26c   :  { %v7761_v46 = vpop.f32.mrf.mxu1 }
 0x26d   :  { %v7763_v59 = vadd.f32 %v1449_v33, %v1337_v18  ;;  %v948_v18 = vld [vmem:[#allocation4 + $0x2a8] sm:$0xff] }
 0x26f   :  { %10486 = vst [vmem:[#allocation16_spill] sm:$0xff] %v7763_v59  ;;  %1680 = vmatmul.f32.gmra.mxu1 %v1074_v29  ;;  %v7765_v42 = vpop.f32.mrf.mxu0  ;;  %1742 = vmatmul.f32.gmra.mxu2 %v939_v56  ;;  %v1089_v56 = vld [vmem:[#allocation4 + $0x710] sm:$0xff]  ;;  %v1090_v59 = vld [vmem:[#allocation4 + $0x718] sm:$0xff] }
 0x270   :  { %1855 = vmatmul.f32.gmra.mxu3 %v940_v52 }
 0x271   :  { %v1452_v39 = vpop.f32.mrf.mxu3 }
 0x272   :  { %v1339_v55 = vpop.f32.mrf.mxu2  ;;  %1570 = vmatmul.f32.gmra.mxu0 %v1081_v26 }
 0x273   :  { %v1340_v8 = vadd.f32 %v1339_v55, %v394_v62 }
 0x274   :  { %v7769_v4 = vpop.f32.mrf.mxu1 }
 0x275   :  { %v7771_v33 = vadd.f32 %v1452_v39, %v1340_v8  ;;  %v956_v8 = vld [vmem:[#allocation4 + $0x2e8] sm:$0xff] }
 0x277   :  { %10487 = vst [vmem:[#allocation17_spill] sm:$0xff] %v7771_v33  ;;  %1683 = vmatmul.f32.gmra.mxu1 %v1082_v37  ;;  %v7773_v29 = vpop.f32.mrf.mxu0  ;;  %1745 = vmatmul.f32.gmra.mxu2 %v947_v60  ;;  %v1097_v60 = vld [vmem:[#allocation4 + $0x750] sm:$0xff]  ;;  %v1098_v33 = vld [vmem:[#allocation4 + $0x758] sm:$0xff] }
 0x278   :  { %1858 = vmatmul.f32.gmra.mxu3 %v948_v18 }
 0x27a   :  { %v1342_v52 = vpop.f32.mrf.mxu2  ;;  %1573 = vmatmul.f32.gmra.mxu0 %v1089_v56 }
 0x27b   :  { %v1343_v26 = vadd.f32 %v1342_v52, %v397_v10  ;;  %v1455_v55 = vpop.f32.mrf.mxu3 }
 0x27c   :  { %v7777_v62 = vpop.f32.mrf.mxu1 }
 0x27d   :  { %v7779_v39 = vadd.f32 %v1455_v55, %v1343_v26  ;;  %v964_v55 = vld [vmem:[#allocation4 + $0x328] sm:$0xff] }
 0x27f   :  { %10488 = vst [vmem:[#allocation18_spill] sm:$0xff] %v7779_v39  ;;  %1686 = vmatmul.f32.gmra.mxu1 %v1090_v59  ;;  %v7781_v37 = vpop.f32.mrf.mxu0  ;;  %1748 = vmatmul.f32.gmra.mxu2 %v955_v43  ;;  %v1105_v43 = vld [vmem:[#allocation4 + $0x790] sm:$0xff]  ;;  %v1106_v39 = vld [vmem:[#allocation4 + $0x798] sm:$0xff] }
 0x280   :  { %1861 = vmatmul.f32.gmra.mxu3 %v956_v8 }
 0x282   :  { %v1345_v18 = vpop.f32.mrf.mxu2  ;;  %1576 = vmatmul.f32.gmra.mxu0 %v1097_v60 }
 0x283   :  { %v1346_v56 = vadd.f32 %v1345_v18, %v400_v31  ;;  %v1458_v10 = vpop.f32.mrf.mxu3 }
 0x284   :  { %v7785_v52 = vpop.f32.mrf.mxu1 }
 0x285   :  { %v7787_v26 = vadd.f32 %v1458_v10, %v1346_v56  ;;  %v972_v10 = vld [vmem:[#allocation4 + $0x368] sm:$0xff] }
 0x287   :  { %10489 = vst [vmem:[#allocation19_spill] sm:$0xff] %v7787_v26  ;;  %1689 = vmatmul.f32.gmra.mxu1 %v1098_v33  ;;  %v7789_v59 = vpop.f32.mrf.mxu0  ;;  %1751 = vmatmul.f32.gmra.mxu2 %v963_v63  ;;  %v1113_v63 = vld [vmem:[#allocation4 + $0x7d0] sm:$0xff]  ;;  %v1114_v26 = vld [vmem:[#allocation4 + $0x7d8] sm:$0xff] }
 0x288   :  { %1864 = vmatmul.f32.gmra.mxu3 %v964_v55 }
 0x28a   :  { %v1348_v8 = vpop.f32.mrf.mxu2  ;;  %1579 = vmatmul.f32.gmra.mxu0 %v1105_v43 }
 0x28b   :  { %v1349_v60 = vadd.f32 %v1348_v8, %v403_v0  ;;  %v1461_v31 = vpop.f32.mrf.mxu3 }
 0x28c   :  { %v7793_v18 = vpop.f32.mrf.mxu1 }
 0x28d   :  { %v7795_v56 = vadd.f32 %v1461_v31, %v1349_v60  ;;  %v980_v31 = vld [vmem:[#allocation4 + $0x3a8] sm:$0xff] }
 0x28f   :  { %10490 = vst [vmem:[#allocation20_spill] sm:$0xff] %v7795_v56  ;;  %1692 = vmatmul.f32.gmra.mxu1 %v1106_v39  ;;  %v7797_v33 = vpop.f32.mrf.mxu0  ;;  %1754 = vmatmul.f32.gmra.mxu2 %v971_v14  ;;  %v869_v14 = vld [vmem:[#allocation4 + $0x30] sm:$0xff]  ;;  %v870_v56 = vld [vmem:[#allocation4 + $0x38] sm:$0xff] }
 0x290   :  { %1867 = vmatmul.f32.gmra.mxu3 %v972_v10 }
 0x292   :  { %v1351_v55 = vpop.f32.mrf.mxu2  ;;  %1582 = vmatmul.f32.gmra.mxu0 %v1113_v63 }
 0x293   :  { %v1352_v43 = vadd.f32 %v1351_v55, %v406_v21  ;;  %v1464_v0 = vpop.f32.mrf.mxu3 }
 0x294   :  { %v7801_v8 = vpop.f32.mrf.mxu1 }
 0x295   :  { %10491 = vst [vmem:[#allocation21_spill] sm:$0xff] %v7801_v8  ;;  %v7803_v60 = vadd.f32 %v1464_v0, %v1352_v43  ;;  %v987_v8 = vld [vmem:[#allocation4 + $0x3e0] sm:$0xff]  ;;  %v988_v0 = vld [vmem:[#allocation4 + $0x3e8] sm:$0xff] }
 0x297   :  { %10492 = vst [vmem:[#allocation22_spill] sm:$0xff] %v7803_v60  ;;  %1695 = vmatmul.f32.gmra.mxu1 %v1114_v26  ;;  %v7805_v39 = vpop.f32.mrf.mxu0  ;;  %1757 = vmatmul.f32.gmra.mxu2 %v979_v25  ;;  %v877_v25 = vld [vmem:[#allocation4 + $0x70] sm:$0xff]  ;;  %v878_v60 = vld [vmem:[#allocation4 + $0x78] sm:$0xff] }
 0x298   :  { %1870 = vmatmul.f32.gmra.mxu3 %v980_v31 }
 0x29a   :  { %v1354_v10 = vpop.f32.mrf.mxu2  ;;  %1941 = vmatmul.f32.vlgmr.msra.gmra.mxu0 %v869_v14 }
 0x29b   :  { %v1355_v63 = vadd.f32 %v1354_v10, %v409_v2  ;;  %v1467_v21 = vpop.f32.mrf.mxu3 }
 0x29c   :  { %v7809_v55 = vpop.f32.mrf.mxu1 }
 0x29d   :  { %10493 = vst [vmem:[#allocation23_spill] sm:$0xff] %v7809_v55  ;;  %v7811_v43 = vadd.f32 %v1467_v21, %v1355_v63  ;;  %v995_v55 = vld [vmem:[#allocation4 + $0x420] sm:$0xff]  ;;  %v996_v21 = vld [vmem:[#allocation4 + $0x428] sm:$0xff] }
 0x29f   :  { %10494 = vst [vmem:[#allocation24_spill] sm:$0xff] %v7811_v43  ;;  %2054 = vmatmul.f32.vlgmr.msra.gmra.mxu1 %v870_v56  ;;  %v7813_v26 = vpop.f32.mrf.mxu0  ;;  %1760 = vmatmul.f32.gmra.mxu2 %v987_v8  ;;  %v1491_v56 = vadd.f32 %v7667_v6, %v7532_v61  ;;  %v1004_v43 = vld [vmem:[#allocation4 + $0x468] sm:$0xff]  ;;  %v1494_v61 = vadd.f32 %v7677_v41, %v7547_v51 }
 0x2a0   :  { %1873 = vmatmul.f32.gmra.mxu3 %v988_v0  ;;  %v885_v0 = vld [vmem:[#allocation4 + $0xb0] sm:$0xff]  ;;  %v1497_v51 = vadd.f32 %v7687_v22, %v7562_v49  ;;  %v1500_v49 = vadd.f32 %v7697_v30, %v7575_v36  ;;  %v1503_v36 = vadd.f32 %v7707_v12, %v7588_v34  ;;  %v1506_v34 = vadd.f32 %v7717_v54, %v7595_v11 }
 0x2a1   :  { %v1604_v58 = vadd.f32 %v7673_v7, %v1491_v56  ;;  %v1607_v7 = vadd.f32 %v7683_v9, %v1494_v61  ;;  %v1509_v11 = vadd.f32 %v7725_v53, %v7604_v40  ;;  %v1512_v40 = vadd.f32 %v7733_v47, %v7613_v20 }
 0x2a2   :  { %v1357_v31 = vpop.f32.mrf.mxu2  ;;  %1944 = vmatmul.f32.gmra.mxu0 %v877_v25  ;;  %v1610_v9 = vadd.f32 %v7693_v15, %v1497_v51  ;;  %v1613_v15 = vadd.f32 %v7703_v27, %v1500_v49  ;;  %v1616_v27 = vadd.f32 %v7713_v13, %v1503_v36  ;;  %v1619_v13 = vadd.f32 %v7721_v28, %v1506_v34 }
 0x2a3   :  { %v1358_v14 = vadd.f32 %v1357_v31, %v412_v48  ;;  %v1470_v2 = vpop.f32.mrf.mxu3  ;;  %v1622_v28 = vadd.f32 %v7729_v19, %v1509_v11  ;;  %v1625_v19 = vadd.f32 %v7737_v35, %v1512_v40  ;;  %v1515_v20 = vadd.f32 %v7741_v44, %v7622_v57 }
 0x2a4   :  { %v7817_v10 = vpop.f32.mrf.mxu1  ;;  %v1518_v57 = vadd.f32 %v7749_v1, %v7631_v24  ;;  %v958_v24 = vld [vmem:[#allocation4 + $0x2f8] sm:$0xff]  ;;  %v1075_v1 = vld [vmem:[#allocation4 + $0x6a0] sm:$0xff] }
 0x2a5   :  { %v7819_v63 = vadd.f32 %v1470_v2, %v1358_v14  ;;  %v886_v14 = vld [vmem:[#allocation4 + $0xb8] sm:$0xff]  ;;  %v1003_v2 = vld [vmem:[#allocation4 + $0x460] sm:$0xff]  ;;  %v1628_v35 = vadd.f32 %v7745_v3, %v1515_v20 }
 0x2a6   :  { %v2183_v3 = vld [vmem:[%s10469_s3] sm:$0xff] }
 0x2a7   :  { %10495 = vst [vmem:[#allocation25_spill] sm:$0xff] %v7819_v63  ;;  %2057 = vmatmul.f32.gmra.mxu1 %v878_v60  ;;  %v7823_v8 = vpop.f32.mrf.mxu0  ;;  %1763 = vmatmul.f32.gmra.mxu2 %v995_v55  ;;  %v893_v60 = vld [vmem:[#allocation4 + $0xf0] sm:$0xff] }
 0x2a8   :  { %1876 = vmatmul.f32.gmra.mxu3 %v996_v21 }
 0x2a9   :  { %2412 = vmatpush.msrb.mxu3 %v2183_v3 }
 0x2aa   :  { %v1716_v32 = vpop.f32.mrf.mxu2  ;;  %1947 = vmatmul.f32.gmra.mxu0 %v885_v0 }
 0x2ab   :  { %v1717_v25 = vadd.f32 %v1716_v32, %v1604_v58  ;;  %v1829_v48 = vpop.f32.mrf.mxu3  ;;  %v894_v58 = vld [vmem:[#allocation4 + $0xf8] sm:$0xff]  ;;  %v1011_v32 = vld [vmem:[#allocation4 + $0x4a0] sm:$0xff] }
 0x2ac   :  { %v7826_v31 = vpop.f32.mrf.mxu1 }
 0x2ad   :  { %v7828_v63 = vadd.f32 %v1829_v48, %v1717_v25  ;;  %v1012_v48 = vld [vmem:[#allocation4 + $0x4a8] sm:$0xff] }
 0x2af   :  { %2060 = vmatmul.f32.gmra.mxu1 %v886_v14  ;;  %v7832_v6 = vpop.f32.mrf.mxu0  ;;  %1766 = vmatmul.f32.gmra.mxu2 %v1003_v2 }
 0x2b0   :  { %1879 = vmatmul.f32.gmra.mxu3 %v1004_v43  ;;  %v901_v43 = vld [vmem:[#allocation4 + $0x130] sm:$0xff] }
 0x2b2   :  { %v1719_v55 = vpop.f32.mrf.mxu2  ;;  %1950 = vmatmul.f32.gmra.mxu0 %v893_v60 }
 0x2b3   :  { %v1720_v21 = vadd.f32 %v1719_v55, %v1607_v7  ;;  %v1832_v56 = vpop.f32.mrf.mxu3  ;;  %v902_v7 = vld [vmem:[#allocation4 + $0x138] sm:$0xff]  ;;  %v1019_v55 = vld [vmem:[#allocation4 + $0x4e0] sm:$0xff] }
 0x2b4   :  { %v7835_v0 = vpop.f32.mrf.mxu1 }
 0x2b5   :  { %v7837_v25 = vadd.f32 %v1832_v56, %v1720_v21  ;;  %v1020_v56 = vld [vmem:[#allocation4 + $0x4e8] sm:$0xff] }
 0x2b7   :  { %2063 = vmatmul.f32.gmra.mxu1 %v894_v58  ;;  %v7841_v41 = vpop.f32.mrf.mxu0  ;;  %1769 = vmatmul.f32.gmra.mxu2 %v1011_v32  ;;  %v909_v58 = vld [vmem:[#allocation4 + $0x170] sm:$0xff] }
 0x2b8   :  { %1882 = vmatmul.f32.gmra.mxu3 %v1012_v48 }
 0x2ba   :  { %v1722_v14 = vpop.f32.mrf.mxu2  ;;  %1953 = vmatmul.f32.gmra.mxu0 %v901_v43 }
 0x2bb   :  { %v1723_v2 = vadd.f32 %v1722_v14, %v1610_v9  ;;  %v1835_v61 = vpop.f32.mrf.mxu3  ;;  %v910_v9 = vld [vmem:[#allocation4 + $0x178] sm:$0xff]  ;;  %v1027_v14 = vld [vmem:[#allocation4 + $0x520] sm:$0xff] }
 0x2bc   :  { %v7844_v60 = vpop.f32.mrf.mxu1 }
 0x2bd   :  { %v7846_v21 = vadd.f32 %v1835_v61, %v1723_v2  ;;  %v1028_v61 = vld [vmem:[#allocation4 + $0x528] sm:$0xff] }
 0x2bf   :  { %2066 = vmatmul.f32.gmra.mxu1 %v902_v7  ;;  %v7850_v22 = vpop.f32.mrf.mxu0  ;;  %1772 = vmatmul.f32.gmra.mxu2 %v1019_v55  ;;  %v917_v7 = vld [vmem:[#allocation4 + $0x1b0] sm:$0xff] }
 0x2c0   :  { %1885 = vmatmul.f32.gmra.mxu3 %v1020_v56 }
 0x2c2   :  { %v1725_v32 = vpop.f32.mrf.mxu2  ;;  %1956 = vmatmul.f32.gmra.mxu0 %v909_v58 }
 0x2c3   :  { %v1726_v48 = vadd.f32 %v1725_v32, %v1613_v15  ;;  %v1838_v51 = vpop.f32.mrf.mxu3  ;;  %v918_v15 = vld [vmem:[#allocation4 + $0x1b8] sm:$0xff]  ;;  %v1035_v32 = vld [vmem:[#allocation4 + $0x560] sm:$0xff] }
 0x2c4   :  { %v7853_v43 = vpop.f32.mrf.mxu1 }
 0x2c5   :  { %v7855_v2 = vadd.f32 %v1838_v51, %v1726_v48  ;;  %v1036_v51 = vld [vmem:[#allocation4 + $0x568] sm:$0xff] }
 0x2c7   :  { %2069 = vmatmul.f32.gmra.mxu1 %v910_v9  ;;  %v7859_v30 = vpop.f32.mrf.mxu0  ;;  %1775 = vmatmul.f32.gmra.mxu2 %v1027_v14  ;;  %v925_v9 = vld [vmem:[#allocation4 + $0x1f0] sm:$0xff] }
 0x2c8   :  { %1888 = vmatmul.f32.gmra.mxu3 %v1028_v61 }
 0x2ca   :  { %v1728_v55 = vpop.f32.mrf.mxu2  ;;  %1959 = vmatmul.f32.gmra.mxu0 %v917_v7 }
 0x2cb   :  { %v1729_v56 = vadd.f32 %v1728_v55, %v1616_v27  ;;  %v1841_v49 = vpop.f32.mrf.mxu3  ;;  %v926_v27 = vld [vmem:[#allocation4 + $0x1f8] sm:$0xff]  ;;  %v1043_v55 = vld [vmem:[#allocation4 + $0x5a0] sm:$0xff] }
 0x2cc   :  { %v7862_v58 = vpop.f32.mrf.mxu1 }
 0x2cd   :  { %v7864_v48 = vadd.f32 %v1841_v49, %v1729_v56  ;;  %v1044_v49 = vld [vmem:[#allocation4 + $0x5a8] sm:$0xff] }
 0x2cf   :  { %2072 = vmatmul.f32.gmra.mxu1 %v918_v15  ;;  %v7868_v12 = vpop.f32.mrf.mxu0  ;;  %1778 = vmatmul.f32.gmra.mxu2 %v1035_v32  ;;  %v933_v15 = vld [vmem:[#allocation4 + $0x230] sm:$0xff] }
 0x2d0   :  { %1891 = vmatmul.f32.gmra.mxu3 %v1036_v51 }
 0x2d2   :  { %v1731_v14 = vpop.f32.mrf.mxu2  ;;  %1962 = vmatmul.f32.gmra.mxu0 %v925_v9 }
 0x2d3   :  { %v1732_v61 = vadd.f32 %v1731_v14, %v1619_v13  ;;  %v1844_v36 = vpop.f32.mrf.mxu3  ;;  %v934_v13 = vld [vmem:[#allocation4 + $0x238] sm:$0xff]  ;;  %v1051_v14 = vld [vmem:[#allocation4 + $0x5e0] sm:$0xff] }
 0x2d4   :  { %v7871_v7 = vpop.f32.mrf.mxu1 }
 0x2d5   :  { %v7873_v56 = vadd.f32 %v1844_v36, %v1732_v61  ;;  %v1052_v36 = vld [vmem:[#allocation4 + $0x5e8] sm:$0xff] }
 0x2d7   :  { %2075 = vmatmul.f32.gmra.mxu1 %v926_v27  ;;  %v7877_v54 = vpop.f32.mrf.mxu0  ;;  %1781 = vmatmul.f32.gmra.mxu2 %v1043_v55  ;;  %v941_v27 = vld [vmem:[#allocation4 + $0x270] sm:$0xff] }
 0x2d8   :  { %1894 = vmatmul.f32.gmra.mxu3 %v1044_v49 }
 0x2da   :  { %v1734_v32 = vpop.f32.mrf.mxu2  ;;  %1965 = vmatmul.f32.gmra.mxu0 %v933_v15 }
 0x2db   :  { %v1735_v51 = vadd.f32 %v1734_v32, %v1622_v28  ;;  %v1847_v34 = vpop.f32.mrf.mxu3  ;;  %v942_v28 = vld [vmem:[#allocation4 + $0x278] sm:$0xff]  ;;  %v1059_v32 = vld [vmem:[#allocation4 + $0x620] sm:$0xff] }
 0x2dc   :  { %v7880_v9 = vpop.f32.mrf.mxu1 }
 0x2dd   :  { %v7882_v61 = vadd.f32 %v1847_v34, %v1735_v51  ;;  %v1060_v34 = vld [vmem:[#allocation4 + $0x628] sm:$0xff] }
 0x2df   :  { %2078 = vmatmul.f32.gmra.mxu1 %v934_v13  ;;  %v7886_v53 = vpop.f32.mrf.mxu0  ;;  %1784 = vmatmul.f32.gmra.mxu2 %v1051_v14  ;;  %v949_v13 = vld [vmem:[#allocation4 + $0x2b0] sm:$0xff] }
 0x2e0   :  { %1897 = vmatmul.f32.gmra.mxu3 %v1052_v36 }
 0x2e2   :  { %v1737_v55 = vpop.f32.mrf.mxu2  ;;  %1968 = vmatmul.f32.gmra.mxu0 %v941_v27 }
 0x2e3   :  { %v1738_v49 = vadd.f32 %v1737_v55, %v1625_v19  ;;  %v1850_v11 = vpop.f32.mrf.mxu3  ;;  %v950_v19 = vld [vmem:[#allocation4 + $0x2b8] sm:$0xff]  ;;  %v1067_v55 = vld [vmem:[#allocation4 + $0x660] sm:$0xff] }
 0x2e4   :  { %v7889_v15 = vpop.f32.mrf.mxu1 }
 0x2e5   :  { %v7891_v51 = vadd.f32 %v1850_v11, %v1738_v49  ;;  %v1068_v11 = vld [vmem:[#allocation4 + $0x668] sm:$0xff] }
 0x2e7   :  { %2081 = vmatmul.f32.gmra.mxu1 %v942_v28  ;;  %v7895_v47 = vpop.f32.mrf.mxu0  ;;  %1787 = vmatmul.f32.gmra.mxu2 %v1059_v32  ;;  %v957_v28 = vld [vmem:[#allocation4 + $0x2f0] sm:$0xff]  ;;  %v1631_v32 = vadd.f32 %v7753_v16, %v1518_v57 }
 0x2e8   :  { %1900 = vmatmul.f32.gmra.mxu3 %v1060_v34  ;;  %v965_v16 = vld [vmem:[#allocation4 + $0x330] sm:$0xff] }
 0x2ea   :  { %v1740_v14 = vpop.f32.mrf.mxu2  ;;  %1971 = vmatmul.f32.gmra.mxu0 %v949_v13 }
 0x2eb   :  { %v1741_v36 = vadd.f32 %v1740_v14, %v1628_v35  ;;  %v1853_v40 = vpop.f32.mrf.mxu3 }
 0x2ec   :  { %v7898_v27 = vpop.f32.mrf.mxu1 }
 0x2ed   :  { %v7900_v49 = vadd.f32 %v1853_v40, %v1741_v36  ;;  %v1076_v36 = vld [vmem:[#allocation4 + $0x6a8] sm:$0xff]  ;;  %v1521_v40 = vadd.f32 %v7757_v38, %v7638_v23  ;;  %v1524_v23 = vadd.f32 %v7765_v42, %v7647_v5  ;;  %v1527_v5 = vadd.f32 %v7773_v29, %v7656_v50 }
 0x2ef   :  { %2084 = vmatmul.f32.gmra.mxu1 %v950_v19  ;;  %v7904_v44 = vpop.f32.mrf.mxu0  ;;  %1790 = vmatmul.f32.gmra.mxu2 %v1067_v55  ;;  %v1634_v55 = vadd.f32 %v7761_v46, %v1521_v40  ;;  %v1637_v46 = vadd.f32 %v7769_v4, %v1524_v23  ;;  %v2187_v4 = vld [vmem:[%s10470_s4 + $0x18] sm:$0xff]  ;;  %v2186_v23 = vld [vmem:[%s10470_s4 + $0x10] sm:$0xff] }
 0x2f0   :  { %1903 = vmatmul.f32.gmra.mxu3 %v1068_v11  ;;  %2296 = vmatpush.msra.mxu2 %v2187_v4 }
 0x2f2   :  { %v1743_v34 = vpop.f32.mrf.mxu2  ;;  %1974 = vmatmul.f32.gmra.mxu0 %v957_v28  ;;  %2297 = vmatpush.msra.mxu2 %v2186_v23 }
 0x2f3   :  { %v1744_v20 = vadd.f32 %v1743_v34, %v1631_v32  ;;  %v1856_v13 = vpop.f32.mrf.mxu3  ;;  %v966_v32 = vld [vmem:[#allocation4 + $0x338] sm:$0xff]  ;;  %v1083_v34 = vld [vmem:[#allocation4 + $0x6e0] sm:$0xff] }
 0x2f4   :  { %v7910_v35 = vpop.f32.mrf.mxu1 }
 0x2f5   :  { %v7912_v14 = vadd.f32 %v1856_v13, %v1744_v20  ;;  %v1084_v13 = vld [vmem:[#allocation4 + $0x6e8] sm:$0xff] }
 0x2f7   :  { %2087 = vmatmul.f32.gmra.mxu1 %v958_v24  ;;  %v7916_v19 = vpop.f32.mrf.mxu0  ;;  %1793 = vmatmul.f32.gmra.mxu2 %v1075_v1  ;;  %v973_v24 = vld [vmem:[#allocation4 + $0x370] sm:$0xff] }
 0x2f8   :  { %1906 = vmatmul.f32.gmra.mxu3 %v1076_v36 }
 0x2fa   :  { %v1746_v11 = vpop.f32.mrf.mxu2  ;;  %1977 = vmatmul.f32.gmra.mxu0 %v965_v16 }
 0x2fb   :  { %v1747_v57 = vadd.f32 %v1746_v11, %v1634_v55  ;;  %v1859_v28 = vpop.f32.mrf.mxu3  ;;  %v974_v55 = vld [vmem:[#allocation4 + $0x378] sm:$0xff]  ;;  %v1091_v11 = vld [vmem:[#allocation4 + $0x720] sm:$0xff] }
 0x2fc   :  { %v7919_v3 = vpop.f32.mrf.mxu1 }
 0x2fd   :  { %v7921_v20 = vadd.f32 %v1859_v28, %v1747_v57  ;;  %v1092_v28 = vld [vmem:[#allocation4 + $0x728] sm:$0xff] }
 0x2ff   :  { %2090 = vmatmul.f32.gmra.mxu1 %v966_v32  ;;  %v7925_v38 = vpop.f32.mrf.mxu0  ;;  %1796 = vmatmul.f32.gmra.mxu2 %v1083_v34  ;;  %v981_v32 = vld [vmem:[#allocation4 + $0x3b0] sm:$0xff]  ;;  %v1640_v34 = vadd.f32 %v7777_v62, %v1527_v5  ;;  %v1100_v62 = vld [vmem:[#allocation4 + $0x768] sm:$0xff] }
 0x300   :  { %1909 = vmatmul.f32.gmra.mxu3 %v1084_v13  ;;  %v989_v5 = vld [vmem:[#allocation4 + $0x3f0] sm:$0xff] }
 0x302   :  { %v1749_v1 = vpop.f32.mrf.mxu2  ;;  %1980 = vmatmul.f32.gmra.mxu0 %v973_v24 }
 0x303   :  { %v1750_v36 = vadd.f32 %v1749_v1, %v1637_v46  ;;  %v1862_v40 = vpop.f32.mrf.mxu3  ;;  %v982_v46 = vld [vmem:[#allocation4 + $0x3b8] sm:$0xff]  ;;  %v1099_v1 = vld [vmem:[#allocation4 + $0x760] sm:$0xff] }
 0x304   :  { %v7928_v16 = vpop.f32.mrf.mxu1 }
 0x305   :  { %v7930_v57 = vadd.f32 %v1862_v40, %v1750_v36  ;;  %v2185_v36 = vld [vmem:[%s10470_s4 + $0x8] sm:$0xff] }
 0x306   :  { %2298 = vmatpush.msra.mxu2 %v2185_v36 }
 0x307   :  { %2093 = vmatmul.f32.gmra.mxu1 %v974_v55  ;;  %v7934_v42 = vpop.f32.mrf.mxu0  ;;  %1799 = vmatmul.f32.gmra.mxu2 %v1091_v11  ;;  %v2184_v55 = vld [vmem:[%s10470_s4] sm:$0xff]  ;;  %v1530_v11 = vadd.f32 %v7781_v37, %v7665_v17  ;;  %v1108_v17 = vld [vmem:[#allocation4 + $0x7a8] sm:$0xff]  ;;  %v1533_v37 = vadd.f32 %v7789_v59, %v7675_v45 }
 0x308   :  { %1912 = vmatmul.f32.gmra.mxu3 %v1092_v28  ;;  %2299 = vmatpush.msra.mxu2 %v2184_v55 }
 0x30a   :  { %v1752_v13 = vpop.f32.mrf.mxu2  ;;  %1983 = vmatmul.f32.gmra.mxu0 %v981_v32  ;;  %v1643_v32 = vadd.f32 %v7785_v52, %v1530_v11  ;;  %v1646_v52 = vadd.f32 %v7793_v18, %v1533_v37 }
 0x30b   :  { %v1753_v50 = vadd.f32 %v1752_v13, %v1640_v34  ;;  %v1865_v29 = vpop.f32.mrf.mxu3 }
 0x30c   :  { %v7943_v24 = vpop.f32.mrf.mxu1 }
 0x30d   :  { %10496 = vst [vmem:[#allocation26_spill] sm:$0xff] %v7943_v24  ;;  %v7948_v40 = vadd.f32 %v1865_v29, %v1753_v50  ;;  %v990_v50 = vld [vmem:[#allocation4 + $0x3f8] sm:$0xff]  ;;  %v1107_v29 = vld [vmem:[#allocation4 + $0x7a0] sm:$0xff] }
 0x30f   :  { %2096 = vmatmul.f32.gmra.mxu1 %v982_v46  ;;  %v7955_v28 = vpop.f32.mrf.mxu0  ;;  %1802 = vmatmul.f32.gmra.mxu2 %v1099_v1  ;;  %v997_v1 = vld [vmem:[#allocation4 + $0x430] sm:$0xff] }
 0x310   :  { %10497 = vst [vmem:[#allocation27_spill] sm:$0xff] %v7955_v28  ;;  %1915 = vmatmul.f32.gmra.mxu3 %v1100_v62  ;;  %v1117_v28 = vld [vmem:[#allocation4 + $0x7f0] sm:$0xff] }
 0x312   :  { %v1755_v4 = vpop.f32.mrf.mxu2  ;;  %1986 = vmatmul.f32.gmra.mxu0 %v989_v5 }
 0x313   :  { %v1756_v34 = vadd.f32 %v1755_v4, %v1643_v32  ;;  %v1868_v13 = vpop.f32.mrf.mxu3  ;;  %v998_v32 = vld [vmem:[#allocation4 + $0x438] sm:$0xff]  ;;  %v1115_v4 = vld [vmem:[#allocation4 + $0x7e0] sm:$0xff] }
 0x314   :  { %v7958_v23 = vpop.f32.mrf.mxu1 }
 0x315   :  { %10498 = vst [vmem:[#allocation28_spill] sm:$0xff] %v7958_v23  ;;  %v7960_v36 = vadd.f32 %v1868_v13, %v1756_v34  ;;  %v1116_v13 = vld [vmem:[#allocation4 + $0x7e8] sm:$0xff]  ;;  %v10499_v23 = vld [vmem:[#allocation7_spill] sm:$0xff] }
 0x316   :  { %v1536_v45 = vadd.f32 %v7797_v33, %v10499_v23  ;;  %v10501_v33 = vld [vmem:[#allocation8_spill] sm:$0xff] }
 0x317   :  { %2099 = vmatmul.f32.gmra.mxu1 %v990_v50  ;;  %1805 = vmatmul.f32.gmra.mxu2 %v1107_v29  ;;  %v1942_v46 = vpop.f32.mrf.mxu0  ;;  %v1005_v50 = vld [vmem:[#allocation4 + $0x470] sm:$0xff]  ;;  %v1539_v23 = vadd.f32 %v7805_v39, %v10501_v33 }
 0x318   :  { %1918 = vmatmul.f32.gmra.mxu3 %v1108_v17  ;;  %v10500_v29 = vld [vmem:[#allocation21_spill] sm:$0xff]  ;;  %v1943_v17 = vadd.f32 %v1942_v46, %v7828_v63  ;;  %v6652_v63 = vld [vmem:[%s10467_s1] sm:$0xff] }
 0x319   :  { %v1649_v18 = vadd.f32 %v10500_v29, %v1536_v45  ;;  %v10502_v46 = vld [vmem:[#allocation23_spill] sm:$0xff] }
 0x31a   :  { %v1758_v62 = vpop.f32.mrf.mxu2  ;;  %1989 = vmatmul.f32.gmra.mxu0 %v997_v1 }
 0x31b   :  { %v1759_v55 = vadd.f32 %v1758_v62, %v1646_v52  ;;  %v1871_v11 = vpop.f32.mrf.mxu3 }
 0x31c   :  { %v2055_v5 = vpop.f32.mrf.mxu1 }
 0x31d   :  { %v7965_v34 = vadd.f32 %v1871_v11, %v1759_v55  ;;  %v2056_v62 = vadd.f32 %v2055_v5, %v1943_v17  ;;  %v1006_v11 = vld [vmem:[#allocation4 + $0x478] sm:$0xff]  ;;  %v1652_v5 = vadd.f32 %v10502_v46, %v1539_v23 }
 0x31e   :  { %v1014_v17 = vld [vmem:[#allocation4 + $0x4b8] sm:$0xff] }
 0x31f   :  { %2102 = vmatmul.f32.gmra.mxu1 %v998_v32  ;;  %1808 = vmatmul.f32.gmra.mxu2 %v1115_v4  ;;  %v1945_v59 = vpop.f32.mrf.mxu0  ;;  %v1013_v4 = vld [vmem:[#allocation4 + $0x4b0] sm:$0xff]  ;;  %6251 = vtanh.f32 %v2056_v62  ;;  %v1022_v46 = vld [vmem:[#allocation4 + $0x4f8] sm:$0xff] }
 0x320   :  { %1921 = vmatmul.f32.gmra.mxu3 %v1116_v13  ;;  %v1946_v13 = vadd.f32 %v1945_v59, %v7837_v25  ;;  %v6653_v25 = vld [vmem:[%s10467_s1 + $0x8] sm:$0xff] }
 0x322   :  { %v1761_v37 = vpop.f32.mrf.mxu2  ;;  %1992 = vmatmul.f32.gmra.mxu0 %v1005_v50 }
 0x323   :  { %v1762_v1 = vadd.f32 %v1761_v37, %v1649_v18  ;;  %v1874_v52 = vpop.f32.mrf.mxu3 }
 0x324   :  { %v2058_v55 = vpop.f32.mrf.mxu1 }
 0x325   :  { %v7971_v24 = vadd.f32 %v1874_v52, %v1762_v1  ;;  %v2059_v39 = vadd.f32 %v2058_v55, %v1946_v13  ;;  %v6252_v37 = vpop.eup %6251  ;;  %v10503_v1 = vld [vmem:[#allocation9_spill] sm:$0xff] }
 0x326   :  { %v1542_v52 = vadd.f32 %v7813_v26, %v10503_v1 }
 0x327   :  { %2105 = vmatmul.f32.gmra.mxu1 %v1006_v11  ;;  %v1948_v32 = vpop.f32.mrf.mxu0  ;;  %2034 = vmatmul.f32.vlgmr.msrb.gmra.mxu2 %v1117_v28  ;;  %v1021_v11 = vld [vmem:[#allocation4 + $0x4f0] sm:$0xff]  ;;  %6253 = vtanh.f32 %v2059_v39 }
 0x328   :  { %6090 = vmatmul.msk.f32.vlgmr.msrb.gmra.mxu3 %vm91_vm0, %v6652_v63  ;;  %v1655_v59 = vadd.f32 %v7817_v10, %v1542_v52  ;;  %v1949_v55 = vadd.f32 %v1948_v32, %v7846_v21  ;;  %v1029_v10 = vld [vmem:[#allocation4 + $0x530] sm:$0xff]  ;;  %v1030_v52 = vld [vmem:[#allocation4 + $0x538] sm:$0xff] }
 0x329   :  { %v6654_v21 = vld [vmem:[%s10467_s1 + $0x10] sm:$0xff] }
 0x32a   :  { %v1764_v45 = vpop.f32.mrf.mxu2  ;;  %1995 = vmatmul.f32.gmra.mxu0 %v1013_v4 }
 0x32b   :  { %v1765_v50 = vadd.f32 %v1764_v45, %v1652_v5  ;;  %v1877_v29 = vpop.f32.mrf.mxu3  ;;  %v10504_v45 = vld [vmem:[#allocation10_spill] sm:$0xff] }
 0x32c   :  { %v2061_v18 = vpop.f32.mrf.mxu1 }
 0x32d   :  { %v7981_v28 = vadd.f32 %v1877_v29, %v1765_v50  ;;  %v2062_v4 = vadd.f32 %v2061_v18, %v1949_v55  ;;  %v6254_v13 = vpop.eup %6253  ;;  %v1545_v50 = vadd.f32 %v7823_v8, %v10504_v45 }
 0x32f   :  { %2108 = vmatmul.f32.gmra.mxu1 %v1014_v17  ;;  %v1951_v62 = vpop.f32.mrf.mxu0  ;;  %6058 = vmatmul.msk.f32.vlgmr.msra.gmra.mxu2 %vm414_vm1, %v6252_v37  ;;  %6255 = vtanh.f32 %v2062_v4  ;;  %v1658_v32 = vadd.f32 %v7826_v31, %v1545_v50  ;;  %v1037_v31 = vld [vmem:[#allocation4 + $0x570] sm:$0xff] }
 0x330   :  { %6091 = vmatmul.msk.f32.gmra.mxu3 %vm91_vm0, %v6653_v25  ;;  %v1952_v39 = vadd.f32 %v1951_v62, %v7855_v2  ;;  %v6655_v2 = vld [vmem:[%s10467_s1 + $0x18] sm:$0xff] }
 0x332   :  { %v1767_v33 = vpop.f32.mrf.mxu2  ;;  %1998 = vmatmul.f32.gmra.mxu0 %v1021_v11 }
 0x333   :  { %v1768_v23 = vadd.f32 %v1767_v33, %v1655_v59  ;;  %v1880_v26 = vpop.f32.mrf.mxu3  ;;  %v10505_v59 = vld [vmem:[#allocation11_spill] sm:$0xff] }
 0x334   :  { %v2064_v63 = vpop.f32.mrf.mxu1  ;;  %v1548_v55 = vadd.f32 %v7832_v6, %v10505_v59  ;;  %v10507_v59 = vld [vmem:[#allocation13_spill] sm:$0xff] }
 0x335   :  { %v7992_v5 = vadd.f32 %v1880_v26, %v1768_v23  ;;  %v2065_v37 = vadd.f32 %v2064_v63, %v1952_v39  ;;  %v6256_v25 = vpop.eup %6255 }
 0x336   :  { %v1661_v62 = vadd.f32 %v7835_v0, %v1548_v55  ;;  %v1045_v0 = vld [vmem:[#allocation4 + $0x5b0] sm:$0xff]  ;;  %v1554_v55 = vadd.f32 %v7850_v22, %v10507_v59 }
 0x337   :  { %2111 = vmatmul.f32.gmra.mxu1 %v1022_v46  ;;  %v1954_v29 = vpop.f32.mrf.mxu0  ;;  %6059 = vmatmul.msk.f32.gmra.mxu2 %vm414_vm1, %v6254_v13  ;;  %6257 = vtanh.f32 %v2065_v37  ;;  %v1038_v13 = vld [vmem:[#allocation4 + $0x578] sm:$0xff] }
 0x338   :  { %6092 = vmatmul.msk.f32.gmra.mxu3 %vm91_vm0, %v6654_v21  ;;  %v1955_v23 = vadd.f32 %v1954_v29, %v7864_v48  ;;  %v6656_v48 = vld [vmem:[%s10467_s1 + $0x20] sm:$0xff] }
 0x33a   :  { %v1770_v18 = vpop.f32.mrf.mxu2  ;;  %2001 = vmatmul.f32.gmra.mxu0 %v1029_v10  ;;  %v10506_v10 = vld [vmem:[#allocation12_spill] sm:$0xff] }
 0x33b   :  { %v1771_v17 = vadd.f32 %v1770_v18, %v1658_v32  ;;  %v1883_v8 = vpop.f32.mrf.mxu3  ;;  %v1551_v21 = vadd.f32 %v7841_v41, %v10506_v10 }
 0x33c   :  { %v2067_v1 = vpop.f32.mrf.mxu1 }
 0x33d   :  { %v8003_v11 = vadd.f32 %v1883_v8, %v1771_v17  ;;  %v2068_v63 = vadd.f32 %v2067_v1, %v1955_v23  ;;  %v6258_v50 = vpop.eup %6257  ;;  %v1664_v29 = vadd.f32 %v7844_v60, %v1551_v21  ;;  %v1046_v1 = vld [vmem:[#allocation4 + $0x5b8] sm:$0xff]  ;;  %v1053_v60 = vld [vmem:[#allocation4 + $0x5f0] sm:$0xff] }
 0x33f   :  { %2114 = vmatmul.f32.gmra.mxu1 %v1030_v52  ;;  %v1957_v33 = vpop.f32.mrf.mxu0  ;;  %6060 = vmatmul.msk.f32.gmra.mxu2 %vm414_vm1, %v6256_v25  ;;  %6259 = vtanh.f32 %v2068_v63 }
 0x340   :  { %6093 = vmatmul.msk.f32.gmra.mxu3 %vm91_vm0, %v6655_v2  ;;  %v1958_v39 = vadd.f32 %v1957_v33, %v7873_v56  ;;  %v6657_v56 = vld [vmem:[%s10467_s1 + $0x28] sm:$0xff]  ;;  %v1667_v33 = vadd.f32 %v7853_v43, %v1554_v55  ;;  %v1061_v43 = vld [vmem:[#allocation4 + $0x630] sm:$0xff] }
 0x342   :  { %v1773_v26 = vpop.f32.mrf.mxu2  ;;  %2004 = vmatmul.f32.gmra.mxu0 %v1037_v31 }
 0x343   :  { %v1774_v4 = vadd.f32 %v1773_v26, %v1661_v62  ;;  %v1886_v6 = vpop.f32.mrf.mxu3 }
 0x344   :  { %v2070_v46 = vpop.f32.mrf.mxu1 }
 0x345   :  { %v8014_v45 = vadd.f32 %v1886_v6, %v1774_v4  ;;  %v2071_v8 = vadd.f32 %v2070_v46, %v1958_v39  ;;  %v6260_v25 = vpop.eup %6259  ;;  %v1054_v6 = vld [vmem:[#allocation4 + $0x5f8] sm:$0xff] }
 0x347   :  { %2117 = vmatmul.f32.gmra.mxu1 %v1038_v13  ;;  %v1960_v32 = vpop.f32.mrf.mxu0  ;;  %6061 = vmatmul.msk.f32.gmra.mxu2 %vm414_vm1, %v6258_v50  ;;  %6261 = vtanh.f32 %v2071_v8  ;;  %v10508_v13 = vld [vmem:[#allocation14_spill] sm:$0xff]  ;;  %v10509_v8 = vld [vmem:[#allocation15_spill] sm:$0xff] }
 0x348   :  { %6094 = vmatmul.msk.f32.gmra.mxu3 %vm91_vm0, %v6656_v48  ;;  %v1961_v2 = vadd.f32 %v1960_v32, %v7882_v61  ;;  %v1557_v50 = vadd.f32 %v7859_v30, %v10508_v13  ;;  %v6658_v61 = vld [vmem:[%s10467_s1 + $0x30] sm:$0xff] }
 0x34a   :  { %v1776_v18 = vpop.f32.mrf.mxu2  ;;  %2007 = vmatmul.f32.gmra.mxu0 %v1045_v0  ;;  %v1670_v21 = vadd.f32 %v7862_v58, %v1557_v50  ;;  %v1069_v58 = vld [vmem:[#allocation4 + $0x670] sm:$0xff] }
 0x34b   :  { %v1777_v17 = vadd.f32 %v1776_v18, %v1664_v29  ;;  %v1889_v41 = vpop.f32.mrf.mxu3  ;;  %v1062_v18 = vld [vmem:[#allocation4 + $0x638] sm:$0xff] }
 0x34c   :  { %v2073_v37 = vpop.f32.mrf.mxu1 }
 0x34d   :  { %v8025_v52 = vadd.f32 %v1889_v41, %v1777_v17  ;;  %v2074_v26 = vadd.f32 %v2073_v37, %v1961_v2  ;;  %v6262_v46 = vpop.eup %6261  ;;  %v1560_v37 = vadd.f32 %v7868_v12, %v10509_v8 }
 0x34f   :  { %2120 = vmatmul.f32.gmra.mxu1 %v1046_v1  ;;  %v1963_v31 = vpop.f32.mrf.mxu0  ;;  %6062 = vmatmul.msk.f32.gmra.mxu2 %vm414_vm1, %v6260_v25  ;;  %6263 = vtanh.f32 %v2074_v26  ;;  %v1673_v25 = vadd.f32 %v7871_v7, %v1560_v37  ;;  %v1077_v7 = vld [vmem:[#allocation4 + $0x6b0] sm:$0xff]  ;;  %v1086_v37 = vld [vmem:[#allocation4 + $0x6f8] sm:$0xff] }
 0x350   :  { %6095 = vmatmul.msk.f32.gmra.mxu3 %vm91_vm0, %v6657_v56  ;;  %v1964_v32 = vadd.f32 %v1963_v31, %v7891_v51  ;;  %v6659_v51 = vld [vmem:[%s10467_s1 + $0x38] sm:$0xff] }
 0x352   :  { %v1779_v62 = vpop.f32.mrf.mxu2  ;;  %2010 = vmatmul.f32.gmra.mxu0 %v1053_v60 }
 0x353   :  { %v1780_v23 = vadd.f32 %v1779_v62, %v1667_v33  ;;  %v1892_v22 = vpop.f32.mrf.mxu3  ;;  %v1070_v33 = vld [vmem:[#allocation4 + $0x678] sm:$0xff] }
 0x354   :  { %v2076_v4 = vpop.f32.mrf.mxu1 }
 0x355   :  { %v8036_v63 = vadd.f32 %v1892_v22, %v1780_v23  ;;  %v2077_v29 = vadd.f32 %v2076_v4, %v1964_v32  ;;  %v6264_v41 = vpop.eup %6263  ;;  %v10510_v23 = vld [vmem:[#allocation16_spill] sm:$0xff]  ;;  %v10511_v32 = vld [vmem:[#allocation17_spill] sm:$0xff] }
 0x356   :  { %v1563_v22 = vadd.f32 %v7877_v54, %v10510_v23 }
 0x357   :  { %2123 = vmatmul.f32.gmra.mxu1 %v1054_v6  ;;  %v1966_v10 = vpop.f32.mrf.mxu0  ;;  %6063 = vmatmul.msk.f32.gmra.mxu2 %vm414_vm1, %v6262_v46  ;;  %6265 = vtanh.f32 %v2077_v29 }
 0x358   :  { %6096 = vmatmul.msk.f32.gmra.mxu3 %vm91_vm0, %v6658_v61  ;;  %v1967_v59 = vadd.f32 %v1966_v10, %v7900_v49  ;;  %v6660_v49 = vld [vmem:[%s10467_s1 + $0x40] sm:$0xff]  ;;  %v1676_v4 = vadd.f32 %v7880_v9, %v1563_v22  ;;  %v1085_v9 = vld [vmem:[#allocation4 + $0x6f0] sm:$0xff] }
 0x35a   :  { %v1782_v0 = vpop.f32.mrf.mxu2  ;;  %2013 = vmatmul.f32.gmra.mxu0 %v1061_v43  ;;  %v1078_v43 = vld [vmem:[#allocation4 + $0x6b8] sm:$0xff] }
 0x35b   :  { %v1783_v48 = vadd.f32 %v1782_v0, %v1670_v21  ;;  %v1895_v30 = vpop.f32.mrf.mxu3  ;;  %v1566_v0 = vadd.f32 %v7886_v53, %v10511_v32  ;;  %v10514_v32 = vld [vmem:[#allocation20_spill] sm:$0xff] }
 0x35c   :  { %v2079_v39 = vpop.f32.mrf.mxu1 }
 0x35d   :  { %v8047_v17 = vadd.f32 %v1895_v30, %v1783_v48  ;;  %v2080_v60 = vadd.f32 %v2079_v39, %v1967_v59  ;;  %v6266_v62 = vpop.eup %6265  ;;  %v1679_v30 = vadd.f32 %v7889_v15, %v1566_v0  ;;  %v1093_v15 = vld [vmem:[#allocation4 + $0x730] sm:$0xff]  ;;  %v1575_v0 = vadd.f32 %v7916_v19, %v10514_v32 }
 0x35f   :  { %2126 = vmatmul.f32.gmra.mxu1 %v1062_v18  ;;  %v1969_v1 = vpop.f32.mrf.mxu0  ;;  %6064 = vmatmul.msk.f32.gmra.mxu2 %vm414_vm1, %v6264_v41  ;;  %6267 = vtanh.f32 %v2080_v60 }
 0x360   :  { %6097 = vmatmul.msk.f32.gmra.mxu3 %vm91_vm0, %v6659_v51  ;;  %v1970_v6 = vadd.f32 %v1969_v1, %v7912_v14  ;;  %v6661_v14 = vld [vmem:[%s10467_s1 + $0x48] sm:$0xff]  ;;  %v10512_v51 = vld [vmem:[#allocation18_spill] sm:$0xff] }
 0x362   :  { %v1785_v55 = vpop.f32.mrf.mxu2  ;;  %2016 = vmatmul.f32.gmra.mxu0 %v1069_v58 }
 0x363   :  { %v1786_v31 = vadd.f32 %v1785_v55, %v1673_v25  ;;  %v1898_v12 = vpop.f32.mrf.mxu3  ;;  %v1569_v25 = vadd.f32 %v7895_v47, %v10512_v51 }
 0x364   :  { %v2082_v56 = vpop.f32.mrf.mxu1 }
 0x365   :  { %v8058_v2 = vadd.f32 %v1898_v12, %v1786_v31  ;;  %v2083_v50 = vadd.f32 %v2082_v56, %v1970_v6  ;;  %v6268_v21 = vpop.eup %6267  ;;  %v1682_v55 = vadd.f32 %v7898_v27, %v1569_v25  ;;  %v1101_v27 = vld [vmem:[#allocation4 + $0x770] sm:$0xff] }
 0x367   :  { %2129 = vmatmul.f32.gmra.mxu1 %v1070_v33  ;;  %v1972_v26 = vpop.f32.mrf.mxu0  ;;  %6065 = vmatmul.msk.f32.gmra.mxu2 %vm414_vm1, %v6266_v62  ;;  %6269 = vtanh.f32 %v2083_v50  ;;  %v1094_v62 = vld [vmem:[#allocation4 + $0x738] sm:$0xff] }
 0x368   :  { %6098 = vmatmul.msk.f32.gmra.mxu3 %vm91_vm0, %v6660_v49  ;;  %v1973_v29 = vadd.f32 %v1972_v26, %v7921_v20  ;;  %v6662_v20 = vld [vmem:[%s10467_s1 + $0x50] sm:$0xff]  ;;  %v10513_v26 = vld [vmem:[#allocation19_spill] sm:$0xff] }
 0x36a   :  { %v1788_v46 = vpop.f32.mrf.mxu2  ;;  %2019 = vmatmul.f32.gmra.mxu0 %v1077_v7  ;;  %v1572_v7 = vadd.f32 %v7904_v44, %v10513_v26 }
 0x36b   :  { %v1789_v13 = vadd.f32 %v1788_v46, %v1676_v4  ;;  %v1901_v54 = vpop.f32.mrf.mxu3 }
 0x36c   :  { %v2085_v10 = vpop.f32.mrf.mxu1  ;;  %v1685_v4 = vadd.f32 %v7910_v35, %v1572_v7  ;;  %v1109_v35 = vld [vmem:[#allocation4 + $0x7b0] sm:$0xff] }
 0x36d   :  { %v8069_v61 = vadd.f32 %v1901_v54, %v1789_v13  ;;  %v2086_v41 = vadd.f32 %v2085_v10, %v1973_v29  ;;  %v6270_v58 = vpop.eup %6269  ;;  %v1102_v10 = vld [vmem:[#allocation4 + $0x778] sm:$0xff] }
 0x36f   :  { %2132 = vmatmul.f32.gmra.mxu1 %v1078_v43  ;;  %v1975_v48 = vpop.f32.mrf.mxu0  ;;  %6066 = vmatmul.msk.f32.gmra.mxu2 %vm414_vm1, %v6268_v21  ;;  %6271 = vtanh.f32 %v2086_v41 }
 0x370   :  { %6099 = vmatmul.msk.f32.gmra.mxu3 %vm91_vm0, %v6661_v14  ;;  %v1976_v31 = vadd.f32 %v1975_v48, %v7930_v57  ;;  %v6663_v57 = vld [vmem:[%s10467_s1 + $0x58] sm:$0xff] }
 0x372   :  { %v1791_v39 = vpop.f32.mrf.mxu2  ;;  %2022 = vmatmul.f32.gmra.mxu0 %v1085_v9  ;;  %v1688_v9 = vadd.f32 %v7919_v3, %v1575_v0  ;;  %v6665_v3 = vld [vmem:[%s10467_s1 + $0x68] sm:$0xff] }
 0x373   :  { %v1792_v18 = vadd.f32 %v1791_v39, %v1679_v30  ;;  %v1904_v53 = vpop.f32.mrf.mxu3 }
 0x374   :  { %v2088_v8 = vpop.f32.mrf.mxu1 }
 0x375   :  { %v8080_v1 = vadd.f32 %v1904_v53, %v1792_v18  ;;  %v2089_v56 = vadd.f32 %v2088_v8, %v1976_v31  ;;  %v6272_v22 = vpop.eup %6271  ;;  %v1110_v53 = vld [vmem:[#allocation4 + $0x7b8] sm:$0xff] }
 0x376   :  { %v1118_v31 = vld [vmem:[#allocation4 + $0x7f8] sm:$0xff] }
 0x377   :  { %2135 = vmatmul.f32.gmra.mxu1 %v1086_v37  ;;  %v1978_v59 = vpop.f32.mrf.mxu0  ;;  %6067 = vmatmul.msk.f32.gmra.mxu2 %vm414_vm1, %v6270_v58  ;;  %6273 = vtanh.f32 %v2089_v56  ;;  %v10515_v37 = vld [vmem:[#allocation22_spill] sm:$0xff] }
 0x378   :  { %6100 = vmatmul.msk.f32.gmra.mxu3 %vm91_vm0, %v6662_v20  ;;  %v1979_v6 = vadd.f32 %v1978_v59, %v7948_v40  ;;  %v6664_v40 = vld [vmem:[%s10467_s1 + $0x60] sm:$0xff]  ;;  %v1578_v58 = vadd.f32 %v7925_v38, %v10515_v37 }
 0x37a   :  { %v1794_v12 = vpop.f32.mrf.mxu2  ;;  %2025 = vmatmul.f32.gmra.mxu0 %v1093_v15 }
 0x37b   :  { %v1795_v60 = vadd.f32 %v1794_v12, %v1682_v55  ;;  %v1907_v47 = vpop.f32.mrf.mxu3 }
 0x37c   :  { %v2091_v33 = vpop.f32.mrf.mxu1 }
 0x37d   :  { %v8091_v23 = vadd.f32 %v1907_v47, %v1795_v60  ;;  %v2092_v54 = vadd.f32 %v2091_v33, %v1979_v6  ;;  %v6274_v21 = vpop.eup %6273  ;;  %v10516_v47 = vld [vmem:[#allocation24_spill] sm:$0xff]  ;;  %v10518_v6 = vld [vmem:[#allocation25_spill] sm:$0xff] }
 0x37e   :  { %v1581_v56 = vadd.f32 %v7934_v42, %v10516_v47 }
 0x37f   :  { %2138 = vmatmul.f32.gmra.mxu1 %v1094_v62  ;;  %v1981_v49 = vpop.f32.mrf.mxu0  ;;  %6068 = vmatmul.msk.f32.gmra.mxu2 %vm414_vm1, %v6272_v22  ;;  %6275 = vtanh.f32 %v2092_v54  ;;  %v6667_v54 = vld [vmem:[%s10467_s1 + $0x78] sm:$0xff] }
 0x380   :  { %6101 = vmatmul.msk.f32.gmra.mxu3 %vm91_vm0, %v6663_v57  ;;  %v1982_v14 = vadd.f32 %v1981_v49, %v7960_v36  ;;  %v1691_v36 = vadd.f32 %v7928_v16, %v1578_v58  ;;  %v6666_v16 = vld [vmem:[%s10467_s1 + $0x70] sm:$0xff]  ;;  %v6669_v58 = vld [vmem:[%s10467_s1 + $0x88] sm:$0xff] }
 0x382   :  { %v1797_v46 = vpop.f32.mrf.mxu2  ;;  %2028 = vmatmul.f32.gmra.mxu0 %v1101_v27 }
 0x383   :  { %v1798_v13 = vadd.f32 %v1797_v46, %v1685_v4  ;;  %v1910_v44 = vpop.f32.mrf.mxu3  ;;  %v10519_v46 = vld [vmem:[#allocation27_spill] sm:$0xff] }
 0x384   :  { %v2094_v50 = vpop.f32.mrf.mxu1 }
 0x385   :  { %v8102_v43 = vadd.f32 %v1910_v44, %v1798_v13  ;;  %v2095_v39 = vadd.f32 %v2094_v50, %v1982_v14  ;;  %v6276_v8 = vpop.eup %6275  ;;  %v1584_v13 = vadd.f32 %v10519_v46, %v10518_v6 }
 0x387   :  { %2141 = vmatmul.f32.gmra.mxu1 %v1102_v10  ;;  %v1984_v48 = vpop.f32.mrf.mxu0  ;;  %6069 = vmatmul.msk.f32.gmra.mxu2 %vm414_vm1, %v6274_v21  ;;  %6277 = vtanh.f32 %v2095_v39 }
 0x388   :  { %6102 = vmatmul.msk.f32.gmra.mxu3 %vm91_vm0, %v6664_v40  ;;  %v1985_v25 = vadd.f32 %v1984_v48, %v7965_v34  ;;  %v10517_v34 = vld [vmem:[#allocation26_spill] sm:$0xff] }
 0x389   :  { %v1694_v62 = vadd.f32 %v10517_v34, %v1581_v56 }
 0x38a   :  { %v1800_v30 = vpop.f32.mrf.mxu2  ;;  %2031 = vmatmul.f32.gmra.mxu0 %v1109_v35 }
 0x38b   :  { %v1801_v29 = vadd.f32 %v1800_v30, %v1688_v9  ;;  %v1913_v19 = vpop.f32.mrf.mxu3  ;;  %v6668_v30 = vld [vmem:[%s10467_s1 + $0x80] sm:$0xff] }
 0x38c   :  { %v2097_v18 = vpop.f32.mrf.mxu1 }
 0x38d   :  { %v8113_v41 = vadd.f32 %v1913_v19, %v1801_v29  ;;  %v2098_v55 = vadd.f32 %v2097_v18, %v1985_v25  ;;  %v6278_v60 = vpop.eup %6277 }
 0x38f   :  { %2144 = vmatmul.f32.gmra.mxu1 %v1110_v53  ;;  %v1987_v51 = vpop.f32.mrf.mxu0  ;;  %6070 = vmatmul.msk.f32.gmra.mxu2 %vm414_vm1, %v6276_v8  ;;  %6279 = vtanh.f32 %v2098_v55 }
 0x390   :  { %6103 = vmatmul.msk.f32.gmra.mxu3 %vm91_vm0, %v6665_v3  ;;  %v1988_v22 = vadd.f32 %v1987_v51, %v7971_v24  ;;  %v10520_v24 = vld [vmem:[#allocation28_spill] sm:$0xff]  ;;  %v8163_v3 = vld [vmem:[%s10475_s9 + $0x1] ss:$0 sm:$0xff] }
 0x391   :  { %v1697_v50 = vadd.f32 %v10520_v24, %v1584_v13 }
 0x392   :  { %v1803_v59 = vpop.f32.mrf.mxu2 }
 0x393   :  { %v1804_v15 = vadd.f32 %v1803_v59, %v1691_v36  ;;  %v1916_v20 = vpop.f32.mrf.mxu3 }
 0x394   :  { %v2100_v38 = vpop.f32.mrf.mxu1 }
 0x395   :  { %v8124_v12 = vadd.f32 %v1916_v20, %v1804_v15  ;;  %v2101_v27 = vadd.f32 %v2100_v38, %v1988_v22  ;;  %v6280_v4 = vpop.eup %6279 }
 0x397   :  { %2147 = vmatmul.f32.gmra.mxu1 %v1118_v31  ;;  %v1990_v33 = vpop.f32.mrf.mxu0  ;;  %6071 = vmatmul.msk.f32.gmra.mxu2 %vm414_vm1, %v6278_v60  ;;  %6281 = vtanh.f32 %v2101_v27 }
 0x398   :  { %6104 = vmatmul.msk.f32.gmra.mxu3 %vm91_vm0, %v6666_v16  ;;  %v1991_v10 = vadd.f32 %v1990_v33, %v7981_v28 }
 0x39a   :  { %v1806_v26 = vpop.f32.mrf.mxu2 }
 0x39b   :  { %v1807_v7 = vadd.f32 %v1806_v26, %v1694_v62  ;;  %v1919_v49 = vpop.f32.mrf.mxu3 }
 0x39c   :  { %v2103_v42 = vpop.f32.mrf.mxu1 }
 0x39d   :  { %v8135_v57 = vadd.f32 %v1919_v49, %v1807_v7  ;;  %v2104_v48 = vadd.f32 %v2103_v42, %v1991_v10  ;;  %v6282_v9 = vpop.eup %6281 }
 0x39f   :  { %v1993_v44 = vpop.f32.mrf.mxu0  ;;  %6072 = vmatmul.msk.f32.gmra.mxu2 %vm414_vm1, %v6280_v4  ;;  %6283 = vtanh.f32 %v2104_v48 }
 0x3a0   :  { %6105 = vmatmul.msk.f32.gmra.mxu3 %vm91_vm0, %v6667_v54  ;;  %v1994_v29 = vadd.f32 %v1993_v44, %v7992_v5 }
 0x3a2   :  { %v1809_v21 = vpop.f32.mrf.mxu2 }
 0x3a3   :  { %v1810_v32 = vadd.f32 %v1809_v21, %v1697_v50  ;;  %v1922_v0 = vpop.f32.mrf.mxu3 }
 0x3a4   :  { %v2106_v35 = vpop.f32.mrf.mxu1 }
 0x3a5   :  { %v1923_v40 = vadd.f32 %v1922_v0, %v1810_v32  ;;  %v2107_v18 = vadd.f32 %v2106_v35, %v1994_v29  ;;  %v6284_v8 = vpop.eup %6283 }
 0x3a7   :  { %v1996_v14 = vpop.f32.mrf.mxu0  ;;  %6073 = vmatmul.msk.f32.gmra.mxu2 %vm414_vm1, %v6282_v9  ;;  %6285 = vtanh.f32 %v2107_v18 }
 0x3a8   :  { %6106 = vmatmul.msk.f32.gmra.mxu3 %vm91_vm0, %v6668_v30  ;;  %v1997_v51 = vadd.f32 %v1996_v14, %v8003_v11  ;;  %v6670_v11 = vld [vmem:[%s10467_s1 + $0x90] sm:$0xff] }
 0x3aa   :  { %v2035_v28 = vpop.f32.mrf.mxu2 }
 0x3ab   :  { %v8152_v19 = vadd.f32 %v2035_v28, %v1923_v40  ;;  %v2414_v39 = vpop.f32.mrf.mxu3 }
 0x3ac   :  { %v2109_v53 = vpop.f32.mrf.mxu1 }
 0x3ad   :  { %v2110_v59 = vadd.f32 %v2109_v53, %v1997_v51  ;;  %v6286_v55 = vpop.eup %6285 }
 0x3af   :  { %v1999_v37 = vpop.f32.mrf.mxu0  ;;  %6074 = vmatmul.msk.f32.gmra.mxu2 %vm414_vm1, %v6284_v8  ;;  %6287 = vtanh.f32 %v2110_v59 }
 0x3b0   :  { %6107 = vmatmul.msk.f32.gmra.mxu3 %vm91_vm0, %v6669_v58  ;;  %v2000_v31 = vadd.f32 %v1999_v37, %v8014_v45  ;;  %v6671_v45 = vld [vmem:[%s10467_s1 + $0x98] sm:$0xff] }
 0x3b2   :  { %v2301_v5 = vpop.f32.mrf.mxu2 }
 0x3b3   :  { %v2415_v36 = vadd.f32 %v2414_v39, %v2301_v5  ;;  %v2417_v25 = vpop.f32.mrf.mxu3 }
 0x3b4   :  { %v2112_v15 = vpop.f32.mrf.mxu1 }
 0x3b5   :  { %v8166_v20 = vadd.f32 %v8163_v3, %v2415_v36  ;;  %v2113_v33 = vadd.f32 %v2112_v15, %v2000_v31  ;;  %v6288_v62 = vpop.eup %6287 }
 0x3b7   :  { %2544 = vst.msk [vmem:[#allocation3] sm:$0xff] %vm2543_vm2, %v8166_v20  ;;  %v2002_v38 = vpop.f32.mrf.mxu0  ;;  %6075 = vmatmul.msk.f32.gmra.mxu2 %vm414_vm1, %v6286_v55  ;;  %6289 = vtanh.f32 %v2113_v33 }
 0x3b8   :  { %6108 = vmatmul.msk.f32.gmra.mxu3 %vm91_vm0, %v6670_v11  ;;  %v2003_v26 = vadd.f32 %v2002_v38, %v8025_v52  ;;  %v6672_v52 = vld [vmem:[%s10467_s1 + $0xa0] sm:$0xff] }
 0x3ba   :  { %v2304_v60 = vpop.f32.mrf.mxu2 }
 0x3bb   :  { %v2418_v47 = vadd.f32 %v2417_v25, %v2304_v60  ;;  %v2420_v56 = vpop.f32.mrf.mxu3 }
 0x3bc   :  { %v2115_v16 = vpop.f32.mrf.mxu1 }
 0x3bd   :  { %v8177_v34 = vadd.f32 %v8163_v3, %v2418_v47  ;;  %v2116_v42 = vadd.f32 %v2115_v16, %v2003_v26  ;;  %v6290_v46 = vpop.eup %6289 }
 0x3bf   :  { %2545 = vst.msk [vmem:[#allocation3 + $0x8] sm:$0xff] %vm2543_vm2, %v8177_v34  ;;  %v2005_v22 = vpop.f32.mrf.mxu0  ;;  %6076 = vmatmul.msk.f32.gmra.mxu2 %vm414_vm1, %v6288_v62  ;;  %6291 = vtanh.f32 %v2116_v42 }
 0x3c0   :  { %6109 = vmatmul.msk.f32.gmra.mxu3 %vm91_vm0, %v6671_v45  ;;  %v2006_v44 = vadd.f32 %v2005_v22, %v8036_v63  ;;  %v6673_v63 = vld [vmem:[%s10467_s1 + $0xa8] sm:$0xff] }
 0x3c2   :  { %v2307_v7 = vpop.f32.mrf.mxu2 }
 0x3c3   :  { %v2421_v49 = vadd.f32 %v2420_v56, %v2307_v7  ;;  %v2423_v27 = vpop.f32.mrf.mxu3 }
 0x3c4   :  { %v2118_v4 = vpop.f32.mrf.mxu1 }
 0x3c5   :  { %v8188_v6 = vadd.f32 %v8163_v3, %v2421_v49  ;;  %v2119_v10 = vadd.f32 %v2118_v4, %v2006_v44  ;;  %v6292_v0 = vpop.eup %6291 }
 0x3c7   :  { %2546 = vst.msk [vmem:[#allocation3 + $0x10] sm:$0xff] %vm2543_vm2, %v8188_v6  ;;  %v2008_v13 = vpop.f32.mrf.mxu0  ;;  %6077 = vmatmul.msk.f32.gmra.mxu2 %vm414_vm1, %v6290_v46  ;;  %6293 = vtanh.f32 %v2119_v10 }
 0x3c8   :  { %6110 = vmatmul.msk.f32.gmra.mxu3 %vm91_vm0, %v6672_v52  ;;  %v2009_v35 = vadd.f32 %v2008_v13, %v8047_v17  ;;  %v6674_v17 = vld [vmem:[%s10467_s1 + $0xb0] sm:$0xff] }
 0x3ca   :  { %v2310_v54 = vpop.f32.mrf.mxu2 }
 0x3cb   :  { %v2424_v24 = vadd.f32 %v2423_v27, %v2310_v54  ;;  %v2426_v50 = vpop.f32.mrf.mxu3 }
 0x3cc   :  { %v2121_v21 = vpop.f32.mrf.mxu1 }
 0x3cd   :  { %v8199_v32 = vadd.f32 %v8163_v3, %v2424_v24  ;;  %v2122_v30 = vadd.f32 %v2121_v21, %v2009_v35  ;;  %v6294_v39 = vpop.eup %6293 }
 0x3cf   :  { %2547 = vst.msk [vmem:[#allocation3 + $0x18] sm:$0xff] %vm2543_vm2, %v8199_v32  ;;  %v2011_v48 = vpop.f32.mrf.mxu0  ;;  %6078 = vmatmul.msk.f32.gmra.mxu2 %vm414_vm1, %v6292_v0  ;;  %6295 = vtanh.f32 %v2122_v30 }
 0x3d0   :  { %6111 = vmatmul.msk.f32.gmra.mxu3 %vm91_vm0, %v6673_v63  ;;  %v2012_v53 = vadd.f32 %v2011_v48, %v8058_v2  ;;  %v6675_v2 = vld [vmem:[%s10467_s1 + $0xb8] sm:$0xff] }
 0x3d2   :  { %v2313_v40 = vpop.f32.mrf.mxu2 }
 0x3d3   :  { %v2427_v9 = vadd.f32 %v2426_v50, %v2313_v40  ;;  %v2429_v14 = vpop.f32.mrf.mxu3 }
 0x3d4   :  { %v2124_v29 = vpop.f32.mrf.mxu1 }
 0x3d5   :  { %v8210_v28 = vadd.f32 %v8163_v3, %v2427_v9  ;;  %v2125_v51 = vadd.f32 %v2124_v29, %v2012_v53  ;;  %v6296_v25 = vpop.eup %6295 }
 0x3d7   :  { %2548 = vst.msk [vmem:[#allocation3 + $0x20] sm:$0xff] %vm2543_vm2, %v8210_v28  ;;  %v2014_v18 = vpop.f32.mrf.mxu0  ;;  %6079 = vmatmul.msk.f32.gmra.mxu2 %vm414_vm1, %v6294_v39  ;;  %6297 = vtanh.f32 %v2125_v51 }
 0x3d8   :  { %6112 = vmatmul.msk.f32.gmra.mxu3 %vm91_vm0, %v6674_v17  ;;  %v2015_v15 = vadd.f32 %v2014_v18, %v8069_v61  ;;  %v6676_v61 = vld [vmem:[%s10467_s1 + $0xc0] sm:$0xff] }
 0x3da   :  { %v2316_v8 = vpop.f32.mrf.mxu2 }
 0x3db   :  { %v2430_v37 = vadd.f32 %v2429_v14, %v2316_v8  ;;  %v2432_v58 = vpop.f32.mrf.mxu3 }
 0x3dc   :  { %v2127_v5 = vpop.f32.mrf.mxu1 }
 0x3dd   :  { %v8221_v36 = vadd.f32 %v8163_v3, %v2430_v37  ;;  %v2128_v31 = vadd.f32 %v2127_v5, %v2015_v15  ;;  %v6298_v56 = vpop.eup %6297 }
 0x3df   :  { %2549 = vst.msk [vmem:[#allocation3 + $0x28] sm:$0xff] %vm2543_vm2, %v8221_v36  ;;  %v2017_v59 = vpop.f32.mrf.mxu0  ;;  %6080 = vmatmul.msk.f32.gmra.mxu2 %vm414_vm1, %v6296_v25  ;;  %2618 = vrot.lane.b32.xlu1 %v8221_v36, %s6748_s24  ;;  %6299 = vtanh.f32 %v2128_v31 }
 0x3e0   :  { %6113 = vmatmul.msk.f32.gmra.mxu3 %vm91_vm0, %v6675_v2  ;;  %v2018_v16 = vadd.f32 %v2017_v59, %v8080_v1  ;;  %v6677_v1 = vld [vmem:[%s10467_s1 + $0xc8] sm:$0xff] }
 0x3e2   :  { %v2319_v55 = vpop.f32.mrf.mxu2 }
 0x3e3   :  { %v2433_v38 = vadd.f32 %v2432_v58, %v2319_v55  ;;  %v2435_v11 = vpop.f32.mrf.mxu3 }
 0x3e4   :  { %v2130_v60 = vpop.f32.mrf.mxu1 }
 0x3e5   :  { %v8234_v47 = vadd.f32 %v8163_v3, %v2433_v38  ;;  %v2131_v26 = vadd.f32 %v2130_v60, %v2018_v16  ;;  %v6300_v27 = vpop.eup %6299 }
 0x3e7   :  { %2550 = vst.msk [vmem:[#allocation3 + $0x30] sm:$0xff] %vm2543_vm2, %v8234_v47  ;;  %v2020_v33 = vpop.f32.mrf.mxu0  ;;  %6081 = vmatmul.msk.f32.gmra.mxu2 %vm414_vm1, %v6298_v56  ;;  %2620 = vrot.lane.b32.xlu2 %v8234_v47, %s6748_s24  ;;  %6301 = vtanh.f32 %v2131_v26 }
 0x3e8   :  { %6114 = vmatmul.msk.f32.gmra.mxu3 %vm91_vm0, %v6676_v61  ;;  %v2021_v4 = vadd.f32 %v2020_v33, %v8091_v23  ;;  %v6678_v23 = vld [vmem:[%s10467_s1 + $0xd0] sm:$0xff] }
 0x3ea   :  { %v2322_v62 = vpop.f32.mrf.mxu2 }
 0x3eb   :  { %v2436_v22 = vadd.f32 %v2435_v11, %v2322_v62  ;;  %v2438_v45 = vpop.f32.mrf.mxu3 }
 0x3ec   :  { %v2133_v7 = vpop.f32.mrf.mxu1 }
 0x3ed   :  { %v8247_v49 = vadd.f32 %v8163_v3, %v2436_v22  ;;  %v2134_v44 = vadd.f32 %v2133_v7, %v2021_v4  ;;  %v6302_v50 = vpop.eup %6301  ;;  %v6683_v4 = vld [vmem:[%s10467_s1 + $0xf8] sm:$0xff] }
 0x3ef   :  { %2551 = vst.msk [vmem:[#allocation3 + $0x38] sm:$0xff] %vm2543_vm2, %v8247_v49  ;;  %6082 = vmatmul.msk.f32.gmra.mxu2 %vm414_vm1, %v6300_v27  ;;  %2622 = vrot.lane.b32.xlu0 %v8247_v49, %s6748_s24  ;;  %v2023_v42 = vpop.f32.mrf.mxu0  ;;  %6303 = vtanh.f32 %v2134_v44 }
 0x3f0   :  { %6115 = vmatmul.msk.f32.gmra.mxu3 %vm91_vm0, %v6677_v1  ;;  %v2024_v10 = vadd.f32 %v2023_v42, %v8102_v43  ;;  %v6679_v43 = vld [vmem:[%s10467_s1 + $0xd8] sm:$0xff] }
 0x3f2   :  { %v2325_v46 = vpop.f32.mrf.mxu2 }
 0x3f3   :  { %v2439_v13 = vadd.f32 %v2438_v45, %v2325_v46  ;;  %v2441_v52 = vpop.f32.mrf.mxu3 }
 0x3f4   :  { %v2136_v54 = vpop.f32.mrf.mxu1 }
 0x3f5   :  { %v8260_v24 = vadd.f32 %v8163_v3, %v2439_v13  ;;  %v2137_v35 = vadd.f32 %v2136_v54, %v2024_v10  ;;  %v6304_v14 = vpop.eup %6303 }
 0x3f7   :  { %2552 = vst.msk [vmem:[#allocation3 + $0x40] sm:$0xff] %vm2543_vm2, %v8260_v24  ;;  %6083 = vmatmul.msk.f32.gmra.mxu2 %vm414_vm1, %v6302_v50  ;;  %2624 = vrot.lane.b32.xlu1 %v8260_v24, %s6748_s24  ;;  %v2026_v0 = vpop.f32.mrf.mxu0  ;;  %6305 = vtanh.f32 %v2137_v35 }
 0x3f8   :  { %6116 = vmatmul.msk.f32.gmra.mxu3 %vm91_vm0, %v6678_v23  ;;  %v2027_v30 = vadd.f32 %v2026_v0, %v8113_v41  ;;  %v6680_v41 = vld [vmem:[%s10467_s1 + $0xe0] sm:$0xff] }
 0x3fa   :  { %v2328_v21 = vpop.f32.mrf.mxu2 }
 0x3fb   :  { %v2442_v48 = vadd.f32 %v2441_v52, %v2328_v21  ;;  %v2444_v63 = vpop.f32.mrf.mxu3 }
 0x3fc   :  { %v2139_v40 = vpop.f32.mrf.mxu1 }
 0x3fd   :  { %v8273_v9 = vadd.f32 %v8163_v3, %v2442_v48  ;;  %v2140_v17 = vadd.f32 %v2139_v40, %v2027_v30  ;;  %v6306_v58 = vpop.eup %6305 }
 0x3ff   :  { %2553 = vst.msk [vmem:[#allocation3 + $0x48] sm:$0xff] %vm2543_vm2, %v8273_v9  ;;  %6084 = vmatmul.msk.f32.gmra.mxu2 %vm414_vm1, %v6304_v14  ;;  %2626 = vrot.lane.b32.xlu2 %v8273_v9, %s6748_s24  ;;  %v2029_v53 = vpop.f32.mrf.mxu0  ;;  %6307 = vtanh.f32 %v2140_v17 }
 0x400   :  { %6117 = vmatmul.msk.f32.gmra.mxu3 %vm91_vm0, %v6679_v43  ;;  %v2030_v51 = vadd.f32 %v2029_v53, %v8124_v12  ;;  %v6681_v12 = vld [vmem:[%s10467_s1 + $0xe8] sm:$0xff] }
 0x402   :  { %v2331_v29 = vpop.f32.mrf.mxu2 }
 0x403   :  { %v2445_v39 = vadd.f32 %v2444_v63, %v2331_v29  ;;  %v2447_v18 = vpop.f32.mrf.mxu3 }
 0x404   :  { %v2142_v37 = vpop.f32.mrf.mxu1 }
 0x405   :  { %v8286_v8 = vadd.f32 %v8163_v3, %v2445_v39  ;;  %v2143_v2 = vadd.f32 %v2142_v37, %v2030_v51  ;;  %v6308_v55 = vpop.eup %6307 }
 0x407   :  { %2554 = vst.msk [vmem:[#allocation3 + $0x50] sm:$0xff] %vm2543_vm2, %v8286_v8  ;;  %6085 = vmatmul.msk.f32.gmra.mxu2 %vm414_vm1, %v6306_v58  ;;  %2628 = vrot.lane.b32.xlu0 %v8286_v8, %s6748_s24  ;;  %v2032_v38 = vpop.f32.mrf.mxu0  ;;  %6309 = vtanh.f32 %v2143_v2  ;;  %v3255_v2 = vld [vmem:[#allocation3 + $0x38] sm:$0xff] }
 0x408   :  { %6118 = vmatmul.msk.f32.gmra.mxu3 %vm91_vm0, %v6680_v41  ;;  %v2033_v31 = vadd.f32 %v2032_v38, %v8135_v57  ;;  %v6682_v57 = vld [vmem:[%s10467_s1 + $0xf0] sm:$0xff]  ;;  %v3257_v41 = vld [vmem:[#allocation3 + $0x48] sm:$0xff] }
 0x40a   :  { %v2334_v5 = vpop.f32.mrf.mxu2 }
 0x40b   :  { %v2448_v25 = vadd.f32 %v2447_v18, %v2334_v5  ;;  %v2450_v59 = vpop.f32.mrf.mxu3 }
 0x40c   :  { %v2145_v11 = vpop.f32.mrf.mxu1 }
 0x40d   :  { %v8299_v15 = vadd.f32 %v8163_v3, %v2448_v25  ;;  %v2146_v61 = vadd.f32 %v2145_v11, %v2033_v31  ;;  %v6310_v62 = vpop.eup %6309  ;;  %v3256_v25 = vld [vmem:[#allocation3 + $0x40] sm:$0xff]  ;;  %v3253_v11 = vld [vmem:[#allocation3 + $0x28] sm:$0xff] }
 0x40e   :  { %v3258_v53 = vld [vmem:[#allocation3 + $0x50] sm:$0xff] }
 0x40f   :  { %2555 = vst.msk [vmem:[#allocation3 + $0x58] sm:$0xff] %vm2543_vm2, %v8299_v15  ;;  %6086 = vmatmul.msk.f32.gmra.mxu2 %vm414_vm1, %v6308_v55  ;;  %2630 = vrot.lane.b32.xlu1 %v8299_v15, %s6748_s24  ;;  %6311 = vtanh.f32 %v2146_v61  ;;  %v3254_v55 = vld [vmem:[#allocation3 + $0x30] sm:$0xff] }
 0x410   :  { %6119 = vmatmul.msk.f32.gmra.mxu3 %vm91_vm0, %v6681_v12  ;;  %v3250_v61 = vld [vmem:[#allocation3 + $0x10] sm:$0xff] }
 0x412   :  { %v2337_v60 = vpop.f32.mrf.mxu2 }
 0x413   :  { %v2451_v56 = vadd.f32 %v2450_v59, %v2337_v60  ;;  %v2453_v33 = vpop.f32.mrf.mxu3  ;;  %v3252_v60 = vld [vmem:[#allocation3 + $0x20] sm:$0xff] }
 0x414   :  { %v2148_v22 = vpop.f32.mrf.mxu1 }
 0x415   :  { %v8312_v16 = vadd.f32 %v8163_v3, %v2451_v56  ;;  %v2149_v27 = vadd.f32 %v2148_v22, %v8152_v19  ;;  %v6312_v42 = vpop.eup %6311  ;;  %v3249_v22 = vld [vmem:[#allocation3 + $0x8] sm:$0xff] }
 0x416   :  { %v3259_v17 = vld [vmem:[#allocation3 + $0x58] sm:$0xff] }
 0x417   :  { %2556 = vst.msk [vmem:[#allocation3 + $0x60] sm:$0xff] %vm2543_vm2, %v8312_v16  ;;  %6087 = vmatmul.msk.f32.gmra.mxu2 %vm414_vm1, %v6310_v62  ;;  %2632 = vrot.lane.b32.xlu2 %v8312_v16, %s6748_s24  ;;  %6313 = vtanh.f32 %v2149_v27 }
 0x418   :  { %6120 = vmatmul.msk.f32.gmra.mxu3 %vm91_vm0, %v6682_v57 }
 0x41a   :  { %v2340_v45 = vpop.f32.mrf.mxu2 }
 0x41b   :  { %v2454_v26 = vadd.f32 %v2453_v33, %v2340_v45  ;;  %v2456_v7 = vpop.f32.mrf.mxu3  ;;  %v3251_v33 = vld [vmem:[#allocation3 + $0x18] sm:$0xff] }
 0x41d   :  { %v8325_v1 = vadd.f32 %v8163_v3, %v2454_v26  ;;  %v6314_v44 = vpop.eup %6313 }
 0x41e   :  { %v3260_v39 = vld [vmem:[#allocation3 + $0x60] sm:$0xff] }
 0x41f   :  { %2557 = vst.msk [vmem:[#allocation3 + $0x68] sm:$0xff] %vm2543_vm2, %v8325_v1  ;;  %6088 = vmatmul.msk.f32.gmra.mxu2 %vm414_vm1, %v6312_v42  ;;  %2634 = vrot.lane.b32.xlu0 %v8325_v1, %s6748_s24 }
 0x420   :  { %6121 = vmatmul.msk.f32.gmra.mxu3 %vm91_vm0, %v6683_v4 }
 0x422   :  { %v2343_v19 = vpop.f32.mrf.mxu2 }
 0x423   :  { %v2457_v46 = vadd.f32 %v2456_v7, %v2343_v19  ;;  %v2459_v13 = vpop.f32.mrf.mxu3  ;;  %v3248_v7 = vld [vmem:[#allocation3] sm:$0xff] }
 0x425   :  { %v8337_v52 = vadd.f32 %v8163_v3, %v2457_v46 }
 0x426   :  { %v3261_v43 = vld [vmem:[#allocation3 + $0x68] sm:$0xff] }
 0x427   :  { %2558 = vst.msk [vmem:[#allocation3 + $0x70] sm:$0xff] %vm2543_vm2, %v8337_v52  ;;  %6089 = vmatmul.msk.f32.gmra.mxu2 %vm414_vm1, %v6314_v44  ;;  %2636 = vrot.lane.b32.xlu1 %v8337_v52, %s6748_s24 }
 0x42a   :  { %v2346_v54 = vpop.f32.mrf.mxu2 }
 0x42b   :  { %v2460_v50 = vadd.f32 %v2459_v13, %v2346_v54  ;;  %v2462_v23 = vpop.f32.mrf.mxu3 }
 0x42d   :  { %v8345_v10 = vadd.f32 %v8163_v3, %v2460_v50 }
 0x42e   :  { %v3262_v40 = vld [vmem:[#allocation3 + $0x70] sm:$0xff] }
 0x42f   :  { %2559 = vst.msk [vmem:[#allocation3 + $0x78] sm:$0xff] %vm2543_vm2, %v8345_v10  ;;  %2638 = vrot.lane.b32.xlu0 %v8345_v10, %s6748_s24 }
 0x432   :  { %v2349_v21 = vpop.f32.mrf.mxu2 }
 0x433   :  { %v2463_v0 = vadd.f32 %v2462_v23, %v2349_v21  ;;  %v2465_v48 = vpop.f32.mrf.mxu3 }
 0x435   :  { %v8352_v63 = vadd.f32 %v8163_v3, %v2463_v0 }
 0x436   :  { %v3263_v35 = vld [vmem:[#allocation3 + $0x78] sm:$0xff] }
 0x437   :  { %2560 = vst.msk [vmem:[#allocation3 + $0x80] sm:$0xff] %vm2543_vm2, %v8352_v63  ;;  %3472 = vmatpush.msrb.mxu0 %v3263_v35 }
 0x439   :  { %3473 = vmatpush.msrb.mxu0 %v3262_v40 }
 0x43a   :  { %v2352_v14 = vpop.f32.mrf.mxu2 }
 0x43b   :  { %v2466_v30 = vadd.f32 %v2465_v48, %v2352_v14  ;;  %3474 = vmatpush.msrb.mxu0 %v3261_v43  ;;  %v2468_v29 = vpop.f32.mrf.mxu3  ;;  %v2992_v43 = vld [vmem:[#allocation4] sm:$0xff] }
 0x43d   :  { %v8357_v18 = vadd.f32 %v8163_v3, %v2466_v30  ;;  %3475 = vmatpush.msrb.mxu0 %v3260_v39 }
 0x43f   :  { %2561 = vst.msk [vmem:[#allocation3 + $0x88] sm:$0xff] %vm2543_vm2, %v8357_v18  ;;  %3476 = vmatpush.msrb.mxu0 %v3259_v17 }
 0x441   :  { %v2621_v37 = vpop.permute.xlu2 %2620  ;;  %3477 = vmatpush.msrb.mxu0 %v3258_v53 }
 0x442   :  { %2710 = vst.msk [vmem:[#allocation3 + $0x130] sm:$0xff] %vm2543_vm2, %v2621_v37  ;;  %v2355_v58 = vpop.f32.mrf.mxu2  ;;  %v3000_v37 = vld [vmem:[#allocation4 + $0x40] sm:$0xff] }
 0x443   :  { %v2469_v51 = vadd.f32 %v2468_v29, %v2355_v58  ;;  %3478 = vmatpush.msrb.mxu0 %v3257_v41  ;;  %v2471_v5 = vpop.f32.mrf.mxu3 }
 0x445   :  { %v8363_v59 = vadd.f32 %v8163_v3, %v2469_v51  ;;  %3479 = vmatpush.msrb.mxu0 %v3256_v25 }
 0x447   :  { %2562 = vst.msk [vmem:[#allocation3 + $0x90] sm:$0xff] %vm2543_vm2, %v8363_v59  ;;  %3480 = vmatpush.msrb.mxu0 %v3255_v2  ;;  %v3008_v2 = vld [vmem:[#allocation4 + $0x80] sm:$0xff] }
 0x449   :  { %3481 = vmatpush.msrb.mxu0 %v3254_v55 }
 0x44a   :  { %v2358_v38 = vpop.f32.mrf.mxu2 }
 0x44b   :  { %v2472_v12 = vadd.f32 %v2471_v5, %v2358_v38  ;;  %3482 = vmatpush.msrb.mxu0 %v3253_v11  ;;  %v2474_v31 = vpop.f32.mrf.mxu3 }
 0x44d   :  { %v8368_v56 = vadd.f32 %v8163_v3, %v2472_v12  ;;  %3483 = vmatpush.msrb.mxu0 %v3252_v60  ;;  %v3016_v60 = vld [vmem:[#allocation4 + $0xc0] sm:$0xff] }
 0x44f   :  { %2563 = vst.msk [vmem:[#allocation3 + $0x98] sm:$0xff] %vm2543_vm2, %v8368_v56  ;;  %3484 = vmatpush.msrb.mxu0 %v3251_v33 }
 0x451   :  { %v2619_v62 = vpop.permute.xlu1 %2618  ;;  %3485 = vmatpush.msrb.mxu0 %v3250_v61 }
 0x452   :  { %2709 = vst.msk [vmem:[#allocation3 + $0x128] sm:$0xff] %vm2543_vm2, %v2619_v62  ;;  %v2361_v57 = vpop.f32.mrf.mxu2 }
 0x453   :  { %v2475_v45 = vadd.f32 %v2474_v31, %v2361_v57  ;;  %3486 = vmatpush.msrb.mxu0 %v3249_v22  ;;  %v2477_v26 = vpop.f32.mrf.mxu3  ;;  %v3024_v22 = vld [vmem:[#allocation4 + $0x100] sm:$0xff] }
 0x455   :  { %v8374_v27 = vadd.f32 %v8163_v3, %v2475_v45  ;;  %3487 = vmatpush.msrb.mxu0 %v3248_v7 }
 0x456   :  { %3488 = vmatmul.f32.vlgmr.msrb.gmra.mxu0 %v2992_v43 }
 0x457   :  { %2564 = vst.msk [vmem:[#allocation3 + $0xa0] sm:$0xff] %vm2543_vm2, %v8374_v27 }
 0x459   :  { %v2627_v42 = vpop.permute.xlu2 %2626 }
 0x45a   :  { %2713 = vst.msk [vmem:[#allocation3 + $0x148] sm:$0xff] %vm2543_vm2, %v2627_v42  ;;  %v2364_v4 = vpop.f32.mrf.mxu2 }
 0x45b   :  { %v2478_v19 = vadd.f32 %v2477_v26, %v2364_v4  ;;  %v2480_v46 = vpop.f32.mrf.mxu3 }
 0x45d   :  { %v8380_v13 = vadd.f32 %v8163_v3, %v2478_v19  ;;  %v3032_v19 = vld [vmem:[#allocation4 + $0x140] sm:$0xff] }
 0x45e   :  { %3491 = vmatmul.f32.gmra.mxu0 %v3000_v37 }
 0x45f   :  { %2565 = vst.msk [vmem:[#allocation3 + $0xa8] sm:$0xff] %vm2543_vm2, %v8380_v13 }
 0x461   :  { %v2623_v44 = vpop.permute.xlu0 %2622 }
 0x462   :  { %2711 = vst.msk [vmem:[#allocation3 + $0x138] sm:$0xff] %vm2543_vm2, %v2623_v44  ;;  %v2367_v54 = vpop.f32.mrf.mxu2 }
 0x463   :  { %v2481_v50 = vadd.f32 %v2480_v46, %v2367_v54  ;;  %v2483_v23 = vpop.f32.mrf.mxu3 }
 0x465   :  { %v8386_v21 = vadd.f32 %v8163_v3, %v2481_v50 }
 0x466   :  { %3494 = vmatmul.f32.gmra.mxu0 %v3008_v2  ;;  %v3056_v2 = vld [vmem:[#allocation4 + $0x200] sm:$0xff] }
 0x467   :  { %2566 = vst.msk [vmem:[#allocation3 + $0xb0] sm:$0xff] %vm2543_vm2, %v8386_v21 }
 0x469   :  { %v2625_v0 = vpop.permute.xlu1 %2624 }
 0x46a   :  { %2712 = vst.msk [vmem:[#allocation3 + $0x140] sm:$0xff] %vm2543_vm2, %v2625_v0  ;;  %v2370_v48 = vpop.f32.mrf.mxu2  ;;  %v3040_v0 = vld [vmem:[#allocation4 + $0x180] sm:$0xff] }
 0x46b   :  { %v2484_v35 = vadd.f32 %v2483_v23, %v2370_v48  ;;  %v2486_v40 = vpop.f32.mrf.mxu3 }
 0x46d   :  { %v8392_v14 = vadd.f32 %v8163_v3, %v2484_v35 }
 0x46e   :  { %3497 = vmatmul.f32.gmra.mxu0 %v3016_v60  ;;  %v3064_v60 = vld [vmem:[#allocation4 + $0x240] sm:$0xff] }
 0x46f   :  { %2567 = vst.msk [vmem:[#allocation3 + $0xb8] sm:$0xff] %vm2543_vm2, %v8392_v14  ;;  %2654 = vrot.lane.b32.xlu0 %v8392_v14, %s6748_s24 }
 0x471   :  { %v2633_v30 = vpop.permute.xlu2 %2632 }
 0x472   :  { %2716 = vst.msk [vmem:[#allocation3 + $0x160] sm:$0xff] %vm2543_vm2, %v2633_v30  ;;  %v2373_v29 = vpop.f32.mrf.mxu2  ;;  %v3048_v30 = vld [vmem:[#allocation4 + $0x1c0] sm:$0xff] }
 0x473   :  { %v2487_v39 = vadd.f32 %v2486_v40, %v2373_v29  ;;  %v2489_v17 = vpop.f32.mrf.mxu3 }
 0x475   :  { %v8400_v53 = vadd.f32 %v8163_v3, %v2487_v39 }
 0x476   :  { %3500 = vmatmul.f32.gmra.mxu0 %v3024_v22  ;;  %v3286_v22 = vld [vmem:[#allocation3 + $0x130] sm:$0xff] }
 0x477   :  { %2568 = vst.msk [vmem:[#allocation3 + $0xc0] sm:$0xff] %vm2543_vm2, %v8400_v53  ;;  %2656 = vrot.lane.b32.xlu1 %v8400_v53, %s6748_s24 }
 0x479   :  { %v2629_v58 = vpop.permute.xlu0 %2628 }
 0x47a   :  { %2714 = vst.msk [vmem:[#allocation3 + $0x150] sm:$0xff] %vm2543_vm2, %v2629_v58  ;;  %v2376_v41 = vpop.f32.mrf.mxu2 }
 0x47b   :  { %v2490_v51 = vadd.f32 %v2489_v17, %v2376_v41  ;;  %v2492_v5 = vpop.f32.mrf.mxu3 }
 0x47d   :  { %v8408_v25 = vadd.f32 %v8163_v3, %v2490_v51 }
 0x47e   :  { %3503 = vmatmul.f32.gmra.mxu0 %v3032_v19 }
 0x47f   :  { %2569 = vst.msk [vmem:[#allocation3 + $0xc8] sm:$0xff] %vm2543_vm2, %v8408_v25  ;;  %2658 = vrot.lane.b32.xlu2 %v8408_v25, %s6748_s24 }
 0x481   :  { %v2631_v55 = vpop.permute.xlu1 %2630 }
 0x482   :  { %2715 = vst.msk [vmem:[#allocation3 + $0x158] sm:$0xff] %vm2543_vm2, %v2631_v55  ;;  %v2379_v38 = vpop.f32.mrf.mxu2 }
 0x483   :  { %v2493_v11 = vadd.f32 %v2492_v5, %v2379_v38  ;;  %v2495_v12 = vpop.f32.mrf.mxu3  ;;  %v3292_v5 = vld [vmem:[#allocation3 + $0x160] sm:$0xff]  ;;  %v3289_v38 = vld [vmem:[#allocation3 + $0x148] sm:$0xff] }
 0x485   :  { %v8416_v31 = vadd.f32 %v8163_v3, %v2493_v11 }
 0x486   :  { %3506 = vmatmul.f32.gmra.mxu0 %v3040_v0  ;;  %v3270_v0 = vld [vmem:[#allocation3 + $0xb0] sm:$0xff] }
 0x487   :  { %2570 = vst.msk [vmem:[#allocation3 + $0xd0] sm:$0xff] %vm2543_vm2, %v8416_v31  ;;  %2660 = vrot.lane.b32.xlu0 %v8416_v31, %s6748_s24 }
 0x489   :  { %v3291_v55 = vld [vmem:[#allocation3 + $0x158] sm:$0xff] }
 0x48a   :  { %v2382_v33 = vpop.f32.mrf.mxu2 }
 0x48b   :  { %v2496_v61 = vadd.f32 %v2495_v12, %v2382_v33  ;;  %v2498_v62 = vpop.f32.mrf.mxu3  ;;  %v3288_v12 = vld [vmem:[#allocation3 + $0x140] sm:$0xff] }
 0x48d   :  { %v8423_v57 = vadd.f32 %v8163_v3, %v2496_v61  ;;  %v3287_v61 = vld [vmem:[#allocation3 + $0x138] sm:$0xff] }
 0x48e   :  { %3509 = vmatmul.f32.gmra.mxu0 %v3048_v30  ;;  %v3274_v19 = vld [vmem:[#allocation3 + $0xd0] sm:$0xff]  ;;  %v3088_v30 = vld [vmem:[#allocation4 + $0x300] sm:$0xff] }
 0x48f   :  { %2571 = vst.msk [vmem:[#allocation3 + $0xd8] sm:$0xff] %vm2543_vm2, %v8423_v57  ;;  %2662 = vrot.lane.b32.xlu1 %v8423_v57, %s6748_s24 }
 0x491   :  { %v2635_v45 = vpop.permute.xlu0 %2634 }
 0x492   :  { %2717 = vst.msk [vmem:[#allocation3 + $0x168] sm:$0xff] %vm2543_vm2, %v2635_v45  ;;  %v2385_v26 = vpop.f32.mrf.mxu2 }
 0x493   :  { %v2499_v7 = vadd.f32 %v2498_v62, %v2385_v26  ;;  %v2501_v42 = vpop.f32.mrf.mxu3  ;;  %v3285_v26 = vld [vmem:[#allocation3 + $0x128] sm:$0xff] }
 0x495   :  { %v8431_v4 = vadd.f32 %v8163_v3, %v2499_v7 }
 0x496   :  { %3512 = vmatmul.f32.gmra.mxu0 %v3056_v2  ;;  %v3275_v7 = vld [vmem:[#allocation3 + $0xd8] sm:$0xff]  ;;  %v3104_v2 = vld [vmem:[#allocation4 + $0x380] sm:$0xff] }
 0x497   :  { %2572 = vst.msk [vmem:[#allocation3 + $0xe0] sm:$0xff] %vm2543_vm2, %v8431_v4  ;;  %2664 = vrot.lane.b32.xlu2 %v8431_v4, %s6748_s24 }
 0x499   :  { %v2637_v46 = vpop.permute.xlu1 %2636  ;;  %v3293_v51 = vld [vmem:[#allocation3 + $0x168] sm:$0xff] }
 0x49a   :  { %2718 = vst.msk [vmem:[#allocation3 + $0x170] sm:$0xff] %vm2543_vm2, %v2637_v46  ;;  %v2388_v44 = vpop.f32.mrf.mxu2  ;;  %v3273_v46 = vld [vmem:[#allocation3 + $0xc8] sm:$0xff] }
 0x49b   :  { %v2502_v54 = vadd.f32 %v2501_v42, %v2388_v44  ;;  %v2504_v23 = vpop.f32.mrf.mxu3  ;;  %v3072_v42 = vld [vmem:[#allocation4 + $0x280] sm:$0xff] }
 0x49c   :  { %v3272_v44 = vld [vmem:[#allocation3 + $0xc0] sm:$0xff] }
 0x49d   :  { %v8439_v50 = vadd.f32 %v8163_v3, %v2502_v54  ;;  %v3271_v54 = vld [vmem:[#allocation3 + $0xb8] sm:$0xff] }
 0x49e   :  { %3515 = vmatmul.f32.gmra.mxu0 %v3064_v60  ;;  %v3276_v45 = vld [vmem:[#allocation3 + $0xe0] sm:$0xff] }
 0x49f   :  { %2573 = vst.msk [vmem:[#allocation3 + $0xe8] sm:$0xff] %vm2543_vm2, %v8439_v50  ;;  %2666 = vrot.lane.b32.xlu0 %v8439_v50, %s6748_s24 }
 0x4a1   :  { %v2639_v48 = vpop.permute.xlu0 %2638  ;;  %v3294_v58 = vld [vmem:[#allocation3 + $0x170] sm:$0xff] }
 0x4a2   :  { %2719 = vst.msk [vmem:[#allocation3 + $0x178] sm:$0xff] %vm2543_vm2, %v2639_v48  ;;  %v2391_v35 = vpop.f32.mrf.mxu2  ;;  %v3269_v48 = vld [vmem:[#allocation3 + $0xa8] sm:$0xff] }
 0x4a3   :  { %v2505_v40 = vadd.f32 %v2504_v23, %v2391_v35  ;;  %v2507_v29 = vpop.f32.mrf.mxu3  ;;  %v3080_v23 = vld [vmem:[#allocation4 + $0x2c0] sm:$0xff] }
 0x4a4   :  { %v3268_v35 = vld [vmem:[#allocation3 + $0xa0] sm:$0xff] }
 0x4a5   :  { %v8447_v43 = vadd.f32 %v8163_v3, %v2505_v40  ;;  %v3267_v40 = vld [vmem:[#allocation3 + $0x98] sm:$0xff] }
 0x4a6   :  { %v3277_v62 = vld [vmem:[#allocation3 + $0xe8] sm:$0xff]  ;;  %3518 = vmatmul.f32.gmra.mxu0 %v3072_v42 }
 0x4a7   :  { %2574 = vst.msk [vmem:[#allocation3 + $0xf0] sm:$0xff] %vm2543_vm2, %v8447_v43  ;;  %2616 = vrot.lane.b32.xlu0 %v8210_v28, %s6748_s24  ;;  %2668 = vrot.lane.b32.xlu1 %v8447_v43, %s6748_s24 }
 0x4a9   :  { %v3295_v39 = vld [vmem:[#allocation3 + $0x178] sm:$0xff] }
 0x4aa   :  { %v2394_v17 = vpop.f32.mrf.mxu2  ;;  %3698 = vmatpush.msrb.mxu2 %v3295_v39  ;;  %v3265_v39 = vld [vmem:[#allocation3 + $0x88] sm:$0xff] }
 0x4ab   :  { %v2508_v37 = vadd.f32 %v2507_v29, %v2394_v17  ;;  %v3266_v29 = vld [vmem:[#allocation3 + $0x90] sm:$0xff]  ;;  %v2993_v17 = vld [vmem:[#allocation4 + $0x8] sm:$0xff] }
 0x4ac   :  { %3699 = vmatpush.msrb.mxu2 %v3294_v58  ;;  %v3096_v58 = vld [vmem:[#allocation4 + $0x340] sm:$0xff] }
 0x4ad   :  { %v8456_v41 = vadd.f32 %v8163_v3, %v2508_v37  ;;  %v3290_v3 = vld [vmem:[#allocation3 + $0x150] sm:$0xff]  ;;  %v3264_v37 = vld [vmem:[#allocation3 + $0x80] sm:$0xff] }
 0x4ae   :  { %3700 = vmatpush.msrb.mxu2 %v3293_v51  ;;  %v3278_v33 = vld [vmem:[#allocation3 + $0xf0] sm:$0xff]  ;;  %3521 = vmatmul.f32.gmra.mxu0 %v3080_v23  ;;  %v3144_v23 = vld [vmem:[#allocation4 + $0x4c0] sm:$0xff] }
 0x4af   :  { %2575 = vst.msk [vmem:[#allocation3 + $0xf8] sm:$0xff] %vm2543_vm2, %v8456_v41  ;;  %2648 = vrot.lane.b32.xlu0 %v8374_v27, %s6748_s24  ;;  %2650 = vrot.lane.b32.xlu1 %v8380_v13, %s6748_s24 }
 0x4b0   :  { %2670 = vrot.lane.b32.xlu2 %v8456_v41, %s6748_s24  ;;  %3701 = vmatpush.msrb.mxu2 %v3292_v5  ;;  %v3001_v5 = vld [vmem:[#allocation4 + $0x48] sm:$0xff] }
 0x4b2   :  { %3702 = vmatpush.msrb.mxu2 %v3291_v55 }
 0x4b4   :  { %3703 = vmatpush.msrb.mxu2 %v3290_v3  ;;  %v3009_v3 = vld [vmem:[#allocation4 + $0x88] sm:$0xff] }
 0x4b6   :  { %3704 = vmatpush.msrb.mxu2 %v3289_v38  ;;  %v3279_v11 = vld [vmem:[#allocation3 + $0xf8] sm:$0xff]  ;;  %3524 = vmatmul.f32.gmra.mxu0 %v3088_v30  ;;  %v3112_v38 = vld [vmem:[#allocation4 + $0x3c0] sm:$0xff] }
 0x4b7   :  { %2610 = vrot.lane.b32.xlu0 %v8177_v34, %s6748_s24  ;;  %2612 = vrot.lane.b32.xlu1 %v8188_v6, %s6748_s24 }
 0x4b8   :  { %2652 = vrot.lane.b32.xlu2 %v8386_v21, %s6748_s24  ;;  %3585 = vmatpush.msrb.mxu1 %v3279_v11 }
 0x4b9   :  { %3705 = vmatpush.msrb.mxu2 %v3288_v12  ;;  %v3017_v12 = vld [vmem:[#allocation4 + $0xc8] sm:$0xff] }
 0x4ba   :  { %3586 = vmatpush.msrb.mxu1 %v3278_v33  ;;  %v3120_v33 = vld [vmem:[#allocation4 + $0x400] sm:$0xff] }
 0x4bb   :  { %3706 = vmatpush.msrb.mxu2 %v3287_v61 }
 0x4bc   :  { %3587 = vmatpush.msrb.mxu1 %v3277_v62  ;;  %v3025_v62 = vld [vmem:[#allocation4 + $0x108] sm:$0xff] }
 0x4bd   :  { %3707 = vmatpush.msrb.mxu2 %v3286_v22 }
 0x4be   :  { %3588 = vmatpush.msrb.mxu1 %v3276_v45  ;;  %3527 = vmatmul.f32.gmra.mxu0 %v3096_v58  ;;  %v3128_v45 = vld [vmem:[#allocation4 + $0x440] sm:$0xff] }
 0x4bf   :  { %3708 = vmatpush.msrb.mxu2 %v3285_v26  ;;  %2642 = vrot.lane.b32.xlu0 %v8357_v18, %s6748_s24  ;;  %v3160_v58 = vld [vmem:[#allocation4 + $0x540] sm:$0xff] }
 0x4c0   :  { %2644 = vrot.lane.b32.xlu1 %v8363_v59, %s6748_s24  ;;  %2614 = vrot.lane.b32.xlu2 %v8199_v32, %s6748_s24 }
 0x4c1   :  { %3589 = vmatpush.msrb.mxu1 %v3275_v7  ;;  %v3033_v7 = vld [vmem:[#allocation4 + $0x148] sm:$0xff] }
 0x4c3   :  { %3590 = vmatpush.msrb.mxu1 %v3274_v19  ;;  %v3136_v19 = vld [vmem:[#allocation4 + $0x480] sm:$0xff] }
 0x4c5   :  { %3591 = vmatpush.msrb.mxu1 %v3273_v46 }
 0x4c6   :  { %3530 = vmatmul.f32.gmra.mxu0 %v3104_v2 }
 0x4c7   :  { %3592 = vmatpush.msrb.mxu1 %v3272_v44  ;;  %2762 = vrot.lane.b32.xlu0 %v8325_v1, %s6746_s2  ;;  %v3041_v44 = vld [vmem:[#allocation4 + $0x188] sm:$0xff] }
 0x4c8   :  { %2640 = vrot.lane.b32.xlu1 %v8352_v63, %s6748_s24  ;;  %2646 = vrot.lane.b32.xlu2 %v8368_v56, %s6748_s24 }
 0x4c9   :  { %3593 = vmatpush.msrb.mxu1 %v3271_v54 }
 0x4cb   :  { %3594 = vmatpush.msrb.mxu1 %v3270_v0 }
 0x4cd   :  { %3595 = vmatpush.msrb.mxu1 %v3269_v48  ;;  %v3049_v48 = vld [vmem:[#allocation4 + $0x1c8] sm:$0xff] }
 0x4ce   :  { %3533 = vmatmul.f32.gmra.mxu0 %v3112_v38  ;;  %v3168_v38 = vld [vmem:[#allocation4 + $0x580] sm:$0xff] }
 0x4cf   :  { %3596 = vmatpush.msrb.mxu1 %v3268_v35  ;;  %2792 = vrot.lane.b32.xlu0 %v8431_v4, %s6746_s2 }
 0x4d0   :  { %2764 = vrot.lane.b32.xlu1 %v8337_v52, %s6746_s2  ;;  %2608 = vrot.lane.b32.xlu2 %v8166_v20, %s6748_s24 }
 0x4d1   :  { %3597 = vmatpush.msrb.mxu1 %v3267_v40  ;;  %v3152_v40 = vld [vmem:[#allocation4 + $0x500] sm:$0xff] }
 0x4d3   :  { %3598 = vmatpush.msrb.mxu1 %v3266_v29  ;;  %v8511_v60 = vpop.f32.mrf.mxu0 }
 0x4d5   :  { %3599 = vmatpush.msrb.mxu1 %v3265_v39 }
 0x4d6   :  { %3536 = vmatmul.f32.gmra.mxu0 %v3120_v33 }
 0x4d7   :  { %3600 = vmatpush.msrb.mxu1 %v3264_v37  ;;  %2756 = vrot.lane.b32.xlu0 %v8286_v8, %s6746_s2 }
 0x4d8   :  { %3601 = vmatmul.f32.vlgmr.msrb.gmra.mxu1 %v2993_v17  ;;  %2794 = vrot.lane.b32.xlu1 %v8439_v50, %s6746_s2  ;;  %v3057_v17 = vld [vmem:[#allocation4 + $0x208] sm:$0xff] }
 0x4d9   :  { %2766 = vrot.lane.b32.xlu2 %v8345_v10, %s6746_s2  ;;  %v2659_v51 = vpop.permute.xlu2 %2658 }
 0x4da   :  { %2729 = vst.msk [vmem:[#allocation3 + $0x1c8] sm:$0xff] %vm2543_vm2, %v2659_v51 }
 0x4db   :  { %v8520_v22 = vpop.f32.mrf.mxu0 }
 0x4de   :  { %3539 = vmatmul.f32.gmra.mxu0 %v3128_v45 }
 0x4df   :  { %2786 = vrot.lane.b32.xlu0 %v8408_v25, %s6746_s2 }
 0x4e0   :  { %3604 = vmatmul.f32.gmra.mxu1 %v3001_v5  ;;  %2758 = vrot.lane.b32.xlu1 %v8299_v15, %s6746_s2 }
 0x4e1   :  { %2796 = vrot.lane.b32.xlu2 %v8447_v43, %s6746_s2  ;;  %v2655_v55 = vpop.permute.xlu0 %2654 }
 0x4e2   :  { %2727 = vst.msk [vmem:[#allocation3 + $0x1b8] sm:$0xff] %vm2543_vm2, %v2655_v55  ;;  %v3065_v55 = vld [vmem:[#allocation4 + $0x248] sm:$0xff] }
 0x4e3   :  { %v8529_v42 = vpop.f32.mrf.mxu0 }
 0x4e6   :  { %3542 = vmatmul.f32.gmra.mxu0 %v3136_v19 }
 0x4e7   :  { %2750 = vrot.lane.b32.xlu0 %v8247_v49, %s6746_s2 }
 0x4e8   :  { %3607 = vmatmul.f32.gmra.mxu1 %v3009_v3  ;;  %2788 = vrot.lane.b32.xlu1 %v8416_v31, %s6746_s2 }
 0x4e9   :  { %2760 = vrot.lane.b32.xlu2 %v8312_v16, %s6746_s2  ;;  %v2657_v11 = vpop.permute.xlu1 %2656 }
 0x4ea   :  { %2728 = vst.msk [vmem:[#allocation3 + $0x1c0] sm:$0xff] %vm2543_vm2, %v2657_v11 }
 0x4eb   :  { %v8538_v54 = vpop.f32.mrf.mxu0 }
 0x4ee   :  { %3545 = vmatmul.f32.gmra.mxu0 %v3144_v23  ;;  %v3176_v23 = vld [vmem:[#allocation4 + $0x5c0] sm:$0xff] }
 0x4ef   :  { %2780 = vrot.lane.b32.xlu0 %v8386_v21, %s6746_s2 }
 0x4f0   :  { %3610 = vmatmul.f32.gmra.mxu1 %v3017_v12  ;;  %2752 = vrot.lane.b32.xlu1 %v8260_v24, %s6746_s2 }
 0x4f1   :  { %2790 = vrot.lane.b32.xlu2 %v8423_v57, %s6746_s2  ;;  %v2665_v61 = vpop.permute.xlu2 %2664 }
 0x4f2   :  { %2732 = vst.msk [vmem:[#allocation3 + $0x1e0] sm:$0xff] %vm2543_vm2, %v2665_v61 }
 0x4f3   :  { %v8547_v35 = vpop.f32.mrf.mxu0 }
 0x4f6   :  { %3548 = vmatmul.f32.gmra.mxu0 %v3152_v40 }
 0x4f7   :  { %2798 = vrot.lane.b32.xlu0 %v8456_v41, %s6746_s2 }
 0x4f8   :  { %3613 = vmatmul.f32.gmra.mxu1 %v3025_v62  ;;  %2782 = vrot.lane.b32.xlu1 %v8392_v14, %s6746_s2 }
 0x4f9   :  { %2754 = vrot.lane.b32.xlu2 %v8273_v9, %s6746_s2  ;;  %v2661_v26 = vpop.permute.xlu0 %2660 }
 0x4fa   :  { %2730 = vst.msk [vmem:[#allocation3 + $0x1d0] sm:$0xff] %vm2543_vm2, %v2661_v26 }
 0x4fb   :  { %v8557_v37 = vpop.f32.mrf.mxu0 }
 0x4fe   :  { %3551 = vmatmul.f32.gmra.mxu0 %v3160_v58 }
 0x4ff   :  { %2744 = vrot.lane.b32.xlu0 %v8210_v28, %s6746_s2 }
 0x500   :  { %3616 = vmatmul.f32.gmra.mxu1 %v3033_v7  ;;  %2746 = vrot.lane.b32.xlu1 %v8221_v36, %s6746_s2  ;;  %v3073_v7 = vld [vmem:[#allocation4 + $0x288] sm:$0xff] }
 0x501   :  { %2784 = vrot.lane.b32.xlu2 %v8400_v53, %s6746_s2  ;;  %v2663_v46 = vpop.permute.xlu1 %2662 }
 0x502   :  { %2731 = vst.msk [vmem:[#allocation3 + $0x1d8] sm:$0xff] %vm2543_vm2, %v2663_v46  ;;  %v3308_v46 = vld [vmem:[#allocation3 + $0x1e0] sm:$0xff] }
 0x503   :  { %v8568_v3 = vpop.f32.mrf.mxu0 }
 0x506   :  { %3554 = vmatmul.f32.gmra.mxu0 %v3168_v38 }
 0x507   :  { %2774 = vrot.lane.b32.xlu0 %v8368_v56, %s6746_s2 }
 0x508   :  { %3619 = vmatmul.f32.gmra.mxu1 %v3041_v44  ;;  %2776 = vrot.lane.b32.xlu1 %v8374_v27, %s6746_s2 }
 0x509   :  { %2748 = vrot.lane.b32.xlu2 %v8234_v47, %s6746_s2  ;;  %v3307_v44 = vld [vmem:[#allocation3 + $0x1d8] sm:$0xff] }
 0x50a   :  { %v2671_v0 = vpop.permute.xlu2 %2670 }
 0x50b   :  { %2735 = vst.msk [vmem:[#allocation3 + $0x1f8] sm:$0xff] %vm2543_vm2, %v2671_v0  ;;  %v8579_v19 = vpop.f32.mrf.mxu0 }
 0x50e   :  { %3557 = vmatmul.f32.gmra.mxu0 %v3176_v23 }
 0x50f   :  { %2738 = vrot.lane.b32.xlu0 %v8177_v34, %s6746_s2 }
 0x510   :  { %3622 = vmatmul.f32.gmra.mxu1 %v3049_v48  ;;  %2740 = vrot.lane.b32.xlu1 %v8188_v6, %s6746_s2 }
 0x511   :  { %2778 = vrot.lane.b32.xlu2 %v8380_v13, %s6746_s2  ;;  %v2667_v30 = vpop.permute.xlu0 %2666 }
 0x512   :  { %2733 = vst.msk [vmem:[#allocation3 + $0x1e8] sm:$0xff] %vm2543_vm2, %v2667_v30  ;;  %v2653_v29 = vpop.permute.xlu2 %2652  ;;  %v3311_v39 = vld [vmem:[#allocation3 + $0x1f8] sm:$0xff]  ;;  %v3306_v30 = vld [vmem:[#allocation3 + $0x1d0] sm:$0xff] }
 0x513   :  { %2726 = vst.msk [vmem:[#allocation3 + $0x1b0] sm:$0xff] %vm2543_vm2, %v2653_v29  ;;  %3811 = vmatpush.msra.mxu3 %v3311_v39  ;;  %v3305_v29 = vld [vmem:[#allocation3 + $0x1c8] sm:$0xff]  ;;  %v8590_v58 = vpop.f32.mrf.mxu0 }
 0x514   :  { %v3081_v39 = vld [vmem:[#allocation4 + $0x2c8] sm:$0xff] }
 0x517   :  { %2768 = vrot.lane.b32.xlu0 %v8352_v63, %s6746_s2 }
 0x518   :  { %3625 = vmatmul.f32.gmra.mxu1 %v3057_v17  ;;  %2770 = vrot.lane.b32.xlu1 %v8357_v18, %s6746_s2  ;;  %v3304_v17 = vld [vmem:[#allocation3 + $0x1c0] sm:$0xff] }
 0x519   :  { %2742 = vrot.lane.b32.xlu2 %v8199_v32, %s6746_s2  ;;  %v2617_v51 = vpop.permute.xlu0 %2616  ;;  %v2669_v5 = vpop.permute.xlu1 %2668  ;;  %v3309_v26 = vld [vmem:[#allocation3 + $0x1e8] sm:$0xff] }
 0x51a   :  { %2708 = vst.msk [vmem:[#allocation3 + $0x120] sm:$0xff] %vm2543_vm2, %v2617_v51  ;;  %v2615_v2 = vpop.permute.xlu2 %2614  ;;  %v3303_v51 = vld [vmem:[#allocation3 + $0x1b8] sm:$0xff] }
 0x51b   :  { %2734 = vst.msk [vmem:[#allocation3 + $0x1f0] sm:$0xff] %vm2543_vm2, %v2669_v5  ;;  %v3184_v5 = vld [vmem:[#allocation4 + $0x600] sm:$0xff] }
 0x51c   :  { %2707 = vst.msk [vmem:[#allocation3 + $0x118] sm:$0xff] %vm2543_vm2, %v2615_v2  ;;  %3560 = vmatmul.f32.gmra.mxu0 %v3184_v5  ;;  %v3002_v5 = vld [vmem:[#allocation4 + $0x50] sm:$0xff] }
 0x51f   :  { %2888 = vrot.lane.b32.xlu0 %v8312_v16, %s6749_s22 }
 0x520   :  { %3628 = vmatmul.f32.gmra.mxu1 %v3065_v55  ;;  %2894 = vrot.lane.b32.xlu1 %v8345_v10, %s6749_s22 }
 0x521   :  { %2772 = vrot.lane.b32.xlu2 %v8363_v59, %s6746_s2  ;;  %v2649_v11 = vpop.permute.xlu0 %2648  ;;  %v2651_v12 = vpop.permute.xlu1 %2650  ;;  %v3284_v33 = vld [vmem:[#allocation3 + $0x120] sm:$0xff] }
 0x522   :  { %2724 = vst.msk [vmem:[#allocation3 + $0x1a0] sm:$0xff] %vm2543_vm2, %v2649_v11  ;;  %v2647_v61 = vpop.permute.xlu2 %2646  ;;  %3709 = vmatpush.msrb.mxu2 %v3284_v33  ;;  %v3310_v62 = vld [vmem:[#allocation3 + $0x1f0] sm:$0xff] }
 0x523   :  { %2725 = vst.msk [vmem:[#allocation3 + $0x1a8] sm:$0xff] %vm2543_vm2, %v2651_v12  ;;  %3812 = vmatpush.msra.mxu3 %v3310_v62  ;;  %v3283_v45 = vld [vmem:[#allocation3 + $0x118] sm:$0xff]  ;;  %v3302_v11 = vld [vmem:[#allocation3 + $0x1b0] sm:$0xff]  ;;  %v3089_v62 = vld [vmem:[#allocation4 + $0x308] sm:$0xff] }
 0x524   :  { %2723 = vst.msk [vmem:[#allocation3 + $0x198] sm:$0xff] %vm2543_vm2, %v2647_v61  ;;  %3710 = vmatpush.msrb.mxu2 %v3283_v45 }
 0x525   :  { %3813 = vmatpush.msra.mxu3 %v3309_v26 }
 0x527   :  { %3814 = vmatpush.msra.mxu3 %v3308_v46  ;;  %2920 = vrot.lane.b32.xlu0 %v8431_v4, %s6749_s22  ;;  %v2994_v46 = vld [vmem:[#allocation4 + $0x10] sm:$0xff] }
 0x528   :  { %3631 = vmatmul.f32.gmra.mxu1 %v3073_v7  ;;  %2890 = vrot.lane.b32.xlu1 %v8325_v1, %s6749_s22  ;;  %v8601_v7 = vpop.f32.mrf.mxu0 }
 0x529   :  { %2736 = vrot.lane.b32.xlu2 %v8166_v20, %s6746_s2  ;;  %3815 = vmatpush.msra.mxu3 %v3307_v44  ;;  %v2611_v0 = vpop.permute.xlu0 %2610  ;;  %v2613_v48 = vpop.permute.xlu1 %2612  ;;  %v3300_v26 = vld [vmem:[#allocation3 + $0x1a0] sm:$0xff] }
 0x52a   :  { %2705 = vst.msk [vmem:[#allocation3 + $0x108] sm:$0xff] %vm2543_vm2, %v2611_v0  ;;  %v2609_v40 = vpop.permute.xlu2 %2608  ;;  %v3301_v61 = vld [vmem:[#allocation3 + $0x1a8] sm:$0xff]  ;;  %v3192_v44 = vld [vmem:[#allocation4 + $0x640] sm:$0xff] }
 0x52b   :  { %2706 = vst.msk [vmem:[#allocation3 + $0x110] sm:$0xff] %vm2543_vm2, %v2613_v48  ;;  %3816 = vmatpush.msra.mxu3 %v3306_v30  ;;  %v3299_v23 = vld [vmem:[#allocation3 + $0x198] sm:$0xff]  ;;  %3563 = vmatmul.f32.gmra.mxu0 %v3192_v44  ;;  %v3208_v44 = vld [vmem:[#allocation4 + $0x6c0] sm:$0xff] }
 0x52c   :  { %2704 = vst.msk [vmem:[#allocation3 + $0x100] sm:$0xff] %vm2543_vm2, %v2609_v40 }
 0x52d   :  { %3817 = vmatpush.msra.mxu3 %v3305_v29 }
 0x52f   :  { %3818 = vmatpush.msra.mxu3 %v3304_v17  ;;  %2882 = vrot.lane.b32.xlu0 %v8273_v9, %s6749_s22  ;;  %v3097_v17 = vld [vmem:[#allocation4 + $0x348] sm:$0xff] }
 0x530   :  { %3634 = vmatmul.f32.gmra.mxu1 %v3081_v39  ;;  %2922 = vrot.lane.b32.xlu1 %v8439_v50, %s6749_s22 }
 0x531   :  { %2892 = vrot.lane.b32.xlu2 %v8337_v52, %s6749_s22  ;;  %3819 = vmatpush.msra.mxu3 %v3303_v51  ;;  %v2643_v2 = vpop.permute.xlu0 %2642  ;;  %v3281_v33 = vld [vmem:[#allocation3 + $0x108] sm:$0xff]  ;;  %v8612_v51 = vpop.f32.mrf.mxu0 }
 0x532   :  { %2721 = vst.msk [vmem:[#allocation3 + $0x188] sm:$0xff] %vm2543_vm2, %v2643_v2  ;;  %v2645_v55 = vpop.permute.xlu1 %2644  ;;  %v3282_v38 = vld [vmem:[#allocation3 + $0x110] sm:$0xff]  ;;  %v3200_v2 = vld [vmem:[#allocation4 + $0x680] sm:$0xff] }
 0x533   :  { %2722 = vst.msk [vmem:[#allocation3 + $0x190] sm:$0xff] %vm2543_vm2, %v2645_v55  ;;  %v2767_v12 = vpop.permute.xlu2 %2766  ;;  %3711 = vmatpush.msrb.mxu2 %v3282_v38  ;;  %3820 = vmatpush.msra.mxu3 %v3302_v11  ;;  %v3280_v45 = vld [vmem:[#allocation3 + $0x100] sm:$0xff]  ;;  %v2995_v38 = vld [vmem:[#allocation4 + $0x18] sm:$0xff] }
 0x534   :  { %2847 = vst.msk [vmem:[#allocation3 + $0x278] sm:$0xff] %vm2543_vm2, %v2767_v12  ;;  %3566 = vmatmul.f32.gmra.mxu0 %v3200_v2  ;;  %v3011_v2 = vld [vmem:[#allocation4 + $0x98] sm:$0xff] }
 0x535   :  { %3712 = vmatpush.msrb.mxu2 %v3281_v33  ;;  %3821 = vmatpush.msra.mxu3 %v3301_v61  ;;  %v3105_v61 = vld [vmem:[#allocation4 + $0x388] sm:$0xff] }
 0x537   :  { %3713 = vmatpush.msrb.mxu2 %v3280_v45  ;;  %3822 = vmatpush.msra.mxu3 %v3300_v26  ;;  %v3010_v45 = vld [vmem:[#allocation4 + $0x90] sm:$0xff] }
 0x538   :  { %3637 = vmatmul.f32.gmra.mxu1 %v3089_v62  ;;  %2884 = vrot.lane.b32.xlu1 %v8286_v8, %s6749_s22 }
 0x539   :  { %2914 = vrot.lane.b32.xlu0 %v8408_v25, %s6749_s22  ;;  %2924 = vrot.lane.b32.xlu2 %v8447_v43, %s6749_s22  ;;  %v2763_v0 = vpop.permute.xlu0 %2762  ;;  %v3297_v39 = vld [vmem:[#allocation3 + $0x188] sm:$0xff]  ;;  %v8623_v62 = vpop.f32.mrf.mxu0 }
 0x53a   :  { %3714 = vmatmul.f32.vlgmr.msrb.gmra.mxu2 %v2994_v46  ;;  %3823 = vmatpush.msra.mxu3 %v3299_v23  ;;  %2845 = vst.msk [vmem:[#allocation3 + $0x268] sm:$0xff] %vm2543_vm2, %v2763_v0  ;;  %v2641_v48 = vpop.permute.xlu1 %2640  ;;  %v3298_v40 = vld [vmem:[#allocation3 + $0x190] sm:$0xff]  ;;  %v3003_v46 = vld [vmem:[#allocation4 + $0x58] sm:$0xff] }
 0x53b   :  { %2720 = vst.msk [vmem:[#allocation3 + $0x180] sm:$0xff] %vm2543_vm2, %v2641_v48  ;;  %v2797_v30 = vpop.permute.xlu2 %2796  ;;  %v3327_v29 = vld [vmem:[#allocation3 + $0x278] sm:$0xff] }
 0x53c   :  { %2862 = vst.msk [vmem:[#allocation3 + $0x2f0] sm:$0xff] %vm2543_vm2, %v2797_v30  ;;  %3824 = vmatpush.msra.mxu3 %v3298_v40  ;;  %3924 = vmatpush.msra.mxu0 %v3327_v29  ;;  %v3113_v30 = vld [vmem:[#allocation4 + $0x3c8] sm:$0xff] }
 0x53d   :  { %3569 = vmatmul.f32.gmra.mxu0 %v3208_v44  ;;  %v3224_v44 = vld [vmem:[#allocation4 + $0x740] sm:$0xff] }
 0x53e   :  { %3825 = vmatpush.msra.mxu3 %v3297_v39 }
 0x540   :  { %3640 = vmatmul.f32.gmra.mxu1 %v3097_v17  ;;  %2916 = vrot.lane.b32.xlu1 %v8416_v31, %s6749_s22  ;;  %v3018_v17 = vld [vmem:[#allocation4 + $0xd0] sm:$0xff] }
 0x541   :  { %2876 = vrot.lane.b32.xlu0 %v8234_v47, %s6749_s22  ;;  %2886 = vrot.lane.b32.xlu2 %v8299_v15, %s6749_s22  ;;  %v2793_v55 = vpop.permute.xlu0 %2792  ;;  %v3325_v40 = vld [vmem:[#allocation3 + $0x268] sm:$0xff]  ;;  %v8634_v39 = vpop.f32.mrf.mxu0 }
 0x542   :  { %3717 = vmatmul.f32.gmra.mxu2 %v3002_v5  ;;  %2860 = vst.msk [vmem:[#allocation3 + $0x2e0] sm:$0xff] %vm2543_vm2, %v2793_v55  ;;  %v2765_v11 = vpop.permute.xlu1 %2764  ;;  %v3296_v12 = vld [vmem:[#allocation3 + $0x180] sm:$0xff] }
 0x543   :  { %2846 = vst.msk [vmem:[#allocation3 + $0x270] sm:$0xff] %vm2543_vm2, %v2765_v11  ;;  %v2761_v33 = vpop.permute.xlu2 %2760  ;;  %3826 = vmatpush.msra.mxu3 %v3296_v12  ;;  %v3216_v55 = vld [vmem:[#allocation4 + $0x700] sm:$0xff] }
 0x544   :  { %2844 = vst.msk [vmem:[#allocation3 + $0x260] sm:$0xff] %vm2543_vm2, %v2761_v33  ;;  %3827 = vmatmul.f32.vlgmr.msra.gmra.mxu3 %v2995_v38  ;;  %v3121_v33 = vld [vmem:[#allocation4 + $0x408] sm:$0xff] }
 0x545   :  { %3572 = vmatmul.f32.gmra.mxu0 %v3216_v55 }
 0x548   :  { %3643 = vmatmul.f32.gmra.mxu1 %v3105_v61  ;;  %2878 = vrot.lane.b32.xlu1 %v8247_v49, %s6749_s22 }
 0x549   :  { %2926 = vrot.lane.b32.xlu0 %v8456_v41, %s6749_s22  ;;  %2918 = vrot.lane.b32.xlu2 %v8423_v57, %s6749_s22  ;;  %v2757_v26 = vpop.permute.xlu0 %2756  ;;  %v8647_v61 = vpop.f32.mrf.mxu0 }
 0x54a   :  { %3720 = vmatmul.f32.gmra.mxu2 %v3010_v45  ;;  %2842 = vst.msk [vmem:[#allocation3 + $0x250] sm:$0xff] %vm2543_vm2, %v2757_v26  ;;  %v2795_v23 = vpop.permute.xlu1 %2794  ;;  %v3326_v0 = vld [vmem:[#allocation3 + $0x270] sm:$0xff] }
 0x54b   :  { %2861 = vst.msk [vmem:[#allocation3 + $0x2e8] sm:$0xff] %vm2543_vm2, %v2795_v23  ;;  %v2791_v48 = vpop.permute.xlu2 %2790  ;;  %3925 = vmatpush.msra.mxu0 %v3326_v0  ;;  %v3324_v29 = vld [vmem:[#allocation3 + $0x260] sm:$0xff]  ;;  %v3026_v45 = vld [vmem:[#allocation4 + $0x110] sm:$0xff] }
 0x54c   :  { %2859 = vst.msk [vmem:[#allocation3 + $0x2d8] sm:$0xff] %vm2543_vm2, %v2791_v48  ;;  %3830 = vmatmul.f32.gmra.mxu3 %v3003_v46  ;;  %v3019_v46 = vld [vmem:[#allocation4 + $0xd8] sm:$0xff] }
 0x54d   :  { %3926 = vmatpush.msra.mxu0 %v3325_v40 }
 0x54e   :  { %3575 = vmatmul.f32.gmra.mxu0 %v3224_v44 }
 0x54f   :  { %3927 = vmatpush.msra.mxu0 %v3324_v29  ;;  %v3129_v29 = vld [vmem:[#allocation4 + $0x448] sm:$0xff] }
 0x550   :  { %3646 = vmatmul.f32.gmra.mxu1 %v3113_v30  ;;  %2910 = vrot.lane.b32.xlu1 %v8392_v14, %s6749_s22 }
 0x551   :  { %2908 = vrot.lane.b32.xlu0 %v8386_v21, %s6749_s22  ;;  %2880 = vrot.lane.b32.xlu2 %v8260_v24, %s6749_s22  ;;  %v2787_v5 = vpop.permute.xlu0 %2786  ;;  %v3322_v40 = vld [vmem:[#allocation3 + $0x250] sm:$0xff] }
 0x552   :  { %3723 = vmatmul.f32.gmra.mxu2 %v3018_v17  ;;  %2857 = vst.msk [vmem:[#allocation3 + $0x2c8] sm:$0xff] %vm2543_vm2, %v2787_v5  ;;  %v2759_v38 = vpop.permute.xlu1 %2758  ;;  %v8660_v5 = vpop.f32.mrf.mxu0 }
 0x553   :  { %2843 = vst.msk [vmem:[#allocation3 + $0x258] sm:$0xff] %vm2543_vm2, %v2759_v38  ;;  %v2755_v11 = vpop.permute.xlu2 %2754  ;;  %v3027_v38 = vld [vmem:[#allocation4 + $0x118] sm:$0xff] }
 0x554   :  { %2841 = vst.msk [vmem:[#allocation3 + $0x248] sm:$0xff] %vm2543_vm2, %v2755_v11  ;;  %3833 = vmatmul.f32.gmra.mxu3 %v3011_v2  ;;  %v3034_v2 = vld [vmem:[#allocation4 + $0x150] sm:$0xff]  ;;  %v3232_v11 = vld [vmem:[#allocation4 + $0x780] sm:$0xff] }
 0x555   :  { %v8645_v12 = vpop.f32.mrf.mxu1 }
 0x556   :  { %3578 = vmatmul.f32.gmra.mxu0 %v3232_v11  ;;  %v3145_v11 = vld [vmem:[#allocation4 + $0x4c8] sm:$0xff] }
 0x558   :  { %3649 = vmatmul.f32.gmra.mxu1 %v3121_v33  ;;  %2872 = vrot.lane.b32.xlu1 %v8210_v28, %s6749_s22 }
 0x559   :  { %2870 = vrot.lane.b32.xlu0 %v8199_v32, %s6749_s22  ;;  %2912 = vrot.lane.b32.xlu2 %v8400_v53, %s6749_s22  ;;  %v2751_v26 = vpop.permute.xlu0 %2750 }
 0x55a   :  { %3726 = vmatmul.f32.gmra.mxu2 %v3026_v45  ;;  %2839 = vst.msk [vmem:[#allocation3 + $0x238] sm:$0xff] %vm2543_vm2, %v2751_v26  ;;  %v2789_v23 = vpop.permute.xlu1 %2788  ;;  %v3323_v0 = vld [vmem:[#allocation3 + $0x258] sm:$0xff]  ;;  %v8673_v44 = vpop.f32.mrf.mxu0 }
 0x55b   :  { %2858 = vst.msk [vmem:[#allocation3 + $0x2d0] sm:$0xff] %vm2543_vm2, %v2789_v23  ;;  %v2785_v48 = vpop.permute.xlu2 %2784  ;;  %3928 = vmatpush.msra.mxu0 %v3323_v0  ;;  %v3321_v17 = vld [vmem:[#allocation3 + $0x248] sm:$0xff]  ;;  %v3042_v23 = vld [vmem:[#allocation4 + $0x190] sm:$0xff] }
 0x55c   :  { %2856 = vst.msk [vmem:[#allocation3 + $0x2c0] sm:$0xff] %vm2543_vm2, %v2785_v48  ;;  %3836 = vmatmul.f32.gmra.mxu3 %v3019_v46  ;;  %v3137_v46 = vld [vmem:[#allocation4 + $0x488] sm:$0xff]  ;;  %v3035_v48 = vld [vmem:[#allocation4 + $0x158] sm:$0xff] }
 0x55d   :  { %v8658_v30 = vpop.f32.mrf.mxu1  ;;  %3929 = vmatpush.msra.mxu0 %v3322_v40  ;;  %v3240_v40 = vld [vmem:[#allocation4 + $0x7c0] sm:$0xff] }
 0x55e   :  { %3581 = vmatmul.f32.gmra.mxu0 %v3240_v40 }
 0x55f   :  { %3930 = vmatpush.msra.mxu0 %v3321_v17 }
 0x560   :  { %3652 = vmatmul.f32.gmra.mxu1 %v3129_v29  ;;  %2904 = vrot.lane.b32.xlu1 %v8374_v27, %s6749_s22 }
 0x561   :  { %2902 = vrot.lane.b32.xlu0 %v8368_v56, %s6749_s22  ;;  %2874 = vrot.lane.b32.xlu2 %v8221_v36, %s6749_s22  ;;  %v2781_v55 = vpop.permute.xlu0 %2780 }
 0x562   :  { %3729 = vmatmul.f32.gmra.mxu2 %v3034_v2  ;;  %2854 = vst.msk [vmem:[#allocation3 + $0x2b0] sm:$0xff] %vm2543_vm2, %v2781_v55  ;;  %v2753_v33 = vpop.permute.xlu1 %2752  ;;  %v3319_v55 = vld [vmem:[#allocation3 + $0x238] sm:$0xff] }
 0x563   :  { %2840 = vst.msk [vmem:[#allocation3 + $0x240] sm:$0xff] %vm2543_vm2, %v2753_v33  ;;  %v2749_v45 = vpop.permute.xlu2 %2748 }
 0x564   :  { %2838 = vst.msk [vmem:[#allocation3 + $0x230] sm:$0xff] %vm2543_vm2, %v2749_v45  ;;  %3839 = vmatmul.f32.gmra.mxu3 %v3027_v38  ;;  %v8686_v45 = vpop.f32.mrf.mxu0 }
 0x565   :  { %v8671_v26 = vpop.f32.mrf.mxu1 }
 0x568   :  { %3655 = vmatmul.f32.gmra.mxu1 %v3137_v46  ;;  %2866 = vrot.lane.b32.xlu1 %v8177_v34, %s6749_s22  ;;  %v3050_v46 = vld [vmem:[#allocation4 + $0x1d0] sm:$0xff] }
 0x569   :  { %2864 = vrot.lane.b32.xlu0 %v8166_v20, %s6749_s22  ;;  %2906 = vrot.lane.b32.xlu2 %v8380_v13, %s6749_s22  ;;  %v2799_v0 = vpop.permute.xlu0 %2798 }
 0x56a   :  { %3732 = vmatmul.f32.gmra.mxu2 %v3042_v23  ;;  %v2783_v29 = vpop.permute.xlu1 %2782  ;;  %2863 = vst.msk [vmem:[#allocation3 + $0x2f8] sm:$0xff] %vm2543_vm2, %v2799_v0  ;;  %v3320_v17 = vld [vmem:[#allocation3 + $0x240] sm:$0xff] }
 0x56b   :  { %2855 = vst.msk [vmem:[#allocation3 + $0x2b8] sm:$0xff] %vm2543_vm2, %v2783_v29  ;;  %v2779_v2 = vpop.permute.xlu2 %2778  ;;  %3931 = vmatpush.msra.mxu0 %v3320_v17  ;;  %v3318_v33 = vld [vmem:[#allocation3 + $0x230] sm:$0xff] }
 0x56c   :  { %2853 = vst.msk [vmem:[#allocation3 + $0x2a8] sm:$0xff] %vm2543_vm2, %v2779_v2  ;;  %3842 = vmatmul.f32.gmra.mxu3 %v3035_v48  ;;  %v3043_v48 = vld [vmem:[#allocation4 + $0x198] sm:$0xff]  ;;  %v3342_v17 = vld [vmem:[#allocation3 + $0x2f0] sm:$0xff]  ;;  %v3153_v2 = vld [vmem:[#allocation4 + $0x508] sm:$0xff] }
 0x56d   :  { %v8684_v38 = vpop.f32.mrf.mxu1  ;;  %3932 = vmatpush.msra.mxu0 %v3319_v55  ;;  %v3341_v55 = vld [vmem:[#allocation3 + $0x2e8] sm:$0xff] }
 0x56f   :  { %3933 = vmatpush.msra.mxu0 %v3318_v33  ;;  %v8701_v33 = vpop.f32.mrf.mxu0 }
 0x570   :  { %3658 = vmatmul.f32.gmra.mxu1 %v3145_v11  ;;  %2898 = vrot.lane.b32.xlu1 %v8357_v18, %s6749_s22  ;;  %v3058_v11 = vld [vmem:[#allocation4 + $0x210] sm:$0xff] }
 0x571   :  { %3376 = vrot.lane.b32.xlu0 %v8166_v20, %s6745_s19  ;;  %2868 = vrot.lane.b32.xlu2 %v8188_v6, %s6749_s22  ;;  %v2745_v23 = vpop.permute.xlu0 %2744  ;;  %v3343_v0 = vld [vmem:[#allocation3 + $0x2f8] sm:$0xff] }
 0x572   :  { %3735 = vmatmul.f32.gmra.mxu2 %v3050_v46  ;;  %v2747_v40 = vpop.permute.xlu1 %2746  ;;  %2836 = vst.msk [vmem:[#allocation3 + $0x220] sm:$0xff] %vm2543_vm2, %v2745_v23  ;;  %4037 = vmatpush.msra.mxu1 %v3343_v0  ;;  %v3340_v46 = vld [vmem:[#allocation3 + $0x2e0] sm:$0xff]  ;;  %v3051_v0 = vld [vmem:[#allocation4 + $0x1d8] sm:$0xff] }
 0x573   :  { %2837 = vst.msk [vmem:[#allocation3 + $0x228] sm:$0xff] %vm2543_vm2, %v2747_v40  ;;  %v2743_v29 = vpop.permute.xlu2 %2742 }
 0x574   :  { %2835 = vst.msk [vmem:[#allocation3 + $0x218] sm:$0xff] %vm2543_vm2, %v2743_v29  ;;  %3845 = vmatmul.f32.gmra.mxu3 %v3043_v48  ;;  %4038 = vmatpush.msra.mxu1 %v3342_v17  ;;  %v3339_v29 = vld [vmem:[#allocation3 + $0x2d8] sm:$0xff] }
 0x575   :  { %v8697_v20 = vpop.f32.mrf.mxu1 }
 0x576   :  { %4039 = vmatpush.msra.mxu1 %v3341_v55  ;;  %v3161_v55 = vld [vmem:[#allocation4 + $0x548] sm:$0xff] }
 0x578   :  { %3661 = vmatmul.f32.gmra.mxu1 %v3153_v2  ;;  %3378 = vrot.lane.b32.xlu1 %v8177_v34, %s6745_s19  ;;  %v3338_v2 = vld [vmem:[#allocation3 + $0x2d0] sm:$0xff] }
 0x579   :  { %3382 = vrot.lane.b32.xlu0 %v8199_v32, %s6745_s19  ;;  %2900 = vrot.lane.b32.xlu2 %v8363_v59, %s6749_s22  ;;  %v2775_v23 = vpop.permute.xlu0 %2774  ;;  %v3316_v32 = vld [vmem:[#allocation3 + $0x220] sm:$0xff] }
 0x57a   :  { %3738 = vmatmul.f32.gmra.mxu2 %v3058_v11  ;;  %4040 = vmatpush.msra.mxu1 %v3340_v46  ;;  %v2777_v48 = vpop.permute.xlu1 %2776  ;;  %2851 = vst.msk [vmem:[#allocation3 + $0x298] sm:$0xff] %vm2543_vm2, %v2775_v23  ;;  %v3317_v40 = vld [vmem:[#allocation3 + $0x228] sm:$0xff]  ;;  %v3066_v46 = vld [vmem:[#allocation4 + $0x250] sm:$0xff] }
 0x57b   :  { %2852 = vst.msk [vmem:[#allocation3 + $0x2a0] sm:$0xff] %vm2543_vm2, %v2777_v48  ;;  %v2773_v34 = vpop.permute.xlu2 %2772  ;;  %3934 = vmatpush.msra.mxu0 %v3317_v40  ;;  %v3315_v11 = vld [vmem:[#allocation3 + $0x218] sm:$0xff]  ;;  %v3337_v23 = vld [vmem:[#allocation3 + $0x2c8] sm:$0xff]  ;;  %v3336_v40 = vld [vmem:[#allocation3 + $0x2c0] sm:$0xff] }
 0x57c   :  { %2850 = vst.msk [vmem:[#allocation3 + $0x290] sm:$0xff] %vm2543_vm2, %v2773_v34  ;;  %4041 = vmatpush.msra.mxu1 %v3339_v29  ;;  %3848 = vmatmul.f32.gmra.mxu3 %v3051_v0  ;;  %v3059_v48 = vld [vmem:[#allocation4 + $0x218] sm:$0xff]  ;;  %v8719_v29 = vpop.f32.mrf.mxu0 }
 0x57d   :  { %v8710_v17 = vpop.f32.mrf.mxu1  ;;  %3935 = vmatpush.msra.mxu0 %v3316_v32  ;;  %v3335_v32 = vld [vmem:[#allocation3 + $0x2b8] sm:$0xff] }
 0x57e   :  { %4042 = vmatpush.msra.mxu1 %v3338_v2  ;;  %v3169_v2 = vld [vmem:[#allocation4 + $0x588] sm:$0xff] }
 0x57f   :  { %3936 = vmatpush.msra.mxu0 %v3315_v11  ;;  %v3074_v11 = vld [vmem:[#allocation4 + $0x290] sm:$0xff] }
 0x580   :  { %3664 = vmatmul.f32.gmra.mxu1 %v3161_v55  ;;  %3384 = vrot.lane.b32.xlu1 %v8210_v28, %s6745_s19  ;;  %v3334_v55 = vld [vmem:[#allocation3 + $0x2b0] sm:$0xff] }
 0x581   :  { %4043 = vmatpush.msra.mxu1 %v3337_v23  ;;  %3388 = vrot.lane.b32.xlu0 %v8234_v47, %s6745_s19  ;;  %v2739_v0 = vpop.permute.xlu0 %2738 }
 0x582   :  { %2896 = vrot.lane.b32.xlu2 %v8352_v63, %s6749_s22  ;;  %3741 = vmatmul.f32.gmra.mxu2 %v3066_v46  ;;  %v2741_v34 = vpop.permute.xlu1 %2740  ;;  %2833 = vst.msk [vmem:[#allocation3 + $0x208] sm:$0xff] %vm2543_vm2, %v2739_v0  ;;  %v3333_v46 = vld [vmem:[#allocation3 + $0x2a8] sm:$0xff]  ;;  %v3067_v0 = vld [vmem:[#allocation4 + $0x258] sm:$0xff] }
 0x583   :  { %4044 = vmatpush.msra.mxu1 %v3336_v40  ;;  %2834 = vst.msk [vmem:[#allocation3 + $0x210] sm:$0xff] %vm2543_vm2, %v2741_v34  ;;  %v2737_v28 = vpop.permute.xlu2 %2736 }
 0x584   :  { %2832 = vst.msk [vmem:[#allocation3 + $0x200] sm:$0xff] %vm2543_vm2, %v2737_v28  ;;  %3851 = vmatmul.f32.gmra.mxu3 %v3059_v48  ;;  %v3332_v48 = vld [vmem:[#allocation3 + $0x2a0] sm:$0xff] }
 0x585   :  { %4045 = vmatpush.msra.mxu1 %v3335_v32  ;;  %v8723_v47 = vpop.f32.mrf.mxu1  ;;  %v8734_v32 = vpop.f32.mrf.mxu0 }
 0x587   :  { %4046 = vmatpush.msra.mxu1 %v3334_v55  ;;  %v3330_v55 = vld [vmem:[#allocation3 + $0x290] sm:$0xff] }
 0x588   :  { %3667 = vmatmul.f32.gmra.mxu1 %v3169_v2  ;;  %3390 = vrot.lane.b32.xlu1 %v8247_v49, %s6745_s19  ;;  %v3331_v49 = vld [vmem:[#allocation3 + $0x298] sm:$0xff]  ;;  %v3177_v2 = vld [vmem:[#allocation4 + $0x5c8] sm:$0xff] }
 0x589   :  { %4047 = vmatpush.msra.mxu1 %v3333_v46  ;;  %3394 = vrot.lane.b32.xlu0 %v8273_v9, %s6745_s19  ;;  %v2769_v23 = vpop.permute.xlu0 %2768  ;;  %v3313_v9 = vld [vmem:[#allocation3 + $0x208] sm:$0xff]  ;;  %v2996_v46 = vld [vmem:[#allocation4 + $0x20] sm:$0xff] }
 0x58a   :  { %3380 = vrot.lane.b32.xlu2 %v8188_v6, %s6745_s19  ;;  %3744 = vmatmul.f32.gmra.mxu2 %v3074_v11  ;;  %v2771_v40 = vpop.permute.xlu1 %2770  ;;  %2848 = vst.msk [vmem:[#allocation3 + $0x280] sm:$0xff] %vm2543_vm2, %v2769_v23  ;;  %v3314_v34 = vld [vmem:[#allocation3 + $0x210] sm:$0xff] }
 0x58b   :  { %4048 = vmatpush.msra.mxu1 %v3332_v48  ;;  %2849 = vst.msk [vmem:[#allocation3 + $0x288] sm:$0xff] %vm2543_vm2, %v2771_v40  ;;  %v2893_v28 = vpop.permute.xlu2 %2892  ;;  %3937 = vmatpush.msra.mxu0 %v3314_v34  ;;  %v3312_v11 = vld [vmem:[#allocation3 + $0x200] sm:$0xff]  ;;  %v3082_v23 = vld [vmem:[#allocation4 + $0x2d0] sm:$0xff]  ;;  %v3075_v48 = vld [vmem:[#allocation4 + $0x298] sm:$0xff] }
 0x58c   :  { %2974 = vst.msk [vmem:[#allocation3 + $0x370] sm:$0xff] %vm2543_vm2, %v2893_v28  ;;  %3854 = vmatmul.f32.gmra.mxu3 %v3067_v0 }
 0x58d   :  { %4049 = vmatpush.msra.mxu1 %v3331_v49  ;;  %v8736_v6 = vpop.f32.mrf.mxu1  ;;  %3938 = vmatpush.msra.mxu0 %v3313_v9  ;;  %v3185_v49 = vld [vmem:[#allocation4 + $0x608] sm:$0xff]  ;;  %v3004_v9 = vld [vmem:[#allocation4 + $0x60] sm:$0xff] }
 0x58f   :  { %4050 = vmatpush.msra.mxu1 %v3330_v55  ;;  %3939 = vmatpush.msra.mxu0 %v3312_v11  ;;  %v3083_v11 = vld [vmem:[#allocation4 + $0x2d8] sm:$0xff] }
 0x590   :  { %3670 = vmatmul.f32.gmra.mxu1 %v3177_v2  ;;  %3396 = vrot.lane.b32.xlu1 %v8286_v8, %s6745_s19  ;;  %v8749_v2 = vpop.f32.mrf.mxu0 }
 0x591   :  { %3400 = vrot.lane.b32.xlu0 %v8312_v16, %s6745_s19  ;;  %3940 = vmatmul.f32.vlgmr.msra.gmra.mxu0 %v2996_v46  ;;  %v2889_v0 = vpop.permute.xlu0 %2888  ;;  %v3328_v8 = vld [vmem:[#allocation3 + $0x280] sm:$0xff] }
 0x592   :  { %3386 = vrot.lane.b32.xlu2 %v8221_v36, %s6745_s19  ;;  %3747 = vmatmul.f32.gmra.mxu2 %v3082_v23  ;;  %v2895_v40 = vpop.permute.xlu1 %2894  ;;  %2972 = vst.msk [vmem:[#allocation3 + $0x360] sm:$0xff] %vm2543_vm2, %v2889_v0  ;;  %v3329_v34 = vld [vmem:[#allocation3 + $0x288] sm:$0xff]  ;;  %v3090_v36 = vld [vmem:[#allocation4 + $0x310] sm:$0xff] }
 0x593   :  { %2975 = vst.msk [vmem:[#allocation3 + $0x378] sm:$0xff] %vm2543_vm2, %v2895_v40  ;;  %v2925_v28 = vpop.permute.xlu2 %2924  ;;  %4051 = vmatpush.msra.mxu1 %v3329_v34  ;;  %v3012_v40 = vld [vmem:[#allocation4 + $0xa0] sm:$0xff]  ;;  %v3098_v34 = vld [vmem:[#allocation4 + $0x350] sm:$0xff] }
 0x594   :  { %2990 = vst.msk [vmem:[#allocation3 + $0x3f0] sm:$0xff] %vm2543_vm2, %v2925_v28  ;;  %3857 = vmatmul.f32.gmra.mxu3 %v3075_v48  ;;  %v3193_v48 = vld [vmem:[#allocation4 + $0x648] sm:$0xff] }
 0x595   :  { %v8747_v16 = vpop.f32.mrf.mxu1  ;;  %4052 = vmatpush.msra.mxu1 %v3328_v8  ;;  %v3091_v8 = vld [vmem:[#allocation4 + $0x318] sm:$0xff] }
 0x598   :  { %3673 = vmatmul.f32.gmra.mxu1 %v3185_v49  ;;  %3402 = vrot.lane.b32.xlu1 %v8325_v1, %s6745_s19  ;;  %v3358_v1 = vld [vmem:[#allocation3 + $0x370] sm:$0xff] }
 0x599   :  { %3406 = vrot.lane.b32.xlu0 %v8345_v10, %s6745_s19  ;;  %3943 = vmatmul.f32.gmra.mxu0 %v3004_v9  ;;  %v2921_v55 = vpop.permute.xlu0 %2920 }
 0x59a   :  { %3392 = vrot.lane.b32.xlu2 %v8260_v24, %s6745_s19  ;;  %3750 = vmatmul.f32.gmra.mxu2 %v3090_v36  ;;  %v2891_v46 = vpop.permute.xlu1 %2890  ;;  %2988 = vst.msk [vmem:[#allocation3 + $0x3e0] sm:$0xff] %vm2543_vm2, %v2921_v55  ;;  %v3359_v23 = vld [vmem:[#allocation3 + $0x378] sm:$0xff]  ;;  %v8764_v24 = vpop.f32.mrf.mxu0  ;;  %v3201_v55 = vld [vmem:[#allocation4 + $0x688] sm:$0xff] }
 0x59b   :  { %2973 = vst.msk [vmem:[#allocation3 + $0x368] sm:$0xff] %vm2543_vm2, %v2891_v46  ;;  %v2887_v0 = vpop.permute.xlu2 %2886  ;;  %4150 = vmatpush.msra.mxu2 %v3359_v23  ;;  %v3020_v46 = vld [vmem:[#allocation4 + $0xe0] sm:$0xff]  ;;  %v3099_v23 = vld [vmem:[#allocation4 + $0x358] sm:$0xff] }
 0x59c   :  { %2971 = vst.msk [vmem:[#allocation3 + $0x358] sm:$0xff] %vm2543_vm2, %v2887_v0  ;;  %3860 = vmatmul.f32.gmra.mxu3 %v3083_v11 }
 0x59d   :  { %v8760_v10 = vpop.f32.mrf.mxu1  ;;  %4151 = vmatpush.msra.mxu2 %v3358_v1 }
 0x5a0   :  { %3676 = vmatmul.f32.gmra.mxu1 %v3193_v48  ;;  %3408 = vrot.lane.b32.xlu1 %v8352_v63, %s6745_s19  ;;  %v3356_v63 = vld [vmem:[#allocation3 + $0x360] sm:$0xff] }
 0x5a1   :  { %3412 = vrot.lane.b32.xlu0 %v8363_v59, %s6745_s19  ;;  %3946 = vmatmul.f32.gmra.mxu0 %v3012_v40  ;;  %v2883_v28 = vpop.permute.xlu0 %2882 }
 0x5a2   :  { %3398 = vrot.lane.b32.xlu2 %v8299_v15, %s6745_s19  ;;  %3753 = vmatmul.f32.gmra.mxu2 %v3098_v34  ;;  %v2923_v49 = vpop.permute.xlu1 %2922  ;;  %2969 = vst.msk [vmem:[#allocation3 + $0x348] sm:$0xff] %vm2543_vm2, %v2883_v28  ;;  %v3357_v9 = vld [vmem:[#allocation3 + $0x368] sm:$0xff]  ;;  %v3106_v15 = vld [vmem:[#allocation4 + $0x390] sm:$0xff]  ;;  %v8781_v1 = vpop.f32.mrf.mxu0  ;;  %v3028_v34 = vld [vmem:[#allocation4 + $0x120] sm:$0xff] }
 0x5a3   :  { %2989 = vst.msk [vmem:[#allocation3 + $0x3e8] sm:$0xff] %vm2543_vm2, %v2923_v49  ;;  %v2919_v36 = vpop.permute.xlu2 %2918  ;;  %4152 = vmatpush.msra.mxu2 %v3357_v9  ;;  %v3355_v11 = vld [vmem:[#allocation3 + $0x358] sm:$0xff]  ;;  %v3114_v28 = vld [vmem:[#allocation4 + $0x3d0] sm:$0xff] }
 0x5a4   :  { %2987 = vst.msk [vmem:[#allocation3 + $0x3d8] sm:$0xff] %vm2543_vm2, %v2919_v36  ;;  %3863 = vmatmul.f32.gmra.mxu3 %v3091_v8 }
 0x5a5   :  { %v8773_v59 = vpop.f32.mrf.mxu1  ;;  %4153 = vmatpush.msra.mxu2 %v3356_v63  ;;  %10521 = vst [vmem:[#allocation7_spill] sm:$0xff] %v8781_v1  ;;  %v3170_v1 = vld [vmem:[#allocation4 + $0x590] sm:$0xff] }
 0x5a7   :  { %4154 = vmatpush.msra.mxu2 %v3355_v11  ;;  %v3036_v11 = vld [vmem:[#allocation4 + $0x160] sm:$0xff] }
 0x5a8   :  { %3679 = vmatmul.f32.gmra.mxu1 %v3201_v55  ;;  %3414 = vrot.lane.b32.xlu1 %v8368_v56, %s6745_s19 }
 0x5a9   :  { %3418 = vrot.lane.b32.xlu0 %v8380_v13, %s6745_s19  ;;  %3949 = vmatmul.f32.gmra.mxu0 %v3020_v46  ;;  %v3209_v13 = vld [vmem:[#allocation4 + $0x6c8] sm:$0xff]  ;;  %v3122_v46 = vld [vmem:[#allocation4 + $0x410] sm:$0xff] }
 0x5aa   :  { %3404 = vrot.lane.b32.xlu2 %v8337_v52, %s6745_s19  ;;  %3756 = vmatmul.f32.gmra.mxu2 %v3106_v15  ;;  %v2885_v0 = vpop.permute.xlu1 %2884  ;;  %v3107_v52 = vld [vmem:[#allocation4 + $0x398] sm:$0xff]  ;;  %v8796_v63 = vpop.f32.mrf.mxu0 }
 0x5ab   :  { %2970 = vst.msk [vmem:[#allocation3 + $0x350] sm:$0xff] %vm2543_vm2, %v2885_v0  ;;  %v2915_v48 = vpop.permute.xlu0 %2914  ;;  %v2881_v40 = vpop.permute.xlu2 %2880  ;;  %v3115_v15 = vld [vmem:[#allocation4 + $0x3d8] sm:$0xff] }
 0x5ac   :  { %2985 = vst.msk [vmem:[#allocation3 + $0x3c8] sm:$0xff] %vm2543_vm2, %v2915_v48  ;;  %3866 = vmatmul.f32.gmra.mxu3 %v3099_v23 }
 0x5ad   :  { %2968 = vst.msk [vmem:[#allocation3 + $0x340] sm:$0xff] %vm2543_vm2, %v2881_v40  ;;  %v8786_v56 = vpop.f32.mrf.mxu1 }
 0x5ae   :  { %10522 = vst [vmem:[#allocation21_spill] sm:$0xff] %v8796_v63 }
 0x5b0   :  { %3682 = vmatmul.f32.gmra.mxu1 %v3209_v13  ;;  %3420 = vrot.lane.b32.xlu1 %v8386_v21, %s6745_s19  ;;  %v3353_v21 = vld [vmem:[#allocation3 + $0x348] sm:$0xff]  ;;  %v3044_v13 = vld [vmem:[#allocation4 + $0x1a0] sm:$0xff] }
 0x5b1   :  { %3424 = vrot.lane.b32.xlu0 %v8400_v53, %s6745_s19  ;;  %3952 = vmatmul.f32.gmra.mxu0 %v3028_v34 }
 0x5b2   :  { %3410 = vrot.lane.b32.xlu2 %v8357_v18, %s6745_s19  ;;  %3759 = vmatmul.f32.gmra.mxu2 %v3114_v28  ;;  %v2917_v8 = vpop.permute.xlu1 %2916  ;;  %v3354_v49 = vld [vmem:[#allocation3 + $0x350] sm:$0xff]  ;;  %v3217_v18 = vld [vmem:[#allocation4 + $0x708] sm:$0xff]  ;;  %v8814_v34 = vpop.f32.mrf.mxu0 }
 0x5b3   :  { %2986 = vst.msk [vmem:[#allocation3 + $0x3d0] sm:$0xff] %vm2543_vm2, %v2917_v8  ;;  %v2877_v9 = vpop.permute.xlu0 %2876  ;;  %v2913_v36 = vpop.permute.xlu2 %2912  ;;  %4155 = vmatpush.msra.mxu2 %v3354_v49  ;;  %v3123_v8 = vld [vmem:[#allocation4 + $0x418] sm:$0xff] }
 0x5b4   :  { %2966 = vst.msk [vmem:[#allocation3 + $0x330] sm:$0xff] %vm2543_vm2, %v2877_v9  ;;  %3869 = vmatmul.f32.gmra.mxu3 %v3107_v52  ;;  %v3352_v55 = vld [vmem:[#allocation3 + $0x340] sm:$0xff] }
 0x5b5   :  { %2984 = vst.msk [vmem:[#allocation3 + $0x3c0] sm:$0xff] %vm2543_vm2, %v2913_v36  ;;  %v8799_v53 = vpop.f32.mrf.mxu1  ;;  %4156 = vmatpush.msra.mxu2 %v3353_v21 }
 0x5b6   :  { %10523 = vst [vmem:[#allocation8_spill] sm:$0xff] %v8814_v34 }
 0x5b7   :  { %4157 = vmatpush.msra.mxu2 %v3352_v55 }
 0x5b8   :  { %3685 = vmatmul.f32.gmra.mxu1 %v3217_v18  ;;  %3426 = vrot.lane.b32.xlu1 %v8408_v25, %s6745_s19  ;;  %v3233_v18 = vld [vmem:[#allocation4 + $0x788] sm:$0xff] }
 0x5b9   :  { %3430 = vrot.lane.b32.xlu0 %v8423_v57, %s6745_s19  ;;  %3955 = vmatmul.f32.gmra.mxu0 %v3036_v11  ;;  %v3225_v57 = vld [vmem:[#allocation4 + $0x748] sm:$0xff]  ;;  %v3052_v11 = vld [vmem:[#allocation4 + $0x1e0] sm:$0xff] }
 0x5ba   :  { %3416 = vrot.lane.b32.xlu2 %v8374_v27, %s6745_s19  ;;  %3762 = vmatmul.f32.gmra.mxu2 %v3122_v46  ;;  %v2879_v23 = vpop.permute.xlu1 %2878  ;;  %v3130_v27 = vld [vmem:[#allocation4 + $0x450] sm:$0xff] }
 0x5bb   :  { %2967 = vst.msk [vmem:[#allocation3 + $0x338] sm:$0xff] %vm2543_vm2, %v2879_v23  ;;  %v2927_v0 = vpop.permute.xlu0 %2926  ;;  %v2875_v48 = vpop.permute.xlu2 %2874  ;;  %v3138_v23 = vld [vmem:[#allocation4 + $0x490] sm:$0xff] }
 0x5bc   :  { %2991 = vst.msk [vmem:[#allocation3 + $0x3f8] sm:$0xff] %vm2543_vm2, %v2927_v0  ;;  %3872 = vmatmul.f32.gmra.mxu3 %v3115_v15  ;;  %v3373_v15 = vld [vmem:[#allocation3 + $0x3e8] sm:$0xff]  ;;  %v8831_v0 = vpop.f32.mrf.mxu0 }
 0x5bd   :  { %2965 = vst.msk [vmem:[#allocation3 + $0x328] sm:$0xff] %vm2543_vm2, %v2875_v48  ;;  %v8810_v25 = vpop.f32.mrf.mxu2  ;;  %v8812_v40 = vpop.f32.mrf.mxu1  ;;  %v3372_v48 = vld [vmem:[#allocation3 + $0x3e0] sm:$0xff] }
 0x5be   :  { %10524 = vst [vmem:[#allocation23_spill] sm:$0xff] %v8831_v0 }
 0x5c0   :  { %3688 = vmatmul.f32.gmra.mxu1 %v3225_v57  ;;  %3432 = vrot.lane.b32.xlu1 %v8431_v4, %s6745_s19  ;;  %v3350_v4 = vld [vmem:[#allocation3 + $0x330] sm:$0xff] }
 0x5c1   :  { %3436 = vrot.lane.b32.xlu0 %v8447_v43, %s6745_s19  ;;  %3958 = vmatmul.f32.gmra.mxu0 %v3044_v13 }
 0x5c2   :  { %3422 = vrot.lane.b32.xlu2 %v8392_v14, %s6745_s19  ;;  %3765 = vmatmul.f32.gmra.mxu2 %v3130_v27  ;;  %v2911_v28 = vpop.permute.xlu1 %2910  ;;  %v3351_v52 = vld [vmem:[#allocation3 + $0x338] sm:$0xff]  ;;  %v3374_v14 = vld [vmem:[#allocation3 + $0x3f0] sm:$0xff] }
 0x5c3   :  { %2983 = vst.msk [vmem:[#allocation3 + $0x3b8] sm:$0xff] %vm2543_vm2, %v2911_v28  ;;  %v2909_v49 = vpop.permute.xlu0 %2908  ;;  %v2907_v9 = vpop.permute.xlu2 %2906  ;;  %4158 = vmatpush.msra.mxu2 %v3351_v52  ;;  %v3375_v36 = vld [vmem:[#allocation3 + $0x3f8] sm:$0xff] }
 0x5c4   :  { %2982 = vst.msk [vmem:[#allocation3 + $0x3b0] sm:$0xff] %vm2543_vm2, %v2909_v49  ;;  %4263 = vmatpush.msrb.mxu3 %v3375_v36  ;;  %v3349_v55 = vld [vmem:[#allocation3 + $0x328] sm:$0xff]  ;;  %v3131_v28 = vld [vmem:[#allocation4 + $0x458] sm:$0xff]  ;;  %v3370_v49 = vld [vmem:[#allocation3 + $0x3d0] sm:$0xff] }
 0x5c5   :  { %2981 = vst.msk [vmem:[#allocation3 + $0x3a8] sm:$0xff] %vm2543_vm2, %v2907_v9  ;;  %v8825_v43 = vpop.f32.mrf.mxu2  ;;  %v8827_v21 = vpop.f32.mrf.mxu1  ;;  %3875 = vmatmul.f32.gmra.mxu3 %v3123_v8  ;;  %4159 = vmatpush.msra.mxu2 %v3350_v4  ;;  %v3371_v52 = vld [vmem:[#allocation3 + $0x3d8] sm:$0xff]  ;;  %v3060_v9 = vld [vmem:[#allocation4 + $0x220] sm:$0xff]  ;;  %v3146_v4 = vld [vmem:[#allocation4 + $0x4d0] sm:$0xff] }
 0x5c6   :  { %4264 = vmatpush.msrb.mxu3 %v3374_v14  ;;  %v3369_v14 = vld [vmem:[#allocation3 + $0x3c8] sm:$0xff] }
 0x5c7   :  { %v8829_v46 = vpop.f32.mrf.mxu3  ;;  %4160 = vmatpush.msra.mxu2 %v3349_v55 }
 0x5c8   :  { %3691 = vmatmul.f32.gmra.mxu1 %v3233_v18  ;;  %4265 = vmatpush.msrb.mxu3 %v3373_v15  ;;  %v3368_v18 = vld [vmem:[#allocation3 + $0x3c0] sm:$0xff]  ;;  %v8848_v15 = vpop.f32.mrf.mxu0 }
 0x5c9   :  { %3438 = vrot.lane.b32.xlu1 %v8456_v41, %s6745_s19  ;;  %3961 = vmatmul.f32.gmra.mxu0 %v3052_v11  ;;  %10525 = vst [vmem:[#allocation9_spill] sm:$0xff] %v8848_v15 }
 0x5ca   :  { %3428 = vrot.lane.b32.xlu2 %v8416_v31, %s6745_s19  ;;  %3768 = vmatmul.f32.gmra.mxu2 %v3138_v23  ;;  %v2873_v57 = vpop.permute.xlu1 %2872  ;;  %v3241_v31 = vld [vmem:[#allocation4 + $0x7c8] sm:$0xff] }
 0x5cb   :  { %4266 = vmatpush.msrb.mxu3 %v3372_v48  ;;  %2964 = vst.msk [vmem:[#allocation3 + $0x320] sm:$0xff] %vm2543_vm2, %v2873_v57  ;;  %v2871_v13 = vpop.permute.xlu0 %2870  ;;  %v2869_v27 = vpop.permute.xlu2 %2868  ;;  %v3139_v57 = vld [vmem:[#allocation4 + $0x498] sm:$0xff] }
 0x5cc   :  { %2963 = vst.msk [vmem:[#allocation3 + $0x318] sm:$0xff] %vm2543_vm2, %v2871_v13  ;;  %v3367_v13 = vld [vmem:[#allocation3 + $0x3b8] sm:$0xff] }
 0x5cd   :  { %2962 = vst.msk [vmem:[#allocation3 + $0x310] sm:$0xff] %vm2543_vm2, %v2869_v27  ;;  %v8840_v8 = vpop.f32.mrf.mxu2  ;;  %4267 = vmatpush.msrb.mxu3 %v3371_v52  ;;  %v8842_v41 = vpop.f32.mrf.mxu1  ;;  %v2997_v52 = vld [vmem:[#allocation4 + $0x28] sm:$0xff] }
 0x5ce   :  { %3878 = vmatmul.f32.gmra.mxu3 %v3131_v28 }
 0x5cf   :  { %4268 = vmatpush.msrb.mxu3 %v3370_v49  ;;  %v8844_v36 = vpop.f32.mrf.mxu3 }
 0x5d0   :  { %3694 = vmatmul.f32.gmra.mxu1 %v3241_v31  ;;  %v3366_v31 = vld [vmem:[#allocation3 + $0x3b0] sm:$0xff] }
 0x5d1   :  { %4269 = vmatpush.msrb.mxu3 %v3369_v14  ;;  %3964 = vmatmul.f32.gmra.mxu0 %v3060_v9  ;;  %v3068_v9 = vld [vmem:[#allocation4 + $0x260] sm:$0xff]  ;;  %v3154_v14 = vld [vmem:[#allocation4 + $0x510] sm:$0xff] }
 0x5d2   :  { %3434 = vrot.lane.b32.xlu2 %v8439_v50, %s6745_s19  ;;  %3771 = vmatmul.f32.gmra.mxu2 %v3146_v4  ;;  %v2905_v55 = vpop.permute.xlu1 %2904  ;;  %v3348_v11 = vld [vmem:[#allocation3 + $0x320] sm:$0xff] }
 0x5d3   :  { %4270 = vmatpush.msrb.mxu3 %v3368_v18  ;;  %2980 = vst.msk [vmem:[#allocation3 + $0x3a0] sm:$0xff] %vm2543_vm2, %v2905_v55  ;;  %v2903_v23 = vpop.permute.xlu0 %2902  ;;  %v2901_v48 = vpop.permute.xlu2 %2900  ;;  %4161 = vmatpush.msra.mxu2 %v3348_v11  ;;  %v3347_v27 = vld [vmem:[#allocation3 + $0x318] sm:$0xff]  ;;  %v3365_v18 = vld [vmem:[#allocation3 + $0x3a8] sm:$0xff] }
 0x5d4   :  { %2979 = vst.msk [vmem:[#allocation3 + $0x398] sm:$0xff] %vm2543_vm2, %v2903_v23  ;;  %v3346_v49 = vld [vmem:[#allocation3 + $0x310] sm:$0xff] }
 0x5d5   :  { %2978 = vst.msk [vmem:[#allocation3 + $0x390] sm:$0xff] %vm2543_vm2, %v2901_v48  ;;  %v8853_v50 = vpop.f32.mrf.mxu2  ;;  %4271 = vmatpush.msrb.mxu3 %v3367_v13  ;;  %v8855_v28 = vpop.f32.mrf.mxu1  ;;  %4162 = vmatpush.msra.mxu2 %v3347_v27  ;;  %v3147_v48 = vld [vmem:[#allocation4 + $0x4d8] sm:$0xff] }
 0x5d6   :  { %3881 = vmatmul.f32.gmra.mxu3 %v3139_v57  ;;  %v8861_v27 = vpop.f32.mrf.mxu0 }
 0x5d7   :  { %4272 = vmatpush.msrb.mxu3 %v3366_v31  ;;  %v8857_v4 = vpop.f32.mrf.mxu3  ;;  %4163 = vmatpush.msra.mxu2 %v3346_v49  ;;  %10526 = vst [vmem:[#allocation10_spill] sm:$0xff] %v8861_v27  ;;  %v3005_v49 = vld [vmem:[#allocation4 + $0x68] sm:$0xff]  ;;  %v3155_v27 = vld [vmem:[#allocation4 + $0x518] sm:$0xff] }
 0x5d8   :  { %4053 = vmatmul.f32.vlgmr.msra.gmra.mxu1 %v2997_v52 }
 0x5d9   :  { %4273 = vmatpush.msrb.mxu3 %v3365_v18  ;;  %3967 = vmatmul.f32.gmra.mxu0 %v3068_v9 }
 0x5da   :  { %3774 = vmatmul.f32.gmra.mxu2 %v3154_v14  ;;  %v2867_v55 = vpop.permute.xlu1 %2866  ;;  %v3364_v11 = vld [vmem:[#allocation3 + $0x3a0] sm:$0xff] }
 0x5db   :  { %2961 = vst.msk [vmem:[#allocation3 + $0x308] sm:$0xff] %vm2543_vm2, %v2867_v55  ;;  %v2865_v23 = vpop.permute.xlu0 %2864  ;;  %4274 = vmatpush.msrb.mxu3 %v3364_v11  ;;  %v3363_v13 = vld [vmem:[#allocation3 + $0x398] sm:$0xff]  ;;  %v3076_v14 = vld [vmem:[#allocation4 + $0x2a0] sm:$0xff]  ;;  %v3162_v55 = vld [vmem:[#allocation4 + $0x550] sm:$0xff] }
 0x5dc   :  { %2960 = vst.msk [vmem:[#allocation3 + $0x300] sm:$0xff] %vm2543_vm2, %v2865_v23  ;;  %v2897_v57 = vpop.permute.xlu2 %2896  ;;  %v3362_v9 = vld [vmem:[#allocation3 + $0x390] sm:$0xff] }
 0x5dd   :  { %2976 = vst.msk [vmem:[#allocation3 + $0x380] sm:$0xff] %vm2543_vm2, %v2897_v57  ;;  %v8864_v52 = vpop.f32.mrf.mxu2  ;;  %v8866_v31 = vpop.f32.mrf.mxu1  ;;  %4275 = vmatpush.msrb.mxu3 %v3363_v13 }
 0x5de   :  { %3884 = vmatmul.f32.gmra.mxu3 %v3147_v48 }
 0x5df   :  { %v8868_v18 = vpop.f32.mrf.mxu3  ;;  %4276 = vmatpush.msrb.mxu3 %v3362_v9 }
 0x5e0   :  { %4056 = vmatmul.f32.gmra.mxu1 %v3005_v49  ;;  %v3013_v49 = vld [vmem:[#allocation4 + $0xa8] sm:$0xff] }
 0x5e1   :  { %3970 = vmatmul.f32.gmra.mxu0 %v3076_v14  ;;  %v3084_v14 = vld [vmem:[#allocation4 + $0x2e0] sm:$0xff] }
 0x5e2   :  { %3777 = vmatmul.f32.gmra.mxu2 %v3162_v55  ;;  %v2899_v11 = vpop.permute.xlu1 %2898  ;;  %v3345_v23 = vld [vmem:[#allocation3 + $0x308] sm:$0xff]  ;;  %v8876_v55 = vpop.f32.mrf.mxu0 }
 0x5e3   :  { %2977 = vst.msk [vmem:[#allocation3 + $0x388] sm:$0xff] %vm2543_vm2, %v2899_v11  ;;  %v3377_v57 = vpop.permute.xlu0 %3376  ;;  %4164 = vmatpush.msra.mxu2 %v3345_v23  ;;  %v3344_v48 = vld [vmem:[#allocation3 + $0x300] sm:$0xff] }
 0x5e4   :  { %v3490_v13 = vadd.f32 %v8511_v60, %v3377_v57  ;;  %v3381_v15 = vpop.permute.xlu2 %3380 }
 0x5e5   :  { %v3496_v0 = vadd.f32 %v8529_v42, %v3381_v15  ;;  %v3730_v34 = vpop.f32.mrf.mxu2  ;;  %v8873_v63 = vpop.f32.mrf.mxu1  ;;  %4165 = vmatpush.msra.mxu2 %v3344_v48 }
 0x5e6   :  { %v3603_v9 = vadd.f32 %v8645_v12, %v3490_v13  ;;  %3887 = vmatmul.f32.gmra.mxu3 %v3155_v27  ;;  %v3163_v13 = vld [vmem:[#allocation4 + $0x558] sm:$0xff] }
 0x5e7   :  { %v3609_v11 = vadd.f32 %v8671_v26, %v3496_v0  ;;  %v3840_v23 = vpop.f32.mrf.mxu3 }
 0x5e8   :  { %v3716_v60 = vadd.f32 %v8810_v25, %v3603_v9  ;;  %4059 = vmatmul.f32.gmra.mxu1 %v3013_v49  ;;  %v3360_v49 = vld [vmem:[#allocation3 + $0x380] sm:$0xff] }
 0x5e9   :  { %v3722_v42 = vadd.f32 %v8840_v8, %v3609_v11  ;;  %3973 = vmatmul.f32.gmra.mxu0 %v3084_v14  ;;  %v3092_v11 = vld [vmem:[#allocation4 + $0x320] sm:$0xff] }
 0x5ea   :  { %3780 = vmatmul.f32.gmra.mxu2 %v3170_v1  ;;  %v3379_v15 = vpop.permute.xlu1 %3378  ;;  %v3361_v57 = vld [vmem:[#allocation3 + $0x388] sm:$0xff]  ;;  %v8882_v48 = vadd.f32 %v8829_v46, %v3716_v60 }
 0x5eb   :  { %v3493_v12 = vadd.f32 %v8520_v22, %v3379_v15  ;;  %v3383_v27 = vpop.permute.xlu0 %3382  ;;  %4277 = vmatpush.msrb.mxu3 %v3361_v57  ;;  %v8886_v26 = vadd.f32 %v8857_v4, %v3722_v42  ;;  %v3021_v46 = vld [vmem:[#allocation4 + $0xe8] sm:$0xff]  ;;  %v3178_v42 = vld [vmem:[#allocation4 + $0x5d0] sm:$0xff] }
 0x5ec   :  { %v3499_v25 = vadd.f32 %v8538_v54, %v3383_v27  ;;  %v3387_v0 = vpop.permute.xlu2 %3386 }
 0x5ed   :  { %v3606_v8 = vadd.f32 %v8658_v30, %v3493_v12  ;;  %v3505_v1 = vadd.f32 %v8557_v37, %v3387_v0  ;;  %v3733_v9 = vpop.f32.mrf.mxu2  ;;  %v8891_v14 = vpop.f32.mrf.mxu1  ;;  %4278 = vmatpush.msrb.mxu3 %v3360_v49 }
 0x5ee   :  { %v3612_v22 = vadd.f32 %v8684_v38, %v3499_v25  ;;  %3890 = vmatmul.f32.gmra.mxu3 %v3163_v13  ;;  %v8897_v30 = vpop.f32.mrf.mxu0  ;;  %v3171_v13 = vld [vmem:[#allocation4 + $0x598] sm:$0xff] }
 0x5ef   :  { %v3719_v4 = vadd.f32 %v8825_v43, %v3606_v8  ;;  %v3618_v60 = vadd.f32 %v8710_v17, %v3505_v1  ;;  %v3843_v54 = vpop.f32.mrf.mxu3  ;;  %v3100_v8 = vld [vmem:[#allocation4 + $0x360] sm:$0xff] }
 0x5f0   :  { %v3725_v15 = vadd.f32 %v8853_v50, %v3612_v22  ;;  %4062 = vmatmul.f32.gmra.mxu1 %v3021_v46  ;;  %v3186_v46 = vld [vmem:[#allocation4 + $0x610] sm:$0xff] }
 0x5f1   :  { %v3731_v37 = vadd.f32 %v3730_v34, %v3618_v60  ;;  %3976 = vmatmul.f32.gmra.mxu0 %v3092_v11  ;;  %v8900_v57 = vadd.f32 %v8844_v36, %v3719_v4  ;;  %v3029_v36 = vld [vmem:[#allocation4 + $0x128] sm:$0xff] }
 0x5f2   :  { %3783 = vmatmul.f32.gmra.mxu2 %v3178_v42  ;;  %v3385_v38 = vpop.permute.xlu1 %3384  ;;  %v8903_v12 = vadd.f32 %v8868_v18, %v3725_v15  ;;  %v3108_v15 = vld [vmem:[#allocation4 + $0x3a0] sm:$0xff] }
 0x5f3   :  { %v8905_v43 = vadd.f32 %v3843_v54, %v3731_v37  ;;  %v3502_v17 = vadd.f32 %v8547_v35, %v3385_v38  ;;  %v3389_v27 = vpop.permute.xlu0 %3388  ;;  %v3194_v38 = vld [vmem:[#allocation4 + $0x650] sm:$0xff] }
 0x5f4   :  { %v3508_v50 = vadd.f32 %v8568_v3, %v3389_v27  ;;  %v3393_v60 = vpop.permute.xlu2 %3392 }
 0x5f5   :  { %v3615_v25 = vadd.f32 %v8697_v20, %v3502_v17  ;;  %v3736_v34 = vpop.f32.mrf.mxu2  ;;  %v8910_v0 = vpop.f32.mrf.mxu1  ;;  %v3514_v17 = vadd.f32 %v8590_v58, %v3393_v60  ;;  %v3202_v58 = vld [vmem:[#allocation4 + $0x690] sm:$0xff]  ;;  %v3053_v60 = vld [vmem:[#allocation4 + $0x1e8] sm:$0xff] }
 0x5f6   :  { %v3621_v49 = vadd.f32 %v8723_v47, %v3508_v50  ;;  %3893 = vmatmul.f32.gmra.mxu3 %v3171_v13  ;;  %v8918_v11 = vpop.f32.mrf.mxu0  ;;  %v3179_v47 = vld [vmem:[#allocation4 + $0x5d8] sm:$0xff] }
 0x5f7   :  { %v3728_v18 = vadd.f32 %v8864_v52, %v3615_v25  ;;  %v3846_v1 = vpop.f32.mrf.mxu3  ;;  %v3627_v13 = vadd.f32 %v8747_v16, %v3514_v17  ;;  %v3195_v16 = vld [vmem:[#allocation4 + $0x658] sm:$0xff] }
 0x5f8   :  { %v3734_v22 = vadd.f32 %v3733_v9, %v3621_v49  ;;  %4065 = vmatmul.f32.gmra.mxu1 %v3029_v36  ;;  %v3037_v9 = vld [vmem:[#allocation4 + $0x168] sm:$0xff] }
 0x5f9   :  { %3979 = vmatmul.f32.gmra.mxu0 %v3100_v8  ;;  %v8914_v35 = vadd.f32 %v3840_v23, %v3728_v18  ;;  %v3045_v49 = vld [vmem:[#allocation4 + $0x1a8] sm:$0xff]  ;;  %v3116_v8 = vld [vmem:[#allocation4 + $0x3e0] sm:$0xff] }
 0x5fa   :  { %v8916_v3 = vadd.f32 %v3846_v1, %v3734_v22  ;;  %3786 = vmatmul.f32.gmra.mxu2 %v3186_v46  ;;  %v3391_v20 = vpop.permute.xlu1 %3390 }
 0x5fb   :  { %v3511_v4 = vadd.f32 %v8579_v19, %v3391_v20  ;;  %v3187_v19 = vld [vmem:[#allocation4 + $0x618] sm:$0xff] }
 0x5fd   :  { %v3624_v54 = vadd.f32 %v8736_v6, %v3511_v4  ;;  %v3739_v52 = vpop.f32.mrf.mxu2  ;;  %v8922_v42 = vpop.f32.mrf.mxu1 }
 0x5fe   :  { %3896 = vmatmul.f32.gmra.mxu3 %v3179_v47  ;;  %v3395_v6 = vpop.permute.xlu0 %3394  ;;  %v8928_v50 = vpop.f32.mrf.mxu0 }
 0x5ff   :  { %v3737_v23 = vadd.f32 %v3736_v34, %v3624_v54  ;;  %v3849_v37 = vpop.f32.mrf.mxu3  ;;  %v3740_v34 = vadd.f32 %v3739_v52, %v3627_v13  ;;  %v3517_v1 = vadd.f32 %v8601_v7, %v3395_v6  ;;  %v3210_v7 = vld [vmem:[#allocation4 + $0x6d0] sm:$0xff]  ;;  %v3061_v6 = vld [vmem:[#allocation4 + $0x228] sm:$0xff] }
 0x600   :  { %4068 = vmatmul.f32.gmra.mxu1 %v3037_v9  ;;  %v3124_v9 = vld [vmem:[#allocation4 + $0x420] sm:$0xff] }
 0x601   :  { %v8925_v27 = vadd.f32 %v3849_v37, %v3737_v23  ;;  %3982 = vmatmul.f32.gmra.mxu0 %v3108_v15  ;;  %v3630_v22 = vadd.f32 %v8760_v10, %v3517_v1  ;;  %v3203_v10 = vld [vmem:[#allocation4 + $0x698] sm:$0xff] }
 0x602   :  { %3789 = vmatmul.f32.gmra.mxu2 %v3194_v38  ;;  %v3397_v20 = vpop.permute.xlu1 %3396  ;;  %v3399_v38 = vpop.permute.xlu2 %3398  ;;  %v3211_v1 = vld [vmem:[#allocation4 + $0x6d8] sm:$0xff] }
 0x603   :  { %v3520_v23 = vadd.f32 %v8612_v51, %v3397_v20  ;;  %v3218_v51 = vld [vmem:[#allocation4 + $0x710] sm:$0xff] }
 0x605   :  { %v3742_v25 = vpop.f32.mrf.mxu2  ;;  %v8930_v36 = vpop.f32.mrf.mxu1  ;;  %v3633_v17 = vadd.f32 %v8773_v59, %v3520_v23 }
 0x606   :  { %3899 = vmatmul.f32.gmra.mxu3 %v3187_v19  ;;  %v3743_v54 = vadd.f32 %v3742_v25, %v3630_v22 }
 0x607   :  { %v3852_v18 = vpop.f32.mrf.mxu3 }
 0x608   :  { %v8933_v46 = vadd.f32 %v3852_v18, %v3740_v34  ;;  %4071 = vmatmul.f32.gmra.mxu1 %v3045_v49  ;;  %v3132_v34 = vld [vmem:[#allocation4 + $0x460] sm:$0xff]  ;;  %v3523_v18 = vadd.f32 %v8623_v62, %v3399_v38  ;;  %v3226_v62 = vld [vmem:[#allocation4 + $0x750] sm:$0xff] }
 0x609   :  { %3985 = vmatmul.f32.gmra.mxu0 %v3116_v8 }
 0x60a   :  { %3792 = vmatmul.f32.gmra.mxu2 %v3202_v58  ;;  %v3636_v59 = vadd.f32 %v8786_v56, %v3523_v18  ;;  %v3219_v56 = vld [vmem:[#allocation4 + $0x718] sm:$0xff]  ;;  %v3405_v38 = vpop.permute.xlu2 %3404  ;;  %v3234_v18 = vld [vmem:[#allocation4 + $0x790] sm:$0xff] }
 0x60d   :  { %v3745_v4 = vpop.f32.mrf.mxu2  ;;  %v8936_v47 = vpop.f32.mrf.mxu1 }
 0x60e   :  { %3902 = vmatmul.f32.gmra.mxu3 %v3195_v16  ;;  %v8938_v52 = vpop.f32.mrf.mxu0  ;;  %v3746_v25 = vadd.f32 %v3745_v4, %v3633_v17  ;;  %v3401_v16 = vpop.permute.xlu0 %3400  ;;  %v3069_v4 = vld [vmem:[#allocation4 + $0x268] sm:$0xff] }
 0x60f   :  { %v3855_v15 = vpop.f32.mrf.mxu3  ;;  %v3403_v17 = vpop.permute.xlu1 %3402 }
 0x610   :  { %v8941_v37 = vadd.f32 %v3855_v15, %v3743_v54  ;;  %4074 = vmatmul.f32.gmra.mxu1 %v3053_v60 }
 0x611   :  { %3988 = vmatmul.f32.gmra.mxu0 %v3124_v9  ;;  %v3140_v9 = vld [vmem:[#allocation4 + $0x4a0] sm:$0xff] }
 0x612   :  { %3795 = vmatmul.f32.gmra.mxu2 %v3210_v7  ;;  %v3526_v7 = vadd.f32 %v8634_v39, %v3401_v16 }
 0x615   :  { %v3748_v19 = vpop.f32.mrf.mxu2  ;;  %v8944_v13 = vpop.f32.mrf.mxu1 }
 0x616   :  { %3905 = vmatmul.f32.gmra.mxu3 %v3203_v10  ;;  %v8946_v49 = vpop.f32.mrf.mxu0  ;;  %v3749_v60 = vadd.f32 %v3748_v19, %v3636_v59  ;;  %v3639_v10 = vadd.f32 %v8799_v53, %v3526_v7  ;;  %v3529_v59 = vadd.f32 %v8647_v61, %v3403_v17  ;;  %v3227_v53 = vld [vmem:[#allocation4 + $0x758] sm:$0xff]  ;;  %v3156_v61 = vld [vmem:[#allocation4 + $0x520] sm:$0xff] }
 0x617   :  { %v3858_v8 = vpop.f32.mrf.mxu3 }
 0x618   :  { %v8949_v58 = vadd.f32 %v3858_v8, %v3746_v25  ;;  %4077 = vmatmul.f32.gmra.mxu1 %v3061_v6  ;;  %v3077_v25 = vld [vmem:[#allocation4 + $0x2a8] sm:$0xff] }
 0x619   :  { %3991 = vmatmul.f32.gmra.mxu0 %v3132_v34 }
 0x61a   :  { %3798 = vmatmul.f32.gmra.mxu2 %v3218_v51  ;;  %v3148_v51 = vld [vmem:[#allocation4 + $0x4e0] sm:$0xff] }
 0x61d   :  { %v3751_v22 = vpop.f32.mrf.mxu2  ;;  %v8952_v20 = vpop.f32.mrf.mxu1 }
 0x61e   :  { %3908 = vmatmul.f32.gmra.mxu3 %v3211_v1  ;;  %v8954_v54 = vpop.f32.mrf.mxu0  ;;  %v3752_v34 = vadd.f32 %v3751_v22, %v3639_v10  ;;  %v3532_v1 = vadd.f32 %v8660_v5, %v3405_v38  ;;  %v3642_v22 = vadd.f32 %v8812_v40, %v3529_v59  ;;  %v3242_v38 = vld [vmem:[#allocation4 + $0x7d0] sm:$0xff]  ;;  %v3235_v40 = vld [vmem:[#allocation4 + $0x798] sm:$0xff]  ;;  %v3164_v59 = vld [vmem:[#allocation4 + $0x560] sm:$0xff] }
 0x61f   :  { %v3861_v15 = vpop.f32.mrf.mxu3 }
 0x620   :  { %v8957_v23 = vadd.f32 %v3861_v15, %v3749_v60  ;;  %4080 = vmatmul.f32.gmra.mxu1 %v3069_v4  ;;  %v3645_v4 = vadd.f32 %v8827_v21, %v3532_v1  ;;  %v3407_v60 = vpop.permute.xlu0 %3406 }
 0x621   :  { %3994 = vmatmul.f32.gmra.mxu0 %v3140_v9  ;;  %v3535_v17 = vadd.f32 %v8673_v44, %v3407_v60  ;;  %v2998_v44 = vld [vmem:[#allocation4 + $0x30] sm:$0xff]  ;;  %v3411_v60 = vpop.permute.xlu2 %3410 }
 0x622   :  { %3801 = vmatmul.f32.gmra.mxu2 %v3226_v62  ;;  %v3085_v62 = vld [vmem:[#allocation4 + $0x2e8] sm:$0xff] }
 0x623   :  { %v3648_v21 = vadd.f32 %v8842_v41, %v3535_v17  ;;  %v3243_v41 = vld [vmem:[#allocation4 + $0x7d8] sm:$0xff]  ;;  %v3172_v17 = vld [vmem:[#allocation4 + $0x5a0] sm:$0xff] }
 0x625   :  { %v3754_v6 = vpop.f32.mrf.mxu2  ;;  %v8960_v19 = vpop.f32.mrf.mxu1 }
 0x626   :  { %3911 = vmatmul.f32.gmra.mxu3 %v3219_v56  ;;  %v8962_v8 = vpop.f32.mrf.mxu0  ;;  %v3755_v7 = vadd.f32 %v3754_v6, %v3642_v22 }
 0x627   :  { %v3864_v39 = vpop.f32.mrf.mxu3 }
 0x628   :  { %v8966_v16 = vadd.f32 %v3864_v39, %v3752_v34  ;;  %4083 = vmatmul.f32.gmra.mxu1 %v3077_v25  ;;  %v3409_v34 = vpop.permute.xlu1 %3408  ;;  %v3093_v39 = vld [vmem:[#allocation4 + $0x328] sm:$0xff] }
 0x629   :  { %3997 = vmatmul.f32.gmra.mxu0 %v3148_v51 }
 0x62a   :  { %3804 = vmatmul.f32.gmra.mxu2 %v3234_v18 }
 0x62d   :  { %v3757_v9 = vpop.f32.mrf.mxu2  ;;  %v8970_v15 = vpop.f32.mrf.mxu1 }
 0x62e   :  { %v3758_v56 = vadd.f32 %v3757_v9, %v3645_v4  ;;  %3914 = vmatmul.f32.gmra.mxu3 %v3227_v53  ;;  %v8972_v5 = vpop.f32.mrf.mxu0  ;;  %v3538_v4 = vadd.f32 %v8686_v45, %v3409_v34  ;;  %v3006_v45 = vld [vmem:[#allocation4 + $0x70] sm:$0xff]  ;;  %v2999_v34 = vld [vmem:[#allocation4 + $0x38] sm:$0xff] }
 0x62f   :  { %v3867_v10 = vpop.f32.mrf.mxu3 }
 0x630   :  { %v8975_v25 = vadd.f32 %v3867_v10, %v3755_v7  ;;  %4086 = vmatmul.f32.gmra.mxu1 %v3085_v62  ;;  %v3651_v9 = vadd.f32 %v8855_v28, %v3538_v4 }
 0x631   :  { %4000 = vmatmul.f32.gmra.mxu0 %v3156_v61  ;;  %v3101_v61 = vld [vmem:[#allocation4 + $0x368] sm:$0xff] }
 0x632   :  { %3807 = vmatmul.f32.gmra.mxu2 %v3242_v38 }
 0x635   :  { %v3760_v51 = vpop.f32.mrf.mxu2  ;;  %v8978_v6 = vpop.f32.mrf.mxu1 }
 0x636   :  { %v3761_v18 = vadd.f32 %v3760_v51, %v3648_v21  ;;  %3917 = vmatmul.f32.gmra.mxu3 %v3235_v40  ;;  %v8980_v1 = vpop.f32.mrf.mxu0  ;;  %v3413_v51 = vpop.permute.xlu0 %3412 }
 0x637   :  { %v3870_v53 = vpop.f32.mrf.mxu3 }
 0x638   :  { %v8983_v22 = vadd.f32 %v3870_v53, %v3758_v56  ;;  %4089 = vmatmul.f32.gmra.mxu1 %v3093_v39  ;;  %v3541_v56 = vadd.f32 %v8701_v33, %v3411_v60  ;;  %v3109_v53 = vld [vmem:[#allocation4 + $0x3a8] sm:$0xff]  ;;  %v3544_v33 = vadd.f32 %v8719_v29, %v3413_v51  ;;  %v3022_v29 = vld [vmem:[#allocation4 + $0xf0] sm:$0xff] }
 0x639   :  { %4003 = vmatmul.f32.gmra.mxu0 %v3164_v59 }
 0x63a   :  { %10527 = vst [vmem:[#allocation11_spill] sm:$0xff] %v8983_v22  ;;  %4166 = vmatmul.f32.vlgmr.msra.gmra.mxu2 %v2998_v44  ;;  %v3654_v28 = vadd.f32 %v8866_v31, %v3541_v56  ;;  %v3007_v31 = vld [vmem:[#allocation4 + $0x78] sm:$0xff]  ;;  %v3078_v22 = vld [vmem:[#allocation4 + $0x2b0] sm:$0xff] }
 0x63d   :  { %v3763_v62 = vpop.f32.mrf.mxu2  ;;  %v8986_v7 = vpop.f32.mrf.mxu1 }
 0x63e   :  { %v3764_v10 = vadd.f32 %v3763_v62, %v3651_v9  ;;  %3920 = vmatmul.f32.gmra.mxu3 %v3243_v41  ;;  %v8988_v38 = vpop.f32.mrf.mxu0  ;;  %v3180_v41 = vld [vmem:[#allocation4 + $0x5e0] sm:$0xff]  ;;  %v3014_v9 = vld [vmem:[#allocation4 + $0xb0] sm:$0xff]  ;;  %v3657_v62 = vadd.f32 %v8873_v63, %v3544_v33  ;;  %v3015_v63 = vld [vmem:[#allocation4 + $0xb8] sm:$0xff] }
 0x63f   :  { %v3873_v40 = vpop.f32.mrf.mxu3 }
 0x640   :  { %v8991_v21 = vadd.f32 %v3873_v40, %v3761_v18  ;;  %4092 = vmatmul.f32.gmra.mxu1 %v3101_v61  ;;  %v3415_v61 = vpop.permute.xlu1 %3414 }
 0x641   :  { %4006 = vmatmul.f32.gmra.mxu0 %v3172_v17  ;;  %v3547_v51 = vadd.f32 %v8734_v32, %v3415_v61  ;;  %v3030_v32 = vld [vmem:[#allocation4 + $0x130] sm:$0xff] }
 0x642   :  { %10528 = vst [vmem:[#allocation12_spill] sm:$0xff] %v8991_v21  ;;  %4169 = vmatmul.f32.gmra.mxu2 %v3006_v45  ;;  %v3117_v45 = vld [vmem:[#allocation4 + $0x3e8] sm:$0xff]  ;;  %v10535_v21 = vld [vmem:[#allocation21_spill] sm:$0xff] }
 0x645   :  { %v3766_v39 = vpop.f32.mrf.mxu2  ;;  %v8994_v59 = vpop.f32.mrf.mxu1 }
 0x646   :  { %v3767_v44 = vadd.f32 %v3766_v39, %v3654_v28  ;;  %4279 = vmatmul.f32.vlgmr.msrb.gmra.mxu3 %v2999_v34  ;;  %v8996_v4 = vpop.f32.mrf.mxu0  ;;  %v3188_v28 = vld [vmem:[#allocation4 + $0x620] sm:$0xff] }
 0x648   :  { %v3876_v18 = vpop.f32.mrf.mxu3  ;;  %4095 = vmatmul.f32.gmra.mxu1 %v3109_v53  ;;  %v3417_v53 = vpop.permute.xlu2 %3416 }
 0x649   :  { %v8999_v60 = vadd.f32 %v3876_v18, %v3764_v10  ;;  %4009 = vmatmul.f32.gmra.mxu0 %v3180_v41  ;;  %v3660_v41 = vadd.f32 %v8891_v14, %v3547_v51  ;;  %v3125_v18 = vld [vmem:[#allocation4 + $0x428] sm:$0xff]  ;;  %v3550_v61 = vadd.f32 %v8749_v2, %v3417_v53  ;;  %v3038_v2 = vld [vmem:[#allocation4 + $0x170] sm:$0xff] }
 0x64a   :  { %4172 = vmatmul.f32.gmra.mxu2 %v3014_v9 }
 0x64b   :  { %10529 = vst [vmem:[#allocation13_spill] sm:$0xff] %v8999_v60  ;;  %v3663_v14 = vadd.f32 %v8910_v0, %v3550_v61  ;;  %v3031_v0 = vld [vmem:[#allocation4 + $0x138] sm:$0xff]  ;;  %v3054_v60 = vld [vmem:[#allocation4 + $0x1f0] sm:$0xff] }
 0x64d   :  { %v3769_v17 = vpop.f32.mrf.mxu2  ;;  %v9002_v40 = vpop.f32.mrf.mxu1 }
 0x64e   :  { %v3770_v56 = vadd.f32 %v3769_v17, %v3657_v62  ;;  %4282 = vmatmul.f32.gmra.mxu3 %v3007_v31  ;;  %v9004_v34 = vpop.f32.mrf.mxu0  ;;  %v3196_v17 = vld [vmem:[#allocation4 + $0x660] sm:$0xff] }
 0x650   :  { %4098 = vmatmul.f32.gmra.mxu1 %v3117_v45 }
 0x651   :  { %v3879_v10 = vpop.f32.mrf.mxu3  ;;  %4012 = vmatmul.f32.gmra.mxu0 %v3188_v28  ;;  %v3023_v28 = vld [vmem:[#allocation4 + $0xf8] sm:$0xff] }
 0x652   :  { %v9007_v39 = vadd.f32 %v3879_v10, %v3767_v44  ;;  %4175 = vmatmul.f32.gmra.mxu2 %v3022_v29  ;;  %v3419_v29 = vpop.permute.xlu0 %3418 }
 0x653   :  { %v3553_v53 = vadd.f32 %v8764_v24, %v3419_v29  ;;  %v3046_v24 = vld [vmem:[#allocation4 + $0x1b0] sm:$0xff]  ;;  %v10533_v29 = vld [vmem:[#allocation7_spill] sm:$0xff] }
 0x654   :  { %10530 = vst [vmem:[#allocation14_spill] sm:$0xff] %v9007_v39  ;;  %v3204_v39 = vld [vmem:[#allocation4 + $0x6a0] sm:$0xff] }
 0x655   :  { %v3772_v9 = vpop.f32.mrf.mxu2  ;;  %v9010_v33 = vpop.f32.mrf.mxu1 }
 0x656   :  { %v3773_v31 = vadd.f32 %v3772_v9, %v3660_v41  ;;  %4285 = vmatmul.f32.gmra.mxu3 %v3015_v63  ;;  %v9012_v62 = vpop.f32.mrf.mxu0  ;;  %v3133_v63 = vld [vmem:[#allocation4 + $0x468] sm:$0xff] }
 0x658   :  { %4101 = vmatmul.f32.gmra.mxu1 %v3125_v18 }
 0x659   :  { %v3882_v44 = vpop.f32.mrf.mxu3  ;;  %4015 = vmatmul.f32.gmra.mxu0 %v3196_v17  ;;  %v3666_v17 = vadd.f32 %v8922_v42, %v3553_v53  ;;  %v3039_v42 = vld [vmem:[#allocation4 + $0x178] sm:$0xff] }
 0x65a   :  { %v9015_v45 = vadd.f32 %v3882_v44, %v3770_v56  ;;  %4178 = vmatmul.f32.gmra.mxu2 %v3030_v32  ;;  %v3421_v32 = vpop.permute.xlu1 %3420 }
 0x65c   :  { %10531 = vst [vmem:[#allocation15_spill] sm:$0xff] %v9015_v45  ;;  %v3212_v45 = vld [vmem:[#allocation4 + $0x6e0] sm:$0xff] }
 0x65d   :  { %v3775_v51 = vpop.f32.mrf.mxu2  ;;  %v9018_v10 = vpop.f32.mrf.mxu1 }
 0x65e   :  { %v3776_v41 = vadd.f32 %v3775_v51, %v3663_v14  ;;  %4288 = vmatmul.f32.gmra.mxu3 %v3023_v28  ;;  %v9020_v9 = vpop.f32.mrf.mxu0  ;;  %v3141_v28 = vld [vmem:[#allocation4 + $0x4a8] sm:$0xff] }
 0x660   :  { %4104 = vmatmul.f32.gmra.mxu1 %v3133_v63  ;;  %v3556_v63 = vadd.f32 %v10533_v29, %v3421_v32  ;;  %v3425_v29 = vpop.permute.xlu0 %3424 }
 0x661   :  { %v3885_v56 = vpop.f32.mrf.mxu3  ;;  %4018 = vmatmul.f32.gmra.mxu0 %v3204_v39 }
 0x662   :  { %v9023_v18 = vadd.f32 %v3885_v56, %v3773_v31  ;;  %4181 = vmatmul.f32.gmra.mxu2 %v3038_v2  ;;  %v3423_v2 = vpop.permute.xlu2 %3422  ;;  %v3669_v53 = vadd.f32 %v8930_v36, %v3556_v63 }
 0x663   :  { %v3559_v32 = vadd.f32 %v10535_v21, %v3423_v2  ;;  %v3062_v21 = vld [vmem:[#allocation4 + $0x230] sm:$0xff]  ;;  %v10537_v2 = vld [vmem:[#allocation8_spill] sm:$0xff] }
 0x664   :  { %10532 = vst [vmem:[#allocation16_spill] sm:$0xff] %v9023_v18 }
 0x665   :  { %v3778_v61 = vpop.f32.mrf.mxu2  ;;  %v9026_v44 = vpop.f32.mrf.mxu1  ;;  %v3672_v36 = vadd.f32 %v8936_v47, %v3559_v32  ;;  %v3055_v47 = vld [vmem:[#allocation4 + $0x1f8] sm:$0xff] }
 0x666   :  { %v3779_v14 = vadd.f32 %v3778_v61, %v3666_v17  ;;  %4291 = vmatmul.f32.gmra.mxu3 %v3031_v0  ;;  %v9028_v51 = vpop.f32.mrf.mxu0  ;;  %v3149_v0 = vld [vmem:[#allocation4 + $0x4e8] sm:$0xff]  ;;  %v3220_v61 = vld [vmem:[#allocation4 + $0x720] sm:$0xff]  ;;  %v3427_v32 = vpop.permute.xlu1 %3426 }
 0x668   :  { %4107 = vmatmul.f32.gmra.mxu1 %v3141_v28 }
 0x669   :  { %v3888_v39 = vpop.f32.mrf.mxu3  ;;  %4021 = vmatmul.f32.gmra.mxu0 %v3212_v45 }
 0x66a   :  { %v9031_v31 = vadd.f32 %v3888_v39, %v3776_v41  ;;  %4184 = vmatmul.f32.gmra.mxu2 %v3046_v24  ;;  %v3047_v24 = vld [vmem:[#allocation4 + $0x1b8] sm:$0xff] }
 0x66c   :  { %10534 = vst [vmem:[#allocation17_spill] sm:$0xff] %v9031_v31  ;;  %v3562_v31 = vadd.f32 %v10537_v2, %v3425_v29  ;;  %v3070_v29 = vld [vmem:[#allocation4 + $0x270] sm:$0xff] }
 0x66d   :  { %v3781_v56 = vpop.f32.mrf.mxu2  ;;  %v9034_v18 = vpop.f32.mrf.mxu1 }
 0x66e   :  { %v3782_v17 = vadd.f32 %v3781_v56, %v3669_v53  ;;  %4294 = vmatmul.f32.gmra.mxu3 %v3039_v42  ;;  %v9037_v28 = vpop.f32.mrf.mxu0  ;;  %v3157_v42 = vld [vmem:[#allocation4 + $0x528] sm:$0xff]  ;;  %v3228_v56 = vld [vmem:[#allocation4 + $0x760] sm:$0xff] }
 0x670   :  { %4110 = vmatmul.f32.gmra.mxu1 %v3149_v0 }
 0x671   :  { %v3891_v45 = vpop.f32.mrf.mxu3  ;;  %4024 = vmatmul.f32.gmra.mxu0 %v3220_v61  ;;  %v3675_v61 = vadd.f32 %v8944_v13, %v3562_v31 }
 0x672   :  { %v9039_v41 = vadd.f32 %v3891_v45, %v3779_v14  ;;  %4187 = vmatmul.f32.gmra.mxu2 %v3054_v60 }
 0x674   :  { %10536 = vst [vmem:[#allocation18_spill] sm:$0xff] %v9039_v41 }
 0x675   :  { %v3784_v63 = vpop.f32.mrf.mxu2  ;;  %v9042_v39 = vpop.f32.mrf.mxu1 }
 0x676   :  { %v3785_v53 = vadd.f32 %v3784_v63, %v3672_v36  ;;  %4297 = vmatmul.f32.gmra.mxu3 %v3047_v24  ;;  %v9045_v14 = vpop.f32.mrf.mxu0  ;;  %v3165_v24 = vld [vmem:[#allocation4 + $0x568] sm:$0xff]  ;;  %v3236_v63 = vld [vmem:[#allocation4 + $0x7a0] sm:$0xff] }
 0x677   :  { %10538 = vst [vmem:[#allocation19_spill] sm:$0xff] %v9045_v14  ;;  %v10546_v14 = vld [vmem:[#allocation10_spill] sm:$0xff] }
 0x678   :  { %4113 = vmatmul.f32.gmra.mxu1 %v3157_v42  ;;  %v10540_v42 = vld [vmem:[#allocation23_spill] sm:$0xff] }
 0x679   :  { %v3894_v0 = vpop.f32.mrf.mxu3  ;;  %4027 = vmatmul.f32.gmra.mxu0 %v3228_v56  ;;  %v3565_v2 = vadd.f32 %v10540_v42, %v3427_v32 }
 0x67a   :  { %v9047_v60 = vadd.f32 %v3894_v0, %v3782_v17  ;;  %4190 = vmatmul.f32.gmra.mxu2 %v3062_v21  ;;  %v3063_v21 = vld [vmem:[#allocation4 + $0x238] sm:$0xff] }
 0x67b   :  { %v3678_v13 = vadd.f32 %v8952_v20, %v3565_v2  ;;  %v3181_v20 = vld [vmem:[#allocation4 + $0x5e8] sm:$0xff]  ;;  %v3429_v2 = vpop.permute.xlu2 %3428 }
 0x67c   :  { %10539 = vst [vmem:[#allocation20_spill] sm:$0xff] %v9047_v60 }
 0x67d   :  { %v3787_v45 = vpop.f32.mrf.mxu2  ;;  %v9050_v41 = vpop.f32.mrf.mxu1 }
 0x67e   :  { %v3788_v36 = vadd.f32 %v3787_v45, %v3675_v61  ;;  %4300 = vmatmul.f32.gmra.mxu3 %v3055_v47  ;;  %v9056_v31 = vpop.f32.mrf.mxu0  ;;  %v3173_v61 = vld [vmem:[#allocation4 + $0x5a8] sm:$0xff]  ;;  %v3244_v45 = vld [vmem:[#allocation4 + $0x7e0] sm:$0xff] }
 0x67f   :  { %10542 = vst [vmem:[#allocation24_spill] sm:$0xff] %v9056_v31 }
 0x680   :  { %4116 = vmatmul.f32.gmra.mxu1 %v3165_v24 }
 0x681   :  { %v3897_v56 = vpop.f32.mrf.mxu3  ;;  %4030 = vmatmul.f32.gmra.mxu0 %v3236_v63 }
 0x682   :  { %v9053_v17 = vadd.f32 %v3897_v56, %v3785_v53  ;;  %4193 = vmatmul.f32.gmra.mxu2 %v3070_v29  ;;  %v3071_v53 = vld [vmem:[#allocation4 + $0x278] sm:$0xff]  ;;  %v3086_v56 = vld [vmem:[#allocation4 + $0x2f0] sm:$0xff] }
 0x684   :  { %10541 = vst [vmem:[#allocation22_spill] sm:$0xff] %v9053_v17  ;;  %v3431_v17 = vpop.permute.xlu0 %3430 }
 0x685   :  { %v3790_v0 = vpop.f32.mrf.mxu2  ;;  %v9058_v60 = vpop.f32.mrf.mxu1 }
 0x686   :  { %v3791_v47 = vadd.f32 %v3790_v0, %v3678_v13  ;;  %4303 = vmatmul.f32.gmra.mxu3 %v3063_v21  ;;  %v9064_v42 = vpop.f32.mrf.mxu0  ;;  %v10545_v13 = vld [vmem:[#allocation9_spill] sm:$0xff] }
 0x687   :  { %10544 = vst [vmem:[#allocation25_spill] sm:$0xff] %v9064_v42  ;;  %v3568_v0 = vadd.f32 %v10545_v13, %v3429_v2  ;;  %v3094_v42 = vld [vmem:[#allocation4 + $0x330] sm:$0xff]  ;;  %v3571_v2 = vadd.f32 %v10546_v14, %v3431_v17  ;;  %v3433_v13 = vpop.permute.xlu1 %3432 }
 0x688   :  { %4119 = vmatmul.f32.gmra.mxu1 %v3173_v61 }
 0x689   :  { %v3900_v32 = vpop.f32.mrf.mxu3  ;;  %4033 = vmatmul.f32.gmra.mxu0 %v3244_v45 }
 0x68a   :  { %v9060_v24 = vadd.f32 %v3900_v32, %v3788_v36  ;;  %4196 = vmatmul.f32.gmra.mxu2 %v3078_v22  ;;  %v3079_v36 = vld [vmem:[#allocation4 + $0x2b8] sm:$0xff]  ;;  %v3189_v32 = vld [vmem:[#allocation4 + $0x628] sm:$0xff] }
 0x68c   :  { %10543 = vst [vmem:[#allocation26_spill] sm:$0xff] %v9060_v24  ;;  %v3681_v24 = vadd.f32 %v8960_v19, %v3568_v0  ;;  %v4409_v19 = vld [vmem:[%s10472_s6 + $0x8] sm:$0xff]  ;;  %v3102_v0 = vld [vmem:[#allocation4 + $0x370] sm:$0xff] }
 0x68d   :  { %v3793_v63 = vpop.f32.mrf.mxu2  ;;  %v9062_v29 = vpop.f32.mrf.mxu1  ;;  %4634 = vmatpush.msrb.mxu1 %v4409_v19  ;;  %v3095_v19 = vld [vmem:[#allocation4 + $0x338] sm:$0xff] }
 0x68e   :  { %4306 = vmatmul.f32.gmra.mxu3 %v3071_v53  ;;  %v3794_v53 = vadd.f32 %v3793_v63, %v3681_v24  ;;  %v9072_v31 = vpop.f32.mrf.mxu0  ;;  %v6684_v24 = vld [vmem:[%s10467_s1] sm:$0xff]  ;;  %v3197_v63 = vld [vmem:[#allocation4 + $0x668] sm:$0xff] }
 0x690   :  { %4122 = vmatmul.f32.gmra.mxu1 %v3181_v20 }
 0x691   :  { %v3903_v21 = vpop.f32.mrf.mxu3 }
 0x692   :  { %v9067_v61 = vadd.f32 %v3903_v21, %v3791_v47  ;;  %4199 = vmatmul.f32.gmra.mxu2 %v3086_v56  ;;  %v4410_v56 = vld [vmem:[%s10471_s5] sm:$0xff]  ;;  %v3087_v21 = vld [vmem:[#allocation4 + $0x2f8] sm:$0xff] }
 0x693   :  { %4426 = vmatpush.msrb.mxu0 %v4410_v56 }
 0x694   :  { %6122 = vmatmul.msk.f32.vlgmr.msrb.gmra.mxu0 %vm91_vm0, %v6684_v24  ;;  %v6685_v24 = vld [vmem:[%s10467_s1 + $0x8] sm:$0xff] }
 0x695   :  { %v3796_v45 = vpop.f32.mrf.mxu2  ;;  %v9069_v22 = vpop.f32.mrf.mxu1 }
 0x696   :  { %4309 = vmatmul.f32.gmra.mxu3 %v3079_v36 }
 0x698   :  { %4125 = vmatmul.f32.gmra.mxu1 %v3189_v32 }
 0x699   :  { %v3906_v20 = vpop.f32.mrf.mxu3 }
 0x69a   :  { %v9075_v47 = vadd.f32 %v3906_v20, %v3794_v53  ;;  %4202 = vmatmul.f32.gmra.mxu2 %v3094_v42  ;;  %v3684_v42 = vadd.f32 %v8970_v15, %v3571_v2  ;;  %v3574_v53 = vadd.f32 %v8876_v55, %v3433_v13  ;;  %v9091_v20 = vpop.f32.mrf.mxu0  ;;  %v3110_v55 = vld [vmem:[#allocation4 + $0x3b0] sm:$0xff] }
 0x69c   :  { %10547 = vst [vmem:[#allocation27_spill] sm:$0xff] %v9075_v47  ;;  %v3797_v36 = vadd.f32 %v3796_v45, %v3684_v42  ;;  %6123 = vmatmul.msk.f32.gmra.mxu0 %vm91_vm0, %v6685_v24  ;;  %v3205_v45 = vld [vmem:[#allocation4 + $0x6a8] sm:$0xff]  ;;  %v3435_v42 = vpop.permute.xlu2 %3434  ;;  %v6686_v24 = vld [vmem:[%s10467_s1 + $0x10] sm:$0xff] }
 0x69d   :  { %v3799_v14 = vpop.f32.mrf.mxu2  ;;  %v9087_v17 = vpop.f32.mrf.mxu1 }
 0x69e   :  { %4312 = vmatmul.f32.gmra.mxu3 %v3087_v21  ;;  %v3687_v21 = vadd.f32 %v8978_v6, %v3574_v53 }
 0x6a0   :  { %4128 = vmatmul.f32.gmra.mxu1 %v3197_v63  ;;  %v3800_v63 = vadd.f32 %v3799_v14, %v3687_v21  ;;  %v3213_v14 = vld [vmem:[#allocation4 + $0x6e8] sm:$0xff]  ;;  %v3118_v21 = vld [vmem:[#allocation4 + $0x3f0] sm:$0xff] }
 0x6a1   :  { %v3909_v32 = vpop.f32.mrf.mxu3 }
 0x6a2   :  { %v9093_v56 = vadd.f32 %v3909_v32, %v3797_v36  ;;  %4205 = vmatmul.f32.gmra.mxu2 %v3102_v0  ;;  %v3103_v36 = vld [vmem:[#allocation4 + $0x378] sm:$0xff]  ;;  %v3577_v32 = vadd.f32 %v8897_v30, %v3435_v42  ;;  %v3437_v30 = vpop.permute.xlu0 %3436 }
 0x6a4   :  { %10548 = vst [vmem:[#allocation28_spill] sm:$0xff] %v9093_v56  ;;  %v9105_v56 = vpop.f32.mrf.mxu0  ;;  %6124 = vmatmul.msk.f32.gmra.mxu0 %vm91_vm0, %v6686_v24  ;;  %v3580_v24 = vadd.f32 %v8918_v11, %v3437_v30  ;;  %v4408_v11 = vld [vmem:[%s10472_s6] sm:$0xff]  ;;  %v3119_v30 = vld [vmem:[#allocation4 + $0x3f8] sm:$0xff] }
 0x6a5   :  { %v3802_v15 = vpop.f32.mrf.mxu2  ;;  %v9099_v2 = vpop.f32.mrf.mxu1  ;;  %4635 = vmatpush.msrb.mxu1 %v4408_v11  ;;  %v3237_v11 = vld [vmem:[#allocation4 + $0x7a8] sm:$0xff] }
 0x6a6   :  { %4315 = vmatmul.f32.gmra.mxu3 %v3095_v19  ;;  %v3690_v19 = vadd.f32 %v8986_v7, %v3577_v32  ;;  %v6687_v7 = vld [vmem:[%s10467_s1 + $0x18] sm:$0xff]  ;;  %v3221_v32 = vld [vmem:[#allocation4 + $0x728] sm:$0xff] }
 0x6a8   :  { %4131 = vmatmul.f32.gmra.mxu1 %v3205_v45  ;;  %v3439_v45 = vpop.permute.xlu1 %3438 }
 0x6a9   :  { %v3912_v13 = vpop.f32.mrf.mxu3  ;;  %v3583_v42 = vadd.f32 %v8928_v50, %v3439_v45  ;;  %v3693_v50 = vadd.f32 %v8994_v59, %v3580_v24  ;;  %v3126_v45 = vld [vmem:[#allocation4 + $0x430] sm:$0xff]  ;;  %v6688_v59 = vld [vmem:[%s10467_s1 + $0x20] sm:$0xff] }
 0x6aa   :  { %v9102_v0 = vadd.f32 %v3912_v13, %v3800_v63  ;;  %4208 = vmatmul.f32.gmra.mxu2 %v3110_v55  ;;  %v3803_v55 = vadd.f32 %v3802_v15, %v3690_v19 }
 0x6ab   :  { %v3696_v47 = vadd.f32 %v9002_v40, %v3583_v42  ;;  %v3134_v42 = vld [vmem:[#allocation4 + $0x470] sm:$0xff] }
 0x6ac   :  { %10549 = vst [vmem:[#allocation7_spill] sm:$0xff] %v9102_v0  ;;  %v3111_v0 = vld [vmem:[#allocation4 + $0x3b8] sm:$0xff]  ;;  %6125 = vmatmul.msk.f32.gmra.mxu0 %vm91_vm0, %v6687_v7 }
 0x6ad   :  { %v3805_v6 = vpop.f32.mrf.mxu2  ;;  %v9111_v53 = vpop.f32.mrf.mxu1 }
 0x6ae   :  { %4318 = vmatmul.f32.gmra.mxu3 %v3103_v36  ;;  %v3806_v40 = vadd.f32 %v3805_v6, %v3693_v50 }
 0x6b0   :  { %4134 = vmatmul.f32.gmra.mxu1 %v3213_v14  ;;  %v9126_v14 = vpop.f32.mrf.mxu0 }
 0x6b1   :  { %v3915_v63 = vpop.f32.mrf.mxu3 }
 0x6b2   :  { %v9115_v13 = vadd.f32 %v3915_v63, %v3803_v55  ;;  %4211 = vmatmul.f32.gmra.mxu2 %v3118_v21  ;;  %v3229_v63 = vld [vmem:[#allocation4 + $0x768] sm:$0xff] }
 0x6b4   :  { %6126 = vmatmul.msk.f32.gmra.mxu0 %vm91_vm0, %v6688_v59 }
 0x6b5   :  { %v3808_v15 = vpop.f32.mrf.mxu2  ;;  %v9123_v36 = vpop.f32.mrf.mxu1 }
 0x6b6   :  { %v3809_v19 = vadd.f32 %v3808_v15, %v3696_v47  ;;  %4321 = vmatmul.f32.gmra.mxu3 %v3111_v0  ;;  %v3127_v15 = vld [vmem:[#allocation4 + $0x438] sm:$0xff] }
 0x6b8   :  { %4137 = vmatmul.f32.gmra.mxu1 %v3221_v32  ;;  %v9139_v6 = vpop.f32.mrf.mxu0  ;;  %v6689_v32 = vld [vmem:[%s10467_s1 + $0x28] sm:$0xff] }
 0x6b9   :  { %v3918_v21 = vpop.f32.mrf.mxu3 }
 0x6ba   :  { %v9131_v55 = vadd.f32 %v3918_v21, %v3806_v40  ;;  %4214 = vmatmul.f32.gmra.mxu2 %v3126_v45  ;;  %v3942_v40 = vadd.f32 %v8938_v52, %v8882_v48  ;;  %v3142_v21 = vld [vmem:[#allocation4 + $0x4b0] sm:$0xff]  ;;  %v3245_v48 = vld [vmem:[#allocation4 + $0x7e8] sm:$0xff]  ;;  %v3945_v52 = vadd.f32 %v8946_v49, %v8900_v57 }
 0x6bc   :  { %6127 = vmatmul.msk.f32.gmra.mxu0 %vm91_vm0, %v6689_v32 }
 0x6bd   :  { %v4167_v47 = vpop.f32.mrf.mxu2  ;;  %v9137_v0 = vpop.f32.mrf.mxu1 }
 0x6be   :  { %4324 = vmatmul.f32.gmra.mxu3 %v3119_v30 }
 0x6c0   :  { %4140 = vmatmul.f32.gmra.mxu1 %v3229_v63  ;;  %v9152_v59 = vpop.f32.mrf.mxu0 }
 0x6c1   :  { %v3921_v24 = vpop.f32.mrf.mxu3 }
 0x6c2   :  { %v9141_v7 = vadd.f32 %v3921_v24, %v3809_v19  ;;  %4217 = vmatmul.f32.gmra.mxu2 %v3134_v42  ;;  %v4055_v19 = vadd.f32 %v9010_v33, %v3942_v40  ;;  %v3135_v42 = vld [vmem:[#allocation4 + $0x478] sm:$0xff]  ;;  %v6690_v24 = vld [vmem:[%s10467_s1 + $0x30] sm:$0xff] }
 0x6c3   :  { %v3150_v33 = vld [vmem:[#allocation4 + $0x4f0] sm:$0xff] }
 0x6c4   :  { %10550 = vst [vmem:[#allocation21_spill] sm:$0xff] %v9141_v7  ;;  %v4168_v63 = vadd.f32 %v4167_v47, %v4055_v19  ;;  %6128 = vmatmul.msk.f32.gmra.mxu0 %vm91_vm0, %v6690_v24  ;;  %v4058_v47 = vadd.f32 %v9018_v10, %v3945_v52  ;;  %v3948_v10 = vadd.f32 %v8954_v54, %v8886_v26  ;;  %v3158_v24 = vld [vmem:[#allocation4 + $0x530] sm:$0xff]  ;;  %v3151_v52 = vld [vmem:[#allocation4 + $0x4f8] sm:$0xff] }
 0x6c5   :  { %v4170_v50 = vpop.f32.mrf.mxu2  ;;  %v9147_v45 = vpop.f32.mrf.mxu1 }
 0x6c6   :  { %4327 = vmatmul.f32.gmra.mxu3 %v3127_v15  ;;  %v4171_v40 = vadd.f32 %v4170_v50, %v4058_v47  ;;  %v4061_v50 = vadd.f32 %v9026_v44, %v3948_v10  ;;  %v3951_v44 = vadd.f32 %v8962_v8, %v8903_v12  ;;  %v6693_v10 = vld [vmem:[%s10467_s1 + $0x48] sm:$0xff]  ;;  %v3954_v8 = vadd.f32 %v8972_v5, %v8914_v35 }
 0x6c8   :  { %4143 = vmatmul.f32.gmra.mxu1 %v3237_v11  ;;  %v9163_v19 = vpop.f32.mrf.mxu0 }
 0x6c9   :  { %v4280_v30 = vpop.f32.mrf.mxu3 }
 0x6ca   :  { %4220 = vmatmul.f32.gmra.mxu2 %v3142_v21  ;;  %v4281_v15 = vadd.f32 %v4280_v30, %v4168_v63  ;;  %v3143_v21 = vld [vmem:[#allocation4 + $0x4b8] sm:$0xff] }
 0x6cb   :  { %v6691_v30 = vld [vmem:[%s10467_s1 + $0x38] sm:$0xff] }
 0x6cc   :  { %6315 = vtanh.f32 %v4281_v15  ;;  %6129 = vmatmul.msk.f32.gmra.mxu0 %vm91_vm0, %v6691_v30 }
 0x6cd   :  { %v4173_v32 = vpop.f32.mrf.mxu2  ;;  %v9158_v7 = vpop.f32.mrf.mxu1 }
 0x6ce   :  { %4330 = vmatmul.f32.gmra.mxu3 %v3135_v42 }
 0x6d0   :  { %4146 = vmatmul.f32.gmra.mxu1 %v3245_v48  ;;  %v4174_v48 = vadd.f32 %v4173_v32, %v4061_v50  ;;  %v9181_v26 = vpop.f32.mrf.mxu0  ;;  %v4064_v32 = vadd.f32 %v9034_v18, %v3951_v44  ;;  %v3174_v18 = vld [vmem:[#allocation4 + $0x5b0] sm:$0xff] }
 0x6d1   :  { %v4283_v11 = vpop.f32.mrf.mxu3 }
 0x6d2   :  { %4223 = vmatmul.f32.gmra.mxu2 %v3150_v33  ;;  %v4284_v63 = vadd.f32 %v4283_v11, %v4171_v40  ;;  %v6316_v49 = vpop.eup %6315  ;;  %v6692_v33 = vld [vmem:[%s10467_s1 + $0x40] sm:$0xff] }
 0x6d4   :  { %6317 = vtanh.f32 %v4284_v63  ;;  %6130 = vmatmul.msk.f32.gmra.mxu0 %vm91_vm0, %v6692_v33 }
 0x6d5   :  { %v4176_v42 = vpop.f32.mrf.mxu2  ;;  %v9169_v57 = vpop.f32.mrf.mxu1 }
 0x6d6   :  { %4333 = vmatmul.f32.gmra.mxu3 %v3143_v21  ;;  %v3166_v21 = vld [vmem:[#allocation4 + $0x570] sm:$0xff]  ;;  %v4177_v63 = vadd.f32 %v4176_v42, %v4064_v32  ;;  %v4067_v42 = vadd.f32 %v9042_v39, %v3954_v8  ;;  %v3957_v39 = vadd.f32 %v8980_v1, %v8905_v43 }
 0x6d7   :  { %v3182_v32 = vld [vmem:[#allocation4 + $0x5f0] sm:$0xff] }
 0x6d8   :  { %6154 = vmatmul.msk.f32.vlgmr.msrb.gmra.mxu1 %vm2543_vm2, %v6316_v49  ;;  %v3159_v49 = vld [vmem:[#allocation4 + $0x538] sm:$0xff] }
 0x6d9   :  { %v4286_v15 = vpop.f32.mrf.mxu3 }
 0x6da   :  { %4226 = vmatmul.f32.gmra.mxu2 %v3158_v24  ;;  %v4287_v47 = vadd.f32 %v4286_v15, %v4174_v48  ;;  %v6318_v54 = vpop.eup %6317  ;;  %v9195_v48 = vpop.f32.mrf.mxu0 }
 0x6dc   :  { %6319 = vtanh.f32 %v4287_v47  ;;  %6131 = vmatmul.msk.f32.gmra.mxu0 %vm91_vm0, %v6693_v10  ;;  %v3167_v47 = vld [vmem:[#allocation4 + $0x578] sm:$0xff] }
 0x6dd   :  { %v4179_v11 = vpop.f32.mrf.mxu2  ;;  %v9179_v40 = vpop.f32.mrf.mxu1  ;;  %v3175_v10 = vld [vmem:[#allocation4 + $0x5b8] sm:$0xff] }
 0x6de   :  { %4336 = vmatmul.f32.gmra.mxu3 %v3151_v52  ;;  %v4180_v33 = vadd.f32 %v4179_v11, %v4067_v42  ;;  %v4070_v11 = vadd.f32 %v9050_v41, %v3957_v39  ;;  %v3960_v41 = vadd.f32 %v8988_v38, %v8916_v3  ;;  %v3198_v39 = vld [vmem:[#allocation4 + $0x670] sm:$0xff] }
 0x6e0   :  { %6155 = vmatmul.msk.f32.gmra.mxu1 %vm2543_vm2, %v6318_v54  ;;  %v6694_v54 = vld [vmem:[%s10467_s1 + $0x50] sm:$0xff] }
 0x6e1   :  { %v4289_v30 = vpop.f32.mrf.mxu3 }
 0x6e2   :  { %4229 = vmatmul.f32.gmra.mxu2 %v3166_v21  ;;  %v4290_v24 = vadd.f32 %v4289_v30, %v4177_v63  ;;  %v6320_v12 = vpop.eup %6319  ;;  %v9209_v63 = vpop.f32.mrf.mxu0 }
 0x6e4   :  { %6321 = vtanh.f32 %v4290_v24  ;;  %6132 = vmatmul.msk.f32.gmra.mxu0 %vm91_vm0, %v6694_v54  ;;  %v6695_v24 = vld [vmem:[%s10467_s1 + $0x58] sm:$0xff]  ;;  %v6696_v54 = vld [vmem:[%s10467_s1 + $0x60] sm:$0xff] }
 0x6e5   :  { %v4182_v50 = vpop.f32.mrf.mxu2  ;;  %v9191_v15 = vpop.f32.mrf.mxu1 }
 0x6e6   :  { %4339 = vmatmul.f32.gmra.mxu3 %v3159_v49  ;;  %v4183_v49 = vadd.f32 %v4182_v50, %v4070_v11  ;;  %v4073_v50 = vadd.f32 %v9058_v60, %v3960_v41  ;;  %v3963_v60 = vadd.f32 %v8996_v4, %v8925_v27 }
 0x6e8   :  { %6156 = vmatmul.msk.f32.gmra.mxu1 %vm2543_vm2, %v6320_v12 }
 0x6e9   :  { %v4292_v52 = vpop.f32.mrf.mxu3 }
 0x6ea   :  { %4232 = vmatmul.f32.gmra.mxu2 %v3174_v18  ;;  %v4293_v44 = vadd.f32 %v4292_v52, %v4180_v33  ;;  %v6322_v21 = vpop.eup %6321  ;;  %v3190_v18 = vld [vmem:[#allocation4 + $0x630] sm:$0xff]  ;;  %v3183_v33 = vld [vmem:[#allocation4 + $0x5f8] sm:$0xff] }
 0x6ec   :  { %6323 = vtanh.f32 %v4293_v44  ;;  %6133 = vmatmul.msk.f32.gmra.mxu0 %vm91_vm0, %v6695_v24 }
 0x6ed   :  { %v4185_v35 = vpop.f32.mrf.mxu2  ;;  %v9203_v5 = vpop.f32.mrf.mxu1 }
 0x6ee   :  { %4342 = vmatmul.f32.gmra.mxu3 %v3167_v47  ;;  %v4186_v52 = vadd.f32 %v4185_v35, %v4073_v50  ;;  %v9221_v47 = vpop.f32.mrf.mxu0  ;;  %v4076_v35 = vadd.f32 %v9062_v29, %v3963_v60  ;;  %v3966_v29 = vadd.f32 %v9004_v34, %v8933_v46  ;;  %v3199_v50 = vld [vmem:[#allocation4 + $0x678] sm:$0xff]  ;;  %v3969_v34 = vadd.f32 %v9012_v62, %v8941_v37 }
 0x6f0   :  { %6157 = vmatmul.msk.f32.gmra.mxu1 %vm2543_vm2, %v6322_v21 }
 0x6f1   :  { %v4295_v30 = vpop.f32.mrf.mxu3 }
 0x6f2   :  { %4235 = vmatmul.f32.gmra.mxu2 %v3182_v32  ;;  %v4296_v12 = vadd.f32 %v4295_v30, %v4183_v49  ;;  %v6324_v8 = vpop.eup %6323  ;;  %v3191_v30 = vld [vmem:[#allocation4 + $0x638] sm:$0xff]  ;;  %v6697_v49 = vld [vmem:[%s10467_s1 + $0x68] sm:$0xff] }
 0x6f4   :  { %6325 = vtanh.f32 %v4296_v12  ;;  %6134 = vmatmul.msk.f32.gmra.mxu0 %vm91_vm0, %v6696_v54 }
 0x6f5   :  { %v4188_v43 = vpop.f32.mrf.mxu2  ;;  %v9215_v1 = vpop.f32.mrf.mxu1 }
 0x6f6   :  { %4345 = vmatmul.f32.gmra.mxu3 %v3175_v10  ;;  %v4189_v11 = vadd.f32 %v4188_v43, %v4076_v35  ;;  %v9239_v27 = vpop.f32.mrf.mxu0  ;;  %v4079_v43 = vadd.f32 %v9069_v22, %v3966_v29  ;;  %v3214_v22 = vld [vmem:[#allocation4 + $0x6f0] sm:$0xff]  ;;  %v6699_v35 = vld [vmem:[%s10467_s1 + $0x78] sm:$0xff] }
 0x6f7   :  { %v3215_v29 = vld [vmem:[#allocation4 + $0x6f8] sm:$0xff] }
 0x6f8   :  { %6158 = vmatmul.msk.f32.gmra.mxu1 %vm2543_vm2, %v6324_v8  ;;  %v3206_v8 = vld [vmem:[#allocation4 + $0x6b0] sm:$0xff] }
 0x6f9   :  { %v4298_v42 = vpop.f32.mrf.mxu3 }
 0x6fa   :  { %4238 = vmatmul.f32.gmra.mxu2 %v3190_v18  ;;  %v4299_v44 = vadd.f32 %v4298_v42, %v4186_v52  ;;  %v6326_v21 = vpop.eup %6325  ;;  %v6698_v42 = vld [vmem:[%s10467_s1 + $0x70] sm:$0xff] }
 0x6fc   :  { %6327 = vtanh.f32 %v4299_v44  ;;  %6135 = vmatmul.msk.f32.gmra.mxu0 %vm91_vm0, %v6697_v49 }
 0x6fd   :  { %v4191_v3 = vpop.f32.mrf.mxu2  ;;  %v9227_v38 = vpop.f32.mrf.mxu1 }
 0x6fe   :  { %4348 = vmatmul.f32.gmra.mxu3 %v3183_v33  ;;  %v4192_v18 = vadd.f32 %v4191_v3, %v4079_v43  ;;  %v9253_v44 = vpop.f32.mrf.mxu0  ;;  %v4082_v3 = vadd.f32 %v9087_v17, %v3969_v34  ;;  %v3972_v17 = vadd.f32 %v9020_v9, %v8949_v58  ;;  %v6701_v34 = vld [vmem:[%s10467_s1 + $0x88] sm:$0xff] }
 0x700   :  { %6159 = vmatmul.msk.f32.gmra.mxu1 %vm2543_vm2, %v6326_v21  ;;  %v4085_v49 = vadd.f32 %v9099_v2, %v3972_v17  ;;  %v3975_v2 = vadd.f32 %v9028_v51, %v8957_v23 }
 0x701   :  { %v4301_v32 = vpop.f32.mrf.mxu3 }
 0x702   :  { %4241 = vmatmul.f32.gmra.mxu2 %v3198_v39  ;;  %v4302_v10 = vadd.f32 %v4301_v32, %v4189_v11  ;;  %v6328_v4 = vpop.eup %6327  ;;  %v3207_v39 = vld [vmem:[#allocation4 + $0x6b8] sm:$0xff] }
 0x704   :  { %6329 = vtanh.f32 %v4302_v10  ;;  %6136 = vmatmul.msk.f32.gmra.mxu0 %vm91_vm0, %v6698_v42 }
 0x705   :  { %v4194_v24 = vpop.f32.mrf.mxu2  ;;  %v9237_v12 = vpop.f32.mrf.mxu1 }
 0x706   :  { %4351 = vmatmul.f32.gmra.mxu3 %v3191_v30  ;;  %v4195_v60 = vadd.f32 %v4194_v24, %v4082_v3  ;;  %v3222_v30 = vld [vmem:[#allocation4 + $0x730] sm:$0xff]  ;;  %v9267_v24 = vpop.f32.mrf.mxu0 }
 0x708   :  { %6160 = vmatmul.msk.f32.gmra.mxu1 %vm2543_vm2, %v6328_v4 }
 0x709   :  { %v4304_v41 = vpop.f32.mrf.mxu3 }
 0x70a   :  { %4244 = vmatmul.f32.gmra.mxu2 %v3206_v8  ;;  %v4305_v52 = vadd.f32 %v4304_v41, %v4192_v18  ;;  %v6330_v46 = vpop.eup %6329  ;;  %v6700_v8 = vld [vmem:[%s10467_s1 + $0x80] sm:$0xff]  ;;  %v3230_v18 = vld [vmem:[#allocation4 + $0x770] sm:$0xff] }
 0x70c   :  { %6331 = vtanh.f32 %v4305_v52  ;;  %6137 = vmatmul.msk.f32.gmra.mxu0 %vm91_vm0, %v6699_v35 }
 0x70d   :  { %v4197_v33 = vpop.f32.mrf.mxu2  ;;  %v9249_v54 = vpop.f32.mrf.mxu1 }
 0x70e   :  { %4354 = vmatmul.f32.gmra.mxu3 %v3199_v50  ;;  %v4198_v4 = vadd.f32 %v4197_v33, %v4085_v49  ;;  %v4088_v50 = vadd.f32 %v9111_v53, %v3975_v2  ;;  %v3223_v33 = vld [vmem:[#allocation4 + $0x738] sm:$0xff]  ;;  %v3978_v53 = vadd.f32 %v9037_v28, %v8966_v16 }
 0x710   :  { %6161 = vmatmul.msk.f32.gmra.mxu1 %vm2543_vm2, %v6330_v46  ;;  %v9279_v46 = vpop.f32.mrf.mxu0 }
 0x711   :  { %v4307_v21 = vpop.f32.mrf.mxu3 }
 0x712   :  { %4247 = vmatmul.f32.gmra.mxu2 %v3214_v22  ;;  %v4308_v32 = vadd.f32 %v4307_v21, %v4195_v60  ;;  %v6332_v11 = vpop.eup %6331  ;;  %v3238_v21 = vld [vmem:[#allocation4 + $0x7b0] sm:$0xff]  ;;  %v4091_v60 = vadd.f32 %v9123_v36, %v3978_v53  ;;  %v10551_v36 = vld [vmem:[#allocation19_spill] sm:$0xff] }
 0x713   :  { %v3981_v49 = vadd.f32 %v10551_v36, %v8975_v25  ;;  %v6705_v36 = vld [vmem:[%s10467_s1 + $0xa8] sm:$0xff] }
 0x714   :  { %6333 = vtanh.f32 %v4308_v32  ;;  %6138 = vmatmul.msk.f32.gmra.mxu0 %vm91_vm0, %v6700_v8  ;;  %v3231_v32 = vld [vmem:[#allocation4 + $0x778] sm:$0xff] }
 0x715   :  { %v4200_v37 = vpop.f32.mrf.mxu2  ;;  %v9261_v62 = vpop.f32.mrf.mxu1 }
 0x716   :  { %4357 = vmatmul.f32.gmra.mxu3 %v3207_v39  ;;  %v4201_v52 = vadd.f32 %v4200_v37, %v4088_v50  ;;  %v6702_v37 = vld [vmem:[%s10467_s1 + $0x90] sm:$0xff] }
 0x718   :  { %6162 = vmatmul.msk.f32.gmra.mxu1 %vm2543_vm2, %v6332_v11  ;;  %v9297_v16 = vpop.f32.mrf.mxu0 }
 0x719   :  { %v4310_v10 = vpop.f32.mrf.mxu3 }
 0x71a   :  { %4250 = vmatmul.f32.gmra.mxu2 %v3222_v30  ;;  %v4311_v43 = vadd.f32 %v4310_v10, %v4198_v4  ;;  %v6334_v41 = vpop.eup %6333  ;;  %v3246_v10 = vld [vmem:[#allocation4 + $0x7f0] sm:$0xff]  ;;  %v4094_v4 = vadd.f32 %v9137_v0, %v3981_v49  ;;  %v10553_v0 = vld [vmem:[#allocation24_spill] sm:$0xff] }
 0x71c   :  { %6335 = vtanh.f32 %v4311_v43  ;;  %6139 = vmatmul.msk.f32.gmra.mxu0 %vm91_vm0, %v6701_v34  ;;  %v3239_v43 = vld [vmem:[#allocation4 + $0x7b8] sm:$0xff] }
 0x71d   :  { %v4203_v58 = vpop.f32.mrf.mxu2  ;;  %v9273_v9 = vpop.f32.mrf.mxu1 }
 0x71e   :  { %4360 = vmatmul.f32.gmra.mxu3 %v3215_v29  ;;  %v4204_v35 = vadd.f32 %v4203_v58, %v4091_v60  ;;  %v6703_v58 = vld [vmem:[%s10467_s1 + $0x98] sm:$0xff] }
 0x720   :  { %6163 = vmatmul.msk.f32.gmra.mxu1 %vm2543_vm2, %v6334_v41  ;;  %v4428_v25 = vpop.f32.mrf.mxu0 }
 0x721   :  { %v4313_v42 = vpop.f32.mrf.mxu3 }
 0x722   :  { %4253 = vmatmul.f32.gmra.mxu2 %v3230_v18  ;;  %v4314_v22 = vadd.f32 %v4313_v42, %v4201_v52  ;;  %v6336_v3 = vpop.eup %6335  ;;  %v10552_v42 = vld [vmem:[#allocation11_spill] sm:$0xff] }
 0x723   :  { %v3984_v52 = vadd.f32 %v10553_v0, %v10552_v42 }
 0x724   :  { %6337 = vtanh.f32 %v4314_v22  ;;  %6140 = vmatmul.msk.f32.gmra.mxu0 %vm91_vm0, %v6702_v37 }
 0x725   :  { %v4206_v23 = vpop.f32.mrf.mxu2  ;;  %v9285_v51 = vpop.f32.mrf.mxu1 }
 0x726   :  { %4363 = vmatmul.f32.gmra.mxu3 %v3223_v33  ;;  %v4207_v8 = vadd.f32 %v4206_v23, %v4094_v4  ;;  %v4097_v33 = vadd.f32 %v9147_v45, %v3984_v52  ;;  %v3247_v23 = vld [vmem:[#allocation4 + $0x7f8] sm:$0xff] }
 0x728   :  { %6164 = vmatmul.msk.f32.gmra.mxu1 %vm2543_vm2, %v6336_v3  ;;  %v6704_v3 = vld [vmem:[%s10467_s1 + $0xa0] sm:$0xff]  ;;  %v4431_v45 = vpop.f32.mrf.mxu0 }
 0x729   :  { %v4316_v39 = vpop.f32.mrf.mxu3 }
 0x72a   :  { %4256 = vmatmul.f32.gmra.mxu2 %v3238_v21  ;;  %v4317_v11 = vadd.f32 %v4316_v39, %v4204_v35  ;;  %v6338_v28 = vpop.eup %6337  ;;  %v10554_v35 = vld [vmem:[#allocation12_spill] sm:$0xff] }
 0x72c   :  { %6339 = vtanh.f32 %v4317_v11  ;;  %6141 = vmatmul.msk.f32.gmra.mxu0 %vm91_vm0, %v6703_v58 }
 0x72d   :  { %v4209_v17 = vpop.f32.mrf.mxu2  ;;  %v9295_v30 = vpop.f32.mrf.mxu1 }
 0x72e   :  { %4366 = vmatmul.f32.gmra.mxu3 %v3231_v32  ;;  %v4210_v22 = vadd.f32 %v4209_v17, %v4097_v33  ;;  %v10555_v32 = vld [vmem:[#allocation25_spill] sm:$0xff] }
 0x72f   :  { %v3987_v37 = vadd.f32 %v10555_v32, %v10554_v35 }
 0x730   :  { %6165 = vmatmul.msk.f32.gmra.mxu1 %vm2543_vm2, %v6338_v28 }
 0x731   :  { %v4319_v29 = vpop.f32.mrf.mxu3  ;;  %v4100_v11 = vadd.f32 %v9158_v7, %v3987_v37  ;;  %v4434_v7 = vpop.f32.mrf.mxu0 }
 0x732   :  { %4259 = vmatmul.f32.gmra.mxu2 %v3246_v10  ;;  %v4320_v41 = vadd.f32 %v4319_v29, %v4207_v8  ;;  %v6340_v50 = vpop.eup %6339  ;;  %v10556_v8 = vld [vmem:[#allocation13_spill] sm:$0xff] }
 0x734   :  { %6341 = vtanh.f32 %v4320_v41  ;;  %6142 = vmatmul.msk.f32.gmra.mxu0 %vm91_vm0, %v6704_v3 }
 0x735   :  { %v4212_v2 = vpop.f32.mrf.mxu2  ;;  %v9307_v18 = vpop.f32.mrf.mxu1 }
 0x736   :  { %4369 = vmatmul.f32.gmra.mxu3 %v3239_v43  ;;  %v4213_v28 = vadd.f32 %v4212_v2, %v4100_v11  ;;  %v3990_v43 = vadd.f32 %v9072_v31, %v10556_v8  ;;  %v10557_v31 = vld [vmem:[#allocation14_spill] sm:$0xff] }
 0x738   :  { %6166 = vmatmul.msk.f32.gmra.mxu1 %vm2543_vm2, %v6340_v50  ;;  %v4103_v58 = vadd.f32 %v9169_v57, %v3990_v43  ;;  %v6706_v50 = vld [vmem:[%s10467_s1 + $0xb0] sm:$0xff] }
 0x739   :  { %v4322_v34 = vpop.f32.mrf.mxu3  ;;  %v9342_v57 = vpop.f32.mrf.mxu0 }
 0x73a   :  { %v4323_v53 = vadd.f32 %v4322_v34, %v4210_v22  ;;  %v6342_v39 = vpop.eup %6341  ;;  %v3993_v34 = vadd.f32 %v9091_v20, %v10557_v31  ;;  %v9352_v20 = vld [vmem:[%s10475_s9 + $0x2] ss:$0 sm:$0xff] }
 0x73c   :  { %6343 = vtanh.f32 %v4323_v53  ;;  %6143 = vmatmul.msk.f32.gmra.mxu0 %vm91_vm0, %v6705_v36  ;;  %v4106_v22 = vadd.f32 %v9179_v40, %v3993_v34  ;;  %v6707_v53 = vld [vmem:[%s10467_s1 + $0xb8] sm:$0xff]  ;;  %v10558_v40 = vld [vmem:[#allocation15_spill] sm:$0xff] }
 0x73d   :  { %v4215_v21 = vpop.f32.mrf.mxu2  ;;  %v9317_v60 = vpop.f32.mrf.mxu1  ;;  %v3996_v11 = vadd.f32 %v9105_v56, %v10558_v40 }
 0x73e   :  { %4372 = vmatmul.f32.gmra.mxu3 %v3247_v23  ;;  %v4216_v2 = vadd.f32 %v4215_v21, %v4103_v58 }
 0x73f   :  { %v4109_v36 = vadd.f32 %v9191_v15, %v3996_v11 }
 0x740   :  { %6167 = vmatmul.msk.f32.gmra.mxu1 %vm2543_vm2, %v6342_v39 }
 0x741   :  { %v4325_v17 = vpop.f32.mrf.mxu3 }
 0x742   :  { %v4326_v49 = vadd.f32 %v4325_v17, %v4213_v28  ;;  %v6344_v29 = vpop.eup %6343  ;;  %v9360_v28 = vpop.f32.mrf.mxu0 }
 0x744   :  { %6345 = vtanh.f32 %v4326_v49  ;;  %6144 = vmatmul.msk.f32.gmra.mxu0 %vm91_vm0, %v6706_v50 }
 0x745   :  { %v4218_v10 = vpop.f32.mrf.mxu2  ;;  %v9327_v4 = vpop.f32.mrf.mxu1 }
 0x746   :  { %v4219_v3 = vadd.f32 %v4218_v10, %v4106_v22 }
 0x748   :  { %6168 = vmatmul.msk.f32.gmra.mxu1 %vm2543_vm2, %v6344_v29 }
 0x749   :  { %v4328_v41 = vpop.f32.mrf.mxu3 }
 0x74a   :  { %v4329_v42 = vadd.f32 %v4328_v41, %v4216_v2  ;;  %v6346_v33 = vpop.eup %6345  ;;  %v10559_v41 = vld [vmem:[#allocation16_spill] sm:$0xff] }
 0x74b   :  { %v3999_v2 = vadd.f32 %v9126_v14, %v10559_v41  ;;  %v6709_v14 = vld [vmem:[%s10467_s1 + $0xc8] sm:$0xff] }
 0x74c   :  { %6347 = vtanh.f32 %v4329_v42  ;;  %6145 = vmatmul.msk.f32.gmra.mxu0 %vm91_vm0, %v6707_v53  ;;  %v9374_v42 = vpop.f32.mrf.mxu0  ;;  %v10560_v53 = vld [vmem:[#allocation17_spill] sm:$0xff] }
 0x74d   :  { %v4221_v0 = vpop.f32.mrf.mxu2  ;;  %v9337_v52 = vpop.f32.mrf.mxu1 }
 0x74e   :  { %v4222_v10 = vadd.f32 %v4221_v0, %v4109_v36  ;;  %v4112_v0 = vadd.f32 %v9203_v5, %v3999_v2  ;;  %v4002_v5 = vadd.f32 %v9139_v6, %v10560_v53  ;;  %v6710_v6 = vld [vmem:[%s10467_s1 + $0xd0] sm:$0xff] }
 0x750   :  { %6169 = vmatmul.msk.f32.gmra.mxu1 %vm2543_vm2, %v6346_v33 }
 0x751   :  { %v4331_v23 = vpop.f32.mrf.mxu3 }
 0x752   :  { %v4332_v21 = vadd.f32 %v4331_v23, %v4219_v3  ;;  %v6348_v37 = vpop.eup %6347 }
 0x754   :  { %6349 = vtanh.f32 %v4332_v21 }
 0x755   :  { %v4224_v39 = vpop.f32.mrf.mxu2  ;;  %v4637_v35 = vpop.f32.mrf.mxu1 }
 0x756   :  { %v4638_v32 = vadd.f32 %v4637_v35, %v4428_v25  ;;  %v6708_v25 = vld [vmem:[%s10467_s1 + $0xc0] sm:$0xff] }
 0x757   :  { %6146 = vmatmul.msk.f32.gmra.mxu0 %vm91_vm0, %v6708_v25 }
 0x758   :  { %v9357_v17 = vadd.f32 %v9352_v20, %v4638_v32  ;;  %6170 = vmatmul.msk.f32.gmra.mxu1 %vm2543_vm2, %v6348_v37  ;;  %v4115_v32 = vadd.f32 %v9215_v1, %v4002_v5  ;;  %v10561_v1 = vld [vmem:[#allocation18_spill] sm:$0xff] }
 0x759   :  { %v4334_v49 = vpop.f32.mrf.mxu3  ;;  %v4005_v25 = vadd.f32 %v9152_v59, %v10561_v1  ;;  %v6711_v59 = vld [vmem:[%s10467_s1 + $0xd8] sm:$0xff] }
 0x75a   :  { %6351 = vtanh.f32 %v9357_v17  ;;  %v4335_v56 = vadd.f32 %v4334_v49, %v4222_v10  ;;  %v6350_v58 = vpop.eup %6349 }
 0x75c   :  { %6353 = vtanh.f32 %v4335_v56 }
 0x75d   :  { %v4227_v29 = vpop.f32.mrf.mxu2  ;;  %v4640_v8 = vpop.f32.mrf.mxu1 }
 0x75e   :  { %v4641_v43 = vadd.f32 %v4640_v8, %v4431_v45  ;;  %v4225_v45 = vadd.f32 %v4224_v39, %v4112_v0  ;;  %v9389_v39 = vpop.f32.mrf.mxu0 }
 0x75f   :  { %6147 = vmatmul.msk.f32.gmra.mxu0 %vm91_vm0, %v6709_v14 }
 0x760   :  { %v6352_v15 = vpop.eup %6351  ;;  %v9371_v50 = vadd.f32 %v9352_v20, %v4641_v43  ;;  %6171 = vmatmul.msk.f32.gmra.mxu1 %vm2543_vm2, %v6350_v58  ;;  %v4118_v43 = vadd.f32 %v9227_v38, %v4005_v25  ;;  %v10562_v38 = vld [vmem:[#allocation20_spill] sm:$0xff] }
 0x761   :  { %v4337_v33 = vpop.f32.mrf.mxu3  ;;  %5438 = vrot.lane.b32.xlu2 %v6352_v15, %s6746_s2 }
 0x762   :  { %6355 = vtanh.f32 %v9371_v50  ;;  %v4338_v31 = vadd.f32 %v4337_v33, %v4225_v45  ;;  %v6354_v3 = vpop.eup %6353  ;;  %v4008_v45 = vadd.f32 %v9163_v19, %v10562_v38  ;;  %v6712_v19 = vld [vmem:[%s10467_s1 + $0xe0] sm:$0xff] }
 0x764   :  { %6357 = vtanh.f32 %v4338_v31 }
 0x765   :  { %v4230_v34 = vpop.f32.mrf.mxu2  ;;  %v4643_v22 = vpop.f32.mrf.mxu1 }
 0x766   :  { %v4644_v23 = vadd.f32 %v4643_v22, %v4434_v7  ;;  %v4228_v7 = vadd.f32 %v4227_v29, %v4115_v32  ;;  %v9405_v29 = vpop.f32.mrf.mxu0  ;;  %v4121_v22 = vadd.f32 %v9237_v12, %v4008_v45  ;;  %v10563_v12 = vld [vmem:[#allocation22_spill] sm:$0xff] }
 0x767   :  { %6148 = vmatmul.msk.f32.gmra.mxu0 %vm91_vm0, %v6710_v6 }
 0x768   :  { %v6356_v21 = vpop.eup %6355  ;;  %v9386_v35 = vadd.f32 %v9352_v20, %v4644_v23  ;;  %6172 = vmatmul.msk.f32.gmra.mxu1 %vm2543_vm2, %v6354_v3 }
 0x769   :  { %v4340_v37 = vpop.f32.mrf.mxu3  ;;  %5440 = vrot.lane.b32.xlu0 %v6356_v21, %s6746_s2 }
 0x76a   :  { %6359 = vtanh.f32 %v9386_v35  ;;  %v4341_v40 = vadd.f32 %v4340_v37, %v4228_v7  ;;  %v6358_v10 = vpop.eup %6357  ;;  %v4011_v37 = vadd.f32 %v9181_v26, %v10563_v12  ;;  %v6713_v26 = vld [vmem:[%s10467_s1 + $0xe8] sm:$0xff] }
 0x76c   :  { %6361 = vtanh.f32 %v4341_v40 }
 0x76d   :  { %v4233_v11 = vpop.f32.mrf.mxu2  ;;  %v4646_v36 = vpop.f32.mrf.mxu1 }
 0x76e   :  { %v4647_v49 = vadd.f32 %v4646_v36, %v9342_v57  ;;  %v4231_v57 = vadd.f32 %v4230_v34, %v4118_v43  ;;  %v9421_v34 = vpop.f32.mrf.mxu0 }
 0x76f   :  { %6149 = vmatmul.msk.f32.gmra.mxu0 %vm91_vm0, %v6711_v59 }
 0x770   :  { %v6360_v56 = vpop.eup %6359  ;;  %v9402_v8 = vadd.f32 %v9352_v20, %v4647_v49  ;;  %6173 = vmatmul.msk.f32.gmra.mxu1 %vm2543_vm2, %v6358_v10 }
 0x771   :  { %v4343_v58 = vpop.f32.mrf.mxu3  ;;  %5442 = vrot.lane.b32.xlu1 %v6360_v56, %s6746_s2 }
 0x772   :  { %6363 = vtanh.f32 %v9402_v8  ;;  %v4344_v41 = vadd.f32 %v4343_v58, %v4231_v57  ;;  %v6362_v33 = vpop.eup %6361 }
 0x774   :  { %6365 = vtanh.f32 %v4344_v41 }
 0x775   :  { %v4236_v2 = vpop.f32.mrf.mxu2  ;;  %v4649_v15 = vpop.f32.mrf.mxu1 }
 0x776   :  { %v4650_v0 = vadd.f32 %v4649_v15, %v9360_v28  ;;  %v4234_v28 = vadd.f32 %v4233_v11, %v4121_v22  ;;  %v9437_v40 = vpop.f32.mrf.mxu0  ;;  %v4124_v11 = vadd.f32 %v9249_v54, %v4011_v37  ;;  %v10564_v54 = vld [vmem:[#allocation26_spill] sm:$0xff] }
 0x777   :  { %6150 = vmatmul.msk.f32.gmra.mxu0 %vm91_vm0, %v6712_v19  ;;  %v4014_v43 = vadd.f32 %v9195_v48, %v10564_v54  ;;  %v6714_v48 = vld [vmem:[%s10467_s1 + $0xf0] sm:$0xff] }
 0x778   :  { %v6364_v14 = vpop.eup %6363  ;;  %v9418_v31 = vadd.f32 %v9352_v20, %v4650_v0  ;;  %6174 = vmatmul.msk.f32.gmra.mxu1 %vm2543_vm2, %v6362_v33 }
 0x779   :  { %v4346_v23 = vpop.f32.mrf.mxu3  ;;  %5444 = vrot.lane.b32.xlu2 %v6364_v14, %s6746_s2  ;;  %v4127_v41 = vadd.f32 %v9261_v62, %v4014_v43  ;;  %v4017_v62 = vadd.f32 %v9209_v63, %v9067_v61  ;;  %v6715_v61 = vld [vmem:[%s10467_s1 + $0xf8] sm:$0xff] }
 0x77a   :  { %6367 = vtanh.f32 %v9418_v31  ;;  %v4347_v3 = vadd.f32 %v4346_v23, %v4234_v28  ;;  %v6366_v32 = vpop.eup %6365 }
 0x77b   :  { %v4130_v28 = vadd.f32 %v9273_v9, %v4017_v62 }
 0x77c   :  { %6369 = vtanh.f32 %v4347_v3 }
 0x77d   :  { %v4239_v53 = vpop.f32.mrf.mxu2  ;;  %v4652_v5 = vpop.f32.mrf.mxu1 }
 0x77e   :  { %v4653_v21 = vadd.f32 %v4652_v5, %v9374_v42  ;;  %v4237_v42 = vadd.f32 %v4236_v2, %v4124_v11  ;;  %v9453_v59 = vpop.f32.mrf.mxu0 }
 0x77f   :  { %6151 = vmatmul.msk.f32.gmra.mxu0 %vm91_vm0, %v6713_v26 }
 0x780   :  { %v6368_v7 = vpop.eup %6367  ;;  %v9434_v6 = vadd.f32 %v9352_v20, %v4653_v21  ;;  %6175 = vmatmul.msk.f32.gmra.mxu1 %vm2543_vm2, %v6366_v32  ;;  %v10565_v21 = vld [vmem:[#allocation27_spill] sm:$0xff] }
 0x781   :  { %v4349_v36 = vpop.f32.mrf.mxu3  ;;  %5446 = vrot.lane.b32.xlu0 %v6368_v7, %s6746_s2  ;;  %v4020_v9 = vadd.f32 %v9221_v47, %v10565_v21  ;;  %v6186_v47 = vmul.f32 -1.442695, %v9357_v17 }
 0x782   :  { %6371 = vtanh.f32 %v9434_v6  ;;  %v4350_v49 = vadd.f32 %v4349_v36, %v4237_v42  ;;  %v6370_v56 = vpop.eup %6369 }
 0x783   :  { %v4133_v11 = vadd.f32 %v9285_v51, %v4020_v9 }
 0x784   :  { %6373 = vtanh.f32 %v4350_v49 }
 0x785   :  { %v4242_v10 = vpop.f32.mrf.mxu2  ;;  %v4655_v1 = vpop.f32.mrf.mxu1 }
 0x786   :  { %v4656_v25 = vadd.f32 %v4655_v1, %v9389_v39  ;;  %v4240_v39 = vadd.f32 %v4239_v53, %v4127_v41  ;;  %v9469_v23 = vpop.f32.mrf.mxu0  ;;  %v10566_v1 = vld [vmem:[#allocation28_spill] sm:$0xff] }
 0x787   :  { %6152 = vmatmul.msk.f32.gmra.mxu0 %vm91_vm0, %v6714_v48 }
 0x788   :  { %v6372_v58 = vpop.eup %6371  ;;  %v9450_v57 = vadd.f32 %v9352_v20, %v4656_v25  ;;  %6176 = vmatmul.msk.f32.gmra.mxu1 %vm2543_vm2, %v6370_v56  ;;  %v4023_v25 = vadd.f32 %v9239_v27, %v10566_v1 }
 0x789   :  { %v4352_v2 = vpop.f32.mrf.mxu3  ;;  %5448 = vrot.lane.b32.xlu1 %v6372_v58, %s6746_s2 }
 0x78a   :  { %6375 = vtanh.f32 %v9450_v57  ;;  %v4353_v15 = vadd.f32 %v4352_v2, %v4240_v39  ;;  %v6374_v45 = vpop.eup %6373  ;;  %v4136_v43 = vadd.f32 %v9295_v30, %v4023_v25 }
 0x78c   :  { %6377 = vtanh.f32 %v4353_v15  ;;  %v10567_v15 = vld [vmem:[#allocation7_spill] sm:$0xff] }
 0x78d   :  { %v4658_v0 = vpop.f32.mrf.mxu1  ;;  %v4245_v33 = vpop.f32.mrf.mxu2 }
 0x78e   :  { %v4659_v38 = vadd.f32 %v4658_v0, %v9405_v29  ;;  %v4243_v29 = vadd.f32 %v4242_v10, %v4130_v28  ;;  %v9485_v7 = vpop.f32.mrf.mxu0  ;;  %v4026_v0 = vadd.f32 %v9253_v44, %v10567_v15  ;;  %v6190_v15 = vmul.f32 -1.442695, %v9418_v31 }
 0x78f   :  { %6153 = vmatmul.msk.f32.gmra.mxu0 %vm91_vm0, %v6715_v61 }
 0x790   :  { %v6376_v14 = vpop.eup %6375  ;;  %v9466_v22 = vadd.f32 %v9352_v20, %v4659_v38  ;;  %6177 = vmatmul.msk.f32.gmra.mxu1 %vm2543_vm2, %v6374_v45  ;;  %v4139_v62 = vadd.f32 %v9307_v18, %v4026_v0 }
 0x791   :  { %v4355_v19 = vpop.f32.mrf.mxu3  ;;  %5450 = vrot.lane.b32.xlu2 %v6376_v14, %s6746_s2 }
 0x792   :  { %6379 = vtanh.f32 %v9466_v22  ;;  %v4356_v63 = vadd.f32 %v4355_v19, %v4243_v29  ;;  %v6378_v5 = vpop.eup %6377 }
 0x794   :  { %6381 = vtanh.f32 %v4356_v63  ;;  %v4029_v63 = vadd.f32 %v9267_v24, %v9115_v13  ;;  %v6188_v13 = vmul.f32 -1.442695, %v9386_v35 }
 0x795   :  { %v4661_v3 = vpop.f32.mrf.mxu1  ;;  %v4248_v12 = vpop.f32.mrf.mxu2 }
 0x796   :  { %v4662_v53 = vadd.f32 %v4661_v3, %v9421_v34  ;;  %v4246_v34 = vadd.f32 %v4245_v33, %v4133_v11  ;;  %v9498_v54 = vpop.f32.mrf.mxu0  ;;  %v4249_v58 = vadd.f32 %v4248_v12, %v4136_v43  ;;  %v6189_v33 = vmul.f32 -1.442695, %v9402_v8 }
 0x797   :  { %v6187_v8 = vmul.f32 -1.442695, %v9371_v50  ;;  %v4142_v21 = vadd.f32 %v9317_v60, %v4029_v63 }
 0x798   :  { %v6380_v32 = vpop.eup %6379  ;;  %v9482_v37 = vadd.f32 %v9352_v20, %v4662_v53  ;;  %6178 = vmatmul.msk.f32.gmra.mxu1 %vm2543_vm2, %v6378_v5 }
 0x799   :  { %v4358_v36 = vpop.f32.mrf.mxu3  ;;  %5452 = vrot.lane.b32.xlu0 %v6380_v32, %s6746_s2 }
 0x79a   :  { %6383 = vtanh.f32 %v9482_v37  ;;  %v4359_v42 = vadd.f32 %v4358_v36, %v4246_v34  ;;  %v6382_v10 = vpop.eup %6381 }
 0x79b   :  { %6385 = vpow2.f32 %v6186_v47 }
 0x79c   :  { %6387 = vtanh.f32 %v4359_v42 }
 0x79d   :  { %v4664_v26 = vpop.f32.mrf.mxu1 }
 0x79e   :  { %v4665_v49 = vadd.f32 %v4664_v26, %v9437_v40  ;;  %v4251_v40 = vpop.f32.mrf.mxu2  ;;  %v9511_v45 = vpop.f32.mrf.mxu0  ;;  %v4032_v26 = vadd.f32 %v9279_v46, %v9131_v55 }
 0x79f   :  { %v4252_v44 = vadd.f32 %v4251_v40, %v4139_v62 }
 0x7a0   :  { %v6384_v56 = vpop.eup %6383  ;;  %v9495_v51 = vadd.f32 %v9352_v20, %v4665_v49  ;;  %6179 = vmatmul.msk.f32.gmra.mxu1 %vm2543_vm2, %v6382_v10 }
 0x7a1   :  { %v4361_v17 = vpop.f32.mrf.mxu3  ;;  %5454 = vrot.lane.b32.xlu1 %v6384_v56, %s6746_s2  ;;  %v6386_v2 = vpop.eup %6385 }
 0x7a2   :  { %6389 = vtanh.f32 %v9495_v51  ;;  %v4362_v27 = vadd.f32 %v4361_v17, %v4249_v58  ;;  %v6388_v48 = vpop.eup %6387  ;;  %v9514_v14 = vadd.f32 1.0, %v6386_v2 }
 0x7a4   :  { %6391 = vtanh.f32 %v4362_v27  ;;  %vm4899_vm4 = vweird.f32 %v9514_v14 }
 0x7a5   :  { %v4667_v41 = vpop.f32.mrf.mxu1 }
 0x7a6   :  { %v4668_v39 = vadd.f32 %v4667_v41, %v9453_v59  ;;  %v4254_v28 = vpop.f32.mrf.mxu2  ;;  %v9527_v5 = vpop.f32.mrf.mxu0  ;;  %v10568_v41 = vld [vmem:[#allocation21_spill] sm:$0xff] }
 0x7a7   :  { %v4255_v24 = vadd.f32 %v4254_v28, %v4142_v21  ;;  %v4035_v2 = vadd.f32 %v9297_v16, %v10568_v41 }
 0x7a8   :  { %v6390_v30 = vpop.eup %6389  ;;  %v9508_v38 = vadd.f32 %v9352_v20, %v4668_v39  ;;  %6180 = vmatmul.msk.f32.gmra.mxu1 %vm2543_vm2, %v6388_v48  ;;  %v6192_v39 = vmul.f32 -1.442695, %v9450_v57 }
 0x7a9   :  { %v4364_v59 = vpop.f32.mrf.mxu3  ;;  %5456 = vrot.lane.b32.xlu2 %v6390_v30, %s6746_s2 }
 0x7aa   :  { %6393 = vtanh.f32 %v9508_v38  ;;  %v4365_v19 = vadd.f32 %v4364_v59, %v4252_v44  ;;  %v6392_v18 = vpop.eup %6391  ;;  %v4905_v44 = vand.u32 2147483648, %v9514_v14 }
 0x7ab   :  { %6395 = vpow2.f32 %v6189_v33 }
 0x7ac   :  { %6397 = vrcp.f32 %v9514_v14 }
 0x7ad   :  { %v4670_v29 = vpop.f32.mrf.mxu1  ;;  %6399 = vpow2.f32 %v6187_v8 }
 0x7ae   :  { %v4671_v61 = vadd.f32 %v4670_v29, %v9469_v23  ;;  %6401 = vtanh.f32 %v4365_v19  ;;  %v4257_v34 = vpop.f32.mrf.mxu2  ;;  %v9547_v10 = vpop.f32.mrf.mxu0 }
 0x7b0   :  { %v6394_v3 = vpop.eup %6393  ;;  %v9524_v53 = vadd.f32 %v9352_v20, %v4671_v61  ;;  %6181 = vmatmul.msk.f32.gmra.mxu1 %vm2543_vm2, %v6392_v18 }
 0x7b1   :  { %v6396_v50 = vpop.eup %6395  ;;  %v4367_v9 = vpop.f32.mrf.mxu3  ;;  %5458 = vrot.lane.b32.xlu0 %v6394_v3, %s6746_s2 }
 0x7b2   :  { %6403 = vtanh.f32 %v9524_v53  ;;  %v9532_v23 = vpop.eup %6397  ;;  %v9535_v32 = vadd.f32 1.0, %v6396_v50  ;;  %v4368_v12 = vadd.f32 %v4367_v9, %v4255_v24 }
 0x7b3   :  { %v6400_v36 = vpop.eup %6399  ;;  %v4895_v60 = vmul.f32 %v9532_v23, %v9514_v14  ;;  %6405 = vpow2.f32 %v6188_v13  ;;  %vm4900_vm3 = vweird.f32 %v9532_v23 }
 0x7b4   :  { %v6402_v42 = vpop.eup %6401  ;;  %6407 = vrcp.f32 %v9535_v32  ;;  %v9552_v46 = vadd.f32 1.0, %v6400_v36  ;;  %vm9583_vm5 = vmor %vm4899_vm4, %vm4900_vm3  ;;  %v6191_v36 = vmul.f32 -1.442695, %v9434_v6  ;;  %vm4944_vm8 = vweird.f32 %v9535_v32 }
 0x7b5   :  { %v4673_v11 = vpop.f32.mrf.mxu1  ;;  %6409 = vtanh.f32 %v4368_v12  ;;  %v4896_v55 = vsub.f32 1.0, %v4895_v60 }
 0x7b6   :  { %v4674_v47 = vadd.f32 %v4673_v11, %v9485_v7  ;;  %v4145_v7 = vadd.f32 %v9327_v4, %v4032_v26  ;;  %v4260_v0 = vpop.f32.mrf.mxu2  ;;  %v9567_v30 = vpop.f32.mrf.mxu0  ;;  %vm4914_vm12 = vweird.f32 %v9552_v46 }
 0x7b7   :  { %v4897_v58 = vmul.f32 %v9532_v23, %v4896_v55  ;;  %v4950_v55 = vand.u32 2147483648, %v9535_v32 }
 0x7b8   :  { %v6404_v49 = vpop.eup %6403  ;;  %v9544_v35 = vadd.f32 %v9352_v20, %v4674_v47  ;;  %6182 = vmatmul.msk.f32.gmra.mxu1 %vm2543_vm2, %v6402_v42  ;;  %v4258_v25 = vadd.f32 %v4257_v34, %v4145_v7 }
 0x7b9   :  { %v4370_v1 = vpop.f32.mrf.mxu3  ;;  %5460 = vrot.lane.b32.xlu1 %v6404_v49, %s6746_s2  ;;  %v6406_v56 = vpop.eup %6405  ;;  %v4898_v57 = vadd.f32 %v9532_v23, %v4897_v58 }
 0x7ba   :  { %6411 = vtanh.f32 %v9544_v35  ;;  %v4371_v43 = vadd.f32 %v4370_v1, %v4258_v25  ;;  %v9554_v40 = vpop.eup %6407  ;;  %v9576_v62 = vadd.f32 1.0, %v6406_v56  ;;  %v4948_v56 = vand.u32 2147483647, %v9535_v32 }
 0x7bb   :  { %v6410_v4 = vpop.eup %6409  ;;  %6413 = vrcp.f32 %v9552_v46  ;;  %v4940_v16 = vmul.f32 %v9554_v40, %v9535_v32  ;;  %v4902_v18 = vsel %vm9583_vm5, %v9532_v23, %v4898_v57  ;;  %v5439_v50 = vpop.permute.xlu2 %5438  ;;  %vm4945_vm7 = vweird.f32 %v9554_v40 }
 0x7bc   :  { %6415 = vtanh.f32 %v4371_v43  ;;  %vm4946_vm9 = vmor %vm4944_vm8, %vm4945_vm7  ;;  %vm4949_vm10 = vcmp.eq.f32.partialorder %v4948_v56, 8.507059e+37  ;;  %vm4929_vm0 = vweird.f32 %v9576_v62 }
 0x7bd   :  { %v4676_v17 = vpop.f32.mrf.mxu1  ;;  %v4941_v61 = vsub.f32 1.0, %v4940_v16  ;;  %v6195_v16 = vmul.f32 -1.442695, %v9495_v51 }
 0x7be   :  { %v4677_v27 = vadd.f32 %v4676_v17, %v9498_v54  ;;  %v4148_v54 = vadd.f32 %v9337_v52, %v4035_v2  ;;  %v4903_v52 = vand.u32 2147483647, %v9514_v14  ;;  %v4906_v14 = vor.u32 1.1754944e-38, %v4905_v44  ;;  %v9600_v23 = vpop.f32.mrf.mxu0 }
 0x7bf   :  { %v4920_v2 = vand.u32 2147483648, %v9552_v46 }
 0x7c0   :  { %v6412_v48 = vpop.eup %6411  ;;  %v9564_v33 = vadd.f32 %v9352_v20, %v4677_v27  ;;  %6183 = vmatmul.msk.f32.gmra.mxu1 %vm2543_vm2, %v6410_v4  ;;  %v4261_v59 = vadd.f32 %v4260_v0, %v4148_v54  ;;  %vm4904_vm6 = vcmp.eq.f32.partialorder %v4903_v52, 8.507059e+37  ;;  %v4951_v4 = vor.u32 1.1754944e-38, %v4950_v55 }
 0x7c1   :  { %5462 = vrot.lane.b32.xlu2 %v6412_v48, %s6746_s2  ;;  %v4373_v31 = vpop.f32.mrf.mxu3  ;;  %v9581_v8 = vpop.eup %6413  ;;  %v4907_v12 = vsel %vm4904_vm6, %v4906_v14, %v4902_v18  ;;  %v4918_v52 = vand.u32 2147483647, %v9552_v46  ;;  %v4921_v18 = vor.u32 1.1754944e-38, %v4920_v2  ;;  %v6193_v14 = vmul.f32 -1.442695, %v9466_v22 }
 0x7c2   :  { %6417 = vtanh.f32 %v9564_v33  ;;  %v4374_v19 = vadd.f32 %v4373_v31, %v4261_v59  ;;  %v6416_v3 = vpop.eup %6415  ;;  %v4910_v13 = vmul.f32 %v9581_v8, %v9552_v46  ;;  %v5534_v34 = vmul.f32 %v5439_v50, %v4907_v12 }
 0x7c3   :  { %6419 = vpow2.f32 %v6192_v39  ;;  %vm4915_vm11 = vweird.f32 %v9581_v8  ;;  %vm4919_vm14 = vcmp.eq.f32.partialorder %v4918_v52, 8.507059e+37 }
 0x7c4   :  { %6421 = vpow2.f32 %v6190_v15  ;;  %v4911_v60 = vsub.f32 1.0, %v4910_v13  ;;  %v5566_v1 = vsel %vm414_vm1, %v5534_v34, 0.0  ;;  %vm9644_vm13 = vmor %vm4914_vm12, %vm4915_vm11  ;;  %v4935_v34 = vand.u32 2147483648, %v9576_v62 }
 0x7c5   :  { %v4679_v29 = vpop.f32.mrf.mxu1  ;;  %6423 = vrcp.f32 %v9576_v62  ;;  %v5567_v27 = vrot.slane %v5566_v1, 4 }
 0x7c6   :  { %v4680_v63 = vadd.f32 %v4679_v29, %v9511_v45  ;;  %6425 = vtanh.f32 %v4374_v19  ;;  %v4942_v45 = vmul.f32 %v9554_v40, %v4941_v61  ;;  %v4912_v58 = vmul.f32 %v9581_v8, %v4911_v60  ;;  %v9630_v39 = vpop.f32.mrf.mxu0 }
 0x7c7   :  { %v5568_v57 = vadd.f32 %v5567_v27, %v5566_v1  ;;  %v4933_v1 = vand.u32 2147483647, %v9576_v62 }
 0x7c8   :  { %v6418_v21 = vpop.eup %6417  ;;  %v9593_v9 = vadd.f32 %v9352_v20, %v4680_v63  ;;  %6184 = vmatmul.msk.f32.gmra.mxu1 %vm2543_vm2, %v6416_v3  ;;  %v4943_v7 = vadd.f32 %v9554_v40, %v4942_v45  ;;  %v4913_v0 = vadd.f32 %v9581_v8, %v4912_v58 }
 0x7c9   :  { %v6420_v24 = vpop.eup %6419  ;;  %5464 = vrot.lane.b32.xlu0 %v6418_v21, %s6746_s2  ;;  %v5569_v46 = vrot.slane %v5568_v57, 2  ;;  %vm4934_vm4 = vcmp.eq.f32.partialorder %v4933_v1, 8.507059e+37 }
 0x7ca   :  { %v6422_v11 = vpop.eup %6421  ;;  %6427 = vtanh.f32 %v9593_v9  ;;  %v9604_v47 = vadd.f32 1.0, %v6420_v24  ;;  %v4947_v32 = vsel %vm4946_vm9, %v9554_v40, %v4943_v7 }
 0x7cb   :  { %v9606_v42 = vpop.eup %6423  ;;  %v9608_v26 = vadd.f32 1.0, %v6422_v11  ;;  %6429 = vpow2.f32 %v6191_v36  ;;  %v4952_v15 = vsel %vm4949_vm10, %v4951_v4, %v4947_v32  ;;  %v5570_v11 = vadd.f32 %v5569_v46, %v5568_v57 }
 0x7cc   :  { %v6426_v25 = vpop.eup %6425  ;;  %6431 = vrcp.f32 %v9604_v47  ;;  %vm4930_vm15 = vweird.f32 %v9606_v42  ;;  %v4936_v4 = vor.u32 1.1754944e-38, %v4935_v34  ;;  %vm4989_vm6 = vweird.f32 %v9604_v47 }
 0x7cd   :  { %v4682_v49 = vpop.f32.mrf.mxu1  ;;  %6433 = vrcp.f32 %v9608_v26  ;;  %vm9673_vm3 = vmor %vm4929_vm0, %vm4930_vm15  ;;  %v4963_v2 = vand.u32 2147483647, %v9608_v26  ;;  %vm4959_vm10 = vweird.f32 %v9608_v26 }
 0x7ce   :  { %v4683_v6 = vadd.f32 %v4682_v49, %v9527_v5  ;;  %v4925_v5 = vmul.f32 %v9606_v42, %v9576_v62  ;;  %v9667_v49 = vpop.f32.mrf.mxu0  ;;  %v5571_v62 = vrot.slane %v5570_v11, 1 }
 0x7cf   :  { %vm9730_vm11 = vcmp.eq.f32.partialorder %v4963_v2, 8.507059e+37 }
 0x7d0   :  { %v6428_v43 = vpop.eup %6427  ;;  %v9619_v17 = vadd.f32 %v9352_v20, %v4683_v6  ;;  %6185 = vmatmul.msk.f32.gmra.mxu1 %vm2543_vm2, %v6426_v25  ;;  %v4926_v54 = vsub.f32 1.0, %v4925_v5  ;;  %v5572_v52 = vadd.f32 %v5571_v62, %v5570_v11 }
 0x7d1   :  { %5466 = vrot.lane.b32.xlu1 %v6428_v43, %s6746_s2  ;;  %v6430_v48 = vpop.eup %6429 }
 0x7d2   :  { %6435 = vtanh.f32 %v9619_v17  ;;  %v9635_v59 = vpop.eup %6431  ;;  %v9642_v19 = vadd.f32 1.0, %v6430_v48  ;;  %v4927_v63 = vmul.f32 %v9606_v42, %v4926_v54 }
 0x7d3   :  { %v5445_v41 = vpop.permute.xlu2 %5444  ;;  %v9640_v28 = vpop.eup %6433  ;;  %6437 = vpow2.f32 %v6195_v16  ;;  %v4985_v50 = vmul.f32 %v9635_v59, %v9604_v47  ;;  %v6194_v16 = vmul.f32 -1.442695, %v9482_v37  ;;  %vm4990_vm5 = vweird.f32 %v9635_v59 }
 0x7d4   :  { %v5537_v40 = vmul.f32 %v5445_v41, %v4952_v15  ;;  %v4955_v13 = vmul.f32 %v9640_v28, %v9608_v26  ;;  %v4928_v45 = vadd.f32 %v9606_v42, %v4927_v63  ;;  %v4995_v37 = vand.u32 2147483648, %v9604_v47  ;;  %vm9712_vm7 = vmor %vm4989_vm6, %vm4990_vm5 }
 0x7d5   :  { %v4685_v31 = vpop.f32.mrf.mxu1  ;;  %v4986_v60 = vsub.f32 1.0, %v4985_v50  ;;  %v4993_v50 = vand.u32 2147483647, %v9604_v47  ;;  %vm4960_vm8 = vweird.f32 %v9640_v28  ;;  %vm4974_vm15 = vweird.f32 %v9642_v19 }
 0x7d6   :  { %v4686_v44 = vadd.f32 %v4685_v31, %v9547_v10  ;;  %v4917_v10 = vsel %vm9644_vm13, %v9581_v8, %v4913_v0  ;;  %v5587_v3 = vsel %vm414_vm1, %v5537_v40, 0.0  ;;  %v4956_v56 = vsub.f32 1.0, %v4955_v13  ;;  %vm9736_vm12 = vmor %vm4959_vm10, %vm4960_vm8 }
 0x7d7   :  { %v4922_v21 = vsel %vm4919_vm14, %v4921_v18, %v4917_v10  ;;  %v5588_v24 = vrot.slane %v5587_v3, 4  ;;  %v4987_v41 = vmul.f32 %v9635_v59, %v4986_v60  ;;  %v4996_v11 = vor.u32 1.1754944e-38, %v4995_v37 }
 0x7d8   :  { %v6436_v51 = vpop.eup %6435  ;;  %v9649_v61 = vadd.f32 %v9352_v20, %v4686_v44  ;;  %vm4994_vm9 = vcmp.eq.f32.partialorder %v4993_v50, 8.507059e+37  ;;  %vm5859_vm13 = vcmask 1041409   ;;  %v4978_v50 = vand.u32 2147483647, %v9642_v19 }
 0x7d9   :  { %5468 = vrot.lane.b32.xlu2 %v6436_v51, %s6746_s2  ;;  %v6438_v6 = vpop.eup %6437  ;;  %v5589_v58 = vadd.f32 %v5588_v24, %v5587_v3  ;;  %v4988_v10 = vadd.f32 %v9635_v59, %v4987_v41 }
 0x7da   :  { %6439 = vtanh.f32 %v9649_v61  ;;  %v9689_v48 = vadd.f32 1.0, %v6438_v6  ;;  %vm4979_vm5 = vcmp.eq.f32.partialorder %v4978_v50, 8.507059e+37 }
 0x7db   :  { %6441 = vrcp.f32 %v9642_v19  ;;  %v5441_v8 = vpop.permute.xlu0 %5440  ;;  %v5590_v57 = vrot.slane %v5589_v58, 2  ;;  %v4992_v47 = vsel %vm9712_vm7, %v9635_v59, %v4988_v10  ;;  %v6198_v59 = vmul.f32 -1.442695, %v9544_v35 }
 0x7dc   :  { %v5535_v12 = vmul.f32 %v5441_v8, %v4922_v21  ;;  %6443 = vpow2.f32 %v6193_v14  ;;  %v9703_v14 = vpop.f32.mrf.mxu0  ;;  %v4997_v1 = vsel %vm4994_vm9, %v4996_v11, %v4992_v47  ;;  %vm5034_vm7 = vweird.f32 %v9689_v48 }
 0x7dd   :  { %v4688_v36 = vpop.f32.mrf.mxu1  ;;  %v5591_v13 = vadd.f32 %v5590_v57, %v5589_v58 }
 0x7de   :  { %v5573_v22 = vsel %vm414_vm1, %v5535_v12, 0.0  ;;  %v4689_v7 = vadd.f32 %v4688_v36, %v9567_v30  ;;  %v4932_v30 = vsel %vm9673_vm3, %v9606_v42, %v4928_v45  ;;  %v4957_v42 = vmul.f32 %v9640_v28, %v4956_v56 }
 0x7df   :  { %v5574_v55 = vrot.slane %v5573_v22, 4  ;;  %v4937_v54 = vsel %vm4934_vm4, %v4936_v4, %v4932_v30  ;;  %v4965_v36 = vand.u32 2147483648, %v9608_v26  ;;  %vm5861_vm3 = vcmask 1042434  }
 0x7e0   :  { %v6440_v43 = vpop.eup %6439  ;;  %v9678_v5 = vadd.f32 %v9352_v20, %v4689_v7  ;;  %v5592_v7 = vrot.slane %v5591_v13, 1  ;;  %v4958_v6 = vadd.f32 %v9640_v28, %v4957_v42  ;;  %vm5863_vm4 = vcmask 1043459  }
 0x7e1   :  { %v9683_v27 = vpop.eup %6441  ;;  %v5575_v32 = vadd.f32 %v5574_v55, %v5573_v22  ;;  %5470 = vrot.lane.b32.xlu0 %v6440_v43, %s6746_s2  ;;  %v4966_v35 = vor.u32 1.1754944e-38, %v4965_v36 }
 0x7e2   :  { %6445 = vtanh.f32 %v9678_v5  ;;  %v4970_v31 = vmul.f32 %v9683_v27, %v9642_v19  ;;  %v6444_v44 = vpop.eup %6443  ;;  %v4962_v2 = vsel %vm9736_vm12, %v9640_v28, %v4958_v6  ;;  %vm4975_vm14 = vweird.f32 %v9683_v27 }
 0x7e3   :  { %v5576_v15 = vrot.slane %v5575_v32, 2  ;;  %v5443_v0 = vpop.permute.xlu1 %5442  ;;  %6447 = vrcp.f32 %v9689_v48  ;;  %v9705_v21 = vadd.f32 1.0, %v6444_v44  ;;  %vm9774_vm0 = vmor %vm4974_vm15, %vm4975_vm14  ;;  %vm5865_vm14 = vcmask 1044484  }
 0x7e4   :  { %v5536_v40 = vmul.f32 %v5443_v0, %v4937_v54  ;;  %6449 = vpow2.f32 %v6194_v16  ;;  %v4971_v22 = vsub.f32 1.0, %v4970_v31  ;;  %v9752_v31 = vpop.f32.mrf.mxu0 }
 0x7e5   :  { %v5577_v29 = vadd.f32 %v5576_v15, %v5575_v32  ;;  %v4691_v51 = vpop.f32.mrf.mxu1  ;;  %6451 = vtanh.f32 %v5572_v52  ;;  %v5010_v50 = vand.u32 2147483648, %v9705_v21 }
 0x7e6   :  { %v5580_v18 = vsel %vm414_vm1, %v5536_v40, 0.0  ;;  %v4692_v63 = vadd.f32 %v4691_v51, %v9600_v23  ;;  %v4972_v15 = vmul.f32 %v9683_v27, %v4971_v22  ;;  %v4980_v40 = vand.u32 2147483648, %v9642_v19 }
 0x7e7   :  { %v5578_v46 = vrot.slane %v5577_v29, 1  ;;  %v5581_v3 = vrot.slane %v5580_v18, 4  ;;  %v4967_v51 = vsel %vm9730_vm11, %v4966_v35, %v4962_v2  ;;  %v6197_v35 = vmul.f32 -1.442695, %v9524_v53 }
 0x7e8   :  { %v6446_v8 = vpop.eup %6445  ;;  %v9708_v24 = vadd.f32 %v9352_v20, %v4692_v63  ;;  %vm5004_vm11 = vweird.f32 %v9705_v21  ;;  %v6200_v53 = vmul.f32 -1.442695, %v9593_v9 }
 0x7e9   :  { %v5579_v12 = vadd.f32 %v5578_v46, %v5577_v29  ;;  %v5582_v45 = vadd.f32 %v5581_v3, %v5580_v18  ;;  %5472 = vrot.lane.b32.xlu1 %v6446_v8, %s6746_s2  ;;  %v9725_v55 = vpop.eup %6447  ;;  %v6196_v29 = vmul.f32 -1.442695, %v9508_v38  ;;  %v4973_v18 = vadd.f32 %v9683_v27, %v4972_v15 }
 0x7ea   :  { %6453 = vtanh.f32 %v9708_v24  ;;  %v6450_v58 = vpop.eup %6449  ;;  %v5030_v54 = vmul.f32 %v9725_v55, %v9689_v48  ;;  %vm5035_vm6 = vweird.f32 %v9725_v55 }
 0x7eb   :  { %6455 = vtanh.f32 %v5579_v12  ;;  %v5583_v34 = vrot.slane %v5582_v45, 2  ;;  %v5451_v60 = vpop.permute.xlu2 %5450  ;;  %v6452_v32 = vpop.eup %6451  ;;  %v9756_v52 = vadd.f32 1.0, %v6450_v58  ;;  %v4981_v12 = vor.u32 1.1754944e-38, %v4980_v40  ;;  %vm9811_vm8 = vmor %vm5034_vm7, %vm5035_vm6 }
 0x7ec   :  { %6457 = vrcp.f32 %v9705_v21  ;;  %v5540_v56 = vmul.f32 %v5451_v60, %v4997_v1  ;;  %v5031_v46 = vsub.f32 1.0, %v5030_v54  ;;  %v4977_v19 = vsel %vm9774_vm0, %v9683_v27, %v4973_v18 }
 0x7ed   :  { %v5584_v25 = vadd.f32 %v5583_v34, %v5582_v45  ;;  %v4694_v43 = vpop.f32.mrf.mxu1  ;;  %6459 = vpow2.f32 %v6198_v59  ;;  %v4982_v6 = vsel %vm4979_vm5, %v4981_v12, %v4977_v19  ;;  %v5822_v19 = vld [vmem:[%s10473_s7] sm:$0xff]  ;;  %vm5019_vm5 = vweird.f32 %v9756_v52 }
 0x7ee   :  { %v4695_v30 = vadd.f32 %v4694_v43, %v9630_v39  ;;  %v5593_v39 = vadd.f32 %v5592_v7, %v5591_v13  ;;  %v5608_v57 = vsel %vm414_vm1, %v5540_v56, 0.0  ;;  %v9790_v56 = vpop.f32.mrf.mxu0  ;;  %vm5867_vm7 = vcmask 1045509  }
 0x7ef   :  { %v5585_v4 = vrot.slane %v5584_v25, 1  ;;  %v5609_v63 = vrot.slane %v5608_v57, 4 }
 0x7f0   :  { %v6454_v0 = vpop.eup %6453  ;;  %v9742_v26 = vadd.f32 %v9352_v20, %v4695_v30 }
 0x7f1   :  { %v6456_v42 = vpop.eup %6455  ;;  %v5586_v16 = vadd.f32 %v5585_v4, %v5584_v25  ;;  %5474 = vrot.lane.b32.xlu2 %v6454_v0, %s6746_s2  ;;  %v5610_v36 = vadd.f32 %v5609_v63, %v5608_v57  ;;  %v5824_v63 = vld [vmem:[%s10473_s7 + $0x10] sm:$0xff] }
 0x7f2   :  { %v9754_v44 = vpop.eup %6457  ;;  %6461 = vtanh.f32 %v9742_v26  ;;  %v5860_v28 = vsel %vm5859_vm13, %v6456_v42, %v6452_v32  ;;  %v5038_v42 = vand.u32 2147483647, %v9689_v48 }
 0x7f3   :  { %6463 = vtanh.f32 %v5586_v16  ;;  %v5447_v10 = vpop.permute.xlu0 %5446  ;;  %v5000_v8 = vmul.f32 %v9754_v44, %v9705_v21  ;;  %v6460_v45 = vpop.eup %6459  ;;  %v5611_v62 = vrot.slane %v5610_v36, 2  ;;  %v5825_v16 = vld [vmem:[%s10473_s7 + $0x18] sm:$0xff]  ;;  %vm5005_vm10 = vweird.f32 %v9754_v44 }
 0x7f4   :  { %6465 = vtanh.f32 %v5593_v39  ;;  %v5538_v37 = vmul.f32 %v5447_v10, %v4967_v51  ;;  %v9797_v30 = vadd.f32 1.0, %v6460_v45  ;;  %5914 = vmatpush.msrb.mxu2 %v5825_v16  ;;  %v9821_v51 = vld [vmem:[%s10475_s9 + $0x2] ss:$0 sm:$0xff]  ;;  %vm5039_vm9 = vcmp.eq.f32.partialorder %v5038_v42, 8.507059e+37  ;;  %vm9857_vm12 = vmor %vm5004_vm11, %vm5005_vm10 }
 0x7f5   :  { %v4697_v3 = vpop.f32.mrf.mxu1  ;;  %6467 = vrcp.f32 %v9756_v52  ;;  %v5001_v7 = vsub.f32 1.0, %v5000_v8  ;;  %v6199_v16 = vmul.f32 -1.442695, %v9564_v33 }
 0x7f6   :  { %v5594_v38 = vsel %vm414_vm1, %v5538_v37, 0.0  ;;  %v4698_v13 = vadd.f32 %v4697_v3, %v9667_v49  ;;  %6469 = vpow2.f32 %v6196_v29  ;;  %v5032_v49 = vmul.f32 %v9725_v55, %v5031_v46  ;;  %5915 = vmatpush.msrb.mxu2 %v5824_v63 }
 0x7f7   :  { %v5595_v47 = vrot.slane %v5594_v38, 4  ;;  %v5002_v39 = vmul.f32 %v9754_v44, %v5001_v7  ;;  %vm5079_vm11 = vweird.f32 %v9797_v30 }
 0x7f8   :  { %v6462_v11 = vpop.eup %6461  ;;  %v9782_v34 = vadd.f32 %v9352_v20, %v4698_v13  ;;  %v5040_v20 = vand.u32 2147483648, %v9689_v48  ;;  %v5033_v4 = vadd.f32 %v9725_v55, %v5032_v49  ;;  %v5612_v48 = vadd.f32 %v5611_v62, %v5610_v36 }
 0x7f9   :  { %v6464_v60 = vpop.eup %6463  ;;  %v5596_v22 = vadd.f32 %v5595_v47, %v5594_v38  ;;  %5476 = vrot.lane.b32.xlu0 %v6462_v11, %s6746_s2  ;;  %v5003_v45 = vadd.f32 %v9754_v44, %v5002_v39  ;;  %v6201_v11 = vmul.f32 -1.442695, %v9619_v17 }
 0x7fa   :  { %v6466_v1 = vpop.eup %6465  ;;  %6471 = vtanh.f32 %v9782_v34  ;;  %v5862_v27 = vsel %vm5861_vm3, %v6464_v60, %v5860_v28  ;;  %v5041_v28 = vor.u32 1.1754944e-38, %v5040_v20  ;;  %v5037_v18 = vsel %vm9811_vm8, %v9725_v55, %v5033_v4  ;;  %v5823_v55 = vld [vmem:[%s10473_s7 + $0x8] sm:$0xff]  ;;  %v9847_v60 = vpop.f32.mrf.mxu0 }
 0x7fb   :  { %v5597_v59 = vrot.slane %v5596_v22, 2  ;;  %v5449_v25 = vpop.permute.xlu1 %5448  ;;  %v9793_v43 = vsel %vm5863_vm4, %v6466_v1, %v5862_v27  ;;  %v9795_v58 = vpop.eup %6467  ;;  %6473 = vrcp.f32 %v9797_v30  ;;  %5916 = vmatpush.msrb.mxu2 %v5823_v55  ;;  %v5613_v23 = vrot.slane %v5612_v48, 1 }
 0x7fc   :  { %v5539_v32 = vmul.f32 %v5449_v25, %v4982_v6  ;;  %v6470_v41 = vpop.eup %6469  ;;  %6475 = vpow2.f32 %v6197_v35  ;;  %v5042_v38 = vsel %vm5039_vm9, %v5041_v28, %v5037_v18  ;;  %v5008_v6 = vand.u32 2147483647, %v9705_v21 }
 0x7fd   :  { %v5598_v15 = vadd.f32 %v5597_v59, %v5596_v22  ;;  %v4700_v0 = vpop.f32.mrf.mxu1  ;;  %v9832_v37 = vadd.f32 1.0, %v6470_v41  ;;  %5917 = vmatpush.msrb.mxu2 %v5822_v19  ;;  %v5011_v25 = vor.u32 1.1754944e-38, %v5010_v50  ;;  %v5614_v62 = vadd.f32 %v5613_v23, %v5612_v48 }
 0x7fe   :  { %v5601_v2 = vsel %vm414_vm1, %v5539_v32, 0.0  ;;  %v4701_v54 = vadd.f32 %v4700_v0, %v9703_v14  ;;  %v5015_v14 = vmul.f32 %v9795_v58, %v9756_v52  ;;  %vm5009_vm15 = vcmp.eq.f32.partialorder %v5008_v6, 8.507059e+37 }
 0x7ff   :  { %v5599_v57 = vrot.slane %v5598_v15, 1  ;;  %v5602_v40 = vrot.slane %v5601_v2, 4  ;;  %v5025_v0 = vand.u32 2147483648, %v9756_v52  ;;  %vm5020_vm0 = vweird.f32 %v9795_v58 }
 0x800   :  { %v6472_v29 = vpop.eup %6471  ;;  %v9824_v10 = vadd.f32 %v9821_v51, %v4701_v54  ;;  %v5016_v47 = vsub.f32 1.0, %v5015_v14  ;;  %v5023_v18 = vand.u32 2147483647, %v9756_v52  ;;  %vm9892_vm6 = vmor %vm5019_vm5, %vm5020_vm0  ;;  %vm5869_vm8 = vcmask 1046534  }
 0x801   :  { %v5600_v46 = vadd.f32 %v5599_v57, %v5598_v15  ;;  %v5603_v3 = vadd.f32 %v5602_v40, %v5601_v2  ;;  %5478 = vrot.lane.b32.xlu1 %v6472_v29, %s6746_s2  ;;  %v9849_v22 = vpop.eup %6473  ;;  %vm5049_vm5 = vweird.f32 %v9832_v37 }
 0x802   :  { %6477 = vtanh.f32 %v9824_v10  ;;  %v6476_v27 = vpop.eup %6475  ;;  %v5017_v21 = vmul.f32 %v9795_v58, %v5016_v47  ;;  %v5075_v15 = vmul.f32 %v9849_v22, %v9797_v30  ;;  %v9896_v50 = vpop.f32.mrf.mxu0  ;;  %vm5024_vm9 = vcmp.eq.f32.partialorder %v5023_v18, 8.507059e+37 }
 0x803   :  { %6479 = vtanh.f32 %v5600_v46  ;;  %v5604_v8 = vrot.slane %v5603_v3, 2  ;;  %v5457_v13 = vpop.permute.xlu2 %5456  ;;  %v9877_v2 = vadd.f32 1.0, %v6476_v27  ;;  %vm5080_vm10 = vweird.f32 %v9849_v22 }
 0x804   :  { %v5543_v12 = vmul.f32 %v5457_v13, %v5042_v38  ;;  %6481 = vrcp.f32 %v9832_v37  ;;  %v5018_v40 = vadd.f32 %v9795_v58, %v5017_v21  ;;  %v5085_v21 = vand.u32 2147483648, %v9797_v30 }
 0x805   :  { %v5605_v36 = vadd.f32 %v5604_v8, %v5603_v3  ;;  %v4703_v49 = vpop.f32.mrf.mxu1  ;;  %6483 = vpow2.f32 %v6201_v11  ;;  %v5026_v3 = vor.u32 1.1754944e-38, %v5025_v0  ;;  %v5083_v0 = vand.u32 2147483647, %v9797_v30 }
 0x806   :  { %v5629_v7 = vsel %vm414_vm1, %v5543_v12, 0.0  ;;  %v4704_v1 = vadd.f32 %v4703_v49, %v9752_v31  ;;  %v5007_v31 = vsel %vm9857_vm12, %v9754_v44, %v5003_v45  ;;  %v5022_v55 = vsel %vm9892_vm6, %v9795_v58, %v5018_v40  ;;  %vm9928_vm12 = vmor %vm5079_vm11, %vm5080_vm10 }
 0x807   :  { %v5606_v59 = vrot.slane %v5605_v36, 1  ;;  %v5630_v35 = vrot.slane %v5629_v7, 4  ;;  %v5012_v54 = vsel %vm5009_vm15, %v5011_v25, %v5007_v31  ;;  %v5027_v11 = vsel %vm5024_vm9, %v5026_v3, %v5022_v55 }
 0x808   :  { %v6478_v20 = vpop.eup %6477  ;;  %v9862_v32 = vadd.f32 %v9821_v51, %v4704_v1  ;;  %v5055_v1 = vand.u32 2147483648, %v9832_v37  ;;  %vm5084_vm0 = vcmp.eq.f32.partialorder %v5083_v0, 8.507059e+37  ;;  %vm5871_vm9 = vcmask 1047559  }
 0x809   :  { %v6480_v4 = vpop.eup %6479  ;;  %v5607_v41 = vadd.f32 %v5606_v59, %v5605_v36  ;;  %5480 = vrot.lane.b32.xlu2 %v6478_v20, %s6746_s2  ;;  %v5631_v28 = vadd.f32 %v5630_v35, %v5629_v7 }
 0x80a   :  { %6485 = vtanh.f32 %v9862_v32  ;;  %v5866_v39 = vsel %vm5865_vm14, %v6480_v4, %v9793_v43  ;;  %v9875_v44 = vpop.eup %6481  ;;  %v5076_v43 = vsub.f32 1.0, %v5075_v15 }
 0x80b   :  { %6487 = vtanh.f32 %v5607_v41  ;;  %v5453_v42 = vpop.permute.xlu0 %5452  ;;  %v5045_v33 = vmul.f32 %v9875_v44, %v9832_v37  ;;  %v6484_v63 = vpop.eup %6483  ;;  %v5632_v38 = vrot.slane %v5631_v28, 2  ;;  %vm5050_vm15 = vweird.f32 %v9875_v44 }
 0x80c   :  { %6489 = vtanh.f32 %v5614_v62  ;;  %v5541_v57 = vmul.f32 %v5453_v42, %v5012_v54  ;;  %v5077_v23 = vmul.f32 %v9849_v22, %v5076_v43  ;;  %v9911_v49 = vadd.f32 1.0, %v6484_v63  ;;  %vm9953_vm6 = vmor %vm5049_vm5, %vm5050_vm15 }
 0x80d   :  { %v4706_v14 = vpop.f32.mrf.mxu1  ;;  %6491 = vrcp.f32 %v9877_v2  ;;  %v5046_v45 = vsub.f32 1.0, %v5045_v33  ;;  %v5633_v27 = vadd.f32 %v5632_v38, %v5631_v28  ;;  %v6204_v33 = vmul.f32 -1.442695, %v9708_v24 }
 0x80e   :  { %v5615_v29 = vsel %vm414_vm1, %v5541_v57, 0.0  ;;  %v4707_v48 = vadd.f32 %v4706_v14, %v9790_v56  ;;  %6493 = vpow2.f32 %v6199_v16  ;;  %v5078_v25 = vadd.f32 %v9849_v22, %v5077_v23 }
 0x80f   :  { %v5616_v46 = vrot.slane %v5615_v29, 4  ;;  %6495 = vpow2.f32 %v6200_v53  ;;  %v5047_v4 = vmul.f32 %v9875_v44, %v5046_v45  ;;  %v5634_v16 = vrot.slane %v5633_v27, 1  ;;  %v4506_v53 = vpop.f32.mrf.mxu0 }
 0x810   :  { %v6486_v56 = vpop.eup %6485  ;;  %v9899_v52 = vadd.f32 %v9821_v51, %v4707_v48  ;;  %v5082_v30 = vsel %vm9928_vm12, %v9849_v22, %v5078_v25  ;;  %v5086_v14 = vor.u32 1.1754944e-38, %v5085_v21  ;;  %v5053_v24 = vand.u32 2147483647, %v9832_v37 }
 0x811   :  { %v6488_v8 = vpop.eup %6487  ;;  %v5617_v13 = vadd.f32 %v5616_v46, %v5615_v29  ;;  %5482 = vrot.lane.b32.xlu0 %v6486_v56, %s6746_s2  ;;  %v5048_v43 = vadd.f32 %v9875_v44, %v5047_v4  ;;  %v5635_v9 = vadd.f32 %v5634_v16, %v5633_v27  ;;  %vm5064_vm12 = vweird.f32 %v9877_v2 }
 0x812   :  { %v6490_v12 = vpop.eup %6489  ;;  %6497 = vtanh.f32 %v9899_v52  ;;  %v5868_v47 = vsel %vm5867_vm7, %v6488_v8, %v5866_v39  ;;  %v5087_v63 = vsel %vm5084_vm0, %v5086_v14, %v5082_v30  ;;  %vm5054_vm10 = vcmp.eq.f32.partialorder %v5053_v24, 8.507059e+37 }
 0x813   :  { %v5618_v19 = vrot.slane %v5617_v13, 2  ;;  %v5455_v36 = vpop.permute.xlu1 %5454  ;;  %v9909_v58 = vsel %vm5869_vm8, %v6490_v12, %v5868_v47  ;;  %v9914_v6 = vpop.eup %6491  ;;  %6499 = vrcp.f32 %v9911_v49  ;;  %v5052_v12 = vsel %vm9953_vm6, %v9875_v44, %v5048_v43 }
 0x814   :  { %v5542_v7 = vmul.f32 %v5455_v36, %v5027_v11  ;;  %v6494_v20 = vpop.eup %6493  ;;  %vm5065_vm11 = vweird.f32 %v9914_v6  ;;  %vm5124_vm6 = vweird.f32 %v9911_v49 }
 0x815   :  { %v5619_v59 = vadd.f32 %v5618_v19, %v5617_v13  ;;  %v4709_v17 = vpop.f32.mrf.mxu1  ;;  %v6496_v41 = vpop.eup %6495  ;;  %v9939_v28 = vadd.f32 1.0, %v6494_v20  ;;  %v5056_v13 = vor.u32 1.1754944e-38, %v5055_v1  ;;  %vm9987_vm15 = vmor %vm5064_vm12, %vm5065_vm11 }
 0x816   :  { %v5622_v62 = vsel %vm414_vm1, %v5542_v7, 0.0  ;;  %v4710_v31 = vadd.f32 %v4709_v17, %v9847_v60  ;;  %v5060_v60 = vmul.f32 %v9914_v6, %v9877_v2  ;;  %v9943_v29 = vadd.f32 1.0, %v6496_v41 }
 0x817   :  { %v5620_v35 = vrot.slane %v5619_v59, 1  ;;  %v5623_v15 = vrot.slane %v5622_v62, 4  ;;  %v5057_v7 = vsel %vm5054_vm10, %v5056_v13, %v5052_v12  ;;  %v4509_v27 = vpop.f32.mrf.mxu0 }
 0x818   :  { %v6498_v39 = vpop.eup %6497  ;;  %v9926_v54 = vadd.f32 %v9821_v51, %v4710_v31  ;;  %v5061_v46 = vsub.f32 1.0, %v5060_v60 }
 0x819   :  { %v5621_v57 = vadd.f32 %v5620_v35, %v5619_v59  ;;  %v5624_v40 = vadd.f32 %v5623_v15, %v5622_v62  ;;  %5484 = vrot.lane.b32.xlu1 %v6498_v39, %s6746_s2  ;;  %v9947_v55 = vpop.eup %6499  ;;  %v5068_v15 = vand.u32 2147483647, %v9877_v2 }
 0x81a   :  { %6501 = vtanh.f32 %v9926_v54  ;;  %v5062_v19 = vmul.f32 %v9914_v6, %v5061_v46  ;;  %v5120_v44 = vmul.f32 %v9947_v55, %v9911_v49  ;;  %vm5125_vm5 = vweird.f32 %v9947_v55 }
 0x81b   :  { %6503 = vtanh.f32 %v5621_v57  ;;  %v5625_v48 = vrot.slane %v5624_v40, 2  ;;  %v5463_v18 = vpop.permute.xlu2 %5462  ;;  %vm5069_vm0 = vcmp.eq.f32.partialorder %v5068_v15, 8.507059e+37  ;;  %vm10022_vm10 = vmor %vm5124_vm6, %vm5125_vm5 }
 0x81c   :  { %v5546_v3 = vmul.f32 %v5463_v18, %v5087_v63  ;;  %6505 = vrcp.f32 %v9939_v28  ;;  %v5063_v20 = vadd.f32 %v9914_v6, %v5062_v19  ;;  %v5121_v21 = vsub.f32 1.0, %v5120_v44 }
 0x81d   :  { %v5626_v22 = vadd.f32 %v5625_v48, %v5624_v40  ;;  %v4712_v56 = vpop.f32.mrf.mxu1  ;;  %6507 = vrcp.f32 %v9943_v29 }
 0x81e   :  { %v4713_v8 = vadd.f32 %v4712_v56, %v9896_v50  ;;  %v6202_v50 = vmul.f32 -1.442695, %v9649_v61  ;;  %6509 = vpow2.f32 %v6204_v33  ;;  %v5650_v36 = vsel %vm414_vm1, %v5546_v3, 0.0 }
 0x81f   :  { %v5627_v23 = vrot.slane %v5626_v22, 1  ;;  %6511 = vtanh.f32 %v5635_v9  ;;  %v5651_v17 = vrot.slane %v5650_v36, 4  ;;  %v5122_v43 = vmul.f32 %v9947_v55, %v5121_v21 }
 0x820   :  { %v6502_v45 = vpop.eup %6501  ;;  %v9964_v47 = vadd.f32 %v9821_v51, %v4713_v8  ;;  %v6203_v33 = vmul.f32 -1.442695, %v9678_v5  ;;  %v4512_v5 = vpop.f32.mrf.mxu0 }
 0x821   :  { %v6504_v11 = vpop.eup %6503  ;;  %v5628_v37 = vadd.f32 %v5627_v23, %v5626_v22  ;;  %5486 = vrot.lane.b32.xlu2 %v6502_v45, %s6746_s2  ;;  %v5652_v57 = vadd.f32 %v5651_v17, %v5650_v36  ;;  %v5123_v23 = vadd.f32 %v9947_v55, %v5122_v43 }
 0x822   :  { %6513 = vtanh.f32 %v9964_v47  ;;  %v5872_v61 = vsel %vm5871_vm9, %v6504_v11, %v9909_v58  ;;  %v9976_v59 = vpop.eup %6505  ;;  %v5070_v58 = vand.u32 2147483648, %v9877_v2  ;;  %v5067_v2 = vsel %vm9987_vm15, %v9914_v6, %v5063_v20 }
 0x823   :  { %6515 = vtanh.f32 %v5628_v37  ;;  %v5459_v1 = vpop.permute.xlu0 %5458  ;;  %6218 = vmatmul.msk.f32.vlgmr.msrb.gmra.mxu2 %vm414_vm1, %v5872_v61  ;;  %v9979_v62 = vpop.eup %6507  ;;  %v5090_v60 = vmul.f32 %v9976_v59, %v9939_v28  ;;  %v5653_v3 = vrot.slane %v5652_v57, 2  ;;  %v5128_v37 = vand.u32 2147483647, %v9911_v49 }
 0x824   :  { %6517 = vpow2.f32 %v6202_v50  ;;  %v5544_v25 = vmul.f32 %v5459_v1, %v5057_v7  ;;  %v6510_v4 = vpop.eup %6509  ;;  %v5071_v14 = vor.u32 1.1754944e-38, %v5070_v58  ;;  %v5105_v8 = vmul.f32 %v9979_v62, %v9943_v29 }
 0x825   :  { %v4715_v31 = vpop.f32.mrf.mxu1  ;;  %v6512_v0 = vpop.eup %6511  ;;  %v5091_v6 = vsub.f32 1.0, %v5090_v60  ;;  %v10006_v22 = vadd.f32 1.0, %v6510_v4  ;;  %v5130_v50 = vand.u32 2147483648, %v9911_v49  ;;  %v5654_v44 = vadd.f32 %v5653_v3, %v5652_v57 }
 0x826   :  { %v5636_v41 = vsel %vm414_vm1, %v5544_v25, 0.0  ;;  %v4716_v35 = vadd.f32 %v4715_v31, %v4506_v53  ;;  %v5072_v46 = vsel %vm5069_vm0, %v5071_v14, %v5067_v2  ;;  %v5127_v49 = vsel %vm10022_vm10, %v9947_v55, %v5123_v23 }
 0x827   :  { %v5637_v39 = vrot.slane %v5636_v41, 4  ;;  %v5092_v1 = vmul.f32 %v9976_v59, %v5091_v6  ;;  %v5131_v25 = vor.u32 1.1754944e-38, %v5130_v50  ;;  %v5100_v20 = vand.u32 2147483648, %v9939_v28 }
 0x828   :  { %v6514_v16 = vpop.eup %6513  ;;  %v9994_v40 = vadd.f32 %v9821_v51, %v4716_v35  ;;  %vm5129_vm11 = vcmp.eq.f32.partialorder %v5128_v37, 8.507059e+37  ;;  %v5106_v21 = vsub.f32 1.0, %v5105_v8  ;;  %v5655_v4 = vrot.slane %v5654_v44, 1  ;;  %v4515_v43 = vpop.f32.mrf.mxu0 }
 0x829   :  { %v6516_v30 = vpop.eup %6515  ;;  %v5638_v53 = vadd.f32 %v5637_v39, %v5636_v41  ;;  %5488 = vrot.lane.b32.xlu0 %v6514_v16, %s6746_s2  ;;  %v5132_v41 = vsel %vm5129_vm11, %v5131_v25, %v5127_v49  ;;  %v5093_v35 = vadd.f32 %v9976_v59, %v5092_v1  ;;  %vm5095_vm12 = vweird.f32 %v9976_v59 }
 0x82a   :  { %v6518_v48 = vpop.eup %6517  ;;  %6519 = vtanh.f32 %v9994_v40  ;;  %v10003_v18 = vsel %vm5859_vm13, %v6512_v0, %v6516_v30  ;;  %v6207_v0 = vmul.f32 -1.442695, %v9824_v10  ;;  %vm5094_vm15 = vweird.f32 %v9939_v28 }
 0x82b   :  { %v5639_v63 = vrot.slane %v5638_v53, 2  ;;  %v5461_v9 = vpop.permute.xlu1 %5460  ;;  %v10010_v38 = vadd.f32 1.0, %v6518_v48  ;;  %6521 = vpow2.f32 %v6203_v33  ;;  %v5098_v57 = vand.u32 2147483647, %v9939_v28  ;;  %vm10043_vm0 = vmor %vm5094_vm15, %vm5095_vm12 }
 0x82c   :  { %v5545_v56 = vmul.f32 %v5461_v9, %v5072_v46  ;;  %6523 = vrcp.f32 %v10006_v22  ;;  %v5101_v14 = vor.u32 1.1754944e-38, %v5100_v20  ;;  %v5107_v10 = vmul.f32 %v9979_v62, %v5106_v21 }
 0x82d   :  { %v5640_v24 = vadd.f32 %v5639_v63, %v5638_v53  ;;  %v4718_v13 = vpop.f32.mrf.mxu1  ;;  %6525 = vrcp.f32 %v10010_v38  ;;  %v5656_v63 = vadd.f32 %v5655_v4, %v5654_v44  ;;  %v5097_v28 = vsel %vm10043_vm0, %v9976_v59, %v5093_v35 }
 0x82e   :  { %v5643_v12 = vsel %vm414_vm1, %v5545_v56, 0.0  ;;  %v4719_v45 = vadd.f32 %v4718_v13, %v4509_v27  ;;  %vm5099_vm5 = vcmp.eq.f32.partialorder %v5098_v57, 8.507059e+37  ;;  %v5108_v59 = vadd.f32 %v9979_v62, %v5107_v10 }
 0x82f   :  { %v5641_v19 = vrot.slane %v5640_v24, 1  ;;  %v5644_v11 = vrot.slane %v5643_v12, 4  ;;  %vm5110_vm6 = vweird.f32 %v9979_v62  ;;  %vm5109_vm10 = vweird.f32 %v9943_v29 }
 0x830   :  { %v6520_v36 = vpop.eup %6519  ;;  %v10020_v61 = vadd.f32 %v9821_v51, %v4719_v45  ;;  %v6205_v45 = vmul.f32 -1.442695, %v9742_v26  ;;  %vm10075_vm11 = vmor %vm5109_vm10, %vm5110_vm6  ;;  %vm5169_vm0 = vweird.f32 %v10006_v22 }
 0x831   :  { %v5642_v27 = vadd.f32 %v5641_v19, %v5640_v24  ;;  %v5645_v17 = vadd.f32 %v5644_v11, %v5643_v12  ;;  %5490 = vrot.lane.b32.xlu1 %v6520_v36, %s6746_s2  ;;  %v6522_v15 = vpop.eup %6521  ;;  %v5102_v24 = vsel %vm5099_vm5, %v5101_v14, %v5097_v28  ;;  %v5113_v36 = vand.u32 2147483647, %v9943_v29 }
 0x832   :  { %6527 = vtanh.f32 %v10020_v61  ;;  %v10037_v60 = vpop.eup %6523  ;;  %v10048_v33 = vadd.f32 1.0, %v6522_v15  ;;  %v5112_v49 = vsel %vm10075_vm11, %v9979_v62, %v5108_v59  ;;  %vm5139_vm11 = vweird.f32 %v10010_v38 }
 0x833   :  { %6529 = vtanh.f32 %v5642_v27  ;;  %v5646_v31 = vrot.slane %v5645_v17, 2  ;;  %v5469_v58 = vpop.permute.xlu2 %5468  ;;  %v10041_v2 = vpop.eup %6525  ;;  %v5165_v56 = vmul.f32 %v10037_v60, %v10006_v22  ;;  %vm5114_vm12 = vcmp.eq.f32.partialorder %v5113_v36, 8.507059e+37 }
 0x834   :  { %v5549_v39 = vmul.f32 %v5469_v58, %v5132_v41  ;;  %6531 = vpow2.f32 %v6207_v0  ;;  %v5135_v12 = vmul.f32 %v10041_v2, %v10010_v38  ;;  %v4518_v58 = vpop.f32.mrf.mxu0  ;;  %vm5170_vm15 = vweird.f32 %v10037_v60 }
 0x835   :  { %v5647_v55 = vadd.f32 %v5646_v31, %v5645_v17  ;;  %v4721_v42 = vpop.f32.mrf.mxu1  ;;  %v5166_v19 = vsub.f32 1.0, %v5165_v56  ;;  %vm10110_vm5 = vmor %vm5169_vm0, %vm5170_vm15  ;;  %vm5140_vm6 = vweird.f32 %v10041_v2 }
 0x836   :  { %v4722_v16 = vadd.f32 %v4721_v42, %v4512_v5  ;;  %v5671_v3 = vsel %vm414_vm1, %v5549_v39, 0.0  ;;  %v5136_v25 = vsub.f32 1.0, %v5135_v12 }
 0x837   :  { %v5648_v30 = vrot.slane %v5647_v55, 1  ;;  %v5672_v23 = vrot.slane %v5671_v3, 4  ;;  %v5167_v21 = vmul.f32 %v10037_v60, %v5166_v19 }
 0x838   :  { %v6528_v48 = vpop.eup %6527  ;;  %v10051_v46 = vadd.f32 %v9821_v51, %v4722_v16  ;;  %v5137_v57 = vmul.f32 %v10041_v2, %v5136_v25 }
 0x839   :  { %v6530_v9 = vpop.eup %6529  ;;  %v5649_v6 = vadd.f32 %v5648_v30, %v5647_v55  ;;  %5492 = vrot.lane.b32.xlu2 %v6528_v48, %s6746_s2  ;;  %v5673_v27 = vadd.f32 %v5672_v23, %v5671_v3  ;;  %v6206_v30 = vmul.f32 -1.442695, %v9782_v34  ;;  %v5173_v34 = vand.u32 2147483647, %v10006_v22 }
 0x83a   :  { %6533 = vtanh.f32 %v10051_v46  ;;  %v5874_v8 = vsel %vm5861_vm3, %v6530_v9, %v10003_v18  ;;  %v5115_v18 = vand.u32 2147483648, %v9943_v29  ;;  %v6532_v44 = vpop.eup %6531  ;;  %v5138_v12 = vadd.f32 %v10041_v2, %v5137_v57 }
 0x83b   :  { %6535 = vtanh.f32 %v5649_v6  ;;  %v5465_v13 = vpop.permute.xlu0 %5464  ;;  %v10094_v39 = vadd.f32 1.0, %v6532_v44  ;;  %v5674_v42 = vrot.slane %v5673_v27, 2  ;;  %vm5174_vm10 = vcmp.eq.f32.partialorder %v5173_v34, 8.507059e+37 }
 0x83c   :  { %6537 = vtanh.f32 %v5656_v63  ;;  %v5547_v5 = vmul.f32 %v5465_v13, %v5102_v24  ;;  %v5116_v31 = vor.u32 1.1754944e-38, %v5115_v18  ;;  %v5175_v63 = vand.u32 2147483648, %v10006_v22 }
 0x83d   :  { %6539 = vrcp.f32 %v10048_v33  ;;  %v4724_v50 = vpop.f32.mrf.mxu1  ;;  %v5145_v44 = vand.u32 2147483648, %v10010_v38 }
 0x83e   :  { %v5657_v11 = vsel %vm414_vm1, %v5547_v5, 0.0  ;;  %v4725_v37 = vadd.f32 %v4724_v50, %v4515_v43  ;;  %6541 = vpow2.f32 %v6205_v45  ;;  %v5117_v62 = vsel %vm5114_vm12, %v5116_v31, %v5112_v49  ;;  %vm10130_vm12 = vmor %vm5139_vm11, %vm5140_vm6 }
 0x83f   :  { %v5658_v7 = vrot.slane %v5657_v11, 4  ;;  %v5168_v43 = vadd.f32 %v10037_v60, %v5167_v21  ;;  %v5176_v5 = vor.u32 1.1754944e-38, %v5175_v63  ;;  %v5142_v31 = vsel %vm10130_vm12, %v10041_v2, %v5138_v12 }
 0x840   :  { %v6534_v26 = vpop.eup %6533  ;;  %v10080_v17 = vadd.f32 %v9821_v51, %v4725_v37  ;;  %vm5214_vm12 = vweird.f32 %v10094_v39 }
 0x841   :  { %v6536_v20 = vpop.eup %6535  ;;  %v5659_v29 = vadd.f32 %v5658_v7, %v5657_v11  ;;  %5494 = vrot.lane.b32.xlu0 %v6534_v26, %s6746_s2  ;;  %v5172_v22 = vsel %vm10110_vm5, %v10037_v60, %v5168_v43  ;;  %v4521_v11 = vpop.f32.mrf.mxu0  ;;  %v5143_v26 = vand.u32 2147483647, %v10010_v38  ;;  %vm5154_vm5 = vweird.f32 %v10048_v33 }
 0x842   :  { %v6538_v4 = vpop.eup %6537  ;;  %6543 = vtanh.f32 %v10080_v17  ;;  %v5875_v41 = vsel %vm5863_vm4, %v6536_v20, %v5874_v8  ;;  %v5675_v8 = vadd.f32 %v5674_v42, %v5673_v27  ;;  %v5177_v36 = vsel %vm5174_vm10, %v5176_v5, %v5172_v22 }
 0x843   :  { %v10089_v35 = vpop.eup %6539  ;;  %v5660_v15 = vrot.slane %v5659_v29, 2  ;;  %v5467_v0 = vpop.permute.xlu1 %5466  ;;  %v10092_v55 = vsel %vm5865_vm14, %v6538_v4, %v5875_v41  ;;  %6545 = vrcp.f32 %v10094_v39  ;;  %v5146_v41 = vor.u32 1.1754944e-38, %v5145_v44 }
 0x844   :  { %v5548_v16 = vmul.f32 %v5467_v0, %v5117_v62  ;;  %v5150_v28 = vmul.f32 %v10089_v35, %v10048_v33  ;;  %v6542_v9 = vpop.eup %6541  ;;  %6547 = vpow2.f32 %v6206_v30  ;;  %v5676_v37 = vrot.slane %v5675_v8, 1 }
 0x845   :  { %v5661_v53 = vadd.f32 %v5660_v15, %v5659_v29  ;;  %v4727_v14 = vpop.f32.mrf.mxu1  ;;  %v10121_v50 = vadd.f32 1.0, %v6542_v9  ;;  %vm5144_vm15 = vcmp.eq.f32.partialorder %v5143_v26, 8.507059e+37  ;;  %vm5155_vm0 = vweird.f32 %v10089_v35 }
 0x846   :  { %v5664_v10 = vsel %vm414_vm1, %v5548_v16, 0.0  ;;  %v4728_v48 = vadd.f32 %v4727_v14, %v4518_v58  ;;  %v5151_v45 = vsub.f32 1.0, %v5150_v28  ;;  %v5677_v21 = vadd.f32 %v5676_v37, %v5675_v8  ;;  %vm10161_vm6 = vmor %vm5154_vm5, %vm5155_vm0 }
 0x847   :  { %v5662_v6 = vrot.slane %v5661_v53, 1  ;;  %v5665_v3 = vrot.slane %v5664_v10, 4  ;;  %v5147_v2 = vsel %vm5144_vm15, %v5146_v41, %v5142_v31  ;;  %v5158_v28 = vand.u32 2147483647, %v10048_v33 }
 0x848   :  { %v6544_v56 = vpop.eup %6543  ;;  %v10108_v24 = vadd.f32 %v9821_v51, %v4728_v48  ;;  %v5152_v58 = vmul.f32 %v10089_v35, %v5151_v45  ;;  %v5160_v48 = vand.u32 2147483648, %v10048_v33 }
 0x849   :  { %v5663_v59 = vadd.f32 %v5662_v6, %v5661_v53  ;;  %v5666_v23 = vadd.f32 %v5665_v3, %v5664_v10  ;;  %5496 = vrot.lane.b32.xlu1 %v6544_v56, %s6746_s2  ;;  %v10126_v27 = vpop.eup %6545  ;;  %v6208_v53 = vmul.f32 -1.442695, %v9862_v32  ;;  %vm5159_vm10 = vcmp.eq.f32.partialorder %v5158_v28, 8.507059e+37 }
 0x84a   :  { %6549 = vtanh.f32 %v10108_v24  ;;  %v6548_v20 = vpop.eup %6547  ;;  %v5210_v42 = vmul.f32 %v10126_v27, %v10094_v39  ;;  %v5153_v30 = vadd.f32 %v10089_v35, %v5152_v58  ;;  %v5161_v33 = vor.u32 1.1754944e-38, %v5160_v48 }
 0x84b   :  { %6551 = vtanh.f32 %v5663_v59  ;;  %v5667_v18 = vrot.slane %v5666_v23, 2  ;;  %v5475_v19 = vpop.permute.xlu2 %5474  ;;  %v10149_v57 = vadd.f32 1.0, %v6548_v20  ;;  %vm5215_vm11 = vweird.f32 %v10126_v27 }
 0x84c   :  { %v5552_v1 = vmul.f32 %v5475_v19, %v5177_v36  ;;  %6553 = vrcp.f32 %v10121_v50  ;;  %v5211_v63 = vsub.f32 1.0, %v5210_v42  ;;  %v5157_v34 = vsel %vm10161_vm6, %v10089_v35, %v5153_v30  ;;  %vm10185_vm15 = vmor %vm5214_vm12, %vm5215_vm11 }
 0x84d   :  { %v5668_v7 = vadd.f32 %v5667_v18, %v5666_v23  ;;  %v4730_v60 = vpop.f32.mrf.mxu1  ;;  %v5162_v12 = vsel %vm5159_vm10, %v5161_v33, %v5157_v34  ;;  %v6210_v36 = vmul.f32 -1.442695, %v9926_v54  ;;  %v5218_v20 = vand.u32 2147483647, %v10094_v39 }
 0x84e   :  { %v4731_v49 = vadd.f32 %v4730_v60, %v4521_v11  ;;  %v5692_v0 = vsel %vm414_vm1, %v5552_v1, 0.0  ;;  %v5212_v59 = vmul.f32 %v10126_v27, %v5211_v63  ;;  %v6209_v1 = vmul.f32 -1.442695, %v9899_v52 }
 0x84f   :  { %v5669_v29 = vrot.slane %v5668_v7, 1  ;;  %v5693_v14 = vrot.slane %v5692_v0, 4  ;;  %vm5219_vm0 = vcmp.eq.f32.partialorder %v5218_v20, 8.507059e+37  ;;  %v6213_v30 = vmul.f32 -1.442695, %v10020_v61 }
 0x850   :  { %v6550_v38 = vpop.eup %6549  ;;  %v10140_v4 = vadd.f32 %v9821_v51, %v4731_v49  ;;  %v5213_v44 = vadd.f32 %v10126_v27, %v5212_v59  ;;  %v5220_v49 = vand.u32 2147483648, %v10094_v39  ;;  %vm5184_vm6 = vweird.f32 %v10121_v50 }
 0x851   :  { %v6552_v15 = vpop.eup %6551  ;;  %v5670_v62 = vadd.f32 %v5669_v29, %v5668_v7  ;;  %5498 = vrot.lane.b32.xlu2 %v6550_v38, %s6746_s2  ;;  %v5694_v3 = vadd.f32 %v5693_v14, %v5692_v0  ;;  %v5190_v0 = vand.u32 2147483648, %v10121_v50 }
 0x852   :  { %6555 = vtanh.f32 %v10140_v4  ;;  %v5877_v16 = vsel %vm5867_vm7, %v6552_v15, %v10092_v55  ;;  %v10154_v10 = vpop.eup %6553  ;;  %v5221_v41 = vor.u32 1.1754944e-38, %v5220_v49 }
 0x853   :  { %6557 = vtanh.f32 %v5670_v62  ;;  %v5471_v51 = vpop.permute.xlu0 %5470  ;;  %v5180_v56 = vmul.f32 %v10154_v10, %v10121_v50  ;;  %v5695_v35 = vrot.slane %v5694_v3, 2  ;;  %vm5185_vm5 = vweird.f32 %v10154_v10 }
 0x854   :  { %6559 = vtanh.f32 %v5677_v21  ;;  %v5550_v43 = vmul.f32 %v5471_v51, %v5147_v2  ;;  %v5217_v21 = vsel %vm10185_vm15, %v10126_v27, %v5213_v44  ;;  %vm10206_vm10 = vmor %vm5184_vm6, %vm5185_vm5  ;;  %vm5199_vm15 = vweird.f32 %v10149_v57 }
 0x855   :  { %6561 = vrcp.f32 %v10149_v57  ;;  %v5181_v11 = vsub.f32 1.0, %v5180_v56  ;;  %v5696_v29 = vadd.f32 %v5695_v35, %v5694_v3  ;;  %v5222_v2 = vsel %vm5219_vm0, %v5221_v41, %v5217_v21 }
 0x856   :  { %v5678_v55 = vsel %vm414_vm1, %v5550_v43, 0.0  ;;  %6563 = vpow2.f32 %v6208_v53  ;;  %v5188_v43 = vand.u32 2147483647, %v10121_v50  ;;  %v5191_v3 = vor.u32 1.1754944e-38, %v5190_v0 }
 0x857   :  { %v5679_v9 = vrot.slane %v5678_v55, 4  ;;  %v5182_v31 = vmul.f32 %v10154_v10, %v5181_v11  ;;  %6565 = vpow2.f32 %v6210_v36  ;;  %v5697_v42 = vrot.slane %v5696_v29, 1 }
 0x858   :  { %v6556_v32 = vpop.eup %6555  ;;  %6567 = vpow2.f32 %v6209_v1  ;;  %vm5189_vm11 = vcmp.eq.f32.partialorder %v5188_v43, 8.507059e+37 }
 0x859   :  { %v6558_v8 = vpop.eup %6557  ;;  %v5680_v13 = vadd.f32 %v5679_v9, %v5678_v55  ;;  %5500 = vrot.lane.b32.xlu0 %v6556_v32, %s6746_s2  ;;  %v5698_v9 = vadd.f32 %v5697_v42, %v5696_v29 }
 0x85a   :  { %v6560_v23 = vpop.eup %6559  ;;  %v5878_v22 = vsel %vm5869_vm8, %v6558_v8, %v5877_v16  ;;  %v5183_v16 = vadd.f32 %v10154_v10, %v5182_v31 }
 0x85b   :  { %v5681_v5 = vrot.slane %v5680_v13, 2  ;;  %v5473_v45 = vpop.permute.xlu1 %5472  ;;  %v5879_v18 = vsel %vm5871_vm9, %v6560_v23, %v5878_v22  ;;  %v10175_v37 = vpop.eup %6561  ;;  %v5203_v22 = vand.u32 2147483647, %v10149_v57 }
 0x85c   :  { %v5551_v19 = vmul.f32 %v5473_v45, %v5162_v12  ;;  %6219 = vmatmul.msk.f32.gmra.mxu2 %vm414_vm1, %v5879_v18  ;;  %v6564_v7 = vpop.eup %6563  ;;  %v5195_v52 = vmul.f32 %v10175_v37, %v10149_v57  ;;  %v5187_v61 = vsel %vm10206_vm10, %v10154_v10, %v5183_v16  ;;  %vm5200_vm12 = vweird.f32 %v10175_v37 }
 0x85d   :  { %v5682_v60 = vadd.f32 %v5681_v5, %v5680_v13  ;;  %v10192_v58 = vadd.f32 1.0, %v6564_v7  ;;  %v6566_v48 = vpop.eup %6565  ;;  %v5192_v13 = vsel %vm5189_vm11, %v5191_v3, %v5187_v61  ;;  %v5205_v5 = vand.u32 2147483648, %v10149_v57  ;;  %vm5201_vm0 = vmor %vm5199_vm15, %vm5200_vm12 }
 0x85e   :  { %v5685_v26 = vsel %vm414_vm1, %v5551_v19, 0.0  ;;  %v5196_v51 = vsub.f32 1.0, %v5195_v52  ;;  %v6568_v28 = vpop.eup %6567  ;;  %v10215_v34 = vadd.f32 1.0, %v6566_v48  ;;  %v6211_v12 = vmul.f32 -1.442695, %v9964_v47 }
 0x85f   :  { %v5686_v25 = vrot.slane %v5685_v26, 4  ;;  %v5683_v39 = vrot.slane %v5682_v60, 1  ;;  %6569 = vrcp.f32 %v10192_v58  ;;  %v10219_v8 = vadd.f32 1.0, %v6568_v28 }
 0x860   :  { %v5197_v6 = vmul.f32 %v10175_v37, %v5196_v51  ;;  %6571 = vpow2.f32 %v6213_v30  ;;  %v5206_v1 = vor.u32 1.1754944e-38, %v5205_v5  ;;  %vm5204_vm5 = vcmp.eq.f32.partialorder %v5203_v22, 8.507059e+37 }
 0x861   :  { %v5687_v38 = vadd.f32 %v5686_v25, %v5685_v26  ;;  %v5684_v14 = vadd.f32 %v5683_v39, %v5682_v60  ;;  %v6212_v39 = vmul.f32 -1.442695, %v9994_v40  ;;  %vm5229_vm10 = vweird.f32 %v10192_v58 }
 0x862   :  { %v5198_v23 = vadd.f32 %v10175_v37, %v5197_v6  ;;  %v6216_v6 = vmul.f32 -1.442695, %v10108_v24  ;;  %v5265_v5 = vand.u32 2147483648, %v10215_v34 }
 0x863   :  { %v5688_v15 = vrot.slane %v5687_v38, 2  ;;  %v5481_v62 = vpop.permute.xlu2 %5480  ;;  %6573 = vtanh.f32 %v5684_v14 }
 0x864   :  { %v5555_v53 = vmul.f32 %v5481_v62, %v5222_v2  ;;  %v5202_v57 = vsel %vm5201_vm0, %v10175_v37, %v5198_v23 }
 0x865   :  { %v5689_v27 = vadd.f32 %v5688_v15, %v5687_v38  ;;  %v10217_v56 = vpop.eup %6569  ;;  %v5207_v25 = vsel %vm5204_vm5, %v5206_v1, %v5202_v57  ;;  %vm5259_vm5 = vweird.f32 %v10215_v34  ;;  %v5263_v57 = vand.u32 2147483647, %v10215_v34 }
 0x866   :  { %v5713_v50 = vsel %vm414_vm1, %v5555_v53, 0.0  ;;  %v5225_v18 = vmul.f32 %v10217_v56, %v10192_v58  ;;  %v6572_v35 = vpop.eup %6571  ;;  %vm5230_vm6 = vweird.f32 %v10217_v56  ;;  %v6214_v1 = vmul.f32 -1.442695, %v10051_v46 }
 0x867   :  { %v5690_v63 = vrot.slane %v5689_v27, 1  ;;  %v5714_v10 = vrot.slane %v5713_v50, 4  ;;  %v10239_v31 = vadd.f32 1.0, %v6572_v35  ;;  %vm10261_vm11 = vmor %vm5229_vm10, %vm5230_vm6  ;;  %vm5244_vm10 = vweird.f32 %v10219_v8 }
 0x868   :  { %v5226_v60 = vsub.f32 1.0, %v5225_v18 }
 0x869   :  { %v5691_v32 = vadd.f32 %v5690_v63, %v5689_v27  ;;  %v6574_v11 = vpop.eup %6573  ;;  %v5715_v36 = vadd.f32 %v5714_v10, %v5713_v50  ;;  %v5235_v63 = vand.u32 2147483648, %v10192_v58 }
 0x86a   :  { %v5227_v15 = vmul.f32 %v10217_v56, %v5226_v60 }
 0x86b   :  { %6575 = vtanh.f32 %v5691_v32  ;;  %v5477_v33 = vpop.permute.xlu0 %5476  ;;  %v5716_v52 = vrot.slane %v5715_v36, 2 }
 0x86c   :  { %6577 = vtanh.f32 %v5698_v9  ;;  %v5553_v59 = vmul.f32 %v5477_v33, %v5192_v13  ;;  %v5228_v40 = vadd.f32 %v10217_v56, %v5227_v15  ;;  %v5233_v9 = vand.u32 2147483647, %v10192_v58 }
 0x86d   :  { %6579 = vrcp.f32 %v10215_v34  ;;  %v5717_v16 = vadd.f32 %v5716_v52, %v5715_v36  ;;  %v5236_v58 = vor.u32 1.1754944e-38, %v5235_v63  ;;  %v6215_v63 = vmul.f32 -1.442695, %v10080_v17 }
 0x86e   :  { %v5699_v45 = vsel %vm414_vm1, %v5553_v59, 0.0  ;;  %6581 = vrcp.f32 %v10219_v8  ;;  %v5232_v13 = vsel %vm10261_vm11, %v10217_v56, %v5228_v40  ;;  %vm5234_vm12 = vcmp.eq.f32.partialorder %v5233_v9, 8.507059e+37 }
 0x86f   :  { %v5700_v19 = vrot.slane %v5699_v45, 4  ;;  %6583 = vpow2.f32 %v6211_v12  ;;  %v5718_v48 = vrot.slane %v5717_v16, 1  ;;  %v5237_v12 = vsel %vm5234_vm12, %v5236_v58, %v5232_v13 }
 0x870   :  { %6585 = vrcp.f32 %v10239_v31  ;;  %vm5264_vm12 = vcmp.eq.f32.partialorder %v5263_v57, 8.507059e+37 }
 0x871   :  { %v6576_v44 = vpop.eup %6575  ;;  %v5701_v7 = vadd.f32 %v5700_v19, %v5699_v45  ;;  %6587 = vpow2.f32 %v6212_v39  ;;  %v5719_v10 = vadd.f32 %v5718_v48, %v5717_v16  ;;  %v5938_v48 = vld [vmem:[%s10474_s8 + $0x18] sm:$0xff] }
 0x872   :  { %v6578_v47 = vpop.eup %6577  ;;  %v5880_v26 = vsel %vm5859_vm13, %v6576_v44, %v6574_v11  ;;  %v5250_v44 = vand.u32 2147483648, %v10219_v8  ;;  %5964 = vmatpush.msra.mxu3 %v5938_v48 }
 0x873   :  { %v5702_v49 = vrot.slane %v5701_v7, 2  ;;  %v5479_v20 = vpop.permute.xlu1 %5478  ;;  %v5881_v29 = vsel %vm5861_vm3, %v6578_v47, %v5880_v26  ;;  %v10237_v54 = vpop.eup %6579  ;;  %v5248_v26 = vand.u32 2147483647, %v10219_v8 }
 0x874   :  { %v5554_v37 = vmul.f32 %v5479_v20, %v5207_v25  ;;  %v10241_v38 = vpop.eup %6581  ;;  %v5255_v42 = vmul.f32 %v10237_v54, %v10215_v34  ;;  %vm5260_vm15 = vweird.f32 %v10237_v54  ;;  %v5266_v20 = vor.u32 1.1754944e-38, %v5265_v5 }
 0x875   :  { %v5703_v21 = vadd.f32 %v5702_v49, %v5701_v7  ;;  %v6584_v2 = vpop.eup %6583  ;;  %v5240_v51 = vmul.f32 %v10241_v38, %v10219_v8  ;;  %vm5245_vm0 = vweird.f32 %v10241_v38  ;;  %vm10287_vm6 = vmor %vm5259_vm5, %vm5260_vm15  ;;  %v5251_v39 = vor.u32 1.1754944e-38, %v5250_v44 }
 0x876   :  { %v5706_v41 = vsel %vm414_vm1, %v5554_v37, 0.0  ;;  %v10253_v53 = vadd.f32 1.0, %v6584_v2  ;;  %v5256_v43 = vsub.f32 1.0, %v5255_v42  ;;  %v10258_v61 = vpop.eup %6585  ;;  %vm10298_vm11 = vmor %vm5244_vm10, %vm5245_vm0  ;;  %vm5249_vm15 = vcmp.eq.f32.partialorder %v5248_v26, 8.507059e+37 }
 0x877   :  { %v5704_v62 = vrot.slane %v5703_v21, 1  ;;  %v5707_v0 = vrot.slane %v5706_v41, 4  ;;  %v5241_v55 = vsub.f32 1.0, %v5240_v51  ;;  %v6588_v33 = vpop.eup %6587  ;;  %v5300_v22 = vmul.f32 %v10258_v61, %v10239_v31 }
 0x878   :  { %v5257_v3 = vmul.f32 %v10237_v54, %v5256_v43  ;;  %v10275_v18 = vadd.f32 1.0, %v6588_v33  ;;  %vm5305_vm0 = vweird.f32 %v10258_v61  ;;  %vm5304_vm5 = vweird.f32 %v10239_v31 }
 0x879   :  { %v5705_v30 = vadd.f32 %v5704_v62, %v5703_v21  ;;  %v5708_v27 = vadd.f32 %v5707_v0, %v5706_v41  ;;  %v5242_v59 = vmul.f32 %v10241_v38, %v5241_v55  ;;  %v5301_v7 = vsub.f32 1.0, %v5300_v22 }
 0x87a   :  { %v5258_v56 = vadd.f32 %v10237_v54, %v5257_v3  ;;  %v5937_v3 = vld [vmem:[%s10474_s8 + $0x10] sm:$0xff]  ;;  %v5280_v44 = vand.u32 2147483648, %v10253_v53  ;;  %v5278_v47 = vand.u32 2147483647, %v10253_v53 }
 0x87b   :  { %6589 = vtanh.f32 %v5705_v30  ;;  %v5709_v14 = vrot.slane %v5708_v27, 2  ;;  %v5243_v11 = vadd.f32 %v10241_v38, %v5242_v59  ;;  %5965 = vmatpush.msra.mxu3 %v5937_v3  ;;  %v10385_v3 = vld [vmem:[%s10475_s9 + $0x3] ss:$0 sm:$0xff] }
 0x87c   :  { %6591 = vrcp.f32 %v10253_v53  ;;  %v5262_v34 = vsel %vm10287_vm6, %v10237_v54, %v5258_v56  ;;  %v5302_v54 = vmul.f32 %v10258_v61, %v5301_v7  ;;  %vm10331_vm6 = vmor %vm5304_vm5, %vm5305_vm0  ;;  %v5935_v56 = vld [vmem:[%s10474_s8] sm:$0xff]  ;;  %vm5279_vm0 = vcmp.eq.f32.partialorder %v5278_v47, 8.507059e+37 }
 0x87d   :  { %v5710_v28 = vadd.f32 %v5709_v14, %v5708_v27  ;;  %6593 = vpow2.f32 %v6216_v6  ;;  %v5247_v52 = vsel %vm10298_vm11, %v10241_v38, %v5243_v11  ;;  %v5267_v15 = vsel %vm5264_vm12, %v5266_v20, %v5262_v34 }
 0x87e   :  { %v5252_v2 = vsel %vm5249_vm15, %v5251_v39, %v5247_v52  ;;  %v5303_v43 = vadd.f32 %v10258_v61, %v5302_v54  ;;  %vm5274_vm12 = vweird.f32 %v10253_v53 }
 0x87f   :  { %v5711_v50 = vrot.slane %v5710_v28, 1 }
 0x881   :  { %v6590_v23 = vpop.eup %6589  ;;  %v5712_v24 = vadd.f32 %v5711_v50, %v5710_v28  ;;  %v5310_v28 = vand.u32 2147483648, %v10239_v31  ;;  %v5308_v50 = vand.u32 2147483647, %v10239_v31  ;;  %v5307_v31 = vsel %vm10331_vm6, %v10258_v61, %v5303_v43 }
 0x882   :  { %v5882_v45 = vsel %vm5863_vm4, %v6590_v23, %v5881_v29  ;;  %v10281_v36 = vpop.eup %6591  ;;  %v5487_v29 = vpop.permute.xlu2 %5486  ;;  %v5936_v23 = vld [vmem:[%s10474_s8 + $0x8] sm:$0xff]  ;;  %vm5289_vm6 = vweird.f32 %v10275_v18 }
 0x883   :  { %6595 = vtanh.f32 %v5712_v24  ;;  %v5483_v35 = vpop.permute.xlu0 %5482  ;;  %v6594_v46 = vpop.eup %6593  ;;  %v5270_v8 = vmul.f32 %v10281_v36, %v10253_v53  ;;  %v5558_v0 = vmul.f32 %v5487_v29, %v5267_v15  ;;  %v5311_v22 = vor.u32 1.1754944e-38, %v5310_v28  ;;  %5966 = vmatpush.msra.mxu3 %v5936_v23 }
 0x884   :  { %6597 = vtanh.f32 %v5719_v10  ;;  %v5556_v19 = vmul.f32 %v5483_v35, %v5237_v12  ;;  %v10312_v51 = vadd.f32 1.0, %v6594_v46  ;;  %vm5309_vm10 = vcmp.eq.f32.partialorder %v5308_v50, 8.507059e+37 }
 0x885   :  { %6599 = vrcp.f32 %v10275_v18  ;;  %v5271_v27 = vsub.f32 1.0, %v5270_v8  ;;  %v5734_v9 = vsel %vm414_vm1, %v5558_v0, 0.0  ;;  %v5312_v35 = vsel %vm5309_vm10, %v5311_v22, %v5307_v31  ;;  %5967 = vmatpush.msra.mxu3 %v5935_v56 }
 0x886   :  { %v5720_v60 = vsel %vm414_vm1, %v5556_v19, 0.0  ;;  %6601 = vpow2.f32 %v6214_v1  ;;  %v5735_v24 = vrot.slane %v5734_v9, 4  ;;  %vm5275_vm11 = vweird.f32 %v10281_v36 }
 0x887   :  { %v5721_v49 = vrot.slane %v5720_v60, 4  ;;  %6603 = vrcp.f32 %v10312_v51  ;;  %v5272_v33 = vmul.f32 %v10281_v36, %v5271_v27  ;;  %vm5276_vm15 = vmor %vm5274_vm12, %vm5275_vm11  ;;  %v5281_v29 = vor.u32 1.1754944e-38, %v5280_v44 }
 0x888   :  { %6605 = vpow2.f32 %v6215_v63  ;;  %v5736_v1 = vadd.f32 %v5735_v24, %v5734_v9  ;;  %v5355_v23 = vand.u32 2147483648, %v10312_v51 }
 0x889   :  { %v6596_v37 = vpop.eup %6595  ;;  %v5722_v21 = vadd.f32 %v5721_v49, %v5720_v60  ;;  %v5273_v61 = vadd.f32 %v10281_v36, %v5272_v33 }
 0x88a   :  { %v6598_v41 = vpop.eup %6597  ;;  %v5883_v62 = vsel %vm5865_vm14, %v6596_v37, %v5882_v45  ;;  %v5737_v8 = vrot.slane %v5736_v1, 2 }
 0x88b   :  { %v5723_v42 = vrot.slane %v5722_v21, 2  ;;  %v5485_v16 = vpop.permute.xlu1 %5484  ;;  %v10310_v38 = vsel %vm5867_vm7, %v6598_v41, %v5883_v62  ;;  %v10314_v40 = vpop.eup %6599  ;;  %v5277_v34 = vsel %vm5276_vm15, %v10281_v36, %v5273_v61  ;;  %v5295_v62 = vand.u32 2147483648, %v10275_v18 }
 0x88c   :  { %v5557_v30 = vmul.f32 %v5485_v16, %v5252_v2  ;;  %v6602_v13 = vpop.eup %6601  ;;  %v5285_v10 = vmul.f32 %v10314_v40, %v10275_v18  ;;  %vm5290_vm5 = vweird.f32 %v10314_v40  ;;  %v5738_v2 = vadd.f32 %v5737_v8, %v5736_v1 }
 0x88d   :  { %v5724_v14 = vadd.f32 %v5723_v42, %v5722_v21  ;;  %v10344_v5 = vadd.f32 1.0, %v6602_v13  ;;  %v10352_v7 = vpop.eup %6603  ;;  %v5282_v21 = vsel %vm5279_vm0, %v5281_v29, %v5277_v34  ;;  %v6217_v42 = vmul.f32 -1.442695, %v10140_v4  ;;  %vm5291_vm10 = vmor %vm5289_vm6, %vm5290_vm5 }
 0x88e   :  { %v5727_v55 = vsel %vm414_vm1, %v5557_v30, 0.0  ;;  %v5286_v19 = vsub.f32 1.0, %v5285_v10  ;;  %v6606_v26 = vpop.eup %6605  ;;  %v5345_v52 = vmul.f32 %v10352_v7, %v10312_v51  ;;  %v5739_v28 = vrot.slane %v5738_v2, 1 }
 0x88f   :  { %v5725_v6 = vrot.slane %v5724_v14, 1  ;;  %v5728_v32 = vrot.slane %v5727_v55, 4  ;;  %v10364_v37 = vadd.f32 1.0, %v6606_v26  ;;  %vm5350_vm12 = vweird.f32 %v10352_v7 }
 0x890   :  { %v5287_v49 = vmul.f32 %v10314_v40, %v5286_v19  ;;  %v5346_v0 = vsub.f32 1.0, %v5345_v52  ;;  %vm5349_vm15 = vweird.f32 %v10312_v51  ;;  %v5325_v52 = vand.u32 2147483648, %v10344_v5 }
 0x891   :  { %v5726_v58 = vadd.f32 %v5725_v6, %v5724_v14  ;;  %v5729_v59 = vadd.f32 %v5728_v32, %v5727_v55  ;;  %v5296_v55 = vor.u32 1.1754944e-38, %v5295_v62  ;;  %vm10396_vm0 = vmor %vm5349_vm15, %vm5350_vm12 }
 0x892   :  { %v5288_v41 = vadd.f32 %v10314_v40, %v5287_v49  ;;  %v5347_v4 = vmul.f32 %v10352_v7, %v5346_v0 }
 0x893   :  { %6607 = vtanh.f32 %v5726_v58  ;;  %v5730_v12 = vrot.slane %v5729_v59, 2  ;;  %v5493_v45 = vpop.permute.xlu2 %5492  ;;  %v5740_v58 = vadd.f32 %v5739_v28, %v5738_v2 }
 0x894   :  { %v5561_v57 = vmul.f32 %v5493_v45, %v5312_v35  ;;  %6609 = vrcp.f32 %v10344_v5  ;;  %v5292_v14 = vsel %vm5291_vm10, %v10314_v40, %v5288_v41  ;;  %v5348_v10 = vadd.f32 %v10352_v7, %v5347_v4 }
 0x895   :  { %v5731_v11 = vadd.f32 %v5730_v12, %v5729_v59  ;;  %v5353_v45 = vand.u32 2147483647, %v10312_v51  ;;  %v5356_v51 = vor.u32 1.1754944e-38, %v5355_v23  ;;  %vm5319_vm10 = vweird.f32 %v10344_v5 }
 0x896   :  { %v5755_v20 = vsel %vm414_vm1, %v5561_v57, 0.0  ;;  %v5352_v1 = vsel %vm10396_vm0, %v10352_v7, %v5348_v10  ;;  %v5323_v7 = vand.u32 2147483647, %v10344_v5  ;;  %vm5334_vm0 = vweird.f32 %v10364_v37 }
 0x897   :  { %v5732_v60 = vrot.slane %v5731_v11, 1  ;;  %v5756_v39 = vrot.slane %v5755_v20, 4  ;;  %vm5354_vm6 = vcmp.eq.f32.partialorder %v5353_v45, 8.507059e+37 }
 0x898   :  { %v5357_v49 = vsel %vm5354_vm6, %v5356_v51, %v5352_v1  ;;  %vm5324_vm12 = vcmp.eq.f32.partialorder %v5323_v7, 8.507059e+37 }
 0x899   :  { %v6608_v25 = vpop.eup %6607  ;;  %v5733_v46 = vadd.f32 %v5732_v60, %v5731_v11  ;;  %v5757_v27 = vadd.f32 %v5756_v39, %v5755_v20 }
 0x89a   :  { %v5885_v53 = vsel %vm5869_vm8, %v6608_v25, %v10310_v38  ;;  %v10368_v15 = vpop.eup %6609  ;;  %v5293_v38 = vand.u32 2147483647, %v10275_v18 }
 0x89b   :  { %6611 = vtanh.f32 %v5733_v46  ;;  %v5489_v36 = vpop.permute.xlu0 %5488  ;;  %v5315_v43 = vmul.f32 %v10368_v15, %v10344_v5  ;;  %v5758_v50 = vrot.slane %v5757_v27, 2  ;;  %vm5320_vm5 = vweird.f32 %v10368_v15 }
 0x89c   :  { %v5559_v54 = vmul.f32 %v5489_v36, %v5282_v21  ;;  %6613 = vrcp.f32 %v10364_v37  ;;  %vm5294_vm11 = vcmp.eq.f32.partialorder %v5293_v38, 8.507059e+37  ;;  %v5326_v5 = vor.u32 1.1754944e-38, %v5325_v52 }
 0x89d   :  { %6615 = vpow2.f32 %v6217_v42  ;;  %v5297_v6 = vsel %vm5294_vm11, %v5296_v55, %v5292_v14  ;;  %v5316_v13 = vsub.f32 1.0, %v5315_v43  ;;  %v5759_v35 = vadd.f32 %v5758_v50, %v5757_v27  ;;  %vm5321_vm11 = vmor %vm5319_vm10, %vm5320_vm5 }
 0x89e   :  { %v5741_v16 = vsel %vm414_vm1, %v5559_v54, 0.0  ;;  %v5340_v14 = vand.u32 2147483648, %v10364_v37 }
 0x89f   :  { %v5742_v30 = vrot.slane %v5741_v16, 4  ;;  %v5317_v19 = vmul.f32 %v10368_v15, %v5316_v13  ;;  %v5760_v34 = vrot.slane %v5759_v35, 1 }
 0x8a1   :  { %v6612_v48 = vpop.eup %6611  ;;  %v5743_v63 = vadd.f32 %v5742_v30, %v5741_v16  ;;  %v5318_v25 = vadd.f32 %v10368_v15, %v5317_v19  ;;  %v5761_v36 = vadd.f32 %v5760_v34, %v5759_v35 }
 0x8a2   :  { %v5886_v18 = vsel %vm5871_vm9, %v6612_v48, %v5885_v53  ;;  %v10387_v17 = vpop.eup %6613  ;;  %v5338_v48 = vand.u32 2147483647, %v10364_v37 }
 0x8a3   :  { %v5744_v9 = vrot.slane %v5743_v63, 2  ;;  %v5491_v32 = vpop.permute.xlu1 %5490  ;;  %6220 = vmatmul.msk.f32.gmra.mxu2 %vm414_vm1, %v5886_v18  ;;  %v6616_v56 = vpop.eup %6615  ;;  %v5330_v11 = vmul.f32 %v10387_v17, %v10364_v37  ;;  %v5322_v39 = vsel %vm5321_vm11, %v10368_v15, %v5318_v25  ;;  %vm5335_vm15 = vweird.f32 %v10387_v17 }
 0x8a4   :  { %v5560_v40 = vmul.f32 %v5491_v32, %v5297_v6  ;;  %v10407_v47 = vadd.f32 1.0, %v6616_v56  ;;  %v5327_v2 = vsel %vm5324_vm12, %v5326_v5, %v5322_v39  ;;  %v5341_v6 = vor.u32 1.1754944e-38, %v5340_v14 }
 0x8a5   :  { %v5745_v33 = vadd.f32 %v5744_v9, %v5743_v63  ;;  %v5331_v46 = vsub.f32 1.0, %v5330_v11  ;;  %vm5339_vm5 = vcmp.eq.f32.partialorder %v5338_v48, 8.507059e+37 }
 0x8a6   :  { %v5748_v59 = vsel %vm414_vm1, %v5560_v40, 0.0  ;;  %v5919_v31 = vpop.f32.mrf.mxu2 }
 0x8a7   :  { %v5746_v24 = vrot.slane %v5745_v33, 1  ;;  %v5749_v22 = vrot.slane %v5748_v59, 4  ;;  %v5920_v12 = vadd.f32 %v5919_v31, %v10385_v3  ;;  %v5332_v54 = vmul.f32 %v10387_v17, %v5331_v46 }
 0x8a9   :  { %v5747_v57 = vadd.f32 %v5746_v24, %v5745_v33  ;;  %v5750_v44 = vadd.f32 %v5749_v22, %v5748_v59  ;;  %6617 = vtanh.f32 %v5920_v12  ;;  %v5333_v15 = vadd.f32 %v10387_v17, %v5332_v54 }
 0x8aa   :  { %6619 = vtanh.f32 %v5740_v58 }
 0x8ab   :  { %6621 = vtanh.f32 %v5747_v57  ;;  %v5751_v60 = vrot.slane %v5750_v44, 2  ;;  %v5499_v26 = vpop.permute.xlu2 %5498  ;;  %v5370_v57 = vand.u32 2147483648, %v10407_v47 }
 0x8ac   :  { %v5564_v29 = vmul.f32 %v5499_v26, %v5357_v49  ;;  %6623 = vrcp.f32 %v10407_v47 }
 0x8ad   :  { %v5752_v20 = vadd.f32 %v5751_v60, %v5750_v44  ;;  %v5368_v44 = vand.u32 2147483647, %v10407_v47  ;;  %v5371_v49 = vor.u32 1.1754944e-38, %v5370_v57 }
 0x8ae   :  { %v5776_v0 = vsel %vm414_vm1, %v5564_v29, 0.0 }
 0x8af   :  { %v6618_v8 = vpop.eup %6617  ;;  %v5753_v53 = vrot.slane %v5752_v20, 1  ;;  %v5777_v38 = vrot.slane %v5776_v0, 4  ;;  %vm5369_vm10 = vcmp.eq.f32.partialorder %v5368_v44, 8.507059e+37 }
 0x8b0   :  { %v6620_v21 = vpop.eup %6619  ;;  %6222 = vmatmul.msk.f32.vlgmr.msra.gmra.mxu3 %vm414_vm1, %v6618_v8 }
 0x8b1   :  { %v6622_v41 = vpop.eup %6621  ;;  %v5754_v62 = vadd.f32 %v5753_v53, %v5752_v20  ;;  %v5778_v55 = vadd.f32 %v5777_v38, %v5776_v0 }
 0x8b2   :  { %v5887_v42 = vsel %vm5859_vm13, %v6622_v41, %v6620_v21  ;;  %v6624_v27 = vpop.eup %6623  ;;  %vm5336_vm13 = vmor %vm5334_vm0, %vm5335_vm15 }
 0x8b3   :  { %6625 = vtanh.f32 %v5754_v62  ;;  %v5495_v16 = vpop.permute.xlu0 %5494  ;;  %v5337_v4 = vsel %vm5336_vm13, %v10387_v17, %v5333_v15  ;;  %v5360_v28 = vmul.f32 %v6624_v27, %v10407_v47  ;;  %v5779_v37 = vrot.slane %v5778_v55, 2 }
 0x8b4   :  { %6627 = vtanh.f32 %v5761_v36  ;;  %v5562_v30 = vmul.f32 %v5495_v16, %v5327_v2  ;;  %v5342_v13 = vsel %vm5339_vm5, %v5341_v6, %v5337_v4 }
 0x8b5   :  { %v5361_v59 = vsub.f32 1.0, %v5360_v28  ;;  %v5780_v22 = vadd.f32 %v5779_v37, %v5778_v55 }
 0x8b6   :  { %v5762_v43 = vsel %vm414_vm1, %v5562_v30, 0.0 }
 0x8b7   :  { %v5763_v63 = vrot.slane %v5762_v43, 4  ;;  %v5362_v12 = vmul.f32 %v6624_v27, %v5361_v59  ;;  %v5781_v61 = vrot.slane %v5780_v22, 1 }
 0x8b9   :  { %v6626_v18 = vpop.eup %6625  ;;  %v5764_v9 = vadd.f32 %v5763_v63, %v5762_v43  ;;  %v5363_v19 = vadd.f32 %v6624_v27, %v5362_v12  ;;  %v5782_v51 = vadd.f32 %v5781_v61, %v5780_v22 }
 0x8ba   :  { %v6628_v32 = vpop.eup %6627  ;;  %v5888_v50 = vsel %vm5861_vm3, %v6626_v18, %v5887_v42  ;;  %vm5365_vm3 = vweird.f32 %v6624_v27 }
 0x8bb   :  { %v5765_v40 = vrot.slane %v5764_v9, 2  ;;  %v5497_v33 = vpop.permute.xlu1 %5496  ;;  %v5889_v10 = vsel %vm5863_vm4, %v6628_v32, %v5888_v50  ;;  %vm5364_vm4 = vweird.f32 %v10407_v47 }
 0x8bc   :  { %v5563_v58 = vmul.f32 %v5497_v33, %v5342_v13  ;;  %vm5366_vm6 = vmor %vm5364_vm4, %vm5365_vm3 }
 0x8bd   :  { %v5766_v31 = vadd.f32 %v5765_v40, %v5764_v9  ;;  %v5367_v60 = vsel %vm5366_vm6, %v6624_v27, %v5363_v19  ;;  %v5939_v27 = vld [vmem:[%s10475_s9 + $0x4] ss:$0 sm:$0xff] }
 0x8be   :  { %v5769_v17 = vsel %vm414_vm1, %v5563_v58, 0.0  ;;  %v5372_v46 = vsel %vm5369_vm10, %v5371_v49, %v5367_v60 }
 0x8bf   :  { %v5767_v23 = vrot.slane %v5766_v31, 1  ;;  %v5770_v24 = vrot.slane %v5769_v17, 4 }
 0x8c1   :  { %v5768_v45 = vadd.f32 %v5767_v23, %v5766_v31  ;;  %v5771_v56 = vadd.f32 %v5770_v24, %v5769_v17 }
 0x8c3   :  { %6629 = vtanh.f32 %v5768_v45  ;;  %v5772_v35 = vrot.slane %v5771_v56, 2 }
 0x8c5   :  { %v5773_v11 = vadd.f32 %v5772_v35, %v5771_v56 }
 0x8c7   :  { %v5774_v1 = vrot.slane %v5773_v11, 1 }
 0x8c9   :  { %v6630_v26 = vpop.eup %6629  ;;  %v5775_v34 = vadd.f32 %v5774_v1, %v5773_v11 }
 0x8ca   :  { %v5890_v25 = vsel %vm5865_vm14, %v6630_v26, %v5889_v10 }
 0x8cb   :  { %6631 = vtanh.f32 %v5775_v34  ;;  %v5501_v20 = vpop.permute.xlu0 %5500 }
 0x8cc   :  { %6633 = vtanh.f32 %v5782_v51  ;;  %v5565_v29 = vmul.f32 %v5501_v20, %v5372_v46 }
 0x8ce   :  { %v5783_v52 = vsel %vm414_vm1, %v5565_v29, 0.0 }
 0x8cf   :  { %v5784_v7 = vrot.slane %v5783_v52, 4 }
 0x8d1   :  { %v6632_v8 = vpop.eup %6631  ;;  %v5785_v47 = vadd.f32 %v5784_v7, %v5783_v52 }
 0x8d2   :  { %v6634_v53 = vpop.eup %6633  ;;  %v5891_v21 = vsel %vm5867_vm7, %v6632_v8, %v5890_v25 }
 0x8d3   :  { %v5786_v36 = vrot.slane %v5785_v47, 2  ;;  %v5892_v39 = vsel %vm5869_vm8, %v6634_v53, %v5891_v21 }
 0x8d5   :  { %v5787_v54 = vadd.f32 %v5786_v36, %v5785_v47 }
 0x8d7   :  { %v5788_v41 = vrot.slane %v5787_v54, 1 }
 0x8d9   :  { %v5789_v62 = vadd.f32 %v5788_v41, %v5787_v54 }
 0x8db   :  { %6635 = vtanh.f32 %v5789_v62 }
 0x8df   :  { %v5922_v0 = vpop.f32.mrf.mxu2 }
 0x8e0   :  { %v5923_v5 = vadd.f32 %v5922_v0, %v10385_v3 }
 0x8e1   :  { %v6636_v42 = vpop.eup %6635 }
 0x8e2   :  { %6637 = vtanh.f32 %v5923_v5  ;;  %v5893_v2 = vsel %vm5871_vm9, %v6636_v42, %v5892_v39 }
 0x8e3   :  { %6221 = vmatmul.msk.f32.gmra.mxu2 %vm414_vm1, %v5893_v2 }
 0x8e8   :  { %v6638_v16 = vpop.eup %6637 }
 0x8e9   :  { %6223 = vmatmul.msk.f32.gmra.mxu3 %vm414_vm1, %v6638_v16 }
 0x926   :  { %v5925_v38 = vpop.f32.mrf.mxu2 }
 0x927   :  { %v5926_v30 = vadd.f32 %v5925_v38, %v10385_v3 }
 0x929   :  { %6639 = vtanh.f32 %v5926_v30 }
 0x92f   :  { %v6640_v15 = vpop.eup %6639 }
 0x930   :  { %6224 = vmatmul.msk.f32.gmra.mxu3 %vm414_vm1, %v6640_v15 }
 0x933   :  { %v5969_v14 = vpop.f32.mrf.mxu3 }
 0x934   :  { %v5970_v43 = vadd.f32 %v5969_v14, %v5939_v27 }
 0x936   :  { %6641 = vtanh.f32 %v5970_v43 }
 0x93c   :  { %v6642_v48 = vpop.eup %6641 }
 0x93d   :  { %5985 = vst.msk [vmem:[%s10476_s10] sm:$0xff] %vm2543_vm2, %v6642_v48 }
 0x966   :  { %v5928_v63 = vpop.f32.mrf.mxu2 }
 0x967   :  { %v5929_v55 = vadd.f32 %v5928_v63, %v10385_v3 }
 0x969   :  { %6643 = vtanh.f32 %v5929_v55 }
 0x96c   :  { %v5972_v4 = vpop.f32.mrf.mxu3 }
 0x96d   :  { %v5973_v28 = vadd.f32 %v5972_v4, %v5939_v27 }
 0x96f   :  { %v6644_v18 = vpop.eup %6643  ;;  %6645 = vtanh.f32 %v5973_v28 }
 0x970   :  { %6225 = vmatmul.msk.f32.gmra.mxu3 %vm414_vm1, %v6644_v18 }
 0x975   :  { %v6646_v9 = vpop.eup %6645 }
 0x976   :  { %5986 = vst.msk [vmem:[%s10476_s10 + $0x8] sm:$0xff] %vm2543_vm2, %v6646_v9 }
 0x9b3   :  { %v5975_v6 = vpop.f32.mrf.mxu3 }
 0x9b4   :  { %v5976_v32 = vadd.f32 %v5975_v6, %v5939_v27 }
 0x9b6   :  { %6647 = vtanh.f32 %v5976_v32 }
 0x9bc   :  { %v6648_v50 = vpop.eup %6647 }
 0x9bd   :  { %5987 = vst.msk [vmem:[%s10476_s10 + $0x10] sm:$0xff] %vm2543_vm2, %v6648_v50 }
 0x9f3   :  { %v5978_v3 = vpop.f32.mrf.mxu3 }
 0x9f4   :  { %v5979_v40 = vadd.f32 %v5978_v3, %v5939_v27 }
 0x9f6   :  { %6649 = vtanh.f32 %v5979_v40 }
 0x9fc   :  { %v6650_v13 = vpop.eup %6649 }
 0x9fd   :  { %5988 = vst.msk [vmem:[%s10476_s10 + $0x18] sm:$0xff] %vm2543_vm2, %v6650_v13 }
 0x9fe   :  { %5993 = vsyncpa [#allocation5], 1 }

</bundles_post_ra>
